<compile_context>
chip_gen: v7x
topology: tpu7x:2x2x1
jax: 0.10.0
libtpu: 0.0.40
codegen_flags: <defaults>
</compile_context>

<pallas_src>
import functools

import jax
import jax.numpy as jnp
from jax.experimental import pallas as pl
from jax.experimental.pallas import tpu as pltpu


# ----------------------------------------------------------------------------
# Pallas kernels
# ----------------------------------------------------------------------------
def _conv_bn_fused_kernel(x_ref, w_ref, b_ref, *rest, kh, kw, stride, ho, wo,
                          relu, has_residual):
    """Conv as sum of kh*kw tap matmuls + folded-BN bias (+ residual) (+ ReLU).

    x_ref : (s*s, 1, Hm, Wm, Cin)  bf16  phase-split padded activation (one image)
    w_ref : (kh*kw, Cin, Cout)     bf16  BN-scale-folded per-tap weights
    b_ref : (1, Cout)              f32   folded BN bias
    rest  : [res_ref (1, ho, wo, Cout) bf16,] o_ref (1, ho, wo, Cout) bf16
    """
    if has_residual:
        res_ref, o_ref = rest
    else:
        (o_ref,) = rest
    cin = w_ref.shape[1]
    cout = w_ref.shape[2]
    s = stride

    acc = None
    for t in range(kh * kw):            # unrolled tap loop, accumulate in f32
        i, j = t // kw, t % kw
        ph = (i % s) * s + (j % s)      # phase index into the space-to-depth split
        di, dj = i // s, j // s         # contiguous offset inside that phase
        x_tap = x_ref[ph, 0, pl.ds(di, ho), pl.ds(dj, wo), :]      # (ho, wo, cin)
        x2d = x_tap.reshape(ho * wo, cin)
        part = jnp.dot(x2d, w_ref[t], preferred_element_type=jnp.float32)
        acc = part if acc is None else acc + part

    y = acc + b_ref[...]                                           # f32 epilogue
    if has_residual:
        y = y + res_ref[0].reshape(ho * wo, cout).astype(jnp.float32)
    if relu:
        y = jnp.maximum(y, 0.0)
    o_ref[0] = y.reshape(ho, wo, cout).astype(o_ref.dtype)         # single bf16 store


def _maxpool_kernel(x_ref, o_ref, *, k, stride, ho, wo):
    """3x3/s2 max pool over a phase-split (-inf padded) activation tile."""
    s = stride
    acc = None
    for t in range(k * k):
        i, j = t // k, t % k
        ph = (i % s) * s + (j % s)
        di, dj = i // s, j // s
        x_tap = x_ref[ph, 0, pl.ds(di, ho), pl.ds(dj, wo), :].astype(jnp.float32)
        acc = x_tap if acc is None else jnp.maximum(acc, x_tap)
    o_ref[0] = acc.astype(o_ref.dtype)


# ----------------------------------------------------------------------------
# Glue: phase split (space-to-depth) so stride-s taps become contiguous slices
# ----------------------------------------------------------------------------
def _phase_split(x_pad, s):
    """(N, Hp, Wp, C) -> (s*s, N, ceil(Hp/s), ceil(Wp/s), C); ~1x activation bytes."""
    n, hp, wp, c = x_pad.shape
    hm = -(-hp // s)
    wm = -(-wp // s)
    xq = jnp.pad(x_pad, ((0, 0), (0, hm * s - hp), (0, wm * s - wp), (0, 0)))
    xr = xq.reshape(n, hm, s, wm, s, c)
    xr = jnp.transpose(xr, (2, 4, 0, 1, 3, 5))
    return xr.reshape(s * s, n, hm, wm, c)


def conv_bn(x_nhwc, params, *, kh, kw, stride, pad, relu, residual=None):
    """Fused conv + folded BN (+ residual) (+ ReLU); activations/weights bf16."""
    w_k = params["w_k"]                       # (kh*kw, Cin, Cout) bf16 (scale folded)
    bias = params["bias"]                     # (1, Cout) f32
    n, h, w, cin = x_nhwc.shape
    cout = w_k.shape[-1]
    ho = (h + 2 * pad - kh) // stride + 1
    wo = (w + 2 * pad - kw) // stride + 1

    xp = jnp.pad(x_nhwc, ((0, 0), (pad, pad), (pad, pad), (0, 0)))
    xph = _phase_split(xp, stride)            # (s*s, N, Hm, Wm, Cin) bf16
    ss, _, hm, wm, _ = xph.shape

    in_specs = [
        pl.BlockSpec((ss, 1, hm, wm, cin), lambda b: (0, b, 0, 0, 0)),
        pl.BlockSpec((kh * kw, cin, cout), lambda b: (0, 0, 0)),
        pl.BlockSpec((1, cout), lambda b: (0, 0)),
    ]
    inputs = [xph, w_k, bias]
    if residual is not None:
        in_specs.append(pl.BlockSpec((1, ho, wo, cout), lambda b: (b, 0, 0, 0)))
        inputs.append(residual)

    flops = 2 * n * ho * wo * kh * kw * cin * cout
    bytes_accessed = (xph.size * xph.dtype.itemsize
                      + w_k.size * w_k.dtype.itemsize
                      + bias.size * bias.dtype.itemsize
                      + (residual.size * residual.dtype.itemsize
                         if residual is not None else 0)
                      + n * ho * wo * cout * 2)

    return pl.pallas_call(
        functools.partial(_conv_bn_fused_kernel, kh=kh, kw=kw, stride=stride,
                          ho=ho, wo=wo, relu=relu,
                          has_residual=residual is not None),
        out_shape=jax.ShapeDtypeStruct((n, ho, wo, cout), jnp.bfloat16),
        grid=(n,),
        in_specs=in_specs,
        out_specs=pl.BlockSpec((1, ho, wo, cout), lambda b: (b, 0, 0, 0)),
        compiler_params=pltpu.CompilerParams(
            dimension_semantics=("parallel",),
            vmem_limit_bytes=32 * 1024 * 1024,
        ),
        cost_estimate=pl.CostEstimate(flops=flops, transcendentals=0,
                                      bytes_accessed=int(bytes_accessed)),
    )(*inputs)


def maxpool2d(x_nhwc, k=3, stride=2, pad=1):
    n, h, w, c = x_nhwc.shape
    ho = (h + 2 * pad - k) // stride + 1
    wo = (w + 2 * pad - k) // stride + 1
    xp = jnp.pad(x_nhwc, ((0, 0), (pad, pad), (pad, pad), (0, 0)),
                 constant_values=-jnp.inf)
    xph = _phase_split(xp, stride)
    ss, _, hm, wm, _ = xph.shape
    return pl.pallas_call(
        functools.partial(_maxpool_kernel, k=k, stride=stride, ho=ho, wo=wo),
        out_shape=jax.ShapeDtypeStruct((n, ho, wo, c), x_nhwc.dtype),
        grid=(n,),
        in_specs=[pl.BlockSpec((ss, 1, hm, wm, c), lambda b: (0, b, 0, 0, 0))],
        out_specs=pl.BlockSpec((1, ho, wo, c), lambda b: (b, 0, 0, 0)),
        compiler_params=pltpu.CompilerParams(dimension_semantics=("parallel",)),
    )(xph)


# ----------------------------------------------------------------------------
# Parameter init (deterministic synthetic weights, BN folded to inference form)
# ----------------------------------------------------------------------------
def _init_conv_bn(key, cout, cin, kh, kw, eps=1e-5):
    kw_key, g_key, b_key, m_key, v_key = jax.random.split(key, 5)
    w = jax.random.normal(kw_key, (cout, cin, kh, kw), jnp.float32) * 0.1
    gamma = 1.0 + 0.1 * jax.random.normal(g_key, (cout,), jnp.float32)
    beta = 0.1 * jax.random.normal(b_key, (cout,), jnp.float32)
    mean = 0.1 * jax.random.normal(m_key, (cout,), jnp.float32)
    var = 0.5 + jax.random.uniform(v_key, (cout,), jnp.float32)
    scale = gamma / jnp.sqrt(var + eps)            # folded BN (inference)
    bias = beta - mean * scale
    # reorder to tap-major (kh*kw, Cin, Cout) and fold BN scale into the weights
    w_k = jnp.transpose(w, (2, 3, 1, 0)).reshape(kh * kw, cin, cout)
    w_k = (w_k * scale[None, None, :]).astype(jnp.bfloat16)
    return {"w_k": w_k, "bias": bias.reshape(1, cout).astype(jnp.float32)}


def init_resnet_params(key, cin=4, c1=64):
    keys = jax.random.split(key, 8)
    c2 = 2 * c1
    p = {}
    p["stem"] = _init_conv_bn(keys[0], c1, cin, 7, 7)
    p["l1_conv1"] = _init_conv_bn(keys[1], c1, c1, 3, 3)
    p["l1_conv2"] = _init_conv_bn(keys[2], c1, c1, 3, 3)
    p["l2_conv1"] = _init_conv_bn(keys[3], c2, c1, 3, 3)
    p["l2_conv2"] = _init_conv_bn(keys[4], c2, c2, 3, 3)
    p["l2_down"] = _init_conv_bn(keys[5], c2, c1, 1, 1)
    return p


# ----------------------------------------------------------------------------
# Model forward
# ----------------------------------------------------------------------------
def basic_block(x, conv1_p, conv2_p, down_p, stride):
    out = conv_bn(x, conv1_p, kh=3, kw=3, stride=stride, pad=1, relu=True)
    if down_p is not None:
        identity = conv_bn(x, down_p, kh=1, kw=1, stride=stride, pad=0, relu=False)
    else:
        identity = x
    # residual add + ReLU fused into the second conv's epilogue
    return conv_bn(out, conv2_p, kh=3, kw=3, stride=1, pad=1, relu=True,
                   residual=identity)


def resnet_forward(params, x_nchw):
    # NCHW (PyTorch, use_nhwc=False) -> NHWC bf16 internal -> NCHW f32 out
    x = jnp.transpose(x_nchw, (0, 2, 3, 1)).astype(jnp.bfloat16)
    x = conv_bn(x, params["stem"], kh=7, kw=7, stride=2, pad=3, relu=True)
    x = maxpool2d(x, k=3, stride=2, pad=1)
    x = basic_block(x, params["l1_conv1"], params["l1_conv2"], None, stride=1)
    x = basic_block(x, params["l2_conv1"], params["l2_conv2"], params["l2_down"],
                    stride=2)
    feat = jnp.transpose(x.astype(jnp.float32), (0, 3, 1, 2))
    return [feat]  # ResNet.forward returns a list


if __name__ == "__main__":
    key = jax.random.PRNGKey(0)
    pkey, xkey = jax.random.split(key)
    params = init_resnet_params(pkey, cin=4, c1=64)

    # small NCHW image batch consistent with the module's forward(data)
    x = jax.random.normal(xkey, (2, 4, 16, 16), jnp.float32)

    outs = jax.jit(resnet_forward)(params, x)
    outs = [jax.block_until_ready(o) for o in outs]

    assert outs[0].shape == (2, 128, 2, 2), outs[0].shape
    assert bool(jnp.all(jnp.isfinite(outs[0])))
    print("KERNEL_OK")
</pallas_src>

<mosaic_0001>
module attributes {stable_mosaic.version = 11 : i64} {
  func.func @_conv_bn_fused_kernel(%arg0: i32, %arg1: memref<4x1x11x11x4xbf16, #tpu.memory_space<vmem>>, %arg2: memref<49x4x64xbf16, #tpu.memory_space<vmem>>, %arg3: memref<1x64xf32, #tpu.memory_space<vmem>>, %arg4: memref<1x8x8x64xbf16, #tpu.memory_space<vmem>>) attributes {dimension_semantics = [#tpu.dimension_semantics<parallel>], iteration_bounds = array<i64: 2>, scalar_prefetch = 0 : i64, scratch_operands = 0 : i64, tpu.core_type = #tpu.core_type<tc>, window_params = [{transform_indices = @transform_0, window_bounds = array<i64: 4, 1, 11, 11, 4>}, {pipeline_mode = #tpu.pipeline_mode<synchronous>, transform_indices = @transform_1, window_bounds = array<i64: 49, 4, 64>}, {pipeline_mode = #tpu.pipeline_mode<synchronous>, transform_indices = @transform_2, window_bounds = array<i64: 1, 64>}, {transform_indices = @transform_3, window_bounds = array<i64: 1, 8, 8, 64>}]} {
    %c0 = arith.constant 0 : index
    %c0_0 = arith.constant 0 : index
    %c0_1 = arith.constant 0 : index
    %c0_2 = arith.constant 0 : index
    %c0_3 = arith.constant 0 : index
    %0 = vector.load %arg1[%c0, %c0_0, %c0_1, %c0_2, %c0_3] : memref<4x1x11x11x4xbf16, #tpu.memory_space<vmem>>, vector<1x1x8x8x4xbf16>
    %1 = vector.shape_cast %0 : vector<1x1x8x8x4xbf16> to vector<8x8x4xbf16>
    %2 = vector.shape_cast %1 : vector<8x8x4xbf16> to vector<64x4xbf16>
    %c0_4 = arith.constant 0 : index
    %c0_5 = arith.constant 0 : index
    %c0_6 = arith.constant 0 : index
    %3 = vector.load %arg2[%c0_4, %c0_5, %c0_6] : memref<49x4x64xbf16, #tpu.memory_space<vmem>>, vector<1x4x64xbf16>
    %4 = vector.shape_cast %3 : vector<1x4x64xbf16> to vector<4x64xbf16>
    %cst = arith.constant dense<0.000000e+00> : vector<64x64xf32>
    %5 = tpu.matmul %2, %4, %cst {dimension_numbers = #tpu.dot_dimension_numbers<[1], [0], [0], [1], [0, 0, 1, 1], [], []>} : vector<64x4xbf16>, vector<4x64xbf16>, vector<64x64xf32> -> vector<64x64xf32>
    %c1 = arith.constant 1 : index
    %c0_7 = arith.constant 0 : index
    %c0_8 = arith.constant 0 : index
    %c0_9 = arith.constant 0 : index
    %c0_10 = arith.constant 0 : index
    %6 = vector.load %arg1[%c1, %c0_7, %c0_8, %c0_9, %c0_10] : memref<4x1x11x11x4xbf16, #tpu.memory_space<vmem>>, vector<1x1x8x8x4xbf16>
    %7 = vector.shape_cast %6 : vector<1x1x8x8x4xbf16> to vector<8x8x4xbf16>
    %8 = vector.shape_cast %7 : vector<8x8x4xbf16> to vector<64x4xbf16>
    %c1_11 = arith.constant 1 : index
    %c0_12 = arith.constant 0 : index
    %c0_13 = arith.constant 0 : index
    %9 = vector.load %arg2[%c1_11, %c0_12, %c0_13] : memref<49x4x64xbf16, #tpu.memory_space<vmem>>, vector<1x4x64xbf16>
    %10 = vector.shape_cast %9 : vector<1x4x64xbf16> to vector<4x64xbf16>
    %cst_14 = arith.constant dense<0.000000e+00> : vector<64x64xf32>
    %11 = tpu.matmul %8, %10, %cst_14 {dimension_numbers = #tpu.dot_dimension_numbers<[1], [0], [0], [1], [0, 0, 1, 1], [], []>} : vector<64x4xbf16>, vector<4x64xbf16>, vector<64x64xf32> -> vector<64x64xf32>
    %12 = arith.addf %5, %11 : vector<64x64xf32>
    %c0_15 = arith.constant 0 : index
    %c0_16 = arith.constant 0 : index
    %c0_17 = arith.constant 0 : index
    %c1_18 = arith.constant 1 : index
    %c0_19 = arith.constant 0 : index
    %13 = vector.load %arg1[%c0_15, %c0_16, %c0_17, %c1_18, %c0_19] : memref<4x1x11x11x4xbf16, #tpu.memory_space<vmem>>, vector<1x1x8x8x4xbf16>
    %14 = vector.shape_cast %13 : vector<1x1x8x8x4xbf16> to vector<8x8x4xbf16>
    %15 = vector.shape_cast %14 : vector<8x8x4xbf16> to vector<64x4xbf16>
    %c2 = arith.constant 2 : index
    %c0_20 = arith.constant 0 : index
    %c0_21 = arith.constant 0 : index
    %16 = vector.load %arg2[%c2, %c0_20, %c0_21] : memref<49x4x64xbf16, #tpu.memory_space<vmem>>, vector<1x4x64xbf16>
    %17 = vector.shape_cast %16 : vector<1x4x64xbf16> to vector<4x64xbf16>
    %cst_22 = arith.constant dense<0.000000e+00> : vector<64x64xf32>
    %18 = tpu.matmul %15, %17, %cst_22 {dimension_numbers = #tpu.dot_dimension_numbers<[1], [0], [0], [1], [0, 0, 1, 1], [], []>} : vector<64x4xbf16>, vector<4x64xbf16>, vector<64x64xf32> -> vector<64x64xf32>
    %19 = arith.addf %12, %18 : vector<64x64xf32>
    %c1_23 = arith.constant 1 : index
    %c0_24 = arith.constant 0 : index
    %c0_25 = arith.constant 0 : index
    %c1_26 = arith.constant 1 : index
    %c0_27 = arith.constant 0 : index
    %20 = vector.load %arg1[%c1_23, %c0_24, %c0_25, %c1_26, %c0_27] : memref<4x1x11x11x4xbf16, #tpu.memory_space<vmem>>, vector<1x1x8x8x4xbf16>
    %21 = vector.shape_cast %20 : vector<1x1x8x8x4xbf16> to vector<8x8x4xbf16>
    %22 = vector.shape_cast %21 : vector<8x8x4xbf16> to vector<64x4xbf16>
    %c3 = arith.constant 3 : index
    %c0_28 = arith.constant 0 : index
    %c0_29 = arith.constant 0 : index
    %23 = vector.load %arg2[%c3, %c0_28, %c0_29] : memref<49x4x64xbf16, #tpu.memory_space<vmem>>, vector<1x4x64xbf16>
    %24 = vector.shape_cast %23 : vector<1x4x64xbf16> to vector<4x64xbf16>
    %cst_30 = arith.constant dense<0.000000e+00> : vector<64x64xf32>
    %25 = tpu.matmul %22, %24, %cst_30 {dimension_numbers = #tpu.dot_dimension_numbers<[1], [0], [0], [1], [0, 0, 1, 1], [], []>} : vector<64x4xbf16>, vector<4x64xbf16>, vector<64x64xf32> -> vector<64x64xf32>
    %26 = arith.addf %19, %25 : vector<64x64xf32>
    %c0_31 = arith.constant 0 : index
    %c0_32 = arith.constant 0 : index
    %c0_33 = arith.constant 0 : index
    %c2_34 = arith.constant 2 : index
    %c0_35 = arith.constant 0 : index
    %27 = vector.load %arg1[%c0_31, %c0_32, %c0_33, %c2_34, %c0_35] : memref<4x1x11x11x4xbf16, #tpu.memory_space<vmem>>, vector<1x1x8x8x4xbf16>
    %28 = vector.shape_cast %27 : vector<1x1x8x8x4xbf16> to vector<8x8x4xbf16>
    %29 = vector.shape_cast %28 : vector<8x8x4xbf16> to vector<64x4xbf16>
    %c4 = arith.constant 4 : index
    %c0_36 = arith.constant 0 : index
    %c0_37 = arith.constant 0 : index
    %30 = vector.load %arg2[%c4, %c0_36, %c0_37] : memref<49x4x64xbf16, #tpu.memory_space<vmem>>, vector<1x4x64xbf16>
    %31 = vector.shape_cast %30 : vector<1x4x64xbf16> to vector<4x64xbf16>
    %cst_38 = arith.constant dense<0.000000e+00> : vector<64x64xf32>
    %32 = tpu.matmul %29, %31, %cst_38 {dimension_numbers = #tpu.dot_dimension_numbers<[1], [0], [0], [1], [0, 0, 1, 1], [], []>} : vector<64x4xbf16>, vector<4x64xbf16>, vector<64x64xf32> -> vector<64x64xf32>
    %33 = arith.addf %26, %32 : vector<64x64xf32>
    %c1_39 = arith.constant 1 : index
    %c0_40 = arith.constant 0 : index
    %c0_41 = arith.constant 0 : index
    %c2_42 = arith.constant 2 : index
    %c0_43 = arith.constant 0 : index
    %34 = vector.load %arg1[%c1_39, %c0_40, %c0_41, %c2_42, %c0_43] : memref<4x1x11x11x4xbf16, #tpu.memory_space<vmem>>, vector<1x1x8x8x4xbf16>
    %35 = vector.shape_cast %34 : vector<1x1x8x8x4xbf16> to vector<8x8x4xbf16>
    %36 = vector.shape_cast %35 : vector<8x8x4xbf16> to vector<64x4xbf16>
    %c5 = arith.constant 5 : index
    %c0_44 = arith.constant 0 : index
    %c0_45 = arith.constant 0 : index
    %37 = vector.load %arg2[%c5, %c0_44, %c0_45] : memref<49x4x64xbf16, #tpu.memory_space<vmem>>, vector<1x4x64xbf16>
    %38 = vector.shape_cast %37 : vector<1x4x64xbf16> to vector<4x64xbf16>
    %cst_46 = arith.constant dense<0.000000e+00> : vector<64x64xf32>
    %39 = tpu.matmul %36, %38, %cst_46 {dimension_numbers = #tpu.dot_dimension_numbers<[1], [0], [0], [1], [0, 0, 1, 1], [], []>} : vector<64x4xbf16>, vector<4x64xbf16>, vector<64x64xf32> -> vector<64x64xf32>
    %40 = arith.addf %33, %39 : vector<64x64xf32>
    %c0_47 = arith.constant 0 : index
    %c0_48 = arith.constant 0 : index
    %c0_49 = arith.constant 0 : index
    %c3_50 = arith.constant 3 : index
    %c0_51 = arith.constant 0 : index
    %41 = vector.load %arg1[%c0_47, %c0_48, %c0_49, %c3_50, %c0_51] : memref<4x1x11x11x4xbf16, #tpu.memory_space<vmem>>, vector<1x1x8x8x4xbf16>
    %42 = vector.shape_cast %41 : vector<1x1x8x8x4xbf16> to vector<8x8x4xbf16>
    %43 = vector.shape_cast %42 : vector<8x8x4xbf16> to vector<64x4xbf16>
    %c6 = arith.constant 6 : index
    %c0_52 = arith.constant 0 : index
    %c0_53 = arith.constant 0 : index
    %44 = vector.load %arg2[%c6, %c0_52, %c0_53] : memref<49x4x64xbf16, #tpu.memory_space<vmem>>, vector<1x4x64xbf16>
    %45 = vector.shape_cast %44 : vector<1x4x64xbf16> to vector<4x64xbf16>
    %cst_54 = arith.constant dense<0.000000e+00> : vector<64x64xf32>
    %46 = tpu.matmul %43, %45, %cst_54 {dimension_numbers = #tpu.dot_dimension_numbers<[1], [0], [0], [1], [0, 0, 1, 1], [], []>} : vector<64x4xbf16>, vector<4x64xbf16>, vector<64x64xf32> -> vector<64x64xf32>
    %47 = arith.addf %40, %46 : vector<64x64xf32>
    %c2_55 = arith.constant 2 : index
    %c0_56 = arith.constant 0 : index
    %c0_57 = arith.constant 0 : index
    %c0_58 = arith.constant 0 : index
    %c0_59 = arith.constant 0 : index
    %48 = vector.load %arg1[%c2_55, %c0_56, %c0_57, %c0_58, %c0_59] : memref<4x1x11x11x4xbf16, #tpu.memory_space<vmem>>, vector<1x1x8x8x4xbf16>
    %49 = vector.shape_cast %48 : vector<1x1x8x8x4xbf16> to vector<8x8x4xbf16>
    %50 = vector.shape_cast %49 : vector<8x8x4xbf16> to vector<64x4xbf16>
    %c7 = arith.constant 7 : index
    %c0_60 = arith.constant 0 : index
    %c0_61 = arith.constant 0 : index
    %51 = vector.load %arg2[%c7, %c0_60, %c0_61] : memref<49x4x64xbf16, #tpu.memory_space<vmem>>, vector<1x4x64xbf16>
    %52 = vector.shape_cast %51 : vector<1x4x64xbf16> to vector<4x64xbf16>
    %cst_62 = arith.constant dense<0.000000e+00> : vector<64x64xf32>
    %53 = tpu.matmul %50, %52, %cst_62 {dimension_numbers = #tpu.dot_dimension_numbers<[1], [0], [0], [1], [0, 0, 1, 1], [], []>} : vector<64x4xbf16>, vector<4x64xbf16>, vector<64x64xf32> -> vector<64x64xf32>
    %54 = arith.addf %47, %53 : vector<64x64xf32>
    %c3_63 = arith.constant 3 : index
    %c0_64 = arith.constant 0 : index
    %c0_65 = arith.constant 0 : index
    %c0_66 = arith.constant 0 : index
    %c0_67 = arith.constant 0 : index
    %55 = vector.load %arg1[%c3_63, %c0_64, %c0_65, %c0_66, %c0_67] : memref<4x1x11x11x4xbf16, #tpu.memory_space<vmem>>, vector<1x1x8x8x4xbf16>
    %56 = vector.shape_cast %55 : vector<1x1x8x8x4xbf16> to vector<8x8x4xbf16>
    %57 = vector.shape_cast %56 : vector<8x8x4xbf16> to vector<64x4xbf16>
    %c8 = arith.constant 8 : index
    %c0_68 = arith.constant 0 : index
    %c0_69 = arith.constant 0 : index
    %58 = vector.load %arg2[%c8, %c0_68, %c0_69] : memref<49x4x64xbf16, #tpu.memory_space<vmem>>, vector<1x4x64xbf16>
    %59 = vector.shape_cast %58 : vector<1x4x64xbf16> to vector<4x64xbf16>
    %cst_70 = arith.constant dense<0.000000e+00> : vector<64x64xf32>
    %60 = tpu.matmul %57, %59, %cst_70 {dimension_numbers = #tpu.dot_dimension_numbers<[1], [0], [0], [1], [0, 0, 1, 1], [], []>} : vector<64x4xbf16>, vector<4x64xbf16>, vector<64x64xf32> -> vector<64x64xf32>
    %61 = arith.addf %54, %60 : vector<64x64xf32>
    %c2_71 = arith.constant 2 : index
    %c0_72 = arith.constant 0 : index
    %c0_73 = arith.constant 0 : index
    %c1_74 = arith.constant 1 : index
    %c0_75 = arith.constant 0 : index
    %62 = vector.load %arg1[%c2_71, %c0_72, %c0_73, %c1_74, %c0_75] : memref<4x1x11x11x4xbf16, #tpu.memory_space<vmem>>, vector<1x1x8x8x4xbf16>
    %63 = vector.shape_cast %62 : vector<1x1x8x8x4xbf16> to vector<8x8x4xbf16>
    %64 = vector.shape_cast %63 : vector<8x8x4xbf16> to vector<64x4xbf16>
    %c9 = arith.constant 9 : index
    %c0_76 = arith.constant 0 : index
    %c0_77 = arith.constant 0 : index
    %65 = vector.load %arg2[%c9, %c0_76, %c0_77] : memref<49x4x64xbf16, #tpu.memory_space<vmem>>, vector<1x4x64xbf16>
    %66 = vector.shape_cast %65 : vector<1x4x64xbf16> to vector<4x64xbf16>
    %cst_78 = arith.constant dense<0.000000e+00> : vector<64x64xf32>
    %67 = tpu.matmul %64, %66, %cst_78 {dimension_numbers = #tpu.dot_dimension_numbers<[1], [0], [0], [1], [0, 0, 1, 1], [], []>} : vector<64x4xbf16>, vector<4x64xbf16>, vector<64x64xf32> -> vector<64x64xf32>
    %68 = arith.addf %61, %67 : vector<64x64xf32>
    %c3_79 = arith.constant 3 : index
    %c0_80 = arith.constant 0 : index
    %c0_81 = arith.constant 0 : index
    %c1_82 = arith.constant 1 : index
    %c0_83 = arith.constant 0 : index
    %69 = vector.load %arg1[%c3_79, %c0_80, %c0_81, %c1_82, %c0_83] : memref<4x1x11x11x4xbf16, #tpu.memory_space<vmem>>, vector<1x1x8x8x4xbf16>
    %70 = vector.shape_cast %69 : vector<1x1x8x8x4xbf16> to vector<8x8x4xbf16>
    %71 = vector.shape_cast %70 : vector<8x8x4xbf16> to vector<64x4xbf16>
    %c10 = arith.constant 10 : index
    %c0_84 = arith.constant 0 : index
    %c0_85 = arith.constant 0 : index
    %72 = vector.load %arg2[%c10, %c0_84, %c0_85] : memref<49x4x64xbf16, #tpu.memory_space<vmem>>, vector<1x4x64xbf16>
    %73 = vector.shape_cast %72 : vector<1x4x64xbf16> to vector<4x64xbf16>
    %cst_86 = arith.constant dense<0.000000e+00> : vector<64x64xf32>
    %74 = tpu.matmul %71, %73, %cst_86 {dimension_numbers = #tpu.dot_dimension_numbers<[1], [0], [0], [1], [0, 0, 1, 1], [], []>} : vector<64x4xbf16>, vector<4x64xbf16>, vector<64x64xf32> -> vector<64x64xf32>
    %75 = arith.addf %68, %74 : vector<64x64xf32>
    %c2_87 = arith.constant 2 : index
    %c0_88 = arith.constant 0 : index
    %c0_89 = arith.constant 0 : index
    %c2_90 = arith.constant 2 : index
    %c0_91 = arith.constant 0 : index
    %76 = vector.load %arg1[%c2_87, %c0_88, %c0_89, %c2_90, %c0_91] : memref<4x1x11x11x4xbf16, #tpu.memory_space<vmem>>, vector<1x1x8x8x4xbf16>
    %77 = vector.shape_cast %76 : vector<1x1x8x8x4xbf16> to vector<8x8x4xbf16>
    %78 = vector.shape_cast %77 : vector<8x8x4xbf16> to vector<64x4xbf16>
    %c11 = arith.constant 11 : index
    %c0_92 = arith.constant 0 : index
    %c0_93 = arith.constant 0 : index
    %79 = vector.load %arg2[%c11, %c0_92, %c0_93] : memref<49x4x64xbf16, #tpu.memory_space<vmem>>, vector<1x4x64xbf16>
    %80 = vector.shape_cast %79 : vector<1x4x64xbf16> to vector<4x64xbf16>
    %cst_94 = arith.constant dense<0.000000e+00> : vector<64x64xf32>
    %81 = tpu.matmul %78, %80, %cst_94 {dimension_numbers = #tpu.dot_dimension_numbers<[1], [0], [0], [1], [0, 0, 1, 1], [], []>} : vector<64x4xbf16>, vector<4x64xbf16>, vector<64x64xf32> -> vector<64x64xf32>
    %82 = arith.addf %75, %81 : vector<64x64xf32>
    %c3_95 = arith.constant 3 : index
    %c0_96 = arith.constant 0 : index
    %c0_97 = arith.constant 0 : index
    %c2_98 = arith.constant 2 : index
    %c0_99 = arith.constant 0 : index
    %83 = vector.load %arg1[%c3_95, %c0_96, %c0_97, %c2_98, %c0_99] : memref<4x1x11x11x4xbf16, #tpu.memory_space<vmem>>, vector<1x1x8x8x4xbf16>
    %84 = vector.shape_cast %83 : vector<1x1x8x8x4xbf16> to vector<8x8x4xbf16>
    %85 = vector.shape_cast %84 : vector<8x8x4xbf16> to vector<64x4xbf16>
    %c12 = arith.constant 12 : index
    %c0_100 = arith.constant 0 : index
    %c0_101 = arith.constant 0 : index
    %86 = vector.load %arg2[%c12, %c0_100, %c0_101] : memref<49x4x64xbf16, #tpu.memory_space<vmem>>, vector<1x4x64xbf16>
    %87 = vector.shape_cast %86 : vector<1x4x64xbf16> to vector<4x64xbf16>
    %cst_102 = arith.constant dense<0.000000e+00> : vector<64x64xf32>
    %88 = tpu.matmul %85, %87, %cst_102 {dimension_numbers = #tpu.dot_dimension_numbers<[1], [0], [0], [1], [0, 0, 1, 1], [], []>} : vector<64x4xbf16>, vector<4x64xbf16>, vector<64x64xf32> -> vector<64x64xf32>
    %89 = arith.addf %82, %88 : vector<64x64xf32>
    %c2_103 = arith.constant 2 : index
    %c0_104 = arith.constant 0 : index
    %c0_105 = arith.constant 0 : index
    %c3_106 = arith.constant 3 : index
    %c0_107 = arith.constant 0 : index
    %90 = vector.load %arg1[%c2_103, %c0_104, %c0_105, %c3_106, %c0_107] : memref<4x1x11x11x4xbf16, #tpu.memory_space<vmem>>, vector<1x1x8x8x4xbf16>
    %91 = vector.shape_cast %90 : vector<1x1x8x8x4xbf16> to vector<8x8x4xbf16>
    %92 = vector.shape_cast %91 : vector<8x8x4xbf16> to vector<64x4xbf16>
    %c13 = arith.constant 13 : index
    %c0_108 = arith.constant 0 : index
    %c0_109 = arith.constant 0 : index
    %93 = vector.load %arg2[%c13, %c0_108, %c0_109] : memref<49x4x64xbf16, #tpu.memory_space<vmem>>, vector<1x4x64xbf16>
    %94 = vector.shape_cast %93 : vector<1x4x64xbf16> to vector<4x64xbf16>
    %cst_110 = arith.constant dense<0.000000e+00> : vector<64x64xf32>
    %95 = tpu.matmul %92, %94, %cst_110 {dimension_numbers = #tpu.dot_dimension_numbers<[1], [0], [0], [1], [0, 0, 1, 1], [], []>} : vector<64x4xbf16>, vector<4x64xbf16>, vector<64x64xf32> -> vector<64x64xf32>
    %96 = arith.addf %89, %95 : vector<64x64xf32>
    %c0_111 = arith.constant 0 : index
    %c0_112 = arith.constant 0 : index
    %c1_113 = arith.constant 1 : index
    %c0_114 = arith.constant 0 : index
    %c0_115 = arith.constant 0 : index
    %97 = vector.load %arg1[%c0_111, %c0_112, %c1_113, %c0_114, %c0_115] : memref<4x1x11x11x4xbf16, #tpu.memory_space<vmem>>, vector<1x1x8x8x4xbf16>
    %98 = vector.shape_cast %97 : vector<1x1x8x8x4xbf16> to vector<8x8x4xbf16>
    %99 = vector.shape_cast %98 : vector<8x8x4xbf16> to vector<64x4xbf16>
    %c14 = arith.constant 14 : index
    %c0_116 = arith.constant 0 : index
    %c0_117 = arith.constant 0 : index
    %100 = vector.load %arg2[%c14, %c0_116, %c0_117] : memref<49x4x64xbf16, #tpu.memory_space<vmem>>, vector<1x4x64xbf16>
    %101 = vector.shape_cast %100 : vector<1x4x64xbf16> to vector<4x64xbf16>
    %cst_118 = arith.constant dense<0.000000e+00> : vector<64x64xf32>
    %102 = tpu.matmul %99, %101, %cst_118 {dimension_numbers = #tpu.dot_dimension_numbers<[1], [0], [0], [1], [0, 0, 1, 1], [], []>} : vector<64x4xbf16>, vector<4x64xbf16>, vector<64x64xf32> -> vector<64x64xf32>
    %103 = arith.addf %96, %102 : vector<64x64xf32>
    %c1_119 = arith.constant 1 : index
    %c0_120 = arith.constant 0 : index
    %c1_121 = arith.constant 1 : index
    %c0_122 = arith.constant 0 : index
    %c0_123 = arith.constant 0 : index
    %104 = vector.load %arg1[%c1_119, %c0_120, %c1_121, %c0_122, %c0_123] : memref<4x1x11x11x4xbf16, #tpu.memory_space<vmem>>, vector<1x1x8x8x4xbf16>
    %105 = vector.shape_cast %104 : vector<1x1x8x8x4xbf16> to vector<8x8x4xbf16>
    %106 = vector.shape_cast %105 : vector<8x8x4xbf16> to vector<64x4xbf16>
    %c15 = arith.constant 15 : index
    %c0_124 = arith.constant 0 : index
    %c0_125 = arith.constant 0 : index
    %107 = vector.load %arg2[%c15, %c0_124, %c0_125] : memref<49x4x64xbf16, #tpu.memory_space<vmem>>, vector<1x4x64xbf16>
    %108 = vector.shape_cast %107 : vector<1x4x64xbf16> to vector<4x64xbf16>
    %cst_126 = arith.constant dense<0.000000e+00> : vector<64x64xf32>
    %109 = tpu.matmul %106, %108, %cst_126 {dimension_numbers = #tpu.dot_dimension_numbers<[1], [0], [0], [1], [0, 0, 1, 1], [], []>} : vector<64x4xbf16>, vector<4x64xbf16>, vector<64x64xf32> -> vector<64x64xf32>
    %110 = arith.addf %103, %109 : vector<64x64xf32>
    %c0_127 = arith.constant 0 : index
    %c0_128 = arith.constant 0 : index
    %c1_129 = arith.constant 1 : index
    %c1_130 = arith.constant 1 : index
    %c0_131 = arith.constant 0 : index
    %111 = vector.load %arg1[%c0_127, %c0_128, %c1_129, %c1_130, %c0_131] : memref<4x1x11x11x4xbf16, #tpu.memory_space<vmem>>, vector<1x1x8x8x4xbf16>
    %112 = vector.shape_cast %111 : vector<1x1x8x8x4xbf16> to vector<8x8x4xbf16>
    %113 = vector.shape_cast %112 : vector<8x8x4xbf16> to vector<64x4xbf16>
    %c16 = arith.constant 16 : index
    %c0_132 = arith.constant 0 : index
    %c0_133 = arith.constant 0 : index
    %114 = vector.load %arg2[%c16, %c0_132, %c0_133] : memref<49x4x64xbf16, #tpu.memory_space<vmem>>, vector<1x4x64xbf16>
    %115 = vector.shape_cast %114 : vector<1x4x64xbf16> to vector<4x64xbf16>
    %cst_134 = arith.constant dense<0.000000e+00> : vector<64x64xf32>
    %116 = tpu.matmul %113, %115, %cst_134 {dimension_numbers = #tpu.dot_dimension_numbers<[1], [0], [0], [1], [0, 0, 1, 1], [], []>} : vector<64x4xbf16>, vector<4x64xbf16>, vector<64x64xf32> -> vector<64x64xf32>
    %117 = arith.addf %110, %116 : vector<64x64xf32>
    %c1_135 = arith.constant 1 : index
    %c0_136 = arith.constant 0 : index
    %c1_137 = arith.constant 1 : index
    %c1_138 = arith.constant 1 : index
    %c0_139 = arith.constant 0 : index
    %118 = vector.load %arg1[%c1_135, %c0_136, %c1_137, %c1_138, %c0_139] : memref<4x1x11x11x4xbf16, #tpu.memory_space<vmem>>, vector<1x1x8x8x4xbf16>
    %119 = vector.shape_cast %118 : vector<1x1x8x8x4xbf16> to vector<8x8x4xbf16>
    %120 = vector.shape_cast %119 : vector<8x8x4xbf16> to vector<64x4xbf16>
    %c17 = arith.constant 17 : index
    %c0_140 = arith.constant 0 : index
    %c0_141 = arith.constant 0 : index
    %121 = vector.load %arg2[%c17, %c0_140, %c0_141] : memref<49x4x64xbf16, #tpu.memory_space<vmem>>, vector<1x4x64xbf16>
    %122 = vector.shape_cast %121 : vector<1x4x64xbf16> to vector<4x64xbf16>
    %cst_142 = arith.constant dense<0.000000e+00> : vector<64x64xf32>
    %123 = tpu.matmul %120, %122, %cst_142 {dimension_numbers = #tpu.dot_dimension_numbers<[1], [0], [0], [1], [0, 0, 1, 1], [], []>} : vector<64x4xbf16>, vector<4x64xbf16>, vector<64x64xf32> -> vector<64x64xf32>
    %124 = arith.addf %117, %123 : vector<64x64xf32>
    %c0_143 = arith.constant 0 : index
    %c0_144 = arith.constant 0 : index
    %c1_145 = arith.constant 1 : index
    %c2_146 = arith.constant 2 : index
    %c0_147 = arith.constant 0 : index
    %125 = vector.load %arg1[%c0_143, %c0_144, %c1_145, %c2_146, %c0_147] : memref<4x1x11x11x4xbf16, #tpu.memory_space<vmem>>, vector<1x1x8x8x4xbf16>
    %126 = vector.shape_cast %125 : vector<1x1x8x8x4xbf16> to vector<8x8x4xbf16>
    %127 = vector.shape_cast %126 : vector<8x8x4xbf16> to vector<64x4xbf16>
    %c18 = arith.constant 18 : index
    %c0_148 = arith.constant 0 : index
    %c0_149 = arith.constant 0 : index
    %128 = vector.load %arg2[%c18, %c0_148, %c0_149] : memref<49x4x64xbf16, #tpu.memory_space<vmem>>, vector<1x4x64xbf16>
    %129 = vector.shape_cast %128 : vector<1x4x64xbf16> to vector<4x64xbf16>
    %cst_150 = arith.constant dense<0.000000e+00> : vector<64x64xf32>
    %130 = tpu.matmul %127, %129, %cst_150 {dimension_numbers = #tpu.dot_dimension_numbers<[1], [0], [0], [1], [0, 0, 1, 1], [], []>} : vector<64x4xbf16>, vector<4x64xbf16>, vector<64x64xf32> -> vector<64x64xf32>
    %131 = arith.addf %124, %130 : vector<64x64xf32>
    %c1_151 = arith.constant 1 : index
    %c0_152 = arith.constant 0 : index
    %c1_153 = arith.constant 1 : index
    %c2_154 = arith.constant 2 : index
    %c0_155 = arith.constant 0 : index
    %132 = vector.load %arg1[%c1_151, %c0_152, %c1_153, %c2_154, %c0_155] : memref<4x1x11x11x4xbf16, #tpu.memory_space<vmem>>, vector<1x1x8x8x4xbf16>
    %133 = vector.shape_cast %132 : vector<1x1x8x8x4xbf16> to vector<8x8x4xbf16>
    %134 = vector.shape_cast %133 : vector<8x8x4xbf16> to vector<64x4xbf16>
    %c19 = arith.constant 19 : index
    %c0_156 = arith.constant 0 : index
    %c0_157 = arith.constant 0 : index
    %135 = vector.load %arg2[%c19, %c0_156, %c0_157] : memref<49x4x64xbf16, #tpu.memory_space<vmem>>, vector<1x4x64xbf16>
    %136 = vector.shape_cast %135 : vector<1x4x64xbf16> to vector<4x64xbf16>
    %cst_158 = arith.constant dense<0.000000e+00> : vector<64x64xf32>
    %137 = tpu.matmul %134, %136, %cst_158 {dimension_numbers = #tpu.dot_dimension_numbers<[1], [0], [0], [1], [0, 0, 1, 1], [], []>} : vector<64x4xbf16>, vector<4x64xbf16>, vector<64x64xf32> -> vector<64x64xf32>
    %138 = arith.addf %131, %137 : vector<64x64xf32>
    %c0_159 = arith.constant 0 : index
    %c0_160 = arith.constant 0 : index
    %c1_161 = arith.constant 1 : index
    %c3_162 = arith.constant 3 : index
    %c0_163 = arith.constant 0 : index
    %139 = vector.load %arg1[%c0_159, %c0_160, %c1_161, %c3_162, %c0_163] : memref<4x1x11x11x4xbf16, #tpu.memory_space<vmem>>, vector<1x1x8x8x4xbf16>
    %140 = vector.shape_cast %139 : vector<1x1x8x8x4xbf16> to vector<8x8x4xbf16>
    %141 = vector.shape_cast %140 : vector<8x8x4xbf16> to vector<64x4xbf16>
    %c20 = arith.constant 20 : index
    %c0_164 = arith.constant 0 : index
    %c0_165 = arith.constant 0 : index
    %142 = vector.load %arg2[%c20, %c0_164, %c0_165] : memref<49x4x64xbf16, #tpu.memory_space<vmem>>, vector<1x4x64xbf16>
    %143 = vector.shape_cast %142 : vector<1x4x64xbf16> to vector<4x64xbf16>
    %cst_166 = arith.constant dense<0.000000e+00> : vector<64x64xf32>
    %144 = tpu.matmul %141, %143, %cst_166 {dimension_numbers = #tpu.dot_dimension_numbers<[1], [0], [0], [1], [0, 0, 1, 1], [], []>} : vector<64x4xbf16>, vector<4x64xbf16>, vector<64x64xf32> -> vector<64x64xf32>
    %145 = arith.addf %138, %144 : vector<64x64xf32>
    %c2_167 = arith.constant 2 : index
    %c0_168 = arith.constant 0 : index
    %c1_169 = arith.constant 1 : index
    %c0_170 = arith.constant 0 : index
    %c0_171 = arith.constant 0 : index
    %146 = vector.load %arg1[%c2_167, %c0_168, %c1_169, %c0_170, %c0_171] : memref<4x1x11x11x4xbf16, #tpu.memory_space<vmem>>, vector<1x1x8x8x4xbf16>
    %147 = vector.shape_cast %146 : vector<1x1x8x8x4xbf16> to vector<8x8x4xbf16>
    %148 = vector.shape_cast %147 : vector<8x8x4xbf16> to vector<64x4xbf16>
    %c21 = arith.constant 21 : index
    %c0_172 = arith.constant 0 : index
    %c0_173 = arith.constant 0 : index
    %149 = vector.load %arg2[%c21, %c0_172, %c0_173] : memref<49x4x64xbf16, #tpu.memory_space<vmem>>, vector<1x4x64xbf16>
    %150 = vector.shape_cast %149 : vector<1x4x64xbf16> to vector<4x64xbf16>
    %cst_174 = arith.constant dense<0.000000e+00> : vector<64x64xf32>
    %151 = tpu.matmul %148, %150, %cst_174 {dimension_numbers = #tpu.dot_dimension_numbers<[1], [0], [0], [1], [0, 0, 1, 1], [], []>} : vector<64x4xbf16>, vector<4x64xbf16>, vector<64x64xf32> -> vector<64x64xf32>
    %152 = arith.addf %145, %151 : vector<64x64xf32>
    %c3_175 = arith.constant 3 : index
    %c0_176 = arith.constant 0 : index
    %c1_177 = arith.constant 1 : index
    %c0_178 = arith.constant 0 : index
    %c0_179 = arith.constant 0 : index
    %153 = vector.load %arg1[%c3_175, %c0_176, %c1_177, %c0_178, %c0_179] : memref<4x1x11x11x4xbf16, #tpu.memory_space<vmem>>, vector<1x1x8x8x4xbf16>
    %154 = vector.shape_cast %153 : vector<1x1x8x8x4xbf16> to vector<8x8x4xbf16>
    %155 = vector.shape_cast %154 : vector<8x8x4xbf16> to vector<64x4xbf16>
    %c22 = arith.constant 22 : index
    %c0_180 = arith.constant 0 : index
    %c0_181 = arith.constant 0 : index
    %156 = vector.load %arg2[%c22, %c0_180, %c0_181] : memref<49x4x64xbf16, #tpu.memory_space<vmem>>, vector<1x4x64xbf16>
    %157 = vector.shape_cast %156 : vector<1x4x64xbf16> to vector<4x64xbf16>
    %cst_182 = arith.constant dense<0.000000e+00> : vector<64x64xf32>
    %158 = tpu.matmul %155, %157, %cst_182 {dimension_numbers = #tpu.dot_dimension_numbers<[1], [0], [0], [1], [0, 0, 1, 1], [], []>} : vector<64x4xbf16>, vector<4x64xbf16>, vector<64x64xf32> -> vector<64x64xf32>
    %159 = arith.addf %152, %158 : vector<64x64xf32>
    %c2_183 = arith.constant 2 : index
    %c0_184 = arith.constant 0 : index
    %c1_185 = arith.constant 1 : index
    %c1_186 = arith.constant 1 : index
    %c0_187 = arith.constant 0 : index
    %160 = vector.load %arg1[%c2_183, %c0_184, %c1_185, %c1_186, %c0_187] : memref<4x1x11x11x4xbf16, #tpu.memory_space<vmem>>, vector<1x1x8x8x4xbf16>
    %161 = vector.shape_cast %160 : vector<1x1x8x8x4xbf16> to vector<8x8x4xbf16>
    %162 = vector.shape_cast %161 : vector<8x8x4xbf16> to vector<64x4xbf16>
    %c23 = arith.constant 23 : index
    %c0_188 = arith.constant 0 : index
    %c0_189 = arith.constant 0 : index
    %163 = vector.load %arg2[%c23, %c0_188, %c0_189] : memref<49x4x64xbf16, #tpu.memory_space<vmem>>, vector<1x4x64xbf16>
    %164 = vector.shape_cast %163 : vector<1x4x64xbf16> to vector<4x64xbf16>
    %cst_190 = arith.constant dense<0.000000e+00> : vector<64x64xf32>
    %165 = tpu.matmul %162, %164, %cst_190 {dimension_numbers = #tpu.dot_dimension_numbers<[1], [0], [0], [1], [0, 0, 1, 1], [], []>} : vector<64x4xbf16>, vector<4x64xbf16>, vector<64x64xf32> -> vector<64x64xf32>
    %166 = arith.addf %159, %165 : vector<64x64xf32>
    %c3_191 = arith.constant 3 : index
    %c0_192 = arith.constant 0 : index
    %c1_193 = arith.constant 1 : index
    %c1_194 = arith.constant 1 : index
    %c0_195 = arith.constant 0 : index
    %167 = vector.load %arg1[%c3_191, %c0_192, %c1_193, %c1_194, %c0_195] : memref<4x1x11x11x4xbf16, #tpu.memory_space<vmem>>, vector<1x1x8x8x4xbf16>
    %168 = vector.shape_cast %167 : vector<1x1x8x8x4xbf16> to vector<8x8x4xbf16>
    %169 = vector.shape_cast %168 : vector<8x8x4xbf16> to vector<64x4xbf16>
    %c24 = arith.constant 24 : index
    %c0_196 = arith.constant 0 : index
    %c0_197 = arith.constant 0 : index
    %170 = vector.load %arg2[%c24, %c0_196, %c0_197] : memref<49x4x64xbf16, #tpu.memory_space<vmem>>, vector<1x4x64xbf16>
    %171 = vector.shape_cast %170 : vector<1x4x64xbf16> to vector<4x64xbf16>
    %cst_198 = arith.constant dense<0.000000e+00> : vector<64x64xf32>
    %172 = tpu.matmul %169, %171, %cst_198 {dimension_numbers = #tpu.dot_dimension_numbers<[1], [0], [0], [1], [0, 0, 1, 1], [], []>} : vector<64x4xbf16>, vector<4x64xbf16>, vector<64x64xf32> -> vector<64x64xf32>
    %173 = arith.addf %166, %172 : vector<64x64xf32>
    %c2_199 = arith.constant 2 : index
    %c0_200 = arith.constant 0 : index
    %c1_201 = arith.constant 1 : index
    %c2_202 = arith.constant 2 : index
    %c0_203 = arith.constant 0 : index
    %174 = vector.load %arg1[%c2_199, %c0_200, %c1_201, %c2_202, %c0_203] : memref<4x1x11x11x4xbf16, #tpu.memory_space<vmem>>, vector<1x1x8x8x4xbf16>
    %175 = vector.shape_cast %174 : vector<1x1x8x8x4xbf16> to vector<8x8x4xbf16>
    %176 = vector.shape_cast %175 : vector<8x8x4xbf16> to vector<64x4xbf16>
    %c25 = arith.constant 25 : index
    %c0_204 = arith.constant 0 : index
    %c0_205 = arith.constant 0 : index
    %177 = vector.load %arg2[%c25, %c0_204, %c0_205] : memref<49x4x64xbf16, #tpu.memory_space<vmem>>, vector<1x4x64xbf16>
    %178 = vector.shape_cast %177 : vector<1x4x64xbf16> to vector<4x64xbf16>
    %cst_206 = arith.constant dense<0.000000e+00> : vector<64x64xf32>
    %179 = tpu.matmul %176, %178, %cst_206 {dimension_numbers = #tpu.dot_dimension_numbers<[1], [0], [0], [1], [0, 0, 1, 1], [], []>} : vector<64x4xbf16>, vector<4x64xbf16>, vector<64x64xf32> -> vector<64x64xf32>
    %180 = arith.addf %173, %179 : vector<64x64xf32>
    %c3_207 = arith.constant 3 : index
    %c0_208 = arith.constant 0 : index
    %c1_209 = arith.constant 1 : index
    %c2_210 = arith.constant 2 : index
    %c0_211 = arith.constant 0 : index
    %181 = vector.load %arg1[%c3_207, %c0_208, %c1_209, %c2_210, %c0_211] : memref<4x1x11x11x4xbf16, #tpu.memory_space<vmem>>, vector<1x1x8x8x4xbf16>
    %182 = vector.shape_cast %181 : vector<1x1x8x8x4xbf16> to vector<8x8x4xbf16>
    %183 = vector.shape_cast %182 : vector<8x8x4xbf16> to vector<64x4xbf16>
    %c26 = arith.constant 26 : index
    %c0_212 = arith.constant 0 : index
    %c0_213 = arith.constant 0 : index
    %184 = vector.load %arg2[%c26, %c0_212, %c0_213] : memref<49x4x64xbf16, #tpu.memory_space<vmem>>, vector<1x4x64xbf16>
    %185 = vector.shape_cast %184 : vector<1x4x64xbf16> to vector<4x64xbf16>
    %cst_214 = arith.constant dense<0.000000e+00> : vector<64x64xf32>
    %186 = tpu.matmul %183, %185, %cst_214 {dimension_numbers = #tpu.dot_dimension_numbers<[1], [0], [0], [1], [0, 0, 1, 1], [], []>} : vector<64x4xbf16>, vector<4x64xbf16>, vector<64x64xf32> -> vector<64x64xf32>
    %187 = arith.addf %180, %186 : vector<64x64xf32>
    %c2_215 = arith.constant 2 : index
    %c0_216 = arith.constant 0 : index
    %c1_217 = arith.constant 1 : index
    %c3_218 = arith.constant 3 : index
    %c0_219 = arith.constant 0 : index
    %188 = vector.load %arg1[%c2_215, %c0_216, %c1_217, %c3_218, %c0_219] : memref<4x1x11x11x4xbf16, #tpu.memory_space<vmem>>, vector<1x1x8x8x4xbf16>
    %189 = vector.shape_cast %188 : vector<1x1x8x8x4xbf16> to vector<8x8x4xbf16>
    %190 = vector.shape_cast %189 : vector<8x8x4xbf16> to vector<64x4xbf16>
    %c27 = arith.constant 27 : index
    %c0_220 = arith.constant 0 : index
    %c0_221 = arith.constant 0 : index
    %191 = vector.load %arg2[%c27, %c0_220, %c0_221] : memref<49x4x64xbf16, #tpu.memory_space<vmem>>, vector<1x4x64xbf16>
    %192 = vector.shape_cast %191 : vector<1x4x64xbf16> to vector<4x64xbf16>
    %cst_222 = arith.constant dense<0.000000e+00> : vector<64x64xf32>
    %193 = tpu.matmul %190, %192, %cst_222 {dimension_numbers = #tpu.dot_dimension_numbers<[1], [0], [0], [1], [0, 0, 1, 1], [], []>} : vector<64x4xbf16>, vector<4x64xbf16>, vector<64x64xf32> -> vector<64x64xf32>
    %194 = arith.addf %187, %193 : vector<64x64xf32>
    %c0_223 = arith.constant 0 : index
    %c0_224 = arith.constant 0 : index
    %c2_225 = arith.constant 2 : index
    %c0_226 = arith.constant 0 : index
    %c0_227 = arith.constant 0 : index
    %195 = vector.load %arg1[%c0_223, %c0_224, %c2_225, %c0_226, %c0_227] : memref<4x1x11x11x4xbf16, #tpu.memory_space<vmem>>, vector<1x1x8x8x4xbf16>
    %196 = vector.shape_cast %195 : vector<1x1x8x8x4xbf16> to vector<8x8x4xbf16>
    %197 = vector.shape_cast %196 : vector<8x8x4xbf16> to vector<64x4xbf16>
    %c28 = arith.constant 28 : index
    %c0_228 = arith.constant 0 : index
    %c0_229 = arith.constant 0 : index
    %198 = vector.load %arg2[%c28, %c0_228, %c0_229] : memref<49x4x64xbf16, #tpu.memory_space<vmem>>, vector<1x4x64xbf16>
    %199 = vector.shape_cast %198 : vector<1x4x64xbf16> to vector<4x64xbf16>
    %cst_230 = arith.constant dense<0.000000e+00> : vector<64x64xf32>
    %200 = tpu.matmul %197, %199, %cst_230 {dimension_numbers = #tpu.dot_dimension_numbers<[1], [0], [0], [1], [0, 0, 1, 1], [], []>} : vector<64x4xbf16>, vector<4x64xbf16>, vector<64x64xf32> -> vector<64x64xf32>
    %201 = arith.addf %194, %200 : vector<64x64xf32>
    %c1_231 = arith.constant 1 : index
    %c0_232 = arith.constant 0 : index
    %c2_233 = arith.constant 2 : index
    %c0_234 = arith.constant 0 : index
    %c0_235 = arith.constant 0 : index
    %202 = vector.load %arg1[%c1_231, %c0_232, %c2_233, %c0_234, %c0_235] : memref<4x1x11x11x4xbf16, #tpu.memory_space<vmem>>, vector<1x1x8x8x4xbf16>
    %203 = vector.shape_cast %202 : vector<1x1x8x8x4xbf16> to vector<8x8x4xbf16>
    %204 = vector.shape_cast %203 : vector<8x8x4xbf16> to vector<64x4xbf16>
    %c29 = arith.constant 29 : index
    %c0_236 = arith.constant 0 : index
    %c0_237 = arith.constant 0 : index
    %205 = vector.load %arg2[%c29, %c0_236, %c0_237] : memref<49x4x64xbf16, #tpu.memory_space<vmem>>, vector<1x4x64xbf16>
    %206 = vector.shape_cast %205 : vector<1x4x64xbf16> to vector<4x64xbf16>
    %cst_238 = arith.constant dense<0.000000e+00> : vector<64x64xf32>
    %207 = tpu.matmul %204, %206, %cst_238 {dimension_numbers = #tpu.dot_dimension_numbers<[1], [0], [0], [1], [0, 0, 1, 1], [], []>} : vector<64x4xbf16>, vector<4x64xbf16>, vector<64x64xf32> -> vector<64x64xf32>
    %208 = arith.addf %201, %207 : vector<64x64xf32>
    %c0_239 = arith.constant 0 : index
    %c0_240 = arith.constant 0 : index
    %c2_241 = arith.constant 2 : index
    %c1_242 = arith.constant 1 : index
    %c0_243 = arith.constant 0 : index
    %209 = vector.load %arg1[%c0_239, %c0_240, %c2_241, %c1_242, %c0_243] : memref<4x1x11x11x4xbf16, #tpu.memory_space<vmem>>, vector<1x1x8x8x4xbf16>
    %210 = vector.shape_cast %209 : vector<1x1x8x8x4xbf16> to vector<8x8x4xbf16>
    %211 = vector.shape_cast %210 : vector<8x8x4xbf16> to vector<64x4xbf16>
    %c30 = arith.constant 30 : index
    %c0_244 = arith.constant 0 : index
    %c0_245 = arith.constant 0 : index
    %212 = vector.load %arg2[%c30, %c0_244, %c0_245] : memref<49x4x64xbf16, #tpu.memory_space<vmem>>, vector<1x4x64xbf16>
    %213 = vector.shape_cast %212 : vector<1x4x64xbf16> to vector<4x64xbf16>
    %cst_246 = arith.constant dense<0.000000e+00> : vector<64x64xf32>
    %214 = tpu.matmul %211, %213, %cst_246 {dimension_numbers = #tpu.dot_dimension_numbers<[1], [0], [0], [1], [0, 0, 1, 1], [], []>} : vector<64x4xbf16>, vector<4x64xbf16>, vector<64x64xf32> -> vector<64x64xf32>
    %215 = arith.addf %208, %214 : vector<64x64xf32>
    %c1_247 = arith.constant 1 : index
    %c0_248 = arith.constant 0 : index
    %c2_249 = arith.constant 2 : index
    %c1_250 = arith.constant 1 : index
    %c0_251 = arith.constant 0 : index
    %216 = vector.load %arg1[%c1_247, %c0_248, %c2_249, %c1_250, %c0_251] : memref<4x1x11x11x4xbf16, #tpu.memory_space<vmem>>, vector<1x1x8x8x4xbf16>
    %217 = vector.shape_cast %216 : vector<1x1x8x8x4xbf16> to vector<8x8x4xbf16>
    %218 = vector.shape_cast %217 : vector<8x8x4xbf16> to vector<64x4xbf16>
    %c31 = arith.constant 31 : index
    %c0_252 = arith.constant 0 : index
    %c0_253 = arith.constant 0 : index
    %219 = vector.load %arg2[%c31, %c0_252, %c0_253] : memref<49x4x64xbf16, #tpu.memory_space<vmem>>, vector<1x4x64xbf16>
    %220 = vector.shape_cast %219 : vector<1x4x64xbf16> to vector<4x64xbf16>
    %cst_254 = arith.constant dense<0.000000e+00> : vector<64x64xf32>
    %221 = tpu.matmul %218, %220, %cst_254 {dimension_numbers = #tpu.dot_dimension_numbers<[1], [0], [0], [1], [0, 0, 1, 1], [], []>} : vector<64x4xbf16>, vector<4x64xbf16>, vector<64x64xf32> -> vector<64x64xf32>
    %222 = arith.addf %215, %221 : vector<64x64xf32>
    %c0_255 = arith.constant 0 : index
    %c0_256 = arith.constant 0 : index
    %c2_257 = arith.constant 2 : index
    %c2_258 = arith.constant 2 : index
    %c0_259 = arith.constant 0 : index
    %223 = vector.load %arg1[%c0_255, %c0_256, %c2_257, %c2_258, %c0_259] : memref<4x1x11x11x4xbf16, #tpu.memory_space<vmem>>, vector<1x1x8x8x4xbf16>
    %224 = vector.shape_cast %223 : vector<1x1x8x8x4xbf16> to vector<8x8x4xbf16>
    %225 = vector.shape_cast %224 : vector<8x8x4xbf16> to vector<64x4xbf16>
    %c32 = arith.constant 32 : index
    %c0_260 = arith.constant 0 : index
    %c0_261 = arith.constant 0 : index
    %226 = vector.load %arg2[%c32, %c0_260, %c0_261] : memref<49x4x64xbf16, #tpu.memory_space<vmem>>, vector<1x4x64xbf16>
    %227 = vector.shape_cast %226 : vector<1x4x64xbf16> to vector<4x64xbf16>
    %cst_262 = arith.constant dense<0.000000e+00> : vector<64x64xf32>
    %228 = tpu.matmul %225, %227, %cst_262 {dimension_numbers = #tpu.dot_dimension_numbers<[1], [0], [0], [1], [0, 0, 1, 1], [], []>} : vector<64x4xbf16>, vector<4x64xbf16>, vector<64x64xf32> -> vector<64x64xf32>
    %229 = arith.addf %222, %228 : vector<64x64xf32>
    %c1_263 = arith.constant 1 : index
    %c0_264 = arith.constant 0 : index
    %c2_265 = arith.constant 2 : index
    %c2_266 = arith.constant 2 : index
    %c0_267 = arith.constant 0 : index
    %230 = vector.load %arg1[%c1_263, %c0_264, %c2_265, %c2_266, %c0_267] : memref<4x1x11x11x4xbf16, #tpu.memory_space<vmem>>, vector<1x1x8x8x4xbf16>
    %231 = vector.shape_cast %230 : vector<1x1x8x8x4xbf16> to vector<8x8x4xbf16>
    %232 = vector.shape_cast %231 : vector<8x8x4xbf16> to vector<64x4xbf16>
    %c33 = arith.constant 33 : index
    %c0_268 = arith.constant 0 : index
    %c0_269 = arith.constant 0 : index
    %233 = vector.load %arg2[%c33, %c0_268, %c0_269] : memref<49x4x64xbf16, #tpu.memory_space<vmem>>, vector<1x4x64xbf16>
    %234 = vector.shape_cast %233 : vector<1x4x64xbf16> to vector<4x64xbf16>
    %cst_270 = arith.constant dense<0.000000e+00> : vector<64x64xf32>
    %235 = tpu.matmul %232, %234, %cst_270 {dimension_numbers = #tpu.dot_dimension_numbers<[1], [0], [0], [1], [0, 0, 1, 1], [], []>} : vector<64x4xbf16>, vector<4x64xbf16>, vector<64x64xf32> -> vector<64x64xf32>
    %236 = arith.addf %229, %235 : vector<64x64xf32>
    %c0_271 = arith.constant 0 : index
    %c0_272 = arith.constant 0 : index
    %c2_273 = arith.constant 2 : index
    %c3_274 = arith.constant 3 : index
    %c0_275 = arith.constant 0 : index
    %237 = vector.load %arg1[%c0_271, %c0_272, %c2_273, %c3_274, %c0_275] : memref<4x1x11x11x4xbf16, #tpu.memory_space<vmem>>, vector<1x1x8x8x4xbf16>
    %238 = vector.shape_cast %237 : vector<1x1x8x8x4xbf16> to vector<8x8x4xbf16>
    %239 = vector.shape_cast %238 : vector<8x8x4xbf16> to vector<64x4xbf16>
    %c34 = arith.constant 34 : index
    %c0_276 = arith.constant 0 : index
    %c0_277 = arith.constant 0 : index
    %240 = vector.load %arg2[%c34, %c0_276, %c0_277] : memref<49x4x64xbf16, #tpu.memory_space<vmem>>, vector<1x4x64xbf16>
    %241 = vector.shape_cast %240 : vector<1x4x64xbf16> to vector<4x64xbf16>
    %cst_278 = arith.constant dense<0.000000e+00> : vector<64x64xf32>
    %242 = tpu.matmul %239, %241, %cst_278 {dimension_numbers = #tpu.dot_dimension_numbers<[1], [0], [0], [1], [0, 0, 1, 1], [], []>} : vector<64x4xbf16>, vector<4x64xbf16>, vector<64x64xf32> -> vector<64x64xf32>
    %243 = arith.addf %236, %242 : vector<64x64xf32>
    %c2_279 = arith.constant 2 : index
    %c0_280 = arith.constant 0 : index
    %c2_281 = arith.constant 2 : index
    %c0_282 = arith.constant 0 : index
    %c0_283 = arith.constant 0 : index
    %244 = vector.load %arg1[%c2_279, %c0_280, %c2_281, %c0_282, %c0_283] : memref<4x1x11x11x4xbf16, #tpu.memory_space<vmem>>, vector<1x1x8x8x4xbf16>
    %245 = vector.shape_cast %244 : vector<1x1x8x8x4xbf16> to vector<8x8x4xbf16>
    %246 = vector.shape_cast %245 : vector<8x8x4xbf16> to vector<64x4xbf16>
    %c35 = arith.constant 35 : index
    %c0_284 = arith.constant 0 : index
    %c0_285 = arith.constant 0 : index
    %247 = vector.load %arg2[%c35, %c0_284, %c0_285] : memref<49x4x64xbf16, #tpu.memory_space<vmem>>, vector<1x4x64xbf16>
    %248 = vector.shape_cast %247 : vector<1x4x64xbf16> to vector<4x64xbf16>
    %cst_286 = arith.constant dense<0.000000e+00> : vector<64x64xf32>
    %249 = tpu.matmul %246, %248, %cst_286 {dimension_numbers = #tpu.dot_dimension_numbers<[1], [0], [0], [1], [0, 0, 1, 1], [], []>} : vector<64x4xbf16>, vector<4x64xbf16>, vector<64x64xf32> -> vector<64x64xf32>
    %250 = arith.addf %243, %249 : vector<64x64xf32>
    %c3_287 = arith.constant 3 : index
    %c0_288 = arith.constant 0 : index
    %c2_289 = arith.constant 2 : index
    %c0_290 = arith.constant 0 : index
    %c0_291 = arith.constant 0 : index
    %251 = vector.load %arg1[%c3_287, %c0_288, %c2_289, %c0_290, %c0_291] : memref<4x1x11x11x4xbf16, #tpu.memory_space<vmem>>, vector<1x1x8x8x4xbf16>
    %252 = vector.shape_cast %251 : vector<1x1x8x8x4xbf16> to vector<8x8x4xbf16>
    %253 = vector.shape_cast %252 : vector<8x8x4xbf16> to vector<64x4xbf16>
    %c36 = arith.constant 36 : index
    %c0_292 = arith.constant 0 : index
    %c0_293 = arith.constant 0 : index
    %254 = vector.load %arg2[%c36, %c0_292, %c0_293] : memref<49x4x64xbf16, #tpu.memory_space<vmem>>, vector<1x4x64xbf16>
    %255 = vector.shape_cast %254 : vector<1x4x64xbf16> to vector<4x64xbf16>
    %cst_294 = arith.constant dense<0.000000e+00> : vector<64x64xf32>
    %256 = tpu.matmul %253, %255, %cst_294 {dimension_numbers = #tpu.dot_dimension_numbers<[1], [0], [0], [1], [0, 0, 1, 1], [], []>} : vector<64x4xbf16>, vector<4x64xbf16>, vector<64x64xf32> -> vector<64x64xf32>
    %257 = arith.addf %250, %256 : vector<64x64xf32>
    %c2_295 = arith.constant 2 : index
    %c0_296 = arith.constant 0 : index
    %c2_297 = arith.constant 2 : index
    %c1_298 = arith.constant 1 : index
    %c0_299 = arith.constant 0 : index
    %258 = vector.load %arg1[%c2_295, %c0_296, %c2_297, %c1_298, %c0_299] : memref<4x1x11x11x4xbf16, #tpu.memory_space<vmem>>, vector<1x1x8x8x4xbf16>
    %259 = vector.shape_cast %258 : vector<1x1x8x8x4xbf16> to vector<8x8x4xbf16>
    %260 = vector.shape_cast %259 : vector<8x8x4xbf16> to vector<64x4xbf16>
    %c37 = arith.constant 37 : index
    %c0_300 = arith.constant 0 : index
    %c0_301 = arith.constant 0 : index
    %261 = vector.load %arg2[%c37, %c0_300, %c0_301] : memref<49x4x64xbf16, #tpu.memory_space<vmem>>, vector<1x4x64xbf16>
    %262 = vector.shape_cast %261 : vector<1x4x64xbf16> to vector<4x64xbf16>
    %cst_302 = arith.constant dense<0.000000e+00> : vector<64x64xf32>
    %263 = tpu.matmul %260, %262, %cst_302 {dimension_numbers = #tpu.dot_dimension_numbers<[1], [0], [0], [1], [0, 0, 1, 1], [], []>} : vector<64x4xbf16>, vector<4x64xbf16>, vector<64x64xf32> -> vector<64x64xf32>
    %264 = arith.addf %257, %263 : vector<64x64xf32>
    %c3_303 = arith.constant 3 : index
    %c0_304 = arith.constant 0 : index
    %c2_305 = arith.constant 2 : index
    %c1_306 = arith.constant 1 : index
    %c0_307 = arith.constant 0 : index
    %265 = vector.load %arg1[%c3_303, %c0_304, %c2_305, %c1_306, %c0_307] : memref<4x1x11x11x4xbf16, #tpu.memory_space<vmem>>, vector<1x1x8x8x4xbf16>
    %266 = vector.shape_cast %265 : vector<1x1x8x8x4xbf16> to vector<8x8x4xbf16>
    %267 = vector.shape_cast %266 : vector<8x8x4xbf16> to vector<64x4xbf16>
    %c38 = arith.constant 38 : index
    %c0_308 = arith.constant 0 : index
    %c0_309 = arith.constant 0 : index
    %268 = vector.load %arg2[%c38, %c0_308, %c0_309] : memref<49x4x64xbf16, #tpu.memory_space<vmem>>, vector<1x4x64xbf16>
    %269 = vector.shape_cast %268 : vector<1x4x64xbf16> to vector<4x64xbf16>
    %cst_310 = arith.constant dense<0.000000e+00> : vector<64x64xf32>
    %270 = tpu.matmul %267, %269, %cst_310 {dimension_numbers = #tpu.dot_dimension_numbers<[1], [0], [0], [1], [0, 0, 1, 1], [], []>} : vector<64x4xbf16>, vector<4x64xbf16>, vector<64x64xf32> -> vector<64x64xf32>
    %271 = arith.addf %264, %270 : vector<64x64xf32>
    %c2_311 = arith.constant 2 : index
    %c0_312 = arith.constant 0 : index
    %c2_313 = arith.constant 2 : index
    %c2_314 = arith.constant 2 : index
    %c0_315 = arith.constant 0 : index
    %272 = vector.load %arg1[%c2_311, %c0_312, %c2_313, %c2_314, %c0_315] : memref<4x1x11x11x4xbf16, #tpu.memory_space<vmem>>, vector<1x1x8x8x4xbf16>
    %273 = vector.shape_cast %272 : vector<1x1x8x8x4xbf16> to vector<8x8x4xbf16>
    %274 = vector.shape_cast %273 : vector<8x8x4xbf16> to vector<64x4xbf16>
    %c39 = arith.constant 39 : index
    %c0_316 = arith.constant 0 : index
    %c0_317 = arith.constant 0 : index
    %275 = vector.load %arg2[%c39, %c0_316, %c0_317] : memref<49x4x64xbf16, #tpu.memory_space<vmem>>, vector<1x4x64xbf16>
    %276 = vector.shape_cast %275 : vector<1x4x64xbf16> to vector<4x64xbf16>
    %cst_318 = arith.constant dense<0.000000e+00> : vector<64x64xf32>
    %277 = tpu.matmul %274, %276, %cst_318 {dimension_numbers = #tpu.dot_dimension_numbers<[1], [0], [0], [1], [0, 0, 1, 1], [], []>} : vector<64x4xbf16>, vector<4x64xbf16>, vector<64x64xf32> -> vector<64x64xf32>
    %278 = arith.addf %271, %277 : vector<64x64xf32>
    %c3_319 = arith.constant 3 : index
    %c0_320 = arith.constant 0 : index
    %c2_321 = arith.constant 2 : index
    %c2_322 = arith.constant 2 : index
    %c0_323 = arith.constant 0 : index
    %279 = vector.load %arg1[%c3_319, %c0_320, %c2_321, %c2_322, %c0_323] : memref<4x1x11x11x4xbf16, #tpu.memory_space<vmem>>, vector<1x1x8x8x4xbf16>
    %280 = vector.shape_cast %279 : vector<1x1x8x8x4xbf16> to vector<8x8x4xbf16>
    %281 = vector.shape_cast %280 : vector<8x8x4xbf16> to vector<64x4xbf16>
    %c40 = arith.constant 40 : index
    %c0_324 = arith.constant 0 : index
    %c0_325 = arith.constant 0 : index
    %282 = vector.load %arg2[%c40, %c0_324, %c0_325] : memref<49x4x64xbf16, #tpu.memory_space<vmem>>, vector<1x4x64xbf16>
    %283 = vector.shape_cast %282 : vector<1x4x64xbf16> to vector<4x64xbf16>
    %cst_326 = arith.constant dense<0.000000e+00> : vector<64x64xf32>
    %284 = tpu.matmul %281, %283, %cst_326 {dimension_numbers = #tpu.dot_dimension_numbers<[1], [0], [0], [1], [0, 0, 1, 1], [], []>} : vector<64x4xbf16>, vector<4x64xbf16>, vector<64x64xf32> -> vector<64x64xf32>
    %285 = arith.addf %278, %284 : vector<64x64xf32>
    %c2_327 = arith.constant 2 : index
    %c0_328 = arith.constant 0 : index
    %c2_329 = arith.constant 2 : index
    %c3_330 = arith.constant 3 : index
    %c0_331 = arith.constant 0 : index
    %286 = vector.load %arg1[%c2_327, %c0_328, %c2_329, %c3_330, %c0_331] : memref<4x1x11x11x4xbf16, #tpu.memory_space<vmem>>, vector<1x1x8x8x4xbf16>
    %287 = vector.shape_cast %286 : vector<1x1x8x8x4xbf16> to vector<8x8x4xbf16>
    %288 = vector.shape_cast %287 : vector<8x8x4xbf16> to vector<64x4xbf16>
    %c41 = arith.constant 41 : index
    %c0_332 = arith.constant 0 : index
    %c0_333 = arith.constant 0 : index
    %289 = vector.load %arg2[%c41, %c0_332, %c0_333] : memref<49x4x64xbf16, #tpu.memory_space<vmem>>, vector<1x4x64xbf16>
    %290 = vector.shape_cast %289 : vector<1x4x64xbf16> to vector<4x64xbf16>
    %cst_334 = arith.constant dense<0.000000e+00> : vector<64x64xf32>
    %291 = tpu.matmul %288, %290, %cst_334 {dimension_numbers = #tpu.dot_dimension_numbers<[1], [0], [0], [1], [0, 0, 1, 1], [], []>} : vector<64x4xbf16>, vector<4x64xbf16>, vector<64x64xf32> -> vector<64x64xf32>
    %292 = arith.addf %285, %291 : vector<64x64xf32>
    %c0_335 = arith.constant 0 : index
    %c0_336 = arith.constant 0 : index
    %c3_337 = arith.constant 3 : index
    %c0_338 = arith.constant 0 : index
    %c0_339 = arith.constant 0 : index
    %293 = vector.load %arg1[%c0_335, %c0_336, %c3_337, %c0_338, %c0_339] : memref<4x1x11x11x4xbf16, #tpu.memory_space<vmem>>, vector<1x1x8x8x4xbf16>
    %294 = vector.shape_cast %293 : vector<1x1x8x8x4xbf16> to vector<8x8x4xbf16>
    %295 = vector.shape_cast %294 : vector<8x8x4xbf16> to vector<64x4xbf16>
    %c42 = arith.constant 42 : index
    %c0_340 = arith.constant 0 : index
    %c0_341 = arith.constant 0 : index
    %296 = vector.load %arg2[%c42, %c0_340, %c0_341] : memref<49x4x64xbf16, #tpu.memory_space<vmem>>, vector<1x4x64xbf16>
    %297 = vector.shape_cast %296 : vector<1x4x64xbf16> to vector<4x64xbf16>
    %cst_342 = arith.constant dense<0.000000e+00> : vector<64x64xf32>
    %298 = tpu.matmul %295, %297, %cst_342 {dimension_numbers = #tpu.dot_dimension_numbers<[1], [0], [0], [1], [0, 0, 1, 1], [], []>} : vector<64x4xbf16>, vector<4x64xbf16>, vector<64x64xf32> -> vector<64x64xf32>
    %299 = arith.addf %292, %298 : vector<64x64xf32>
    %c1_343 = arith.constant 1 : index
    %c0_344 = arith.constant 0 : index
    %c3_345 = arith.constant 3 : index
    %c0_346 = arith.constant 0 : index
    %c0_347 = arith.constant 0 : index
    %300 = vector.load %arg1[%c1_343, %c0_344, %c3_345, %c0_346, %c0_347] : memref<4x1x11x11x4xbf16, #tpu.memory_space<vmem>>, vector<1x1x8x8x4xbf16>
    %301 = vector.shape_cast %300 : vector<1x1x8x8x4xbf16> to vector<8x8x4xbf16>
    %302 = vector.shape_cast %301 : vector<8x8x4xbf16> to vector<64x4xbf16>
    %c43 = arith.constant 43 : index
    %c0_348 = arith.constant 0 : index
    %c0_349 = arith.constant 0 : index
    %303 = vector.load %arg2[%c43, %c0_348, %c0_349] : memref<49x4x64xbf16, #tpu.memory_space<vmem>>, vector<1x4x64xbf16>
    %304 = vector.shape_cast %303 : vector<1x4x64xbf16> to vector<4x64xbf16>
    %cst_350 = arith.constant dense<0.000000e+00> : vector<64x64xf32>
    %305 = tpu.matmul %302, %304, %cst_350 {dimension_numbers = #tpu.dot_dimension_numbers<[1], [0], [0], [1], [0, 0, 1, 1], [], []>} : vector<64x4xbf16>, vector<4x64xbf16>, vector<64x64xf32> -> vector<64x64xf32>
    %306 = arith.addf %299, %305 : vector<64x64xf32>
    %c0_351 = arith.constant 0 : index
    %c0_352 = arith.constant 0 : index
    %c3_353 = arith.constant 3 : index
    %c1_354 = arith.constant 1 : index
    %c0_355 = arith.constant 0 : index
    %307 = vector.load %arg1[%c0_351, %c0_352, %c3_353, %c1_354, %c0_355] : memref<4x1x11x11x4xbf16, #tpu.memory_space<vmem>>, vector<1x1x8x8x4xbf16>
    %308 = vector.shape_cast %307 : vector<1x1x8x8x4xbf16> to vector<8x8x4xbf16>
    %309 = vector.shape_cast %308 : vector<8x8x4xbf16> to vector<64x4xbf16>
    %c44 = arith.constant 44 : index
    %c0_356 = arith.constant 0 : index
    %c0_357 = arith.constant 0 : index
    %310 = vector.load %arg2[%c44, %c0_356, %c0_357] : memref<49x4x64xbf16, #tpu.memory_space<vmem>>, vector<1x4x64xbf16>
    %311 = vector.shape_cast %310 : vector<1x4x64xbf16> to vector<4x64xbf16>
    %cst_358 = arith.constant dense<0.000000e+00> : vector<64x64xf32>
    %312 = tpu.matmul %309, %311, %cst_358 {dimension_numbers = #tpu.dot_dimension_numbers<[1], [0], [0], [1], [0, 0, 1, 1], [], []>} : vector<64x4xbf16>, vector<4x64xbf16>, vector<64x64xf32> -> vector<64x64xf32>
    %313 = arith.addf %306, %312 : vector<64x64xf32>
    %c1_359 = arith.constant 1 : index
    %c0_360 = arith.constant 0 : index
    %c3_361 = arith.constant 3 : index
    %c1_362 = arith.constant 1 : index
    %c0_363 = arith.constant 0 : index
    %314 = vector.load %arg1[%c1_359, %c0_360, %c3_361, %c1_362, %c0_363] : memref<4x1x11x11x4xbf16, #tpu.memory_space<vmem>>, vector<1x1x8x8x4xbf16>
    %315 = vector.shape_cast %314 : vector<1x1x8x8x4xbf16> to vector<8x8x4xbf16>
    %316 = vector.shape_cast %315 : vector<8x8x4xbf16> to vector<64x4xbf16>
    %c45 = arith.constant 45 : index
    %c0_364 = arith.constant 0 : index
    %c0_365 = arith.constant 0 : index
    %317 = vector.load %arg2[%c45, %c0_364, %c0_365] : memref<49x4x64xbf16, #tpu.memory_space<vmem>>, vector<1x4x64xbf16>
    %318 = vector.shape_cast %317 : vector<1x4x64xbf16> to vector<4x64xbf16>
    %cst_366 = arith.constant dense<0.000000e+00> : vector<64x64xf32>
    %319 = tpu.matmul %316, %318, %cst_366 {dimension_numbers = #tpu.dot_dimension_numbers<[1], [0], [0], [1], [0, 0, 1, 1], [], []>} : vector<64x4xbf16>, vector<4x64xbf16>, vector<64x64xf32> -> vector<64x64xf32>
    %320 = arith.addf %313, %319 : vector<64x64xf32>
    %c0_367 = arith.constant 0 : index
    %c0_368 = arith.constant 0 : index
    %c3_369 = arith.constant 3 : index
    %c2_370 = arith.constant 2 : index
    %c0_371 = arith.constant 0 : index
    %321 = vector.load %arg1[%c0_367, %c0_368, %c3_369, %c2_370, %c0_371] : memref<4x1x11x11x4xbf16, #tpu.memory_space<vmem>>, vector<1x1x8x8x4xbf16>
    %322 = vector.shape_cast %321 : vector<1x1x8x8x4xbf16> to vector<8x8x4xbf16>
    %323 = vector.shape_cast %322 : vector<8x8x4xbf16> to vector<64x4xbf16>
    %c46 = arith.constant 46 : index
    %c0_372 = arith.constant 0 : index
    %c0_373 = arith.constant 0 : index
    %324 = vector.load %arg2[%c46, %c0_372, %c0_373] : memref<49x4x64xbf16, #tpu.memory_space<vmem>>, vector<1x4x64xbf16>
    %325 = vector.shape_cast %324 : vector<1x4x64xbf16> to vector<4x64xbf16>
    %cst_374 = arith.constant dense<0.000000e+00> : vector<64x64xf32>
    %326 = tpu.matmul %323, %325, %cst_374 {dimension_numbers = #tpu.dot_dimension_numbers<[1], [0], [0], [1], [0, 0, 1, 1], [], []>} : vector<64x4xbf16>, vector<4x64xbf16>, vector<64x64xf32> -> vector<64x64xf32>
    %327 = arith.addf %320, %326 : vector<64x64xf32>
    %c1_375 = arith.constant 1 : index
    %c0_376 = arith.constant 0 : index
    %c3_377 = arith.constant 3 : index
    %c2_378 = arith.constant 2 : index
    %c0_379 = arith.constant 0 : index
    %328 = vector.load %arg1[%c1_375, %c0_376, %c3_377, %c2_378, %c0_379] : memref<4x1x11x11x4xbf16, #tpu.memory_space<vmem>>, vector<1x1x8x8x4xbf16>
    %329 = vector.shape_cast %328 : vector<1x1x8x8x4xbf16> to vector<8x8x4xbf16>
    %330 = vector.shape_cast %329 : vector<8x8x4xbf16> to vector<64x4xbf16>
    %c47 = arith.constant 47 : index
    %c0_380 = arith.constant 0 : index
    %c0_381 = arith.constant 0 : index
    %331 = vector.load %arg2[%c47, %c0_380, %c0_381] : memref<49x4x64xbf16, #tpu.memory_space<vmem>>, vector<1x4x64xbf16>
    %332 = vector.shape_cast %331 : vector<1x4x64xbf16> to vector<4x64xbf16>
    %cst_382 = arith.constant dense<0.000000e+00> : vector<64x64xf32>
    %333 = tpu.matmul %330, %332, %cst_382 {dimension_numbers = #tpu.dot_dimension_numbers<[1], [0], [0], [1], [0, 0, 1, 1], [], []>} : vector<64x4xbf16>, vector<4x64xbf16>, vector<64x64xf32> -> vector<64x64xf32>
    %334 = arith.addf %327, %333 : vector<64x64xf32>
    %c0_383 = arith.constant 0 : index
    %c0_384 = arith.constant 0 : index
    %c3_385 = arith.constant 3 : index
    %c3_386 = arith.constant 3 : index
    %c0_387 = arith.constant 0 : index
    %335 = vector.load %arg1[%c0_383, %c0_384, %c3_385, %c3_386, %c0_387] : memref<4x1x11x11x4xbf16, #tpu.memory_space<vmem>>, vector<1x1x8x8x4xbf16>
    %336 = vector.shape_cast %335 : vector<1x1x8x8x4xbf16> to vector<8x8x4xbf16>
    %337 = vector.shape_cast %336 : vector<8x8x4xbf16> to vector<64x4xbf16>
    %c48 = arith.constant 48 : index
    %c0_388 = arith.constant 0 : index
    %c0_389 = arith.constant 0 : index
    %338 = vector.load %arg2[%c48, %c0_388, %c0_389] : memref<49x4x64xbf16, #tpu.memory_space<vmem>>, vector<1x4x64xbf16>
    %339 = vector.shape_cast %338 : vector<1x4x64xbf16> to vector<4x64xbf16>
    %cst_390 = arith.constant dense<0.000000e+00> : vector<64x64xf32>
    %340 = tpu.matmul %337, %339, %cst_390 {dimension_numbers = #tpu.dot_dimension_numbers<[1], [0], [0], [1], [0, 0, 1, 1], [], []>} : vector<64x4xbf16>, vector<4x64xbf16>, vector<64x64xf32> -> vector<64x64xf32>
    %341 = arith.addf %334, %340 : vector<64x64xf32>
    %c0_391 = arith.constant 0 : index
    %c0_392 = arith.constant 0 : index
    %342 = vector.load %arg3[%c0_391, %c0_392] : memref<1x64xf32, #tpu.memory_space<vmem>>, vector<1x64xf32>
    %343 = vector.broadcast %342 : vector<1x64xf32> to vector<64x64xf32>
    %344 = arith.addf %341, %343 : vector<64x64xf32>
    %cst_393 = arith.constant 0.000000e+00 : f32
    %345 = vector.broadcast %cst_393 : f32 to vector<64x64xf32>
    %346 = arith.maximumf %344, %345 : vector<64x64xf32>
    %347 = vector.shape_cast %346 : vector<64x64xf32> to vector<8x8x64xf32>
    %348 = arith.truncf %347 : vector<8x8x64xf32> to vector<8x8x64xbf16>
    %c0_394 = arith.constant 0 : index
    %c0_395 = arith.constant 0 : index
    %c0_396 = arith.constant 0 : index
    %c0_397 = arith.constant 0 : index
    %349 = vector.load %arg4[%c0_394, %c0_395, %c0_396, %c0_397] : memref<1x8x8x64xbf16, #tpu.memory_space<vmem>>, vector<1x8x8x64xbf16>
    %350 = vector.shape_cast %349 : vector<1x8x8x64xbf16> to vector<8x8x64xbf16>
    %351 = vector.shape_cast %348 : vector<8x8x64xbf16> to vector<1x8x8x64xbf16>
    tpu.vector_store %arg4[%c0_394, %c0_395, %c0_396, %c0_397], %351 {strides = array<i32>} : memref<1x8x8x64xbf16, #tpu.memory_space<vmem>>, vector<1x8x8x64xbf16>,
    return
  }
  func.func @transform_0(%arg0: i32) -> (i32, i32, i32, i32, i32) {
    %c0_i32 = arith.constant 0 : i32
    %c0_i32_0 = arith.constant 0 : i32
    %c0_i32_1 = arith.constant 0 : i32
    %c0_i32_2 = arith.constant 0 : i32
    %c0_i32_3 = arith.constant 0 : i32
    return %c0_i32, %arg0, %c0_i32_0, %c0_i32_1, %c0_i32_2 : i32, i32, i32, i32, i32
  }
  func.func @transform_1(%arg0: i32) -> (i32, i32, i32) {
    %c0_i32 = arith.constant 0 : i32
    %c0_i32_0 = arith.constant 0 : i32
    %c0_i32_1 = arith.constant 0 : i32
    %c0_i32_2 = arith.constant 0 : i32
    return %c0_i32, %c0_i32_0, %c0_i32_1 : i32, i32, i32
  }
  func.func @transform_2(%arg0: i32) -> (i32, i32) {
    %c0_i32 = arith.constant 0 : i32
    %c0_i32_0 = arith.constant 0 : i32
    %c0_i32_1 = arith.constant 0 : i32
    return %c0_i32, %c0_i32_0 : i32, i32
  }
  func.func @transform_3(%arg0: i32) -> (i32, i32, i32, i32) {
    %c0_i32 = arith.constant 0 : i32
    %c0_i32_0 = arith.constant 0 : i32
    %c0_i32_1 = arith.constant 0 : i32
    %c0_i32_2 = arith.constant 0 : i32
    return %arg0, %c0_i32, %c0_i32_0, %c0_i32_1 : i32, i32, i32, i32
  }
}

module attributes {stable_mosaic.version = 11 : i64} {
  func.func @_maxpool_kernel(%arg0: i32, %arg1: memref<4x1x5x5x64xbf16, #tpu.memory_space<vmem>>, %arg2: memref<1x4x4x64xbf16, #tpu.memory_space<vmem>>) attributes {dimension_semantics = [#tpu.dimension_semantics<parallel>], iteration_bounds = array<i64: 2>, scalar_prefetch = 0 : i64, scratch_operands = 0 : i64, tpu.core_type = #tpu.core_type<tc>, window_params = [{transform_indices = @transform_0, window_bounds = array<i64: 4, 1, 5, 5, 64>}, {transform_indices = @transform_1, window_bounds = array<i64: 1, 4, 4, 64>}]} {
    %c0 = arith.constant 0 : index
    %c0_0 = arith.constant 0 : index
    %c0_1 = arith.constant 0 : index
    %c0_2 = arith.constant 0 : index
    %c0_3 = arith.constant 0 : index
    %0 = vector.load %arg1[%c0, %c0_0, %c0_1, %c0_2, %c0_3] : memref<4x1x5x5x64xbf16, #tpu.memory_space<vmem>>, vector<1x1x4x4x64xbf16>
    %1 = vector.shape_cast %0 : vector<1x1x4x4x64xbf16> to vector<4x4x64xbf16>
    %2 = arith.extf %1 : vector<4x4x64xbf16> to vector<4x4x64xf32>
    %c1 = arith.constant 1 : index
    %c0_4 = arith.constant 0 : index
    %c0_5 = arith.constant 0 : index
    %c0_6 = arith.constant 0 : index
    %c0_7 = arith.constant 0 : index
    %3 = vector.load %arg1[%c1, %c0_4, %c0_5, %c0_6, %c0_7] : memref<4x1x5x5x64xbf16, #tpu.memory_space<vmem>>, vector<1x1x4x4x64xbf16>
    %4 = vector.shape_cast %3 : vector<1x1x4x4x64xbf16> to vector<4x4x64xbf16>
    %5 = arith.extf %4 : vector<4x4x64xbf16> to vector<4x4x64xf32>
    %6 = arith.maximumf %2, %5 : vector<4x4x64xf32>
    %c0_8 = arith.constant 0 : index
    %c0_9 = arith.constant 0 : index
    %c0_10 = arith.constant 0 : index
    %c1_11 = arith.constant 1 : index
    %c0_12 = arith.constant 0 : index
    %7 = vector.load %arg1[%c0_8, %c0_9, %c0_10, %c1_11, %c0_12] : memref<4x1x5x5x64xbf16, #tpu.memory_space<vmem>>, vector<1x1x4x4x64xbf16>
    %8 = vector.shape_cast %7 : vector<1x1x4x4x64xbf16> to vector<4x4x64xbf16>
    %9 = arith.extf %8 : vector<4x4x64xbf16> to vector<4x4x64xf32>
    %10 = arith.maximumf %6, %9 : vector<4x4x64xf32>
    %c2 = arith.constant 2 : index
    %c0_13 = arith.constant 0 : index
    %c0_14 = arith.constant 0 : index
    %c0_15 = arith.constant 0 : index
    %c0_16 = arith.constant 0 : index
    %11 = vector.load %arg1[%c2, %c0_13, %c0_14, %c0_15, %c0_16] : memref<4x1x5x5x64xbf16, #tpu.memory_space<vmem>>, vector<1x1x4x4x64xbf16>
    %12 = vector.shape_cast %11 : vector<1x1x4x4x64xbf16> to vector<4x4x64xbf16>
    %13 = arith.extf %12 : vector<4x4x64xbf16> to vector<4x4x64xf32>
    %14 = arith.maximumf %10, %13 : vector<4x4x64xf32>
    %c3 = arith.constant 3 : index
    %c0_17 = arith.constant 0 : index
    %c0_18 = arith.constant 0 : index
    %c0_19 = arith.constant 0 : index
    %c0_20 = arith.constant 0 : index
    %15 = vector.load %arg1[%c3, %c0_17, %c0_18, %c0_19, %c0_20] : memref<4x1x5x5x64xbf16, #tpu.memory_space<vmem>>, vector<1x1x4x4x64xbf16>
    %16 = vector.shape_cast %15 : vector<1x1x4x4x64xbf16> to vector<4x4x64xbf16>
    %17 = arith.extf %16 : vector<4x4x64xbf16> to vector<4x4x64xf32>
    %18 = arith.maximumf %14, %17 : vector<4x4x64xf32>
    %c2_21 = arith.constant 2 : index
    %c0_22 = arith.constant 0 : index
    %c0_23 = arith.constant 0 : index
    %c1_24 = arith.constant 1 : index
    %c0_25 = arith.constant 0 : index
    %19 = vector.load %arg1[%c2_21, %c0_22, %c0_23, %c1_24, %c0_25] : memref<4x1x5x5x64xbf16, #tpu.memory_space<vmem>>, vector<1x1x4x4x64xbf16>
    %20 = vector.shape_cast %19 : vector<1x1x4x4x64xbf16> to vector<4x4x64xbf16>
    %21 = arith.extf %20 : vector<4x4x64xbf16> to vector<4x4x64xf32>
    %22 = arith.maximumf %18, %21 : vector<4x4x64xf32>
    %c0_26 = arith.constant 0 : index
    %c0_27 = arith.constant 0 : index
    %c1_28 = arith.constant 1 : index
    %c0_29 = arith.constant 0 : index
    %c0_30 = arith.constant 0 : index
    %23 = vector.load %arg1[%c0_26, %c0_27, %c1_28, %c0_29, %c0_30] : memref<4x1x5x5x64xbf16, #tpu.memory_space<vmem>>, vector<1x1x4x4x64xbf16>
    %24 = vector.shape_cast %23 : vector<1x1x4x4x64xbf16> to vector<4x4x64xbf16>
    %25 = arith.extf %24 : vector<4x4x64xbf16> to vector<4x4x64xf32>
    %26 = arith.maximumf %22, %25 : vector<4x4x64xf32>
    %c1_31 = arith.constant 1 : index
    %c0_32 = arith.constant 0 : index
    %c1_33 = arith.constant 1 : index
    %c0_34 = arith.constant 0 : index
    %c0_35 = arith.constant 0 : index
    %27 = vector.load %arg1[%c1_31, %c0_32, %c1_33, %c0_34, %c0_35] : memref<4x1x5x5x64xbf16, #tpu.memory_space<vmem>>, vector<1x1x4x4x64xbf16>
    %28 = vector.shape_cast %27 : vector<1x1x4x4x64xbf16> to vector<4x4x64xbf16>
    %29 = arith.extf %28 : vector<4x4x64xbf16> to vector<4x4x64xf32>
    %30 = arith.maximumf %26, %29 : vector<4x4x64xf32>
    %c0_36 = arith.constant 0 : index
    %c0_37 = arith.constant 0 : index
    %c1_38 = arith.constant 1 : index
    %c1_39 = arith.constant 1 : index
    %c0_40 = arith.constant 0 : index
    %31 = vector.load %arg1[%c0_36, %c0_37, %c1_38, %c1_39, %c0_40] : memref<4x1x5x5x64xbf16, #tpu.memory_space<vmem>>, vector<1x1x4x4x64xbf16>
    %32 = vector.shape_cast %31 : vector<1x1x4x4x64xbf16> to vector<4x4x64xbf16>
    %33 = arith.extf %32 : vector<4x4x64xbf16> to vector<4x4x64xf32>
    %34 = arith.maximumf %30, %33 : vector<4x4x64xf32>
    %35 = arith.truncf %34 : vector<4x4x64xf32> to vector<4x4x64xbf16>
    %c0_41 = arith.constant 0 : index
    %c0_42 = arith.constant 0 : index
    %c0_43 = arith.constant 0 : index
    %c0_44 = arith.constant 0 : index
    %36 = vector.load %arg2[%c0_41, %c0_42, %c0_43, %c0_44] : memref<1x4x4x64xbf16, #tpu.memory_space<vmem>>, vector<1x4x4x64xbf16>
    %37 = vector.shape_cast %36 : vector<1x4x4x64xbf16> to vector<4x4x64xbf16>
    %38 = vector.shape_cast %35 : vector<4x4x64xbf16> to vector<1x4x4x64xbf16>
    tpu.vector_store %arg2[%c0_41, %c0_42, %c0_43, %c0_44], %38 {strides = array<i32>} : memref<1x4x4x64xbf16, #tpu.memory_space<vmem>>, vector<1x4x4x64xbf16>,
    return
  }
  func.func @transform_0(%arg0: i32) -> (i32, i32, i32, i32, i32) {
    %c0_i32 = arith.constant 0 : i32
    %c0_i32_0 = arith.constant 0 : i32
    %c0_i32_1 = arith.constant 0 : i32
    %c0_i32_2 = arith.constant 0 : i32
    %c0_i32_3 = arith.constant 0 : i32
    return %c0_i32, %arg0, %c0_i32_0, %c0_i32_1, %c0_i32_2 : i32, i32, i32, i32, i32
  }
  func.func @transform_1(%arg0: i32) -> (i32, i32, i32, i32) {
    %c0_i32 = arith.constant 0 : i32
    %c0_i32_0 = arith.constant 0 : i32
    %c0_i32_1 = arith.constant 0 : i32
    %c0_i32_2 = arith.constant 0 : i32
    return %arg0, %c0_i32, %c0_i32_0, %c0_i32_1 : i32, i32, i32, i32
  }
}

module attributes {stable_mosaic.version = 11 : i64} {
  func.func @_conv_bn_fused_kernel(%arg0: i32, %arg1: memref<1x1x6x6x64xbf16, #tpu.memory_space<vmem>>, %arg2: memref<9x64x64xbf16, #tpu.memory_space<vmem>>, %arg3: memref<1x64xf32, #tpu.memory_space<vmem>>, %arg4: memref<1x4x4x64xbf16, #tpu.memory_space<vmem>>, %arg5: memref<1x4x4x64xbf16, #tpu.memory_space<vmem>>) attributes {dimension_semantics = [#tpu.dimension_semantics<parallel>], iteration_bounds = array<i64: 2>, scalar_prefetch = 0 : i64, scratch_operands = 0 : i64, tpu.core_type = #tpu.core_type<tc>, window_params = [{transform_indices = @transform_0, window_bounds = array<i64: 1, 1, 6, 6, 64>}, {pipeline_mode = #tpu.pipeline_mode<synchronous>, transform_indices = @transform_1, window_bounds = array<i64: 9, 64, 64>}, {pipeline_mode = #tpu.pipeline_mode<synchronous>, transform_indices = @transform_2, window_bounds = array<i64: 1, 64>}, {transform_indices = @transform_3, window_bounds = array<i64: 1, 4, 4, 64>}, {transform_indices = @transform_4, window_bounds = array<i64: 1, 4, 4, 64>}]} {
    %c0 = arith.constant 0 : index
    %c0_0 = arith.constant 0 : index
    %c0_1 = arith.constant 0 : index
    %c0_2 = arith.constant 0 : index
    %c0_3 = arith.constant 0 : index
    %0 = vector.load %arg1[%c0, %c0_0, %c0_1, %c0_2, %c0_3] : memref<1x1x6x6x64xbf16, #tpu.memory_space<vmem>>, vector<1x1x4x4x64xbf16>
    %1 = vector.shape_cast %0 : vector<1x1x4x4x64xbf16> to vector<4x4x64xbf16>
    %2 = vector.shape_cast %1 : vector<4x4x64xbf16> to vector<16x64xbf16>
    %c0_4 = arith.constant 0 : index
    %c0_5 = arith.constant 0 : index
    %c0_6 = arith.constant 0 : index
    %3 = vector.load %arg2[%c0_4, %c0_5, %c0_6] : memref<9x64x64xbf16, #tpu.memory_space<vmem>>, vector<1x64x64xbf16>
    %4 = vector.shape_cast %3 : vector<1x64x64xbf16> to vector<64x64xbf16>
    %cst = arith.constant dense<0.000000e+00> : vector<16x64xf32>
    %5 = tpu.matmul %2, %4, %cst {dimension_numbers = #tpu.dot_dimension_numbers<[1], [0], [0], [1], [0, 0, 1, 1], [], []>} : vector<16x64xbf16>, vector<64x64xbf16>, vector<16x64xf32> -> vector<16x64xf32>
    %c0_7 = arith.constant 0 : index
    %c0_8 = arith.constant 0 : index
    %c0_9 = arith.constant 0 : index
    %c1 = arith.constant 1 : index
    %c0_10 = arith.constant 0 : index
    %6 = vector.load %arg1[%c0_7, %c0_8, %c0_9, %c1, %c0_10] : memref<1x1x6x6x64xbf16, #tpu.memory_space<vmem>>, vector<1x1x4x4x64xbf16>
    %7 = vector.shape_cast %6 : vector<1x1x4x4x64xbf16> to vector<4x4x64xbf16>
    %8 = vector.shape_cast %7 : vector<4x4x64xbf16> to vector<16x64xbf16>
    %c1_11 = arith.constant 1 : index
    %c0_12 = arith.constant 0 : index
    %c0_13 = arith.constant 0 : index
    %9 = vector.load %arg2[%c1_11, %c0_12, %c0_13] : memref<9x64x64xbf16, #tpu.memory_space<vmem>>, vector<1x64x64xbf16>
    %10 = vector.shape_cast %9 : vector<1x64x64xbf16> to vector<64x64xbf16>
    %cst_14 = arith.constant dense<0.000000e+00> : vector<16x64xf32>
    %11 = tpu.matmul %8, %10, %cst_14 {dimension_numbers = #tpu.dot_dimension_numbers<[1], [0], [0], [1], [0, 0, 1, 1], [], []>} : vector<16x64xbf16>, vector<64x64xbf16>, vector<16x64xf32> -> vector<16x64xf32>
    %12 = arith.addf %5, %11 : vector<16x64xf32>
    %c0_15 = arith.constant 0 : index
    %c0_16 = arith.constant 0 : index
    %c0_17 = arith.constant 0 : index
    %c2 = arith.constant 2 : index
    %c0_18 = arith.constant 0 : index
    %13 = vector.load %arg1[%c0_15, %c0_16, %c0_17, %c2, %c0_18] : memref<1x1x6x6x64xbf16, #tpu.memory_space<vmem>>, vector<1x1x4x4x64xbf16>
    %14 = vector.shape_cast %13 : vector<1x1x4x4x64xbf16> to vector<4x4x64xbf16>
    %15 = vector.shape_cast %14 : vector<4x4x64xbf16> to vector<16x64xbf16>
    %c2_19 = arith.constant 2 : index
    %c0_20 = arith.constant 0 : index
    %c0_21 = arith.constant 0 : index
    %16 = vector.load %arg2[%c2_19, %c0_20, %c0_21] : memref<9x64x64xbf16, #tpu.memory_space<vmem>>, vector<1x64x64xbf16>
    %17 = vector.shape_cast %16 : vector<1x64x64xbf16> to vector<64x64xbf16>
    %cst_22 = arith.constant dense<0.000000e+00> : vector<16x64xf32>
    %18 = tpu.matmul %15, %17, %cst_22 {dimension_numbers = #tpu.dot_dimension_numbers<[1], [0], [0], [1], [0, 0, 1, 1], [], []>} : vector<16x64xbf16>, vector<64x64xbf16>, vector<16x64xf32> -> vector<16x64xf32>
    %19 = arith.addf %12, %18 : vector<16x64xf32>
    %c0_23 = arith.constant 0 : index
    %c0_24 = arith.constant 0 : index
    %c1_25 = arith.constant 1 : index
    %c0_26 = arith.constant 0 : index
    %c0_27 = arith.constant 0 : index
    %20 = vector.load %arg1[%c0_23, %c0_24, %c1_25, %c0_26, %c0_27] : memref<1x1x6x6x64xbf16, #tpu.memory_space<vmem>>, vector<1x1x4x4x64xbf16>
    %21 = vector.shape_cast %20 : vector<1x1x4x4x64xbf16> to vector<4x4x64xbf16>
    %22 = vector.shape_cast %21 : vector<4x4x64xbf16> to vector<16x64xbf16>
    %c3 = arith.constant 3 : index
    %c0_28 = arith.constant 0 : index
    %c0_29 = arith.constant 0 : index
    %23 = vector.load %arg2[%c3, %c0_28, %c0_29] : memref<9x64x64xbf16, #tpu.memory_space<vmem>>, vector<1x64x64xbf16>
    %24 = vector.shape_cast %23 : vector<1x64x64xbf16> to vector<64x64xbf16>
    %cst_30 = arith.constant dense<0.000000e+00> : vector<16x64xf32>
    %25 = tpu.matmul %22, %24, %cst_30 {dimension_numbers = #tpu.dot_dimension_numbers<[1], [0], [0], [1], [0, 0, 1, 1], [], []>} : vector<16x64xbf16>, vector<64x64xbf16>, vector<16x64xf32> -> vector<16x64xf32>
    %26 = arith.addf %19, %25 : vector<16x64xf32>
    %c0_31 = arith.constant 0 : index
    %c0_32 = arith.constant 0 : index
    %c1_33 = arith.constant 1 : index
    %c1_34 = arith.constant 1 : index
    %c0_35 = arith.constant 0 : index
    %27 = vector.load %arg1[%c0_31, %c0_32, %c1_33, %c1_34, %c0_35] : memref<1x1x6x6x64xbf16, #tpu.memory_space<vmem>>, vector<1x1x4x4x64xbf16>
    %28 = vector.shape_cast %27 : vector<1x1x4x4x64xbf16> to vector<4x4x64xbf16>
    %29 = vector.shape_cast %28 : vector<4x4x64xbf16> to vector<16x64xbf16>
    %c4 = arith.constant 4 : index
    %c0_36 = arith.constant 0 : index
    %c0_37 = arith.constant 0 : index
    %30 = vector.load %arg2[%c4, %c0_36, %c0_37] : memref<9x64x64xbf16, #tpu.memory_space<vmem>>, vector<1x64x64xbf16>
    %31 = vector.shape_cast %30 : vector<1x64x64xbf16> to vector<64x64xbf16>
    %cst_38 = arith.constant dense<0.000000e+00> : vector<16x64xf32>
    %32 = tpu.matmul %29, %31, %cst_38 {dimension_numbers = #tpu.dot_dimension_numbers<[1], [0], [0], [1], [0, 0, 1, 1], [], []>} : vector<16x64xbf16>, vector<64x64xbf16>, vector<16x64xf32> -> vector<16x64xf32>
    %33 = arith.addf %26, %32 : vector<16x64xf32>
    %c0_39 = arith.constant 0 : index
    %c0_40 = arith.constant 0 : index
    %c1_41 = arith.constant 1 : index
    %c2_42 = arith.constant 2 : index
    %c0_43 = arith.constant 0 : index
    %34 = vector.load %arg1[%c0_39, %c0_40, %c1_41, %c2_42, %c0_43] : memref<1x1x6x6x64xbf16, #tpu.memory_space<vmem>>, vector<1x1x4x4x64xbf16>
    %35 = vector.shape_cast %34 : vector<1x1x4x4x64xbf16> to vector<4x4x64xbf16>
    %36 = vector.shape_cast %35 : vector<4x4x64xbf16> to vector<16x64xbf16>
    %c5 = arith.constant 5 : index
    %c0_44 = arith.constant 0 : index
    %c0_45 = arith.constant 0 : index
    %37 = vector.load %arg2[%c5, %c0_44, %c0_45] : memref<9x64x64xbf16, #tpu.memory_space<vmem>>, vector<1x64x64xbf16>
    %38 = vector.shape_cast %37 : vector<1x64x64xbf16> to vector<64x64xbf16>
    %cst_46 = arith.constant dense<0.000000e+00> : vector<16x64xf32>
    %39 = tpu.matmul %36, %38, %cst_46 {dimension_numbers = #tpu.dot_dimension_numbers<[1], [0], [0], [1], [0, 0, 1, 1], [], []>} : vector<16x64xbf16>, vector<64x64xbf16>, vector<16x64xf32> -> vector<16x64xf32>
    %40 = arith.addf %33, %39 : vector<16x64xf32>
    %c0_47 = arith.constant 0 : index
    %c0_48 = arith.constant 0 : index
    %c2_49 = arith.constant 2 : index
    %c0_50 = arith.constant 0 : index
    %c0_51 = arith.constant 0 : index
    %41 = vector.load %arg1[%c0_47, %c0_48, %c2_49, %c0_50, %c0_51] : memref<1x1x6x6x64xbf16, #tpu.memory_space<vmem>>, vector<1x1x4x4x64xbf16>
    %42 = vector.shape_cast %41 : vector<1x1x4x4x64xbf16> to vector<4x4x64xbf16>
    %43 = vector.shape_cast %42 : vector<4x4x64xbf16> to vector<16x64xbf16>
    %c6 = arith.constant 6 : index
    %c0_52 = arith.constant 0 : index
    %c0_53 = arith.constant 0 : index
    %44 = vector.load %arg2[%c6, %c0_52, %c0_53] : memref<9x64x64xbf16, #tpu.memory_space<vmem>>, vector<1x64x64xbf16>
    %45 = vector.shape_cast %44 : vector<1x64x64xbf16> to vector<64x64xbf16>
    %cst_54 = arith.constant dense<0.000000e+00> : vector<16x64xf32>
    %46 = tpu.matmul %43, %45, %cst_54 {dimension_numbers = #tpu.dot_dimension_numbers<[1], [0], [0], [1], [0, 0, 1, 1], [], []>} : vector<16x64xbf16>, vector<64x64xbf16>, vector<16x64xf32> -> vector<16x64xf32>
    %47 = arith.addf %40, %46 : vector<16x64xf32>
    %c0_55 = arith.constant 0 : index
    %c0_56 = arith.constant 0 : index
    %c2_57 = arith.constant 2 : index
    %c1_58 = arith.constant 1 : index
    %c0_59 = arith.constant 0 : index
    %48 = vector.load %arg1[%c0_55, %c0_56, %c2_57, %c1_58, %c0_59] : memref<1x1x6x6x64xbf16, #tpu.memory_space<vmem>>, vector<1x1x4x4x64xbf16>
    %49 = vector.shape_cast %48 : vector<1x1x4x4x64xbf16> to vector<4x4x64xbf16>
    %50 = vector.shape_cast %49 : vector<4x4x64xbf16> to vector<16x64xbf16>
    %c7 = arith.constant 7 : index
    %c0_60 = arith.constant 0 : index
    %c0_61 = arith.constant 0 : index
    %51 = vector.load %arg2[%c7, %c0_60, %c0_61] : memref<9x64x64xbf16, #tpu.memory_space<vmem>>, vector<1x64x64xbf16>
    %52 = vector.shape_cast %51 : vector<1x64x64xbf16> to vector<64x64xbf16>
    %cst_62 = arith.constant dense<0.000000e+00> : vector<16x64xf32>
    %53 = tpu.matmul %50, %52, %cst_62 {dimension_numbers = #tpu.dot_dimension_numbers<[1], [0], [0], [1], [0, 0, 1, 1], [], []>} : vector<16x64xbf16>, vector<64x64xbf16>, vector<16x64xf32> -> vector<16x64xf32>
    %54 = arith.addf %47, %53 : vector<16x64xf32>
    %c0_63 = arith.constant 0 : index
    %c0_64 = arith.constant 0 : index
    %c2_65 = arith.constant 2 : index
    %c2_66 = arith.constant 2 : index
    %c0_67 = arith.constant 0 : index
    %55 = vector.load %arg1[%c0_63, %c0_64, %c2_65, %c2_66, %c0_67] : memref<1x1x6x6x64xbf16, #tpu.memory_space<vmem>>, vector<1x1x4x4x64xbf16>
    %56 = vector.shape_cast %55 : vector<1x1x4x4x64xbf16> to vector<4x4x64xbf16>
    %57 = vector.shape_cast %56 : vector<4x4x64xbf16> to vector<16x64xbf16>
    %c8 = arith.constant 8 : index
    %c0_68 = arith.constant 0 : index
    %c0_69 = arith.constant 0 : index
    %58 = vector.load %arg2[%c8, %c0_68, %c0_69] : memref<9x64x64xbf16, #tpu.memory_space<vmem>>, vector<1x64x64xbf16>
    %59 = vector.shape_cast %58 : vector<1x64x64xbf16> to vector<64x64xbf16>
    %cst_70 = arith.constant dense<0.000000e+00> : vector<16x64xf32>
    %60 = tpu.matmul %57, %59, %cst_70 {dimension_numbers = #tpu.dot_dimension_numbers<[1], [0], [0], [1], [0, 0, 1, 1], [], []>} : vector<16x64xbf16>, vector<64x64xbf16>, vector<16x64xf32> -> vector<16x64xf32>
    %61 = arith.addf %54, %60 : vector<16x64xf32>
    %c0_71 = arith.constant 0 : index
    %c0_72 = arith.constant 0 : index
    %62 = vector.load %arg3[%c0_71, %c0_72] : memref<1x64xf32, #tpu.memory_space<vmem>>, vector<1x64xf32>
    %63 = vector.broadcast %62 : vector<1x64xf32> to vector<16x64xf32>
    %64 = arith.addf %61, %63 : vector<16x64xf32>
    %c0_73 = arith.constant 0 : index
    %c0_74 = arith.constant 0 : index
    %c0_75 = arith.constant 0 : index
    %c0_76 = arith.constant 0 : index
    %65 = vector.load %arg4[%c0_73, %c0_74, %c0_75, %c0_76] : memref<1x4x4x64xbf16, #tpu.memory_space<vmem>>, vector<1x4x4x64xbf16>
    %66 = vector.shape_cast %65 : vector<1x4x4x64xbf16> to vector<4x4x64xbf16>
    %67 = vector.shape_cast %66 : vector<4x4x64xbf16> to vector<16x64xbf16>
    %68 = arith.extf %67 : vector<16x64xbf16> to vector<16x64xf32>
    %69 = arith.addf %64, %68 : vector<16x64xf32>
    %cst_77 = arith.constant 0.000000e+00 : f32
    %70 = vector.broadcast %cst_77 : f32 to vector<16x64xf32>
    %71 = arith.maximumf %69, %70 : vector<16x64xf32>
    %72 = vector.shape_cast %71 : vector<16x64xf32> to vector<4x4x64xf32>
    %73 = arith.truncf %72 : vector<4x4x64xf32> to vector<4x4x64xbf16>
    %c0_78 = arith.constant 0 : index
    %c0_79 = arith.constant 0 : index
    %c0_80 = arith.constant 0 : index
    %c0_81 = arith.constant 0 : index
    %74 = vector.load %arg5[%c0_78, %c0_79, %c0_80, %c0_81] : memref<1x4x4x64xbf16, #tpu.memory_space<vmem>>, vector<1x4x4x64xbf16>
    %75 = vector.shape_cast %74 : vector<1x4x4x64xbf16> to vector<4x4x64xbf16>
    %76 = vector.shape_cast %73 : vector<4x4x64xbf16> to vector<1x4x4x64xbf16>
    tpu.vector_store %arg5[%c0_78, %c0_79, %c0_80, %c0_81], %76 {strides = array<i32>} : memref<1x4x4x64xbf16, #tpu.memory_space<vmem>>, vector<1x4x4x64xbf16>,
    return
  }
  func.func @transform_0(%arg0: i32) -> (i32, i32, i32, i32, i32) {
    %c0_i32 = arith.constant 0 : i32
    %c0_i32_0 = arith.constant 0 : i32
    %c0_i32_1 = arith.constant 0 : i32
    %c0_i32_2 = arith.constant 0 : i32
    %c0_i32_3 = arith.constant 0 : i32
    return %c0_i32, %arg0, %c0_i32_0, %c0_i32_1, %c0_i32_2 : i32, i32, i32, i32, i32
  }
  func.func @transform_1(%arg0: i32) -> (i32, i32, i32) {
    %c0_i32 = arith.constant 0 : i32
    %c0_i32_0 = arith.constant 0 : i32
    %c0_i32_1 = arith.constant 0 : i32
    %c0_i32_2 = arith.constant 0 : i32
    return %c0_i32, %c0_i32_0, %c0_i32_1 : i32, i32, i32
  }
  func.func @transform_2(%arg0: i32) -> (i32, i32) {
    %c0_i32 = arith.constant 0 : i32
    %c0_i32_0 = arith.constant 0 : i32
    %c0_i32_1 = arith.constant 0 : i32
    return %c0_i32, %c0_i32_0 : i32, i32
  }
  func.func @transform_3(%arg0: i32) -> (i32, i32, i32, i32) {
    %c0_i32 = arith.constant 0 : i32
    %c0_i32_0 = arith.constant 0 : i32
    %c0_i32_1 = arith.constant 0 : i32
    %c0_i32_2 = arith.constant 0 : i32
    return %arg0, %c0_i32, %c0_i32_0, %c0_i32_1 : i32, i32, i32, i32
  }
  func.func @transform_4(%arg0: i32) -> (i32, i32, i32, i32) {
    %c0_i32 = arith.constant 0 : i32
    %c0_i32_0 = arith.constant 0 : i32
    %c0_i32_1 = arith.constant 0 : i32
    %c0_i32_2 = arith.constant 0 : i32
    return %arg0, %c0_i32, %c0_i32_0, %c0_i32_1 : i32, i32, i32, i32
  }
}

module attributes {stable_mosaic.version = 11 : i64} {
  func.func @_conv_bn_fused_kernel(%arg0: i32, %arg1: memref<1x1x6x6x64xbf16, #tpu.memory_space<vmem>>, %arg2: memref<9x64x64xbf16, #tpu.memory_space<vmem>>, %arg3: memref<1x64xf32, #tpu.memory_space<vmem>>, %arg4: memref<1x4x4x64xbf16, #tpu.memory_space<vmem>>) attributes {dimension_semantics = [#tpu.dimension_semantics<parallel>], iteration_bounds = array<i64: 2>, scalar_prefetch = 0 : i64, scratch_operands = 0 : i64, tpu.core_type = #tpu.core_type<tc>, window_params = [{transform_indices = @transform_0, window_bounds = array<i64: 1, 1, 6, 6, 64>}, {pipeline_mode = #tpu.pipeline_mode<synchronous>, transform_indices = @transform_1, window_bounds = array<i64: 9, 64, 64>}, {pipeline_mode = #tpu.pipeline_mode<synchronous>, transform_indices = @transform_2, window_bounds = array<i64: 1, 64>}, {transform_indices = @transform_3, window_bounds = array<i64: 1, 4, 4, 64>}]} {
    %c0 = arith.constant 0 : index
    %c0_0 = arith.constant 0 : index
    %c0_1 = arith.constant 0 : index
    %c0_2 = arith.constant 0 : index
    %c0_3 = arith.constant 0 : index
    %0 = vector.load %arg1[%c0, %c0_0, %c0_1, %c0_2, %c0_3] : memref<1x1x6x6x64xbf16, #tpu.memory_space<vmem>>, vector<1x1x4x4x64xbf16>
    %1 = vector.shape_cast %0 : vector<1x1x4x4x64xbf16> to vector<4x4x64xbf16>
    %2 = vector.shape_cast %1 : vector<4x4x64xbf16> to vector<16x64xbf16>
    %c0_4 = arith.constant 0 : index
    %c0_5 = arith.constant 0 : index
    %c0_6 = arith.constant 0 : index
    %3 = vector.load %arg2[%c0_4, %c0_5, %c0_6] : memref<9x64x64xbf16, #tpu.memory_space<vmem>>, vector<1x64x64xbf16>
    %4 = vector.shape_cast %3 : vector<1x64x64xbf16> to vector<64x64xbf16>
    %cst = arith.constant dense<0.000000e+00> : vector<16x64xf32>
    %5 = tpu.matmul %2, %4, %cst {dimension_numbers = #tpu.dot_dimension_numbers<[1], [0], [0], [1], [0, 0, 1, 1], [], []>} : vector<16x64xbf16>, vector<64x64xbf16>, vector<16x64xf32> -> vector<16x64xf32>
    %c0_7 = arith.constant 0 : index
    %c0_8 = arith.constant 0 : index
    %c0_9 = arith.constant 0 : index
    %c1 = arith.constant 1 : index
    %c0_10 = arith.constant 0 : index
    %6 = vector.load %arg1[%c0_7, %c0_8, %c0_9, %c1, %c0_10] : memref<1x1x6x6x64xbf16, #tpu.memory_space<vmem>>, vector<1x1x4x4x64xbf16>
    %7 = vector.shape_cast %6 : vector<1x1x4x4x64xbf16> to vector<4x4x64xbf16>
    %8 = vector.shape_cast %7 : vector<4x4x64xbf16> to vector<16x64xbf16>
    %c1_11 = arith.constant 1 : index
    %c0_12 = arith.constant 0 : index
    %c0_13 = arith.constant 0 : index
    %9 = vector.load %arg2[%c1_11, %c0_12, %c0_13] : memref<9x64x64xbf16, #tpu.memory_space<vmem>>, vector<1x64x64xbf16>
    %10 = vector.shape_cast %9 : vector<1x64x64xbf16> to vector<64x64xbf16>
    %cst_14 = arith.constant dense<0.000000e+00> : vector<16x64xf32>
    %11 = tpu.matmul %8, %10, %cst_14 {dimension_numbers = #tpu.dot_dimension_numbers<[1], [0], [0], [1], [0, 0, 1, 1], [], []>} : vector<16x64xbf16>, vector<64x64xbf16>, vector<16x64xf32> -> vector<16x64xf32>
    %12 = arith.addf %5, %11 : vector<16x64xf32>
    %c0_15 = arith.constant 0 : index
    %c0_16 = arith.constant 0 : index
    %c0_17 = arith.constant 0 : index
    %c2 = arith.constant 2 : index
    %c0_18 = arith.constant 0 : index
    %13 = vector.load %arg1[%c0_15, %c0_16, %c0_17, %c2, %c0_18] : memref<1x1x6x6x64xbf16, #tpu.memory_space<vmem>>, vector<1x1x4x4x64xbf16>
    %14 = vector.shape_cast %13 : vector<1x1x4x4x64xbf16> to vector<4x4x64xbf16>
    %15 = vector.shape_cast %14 : vector<4x4x64xbf16> to vector<16x64xbf16>
    %c2_19 = arith.constant 2 : index
    %c0_20 = arith.constant 0 : index
    %c0_21 = arith.constant 0 : index
    %16 = vector.load %arg2[%c2_19, %c0_20, %c0_21] : memref<9x64x64xbf16, #tpu.memory_space<vmem>>, vector<1x64x64xbf16>
    %17 = vector.shape_cast %16 : vector<1x64x64xbf16> to vector<64x64xbf16>
    %cst_22 = arith.constant dense<0.000000e+00> : vector<16x64xf32>
    %18 = tpu.matmul %15, %17, %cst_22 {dimension_numbers = #tpu.dot_dimension_numbers<[1], [0], [0], [1], [0, 0, 1, 1], [], []>} : vector<16x64xbf16>, vector<64x64xbf16>, vector<16x64xf32> -> vector<16x64xf32>
    %19 = arith.addf %12, %18 : vector<16x64xf32>
    %c0_23 = arith.constant 0 : index
    %c0_24 = arith.constant 0 : index
    %c1_25 = arith.constant 1 : index
    %c0_26 = arith.constant 0 : index
    %c0_27 = arith.constant 0 : index
    %20 = vector.load %arg1[%c0_23, %c0_24, %c1_25, %c0_26, %c0_27] : memref<1x1x6x6x64xbf16, #tpu.memory_space<vmem>>, vector<1x1x4x4x64xbf16>
    %21 = vector.shape_cast %20 : vector<1x1x4x4x64xbf16> to vector<4x4x64xbf16>
    %22 = vector.shape_cast %21 : vector<4x4x64xbf16> to vector<16x64xbf16>
    %c3 = arith.constant 3 : index
    %c0_28 = arith.constant 0 : index
    %c0_29 = arith.constant 0 : index
    %23 = vector.load %arg2[%c3, %c0_28, %c0_29] : memref<9x64x64xbf16, #tpu.memory_space<vmem>>, vector<1x64x64xbf16>
    %24 = vector.shape_cast %23 : vector<1x64x64xbf16> to vector<64x64xbf16>
    %cst_30 = arith.constant dense<0.000000e+00> : vector<16x64xf32>
    %25 = tpu.matmul %22, %24, %cst_30 {dimension_numbers = #tpu.dot_dimension_numbers<[1], [0], [0], [1], [0, 0, 1, 1], [], []>} : vector<16x64xbf16>, vector<64x64xbf16>, vector<16x64xf32> -> vector<16x64xf32>
    %26 = arith.addf %19, %25 : vector<16x64xf32>
    %c0_31 = arith.constant 0 : index
    %c0_32 = arith.constant 0 : index
    %c1_33 = arith.constant 1 : index
    %c1_34 = arith.constant 1 : index
    %c0_35 = arith.constant 0 : index
    %27 = vector.load %arg1[%c0_31, %c0_32, %c1_33, %c1_34, %c0_35] : memref<1x1x6x6x64xbf16, #tpu.memory_space<vmem>>, vector<1x1x4x4x64xbf16>
    %28 = vector.shape_cast %27 : vector<1x1x4x4x64xbf16> to vector<4x4x64xbf16>
    %29 = vector.shape_cast %28 : vector<4x4x64xbf16> to vector<16x64xbf16>
    %c4 = arith.constant 4 : index
    %c0_36 = arith.constant 0 : index
    %c0_37 = arith.constant 0 : index
    %30 = vector.load %arg2[%c4, %c0_36, %c0_37] : memref<9x64x64xbf16, #tpu.memory_space<vmem>>, vector<1x64x64xbf16>
    %31 = vector.shape_cast %30 : vector<1x64x64xbf16> to vector<64x64xbf16>
    %cst_38 = arith.constant dense<0.000000e+00> : vector<16x64xf32>
    %32 = tpu.matmul %29, %31, %cst_38 {dimension_numbers = #tpu.dot_dimension_numbers<[1], [0], [0], [1], [0, 0, 1, 1], [], []>} : vector<16x64xbf16>, vector<64x64xbf16>, vector<16x64xf32> -> vector<16x64xf32>
    %33 = arith.addf %26, %32 : vector<16x64xf32>
    %c0_39 = arith.constant 0 : index
    %c0_40 = arith.constant 0 : index
    %c1_41 = arith.constant 1 : index
    %c2_42 = arith.constant 2 : index
    %c0_43 = arith.constant 0 : index
    %34 = vector.load %arg1[%c0_39, %c0_40, %c1_41, %c2_42, %c0_43] : memref<1x1x6x6x64xbf16, #tpu.memory_space<vmem>>, vector<1x1x4x4x64xbf16>
    %35 = vector.shape_cast %34 : vector<1x1x4x4x64xbf16> to vector<4x4x64xbf16>
    %36 = vector.shape_cast %35 : vector<4x4x64xbf16> to vector<16x64xbf16>
    %c5 = arith.constant 5 : index
    %c0_44 = arith.constant 0 : index
    %c0_45 = arith.constant 0 : index
    %37 = vector.load %arg2[%c5, %c0_44, %c0_45] : memref<9x64x64xbf16, #tpu.memory_space<vmem>>, vector<1x64x64xbf16>
    %38 = vector.shape_cast %37 : vector<1x64x64xbf16> to vector<64x64xbf16>
    %cst_46 = arith.constant dense<0.000000e+00> : vector<16x64xf32>
    %39 = tpu.matmul %36, %38, %cst_46 {dimension_numbers = #tpu.dot_dimension_numbers<[1], [0], [0], [1], [0, 0, 1, 1], [], []>} : vector<16x64xbf16>, vector<64x64xbf16>, vector<16x64xf32> -> vector<16x64xf32>
    %40 = arith.addf %33, %39 : vector<16x64xf32>
    %c0_47 = arith.constant 0 : index
    %c0_48 = arith.constant 0 : index
    %c2_49 = arith.constant 2 : index
    %c0_50 = arith.constant 0 : index
    %c0_51 = arith.constant 0 : index
    %41 = vector.load %arg1[%c0_47, %c0_48, %c2_49, %c0_50, %c0_51] : memref<1x1x6x6x64xbf16, #tpu.memory_space<vmem>>, vector<1x1x4x4x64xbf16>
    %42 = vector.shape_cast %41 : vector<1x1x4x4x64xbf16> to vector<4x4x64xbf16>
    %43 = vector.shape_cast %42 : vector<4x4x64xbf16> to vector<16x64xbf16>
    %c6 = arith.constant 6 : index
    %c0_52 = arith.constant 0 : index
    %c0_53 = arith.constant 0 : index
    %44 = vector.load %arg2[%c6, %c0_52, %c0_53] : memref<9x64x64xbf16, #tpu.memory_space<vmem>>, vector<1x64x64xbf16>
    %45 = vector.shape_cast %44 : vector<1x64x64xbf16> to vector<64x64xbf16>
    %cst_54 = arith.constant dense<0.000000e+00> : vector<16x64xf32>
    %46 = tpu.matmul %43, %45, %cst_54 {dimension_numbers = #tpu.dot_dimension_numbers<[1], [0], [0], [1], [0, 0, 1, 1], [], []>} : vector<16x64xbf16>, vector<64x64xbf16>, vector<16x64xf32> -> vector<16x64xf32>
    %47 = arith.addf %40, %46 : vector<16x64xf32>
    %c0_55 = arith.constant 0 : index
    %c0_56 = arith.constant 0 : index
    %c2_57 = arith.constant 2 : index
    %c1_58 = arith.constant 1 : index
    %c0_59 = arith.constant 0 : index
    %48 = vector.load %arg1[%c0_55, %c0_56, %c2_57, %c1_58, %c0_59] : memref<1x1x6x6x64xbf16, #tpu.memory_space<vmem>>, vector<1x1x4x4x64xbf16>
    %49 = vector.shape_cast %48 : vector<1x1x4x4x64xbf16> to vector<4x4x64xbf16>
    %50 = vector.shape_cast %49 : vector<4x4x64xbf16> to vector<16x64xbf16>
    %c7 = arith.constant 7 : index
    %c0_60 = arith.constant 0 : index
    %c0_61 = arith.constant 0 : index
    %51 = vector.load %arg2[%c7, %c0_60, %c0_61] : memref<9x64x64xbf16, #tpu.memory_space<vmem>>, vector<1x64x64xbf16>
    %52 = vector.shape_cast %51 : vector<1x64x64xbf16> to vector<64x64xbf16>
    %cst_62 = arith.constant dense<0.000000e+00> : vector<16x64xf32>
    %53 = tpu.matmul %50, %52, %cst_62 {dimension_numbers = #tpu.dot_dimension_numbers<[1], [0], [0], [1], [0, 0, 1, 1], [], []>} : vector<16x64xbf16>, vector<64x64xbf16>, vector<16x64xf32> -> vector<16x64xf32>
    %54 = arith.addf %47, %53 : vector<16x64xf32>
    %c0_63 = arith.constant 0 : index
    %c0_64 = arith.constant 0 : index
    %c2_65 = arith.constant 2 : index
    %c2_66 = arith.constant 2 : index
    %c0_67 = arith.constant 0 : index
    %55 = vector.load %arg1[%c0_63, %c0_64, %c2_65, %c2_66, %c0_67] : memref<1x1x6x6x64xbf16, #tpu.memory_space<vmem>>, vector<1x1x4x4x64xbf16>
    %56 = vector.shape_cast %55 : vector<1x1x4x4x64xbf16> to vector<4x4x64xbf16>
    %57 = vector.shape_cast %56 : vector<4x4x64xbf16> to vector<16x64xbf16>
    %c8 = arith.constant 8 : index
    %c0_68 = arith.constant 0 : index
    %c0_69 = arith.constant 0 : index
    %58 = vector.load %arg2[%c8, %c0_68, %c0_69] : memref<9x64x64xbf16, #tpu.memory_space<vmem>>, vector<1x64x64xbf16>
    %59 = vector.shape_cast %58 : vector<1x64x64xbf16> to vector<64x64xbf16>
    %cst_70 = arith.constant dense<0.000000e+00> : vector<16x64xf32>
    %60 = tpu.matmul %57, %59, %cst_70 {dimension_numbers = #tpu.dot_dimension_numbers<[1], [0], [0], [1], [0, 0, 1, 1], [], []>} : vector<16x64xbf16>, vector<64x64xbf16>, vector<16x64xf32> -> vector<16x64xf32>
    %61 = arith.addf %54, %60 : vector<16x64xf32>
    %c0_71 = arith.constant 0 : index
    %c0_72 = arith.constant 0 : index
    %62 = vector.load %arg3[%c0_71, %c0_72] : memref<1x64xf32, #tpu.memory_space<vmem>>, vector<1x64xf32>
    %63 = vector.broadcast %62 : vector<1x64xf32> to vector<16x64xf32>
    %64 = arith.addf %61, %63 : vector<16x64xf32>
    %cst_73 = arith.constant 0.000000e+00 : f32
    %65 = vector.broadcast %cst_73 : f32 to vector<16x64xf32>
    %66 = arith.maximumf %64, %65 : vector<16x64xf32>
    %67 = vector.shape_cast %66 : vector<16x64xf32> to vector<4x4x64xf32>
    %68 = arith.truncf %67 : vector<4x4x64xf32> to vector<4x4x64xbf16>
    %c0_74 = arith.constant 0 : index
    %c0_75 = arith.constant 0 : index
    %c0_76 = arith.constant 0 : index
    %c0_77 = arith.constant 0 : index
    %69 = vector.load %arg4[%c0_74, %c0_75, %c0_76, %c0_77] : memref<1x4x4x64xbf16, #tpu.memory_space<vmem>>, vector<1x4x4x64xbf16>
    %70 = vector.shape_cast %69 : vector<1x4x4x64xbf16> to vector<4x4x64xbf16>
    %71 = vector.shape_cast %68 : vector<4x4x64xbf16> to vector<1x4x4x64xbf16>
    tpu.vector_store %arg4[%c0_74, %c0_75, %c0_76, %c0_77], %71 {strides = array<i32>} : memref<1x4x4x64xbf16, #tpu.memory_space<vmem>>, vector<1x4x4x64xbf16>,
    return
  }
  func.func @transform_0(%arg0: i32) -> (i32, i32, i32, i32, i32) {
    %c0_i32 = arith.constant 0 : i32
    %c0_i32_0 = arith.constant 0 : i32
    %c0_i32_1 = arith.constant 0 : i32
    %c0_i32_2 = arith.constant 0 : i32
    %c0_i32_3 = arith.constant 0 : i32
    return %c0_i32, %arg0, %c0_i32_0, %c0_i32_1, %c0_i32_2 : i32, i32, i32, i32, i32
  }
  func.func @transform_1(%arg0: i32) -> (i32, i32, i32) {
    %c0_i32 = arith.constant 0 : i32
    %c0_i32_0 = arith.constant 0 : i32
    %c0_i32_1 = arith.constant 0 : i32
    %c0_i32_2 = arith.constant 0 : i32
    return %c0_i32, %c0_i32_0, %c0_i32_1 : i32, i32, i32
  }
  func.func @transform_2(%arg0: i32) -> (i32, i32) {
    %c0_i32 = arith.constant 0 : i32
    %c0_i32_0 = arith.constant 0 : i32
    %c0_i32_1 = arith.constant 0 : i32
    return %c0_i32, %c0_i32_0 : i32, i32
  }
  func.func @transform_3(%arg0: i32) -> (i32, i32, i32, i32) {
    %c0_i32 = arith.constant 0 : i32
    %c0_i32_0 = arith.constant 0 : i32
    %c0_i32_1 = arith.constant 0 : i32
    %c0_i32_2 = arith.constant 0 : i32
    return %arg0, %c0_i32, %c0_i32_0, %c0_i32_1 : i32, i32, i32, i32
  }
}

module attributes {stable_mosaic.version = 11 : i64} {
  func.func @_conv_bn_fused_kernel(%arg0: i32, %arg1: memref<4x1x2x2x64xbf16, #tpu.memory_space<vmem>>, %arg2: memref<1x64x128xbf16, #tpu.memory_space<vmem>>, %arg3: memref<1x128xf32, #tpu.memory_space<vmem>>, %arg4: memref<1x2x2x128xbf16, #tpu.memory_space<vmem>>) attributes {dimension_semantics = [#tpu.dimension_semantics<parallel>], iteration_bounds = array<i64: 2>, scalar_prefetch = 0 : i64, scratch_operands = 0 : i64, tpu.core_type = #tpu.core_type<tc>, window_params = [{transform_indices = @transform_0, window_bounds = array<i64: 4, 1, 2, 2, 64>}, {pipeline_mode = #tpu.pipeline_mode<synchronous>, transform_indices = @transform_1, window_bounds = array<i64: 1, 64, 128>}, {pipeline_mode = #tpu.pipeline_mode<synchronous>, transform_indices = @transform_2, window_bounds = array<i64: 1, 128>}, {transform_indices = @transform_3, window_bounds = array<i64: 1, 2, 2, 128>}]} {
    %c0 = arith.constant 0 : index
    %c0_0 = arith.constant 0 : index
    %c0_1 = arith.constant 0 : index
    %c0_2 = arith.constant 0 : index
    %c0_3 = arith.constant 0 : index
    %0 = vector.load %arg1[%c0, %c0_0, %c0_1, %c0_2, %c0_3] : memref<4x1x2x2x64xbf16, #tpu.memory_space<vmem>>, vector<1x1x2x2x64xbf16>
    %1 = vector.shape_cast %0 : vector<1x1x2x2x64xbf16> to vector<2x2x64xbf16>
    %2 = vector.shape_cast %1 : vector<2x2x64xbf16> to vector<4x64xbf16>
    %c0_4 = arith.constant 0 : index
    %c0_5 = arith.constant 0 : index
    %c0_6 = arith.constant 0 : index
    %3 = vector.load %arg2[%c0_4, %c0_5, %c0_6] : memref<1x64x128xbf16, #tpu.memory_space<vmem>>, vector<1x64x128xbf16>
    %4 = vector.shape_cast %3 : vector<1x64x128xbf16> to vector<64x128xbf16>
    %cst = arith.constant dense<0.000000e+00> : vector<4x128xf32>
    %5 = tpu.matmul %2, %4, %cst {dimension_numbers = #tpu.dot_dimension_numbers<[1], [0], [0], [1], [0, 0, 1, 1], [], []>} : vector<4x64xbf16>, vector<64x128xbf16>, vector<4x128xf32> -> vector<4x128xf32>
    %c0_7 = arith.constant 0 : index
    %c0_8 = arith.constant 0 : index
    %6 = vector.load %arg3[%c0_7, %c0_8] : memref<1x128xf32, #tpu.memory_space<vmem>>, vector<1x128xf32>
    %7 = vector.broadcast %6 : vector<1x128xf32> to vector<4x128xf32>
    %8 = arith.addf %5, %7 : vector<4x128xf32>
    %9 = vector.shape_cast %8 : vector<4x128xf32> to vector<2x2x128xf32>
    %10 = arith.truncf %9 : vector<2x2x128xf32> to vector<2x2x128xbf16>
    %c0_9 = arith.constant 0 : index
    %c0_10 = arith.constant 0 : index
    %c0_11 = arith.constant 0 : index
    %c0_12 = arith.constant 0 : index
    %11 = vector.load %arg4[%c0_9, %c0_10, %c0_11, %c0_12] : memref<1x2x2x128xbf16, #tpu.memory_space<vmem>>, vector<1x2x2x128xbf16>
    %12 = vector.shape_cast %11 : vector<1x2x2x128xbf16> to vector<2x2x128xbf16>
    %13 = vector.shape_cast %10 : vector<2x2x128xbf16> to vector<1x2x2x128xbf16>
    tpu.vector_store %arg4[%c0_9, %c0_10, %c0_11, %c0_12], %13 {strides = array<i32>} : memref<1x2x2x128xbf16, #tpu.memory_space<vmem>>, vector<1x2x2x128xbf16>,
    return
  }
  func.func @transform_0(%arg0: i32) -> (i32, i32, i32, i32, i32) {
    %c0_i32 = arith.constant 0 : i32
    %c0_i32_0 = arith.constant 0 : i32
    %c0_i32_1 = arith.constant 0 : i32
    %c0_i32_2 = arith.constant 0 : i32
    %c0_i32_3 = arith.constant 0 : i32
    return %c0_i32, %arg0, %c0_i32_0, %c0_i32_1, %c0_i32_2 : i32, i32, i32, i32, i32
  }
  func.func @transform_1(%arg0: i32) -> (i32, i32, i32) {
    %c0_i32 = arith.constant 0 : i32
    %c0_i32_0 = arith.constant 0 : i32
    %c0_i32_1 = arith.constant 0 : i32
    %c0_i32_2 = arith.constant 0 : i32
    return %c0_i32, %c0_i32_0, %c0_i32_1 : i32, i32, i32
  }
  func.func @transform_2(%arg0: i32) -> (i32, i32) {
    %c0_i32 = arith.constant 0 : i32
    %c0_i32_0 = arith.constant 0 : i32
    %c0_i32_1 = arith.constant 0 : i32
    return %c0_i32, %c0_i32_0 : i32, i32
  }
  func.func @transform_3(%arg0: i32) -> (i32, i32, i32, i32) {
    %c0_i32 = arith.constant 0 : i32
    %c0_i32_0 = arith.constant 0 : i32
    %c0_i32_1 = arith.constant 0 : i32
    %c0_i32_2 = arith.constant 0 : i32
    return %arg0, %c0_i32, %c0_i32_0, %c0_i32_1 : i32, i32, i32, i32
  }
}

module attributes {stable_mosaic.version = 11 : i64} {
  func.func @_conv_bn_fused_kernel(%arg0: i32, %arg1: memref<4x1x3x3x64xbf16, #tpu.memory_space<vmem>>, %arg2: memref<9x64x128xbf16, #tpu.memory_space<vmem>>, %arg3: memref<1x128xf32, #tpu.memory_space<vmem>>, %arg4: memref<1x2x2x128xbf16, #tpu.memory_space<vmem>>) attributes {dimension_semantics = [#tpu.dimension_semantics<parallel>], iteration_bounds = array<i64: 2>, scalar_prefetch = 0 : i64, scratch_operands = 0 : i64, tpu.core_type = #tpu.core_type<tc>, window_params = [{transform_indices = @transform_0, window_bounds = array<i64: 4, 1, 3, 3, 64>}, {pipeline_mode = #tpu.pipeline_mode<synchronous>, transform_indices = @transform_1, window_bounds = array<i64: 9, 64, 128>}, {pipeline_mode = #tpu.pipeline_mode<synchronous>, transform_indices = @transform_2, window_bounds = array<i64: 1, 128>}, {transform_indices = @transform_3, window_bounds = array<i64: 1, 2, 2, 128>}]} {
    %c0 = arith.constant 0 : index
    %c0_0 = arith.constant 0 : index
    %c0_1 = arith.constant 0 : index
    %c0_2 = arith.constant 0 : index
    %c0_3 = arith.constant 0 : index
    %0 = vector.load %arg1[%c0, %c0_0, %c0_1, %c0_2, %c0_3] : memref<4x1x3x3x64xbf16, #tpu.memory_space<vmem>>, vector<1x1x2x2x64xbf16>
    %1 = vector.shape_cast %0 : vector<1x1x2x2x64xbf16> to vector<2x2x64xbf16>
    %2 = vector.shape_cast %1 : vector<2x2x64xbf16> to vector<4x64xbf16>
    %c0_4 = arith.constant 0 : index
    %c0_5 = arith.constant 0 : index
    %c0_6 = arith.constant 0 : index
    %3 = vector.load %arg2[%c0_4, %c0_5, %c0_6] : memref<9x64x128xbf16, #tpu.memory_space<vmem>>, vector<1x64x128xbf16>
    %4 = vector.shape_cast %3 : vector<1x64x128xbf16> to vector<64x128xbf16>
    %cst = arith.constant dense<0.000000e+00> : vector<4x128xf32>
    %5 = tpu.matmul %2, %4, %cst {dimension_numbers = #tpu.dot_dimension_numbers<[1], [0], [0], [1], [0, 0, 1, 1], [], []>} : vector<4x64xbf16>, vector<64x128xbf16>, vector<4x128xf32> -> vector<4x128xf32>
    %c1 = arith.constant 1 : index
    %c0_7 = arith.constant 0 : index
    %c0_8 = arith.constant 0 : index
    %c0_9 = arith.constant 0 : index
    %c0_10 = arith.constant 0 : index
    %6 = vector.load %arg1[%c1, %c0_7, %c0_8, %c0_9, %c0_10] : memref<4x1x3x3x64xbf16, #tpu.memory_space<vmem>>, vector<1x1x2x2x64xbf16>
    %7 = vector.shape_cast %6 : vector<1x1x2x2x64xbf16> to vector<2x2x64xbf16>
    %8 = vector.shape_cast %7 : vector<2x2x64xbf16> to vector<4x64xbf16>
    %c1_11 = arith.constant 1 : index
    %c0_12 = arith.constant 0 : index
    %c0_13 = arith.constant 0 : index
    %9 = vector.load %arg2[%c1_11, %c0_12, %c0_13] : memref<9x64x128xbf16, #tpu.memory_space<vmem>>, vector<1x64x128xbf16>
    %10 = vector.shape_cast %9 : vector<1x64x128xbf16> to vector<64x128xbf16>
    %cst_14 = arith.constant dense<0.000000e+00> : vector<4x128xf32>
    %11 = tpu.matmul %8, %10, %cst_14 {dimension_numbers = #tpu.dot_dimension_numbers<[1], [0], [0], [1], [0, 0, 1, 1], [], []>} : vector<4x64xbf16>, vector<64x128xbf16>, vector<4x128xf32> -> vector<4x128xf32>
    %12 = arith.addf %5, %11 : vector<4x128xf32>
    %c0_15 = arith.constant 0 : index
    %c0_16 = arith.constant 0 : index
    %c0_17 = arith.constant 0 : index
    %c1_18 = arith.constant 1 : index
    %c0_19 = arith.constant 0 : index
    %13 = vector.load %arg1[%c0_15, %c0_16, %c0_17, %c1_18, %c0_19] : memref<4x1x3x3x64xbf16, #tpu.memory_space<vmem>>, vector<1x1x2x2x64xbf16>
    %14 = vector.shape_cast %13 : vector<1x1x2x2x64xbf16> to vector<2x2x64xbf16>
    %15 = vector.shape_cast %14 : vector<2x2x64xbf16> to vector<4x64xbf16>
    %c2 = arith.constant 2 : index
    %c0_20 = arith.constant 0 : index
    %c0_21 = arith.constant 0 : index
    %16 = vector.load %arg2[%c2, %c0_20, %c0_21] : memref<9x64x128xbf16, #tpu.memory_space<vmem>>, vector<1x64x128xbf16>
    %17 = vector.shape_cast %16 : vector<1x64x128xbf16> to vector<64x128xbf16>
    %cst_22 = arith.constant dense<0.000000e+00> : vector<4x128xf32>
    %18 = tpu.matmul %15, %17, %cst_22 {dimension_numbers = #tpu.dot_dimension_numbers<[1], [0], [0], [1], [0, 0, 1, 1], [], []>} : vector<4x64xbf16>, vector<64x128xbf16>, vector<4x128xf32> -> vector<4x128xf32>
    %19 = arith.addf %12, %18 : vector<4x128xf32>
    %c2_23 = arith.constant 2 : index
    %c0_24 = arith.constant 0 : index
    %c0_25 = arith.constant 0 : index
    %c0_26 = arith.constant 0 : index
    %c0_27 = arith.constant 0 : index
    %20 = vector.load %arg1[%c2_23, %c0_24, %c0_25, %c0_26, %c0_27] : memref<4x1x3x3x64xbf16, #tpu.memory_space<vmem>>, vector<1x1x2x2x64xbf16>
    %21 = vector.shape_cast %20 : vector<1x1x2x2x64xbf16> to vector<2x2x64xbf16>
    %22 = vector.shape_cast %21 : vector<2x2x64xbf16> to vector<4x64xbf16>
    %c3 = arith.constant 3 : index
    %c0_28 = arith.constant 0 : index
    %c0_29 = arith.constant 0 : index
    %23 = vector.load %arg2[%c3, %c0_28, %c0_29] : memref<9x64x128xbf16, #tpu.memory_space<vmem>>, vector<1x64x128xbf16>
    %24 = vector.shape_cast %23 : vector<1x64x128xbf16> to vector<64x128xbf16>
    %cst_30 = arith.constant dense<0.000000e+00> : vector<4x128xf32>
    %25 = tpu.matmul %22, %24, %cst_30 {dimension_numbers = #tpu.dot_dimension_numbers<[1], [0], [0], [1], [0, 0, 1, 1], [], []>} : vector<4x64xbf16>, vector<64x128xbf16>, vector<4x128xf32> -> vector<4x128xf32>
    %26 = arith.addf %19, %25 : vector<4x128xf32>
    %c3_31 = arith.constant 3 : index
    %c0_32 = arith.constant 0 : index
    %c0_33 = arith.constant 0 : index
    %c0_34 = arith.constant 0 : index
    %c0_35 = arith.constant 0 : index
    %27 = vector.load %arg1[%c3_31, %c0_32, %c0_33, %c0_34, %c0_35] : memref<4x1x3x3x64xbf16, #tpu.memory_space<vmem>>, vector<1x1x2x2x64xbf16>
    %28 = vector.shape_cast %27 : vector<1x1x2x2x64xbf16> to vector<2x2x64xbf16>
    %29 = vector.shape_cast %28 : vector<2x2x64xbf16> to vector<4x64xbf16>
    %c4 = arith.constant 4 : index
    %c0_36 = arith.constant 0 : index
    %c0_37 = arith.constant 0 : index
    %30 = vector.load %arg2[%c4, %c0_36, %c0_37] : memref<9x64x128xbf16, #tpu.memory_space<vmem>>, vector<1x64x128xbf16>
    %31 = vector.shape_cast %30 : vector<1x64x128xbf16> to vector<64x128xbf16>
    %cst_38 = arith.constant dense<0.000000e+00> : vector<4x128xf32>
    %32 = tpu.matmul %29, %31, %cst_38 {dimension_numbers = #tpu.dot_dimension_numbers<[1], [0], [0], [1], [0, 0, 1, 1], [], []>} : vector<4x64xbf16>, vector<64x128xbf16>, vector<4x128xf32> -> vector<4x128xf32>
    %33 = arith.addf %26, %32 : vector<4x128xf32>
    %c2_39 = arith.constant 2 : index
    %c0_40 = arith.constant 0 : index
    %c0_41 = arith.constant 0 : index
    %c1_42 = arith.constant 1 : index
    %c0_43 = arith.constant 0 : index
    %34 = vector.load %arg1[%c2_39, %c0_40, %c0_41, %c1_42, %c0_43] : memref<4x1x3x3x64xbf16, #tpu.memory_space<vmem>>, vector<1x1x2x2x64xbf16>
    %35 = vector.shape_cast %34 : vector<1x1x2x2x64xbf16> to vector<2x2x64xbf16>
    %36 = vector.shape_cast %35 : vector<2x2x64xbf16> to vector<4x64xbf16>
    %c5 = arith.constant 5 : index
    %c0_44 = arith.constant 0 : index
    %c0_45 = arith.constant 0 : index
    %37 = vector.load %arg2[%c5, %c0_44, %c0_45] : memref<9x64x128xbf16, #tpu.memory_space<vmem>>, vector<1x64x128xbf16>
    %38 = vector.shape_cast %37 : vector<1x64x128xbf16> to vector<64x128xbf16>
    %cst_46 = arith.constant dense<0.000000e+00> : vector<4x128xf32>
    %39 = tpu.matmul %36, %38, %cst_46 {dimension_numbers = #tpu.dot_dimension_numbers<[1], [0], [0], [1], [0, 0, 1, 1], [], []>} : vector<4x64xbf16>, vector<64x128xbf16>, vector<4x128xf32> -> vector<4x128xf32>
    %40 = arith.addf %33, %39 : vector<4x128xf32>
    %c0_47 = arith.constant 0 : index
    %c0_48 = arith.constant 0 : index
    %c1_49 = arith.constant 1 : index
    %c0_50 = arith.constant 0 : index
    %c0_51 = arith.constant 0 : index
    %41 = vector.load %arg1[%c0_47, %c0_48, %c1_49, %c0_50, %c0_51] : memref<4x1x3x3x64xbf16, #tpu.memory_space<vmem>>, vector<1x1x2x2x64xbf16>
    %42 = vector.shape_cast %41 : vector<1x1x2x2x64xbf16> to vector<2x2x64xbf16>
    %43 = vector.shape_cast %42 : vector<2x2x64xbf16> to vector<4x64xbf16>
    %c6 = arith.constant 6 : index
    %c0_52 = arith.constant 0 : index
    %c0_53 = arith.constant 0 : index
    %44 = vector.load %arg2[%c6, %c0_52, %c0_53] : memref<9x64x128xbf16, #tpu.memory_space<vmem>>, vector<1x64x128xbf16>
    %45 = vector.shape_cast %44 : vector<1x64x128xbf16> to vector<64x128xbf16>
    %cst_54 = arith.constant dense<0.000000e+00> : vector<4x128xf32>
    %46 = tpu.matmul %43, %45, %cst_54 {dimension_numbers = #tpu.dot_dimension_numbers<[1], [0], [0], [1], [0, 0, 1, 1], [], []>} : vector<4x64xbf16>, vector<64x128xbf16>, vector<4x128xf32> -> vector<4x128xf32>
    %47 = arith.addf %40, %46 : vector<4x128xf32>
    %c1_55 = arith.constant 1 : index
    %c0_56 = arith.constant 0 : index
    %c1_57 = arith.constant 1 : index
    %c0_58 = arith.constant 0 : index
    %c0_59 = arith.constant 0 : index
    %48 = vector.load %arg1[%c1_55, %c0_56, %c1_57, %c0_58, %c0_59] : memref<4x1x3x3x64xbf16, #tpu.memory_space<vmem>>, vector<1x1x2x2x64xbf16>
    %49 = vector.shape_cast %48 : vector<1x1x2x2x64xbf16> to vector<2x2x64xbf16>
    %50 = vector.shape_cast %49 : vector<2x2x64xbf16> to vector<4x64xbf16>
    %c7 = arith.constant 7 : index
    %c0_60 = arith.constant 0 : index
    %c0_61 = arith.constant 0 : index
    %51 = vector.load %arg2[%c7, %c0_60, %c0_61] : memref<9x64x128xbf16, #tpu.memory_space<vmem>>, vector<1x64x128xbf16>
    %52 = vector.shape_cast %51 : vector<1x64x128xbf16> to vector<64x128xbf16>
    %cst_62 = arith.constant dense<0.000000e+00> : vector<4x128xf32>
    %53 = tpu.matmul %50, %52, %cst_62 {dimension_numbers = #tpu.dot_dimension_numbers<[1], [0], [0], [1], [0, 0, 1, 1], [], []>} : vector<4x64xbf16>, vector<64x128xbf16>, vector<4x128xf32> -> vector<4x128xf32>
    %54 = arith.addf %47, %53 : vector<4x128xf32>
    %c0_63 = arith.constant 0 : index
    %c0_64 = arith.constant 0 : index
    %c1_65 = arith.constant 1 : index
    %c1_66 = arith.constant 1 : index
    %c0_67 = arith.constant 0 : index
    %55 = vector.load %arg1[%c0_63, %c0_64, %c1_65, %c1_66, %c0_67] : memref<4x1x3x3x64xbf16, #tpu.memory_space<vmem>>, vector<1x1x2x2x64xbf16>
    %56 = vector.shape_cast %55 : vector<1x1x2x2x64xbf16> to vector<2x2x64xbf16>
    %57 = vector.shape_cast %56 : vector<2x2x64xbf16> to vector<4x64xbf16>
    %c8 = arith.constant 8 : index
    %c0_68 = arith.constant 0 : index
    %c0_69 = arith.constant 0 : index
    %58 = vector.load %arg2[%c8, %c0_68, %c0_69] : memref<9x64x128xbf16, #tpu.memory_space<vmem>>, vector<1x64x128xbf16>
    %59 = vector.shape_cast %58 : vector<1x64x128xbf16> to vector<64x128xbf16>
    %cst_70 = arith.constant dense<0.000000e+00> : vector<4x128xf32>
    %60 = tpu.matmul %57, %59, %cst_70 {dimension_numbers = #tpu.dot_dimension_numbers<[1], [0], [0], [1], [0, 0, 1, 1], [], []>} : vector<4x64xbf16>, vector<64x128xbf16>, vector<4x128xf32> -> vector<4x128xf32>
    %61 = arith.addf %54, %60 : vector<4x128xf32>
    %c0_71 = arith.constant 0 : index
    %c0_72 = arith.constant 0 : index
    %62 = vector.load %arg3[%c0_71, %c0_72] : memref<1x128xf32, #tpu.memory_space<vmem>>, vector<1x128xf32>
    %63 = vector.broadcast %62 : vector<1x128xf32> to vector<4x128xf32>
    %64 = arith.addf %61, %63 : vector<4x128xf32>
    %cst_73 = arith.constant 0.000000e+00 : f32
    %65 = vector.broadcast %cst_73 : f32 to vector<4x128xf32>
    %66 = arith.maximumf %64, %65 : vector<4x128xf32>
    %67 = vector.shape_cast %66 : vector<4x128xf32> to vector<2x2x128xf32>
    %68 = arith.truncf %67 : vector<2x2x128xf32> to vector<2x2x128xbf16>
    %c0_74 = arith.constant 0 : index
    %c0_75 = arith.constant 0 : index
    %c0_76 = arith.constant 0 : index
    %c0_77 = arith.constant 0 : index
    %69 = vector.load %arg4[%c0_74, %c0_75, %c0_76, %c0_77] : memref<1x2x2x128xbf16, #tpu.memory_space<vmem>>, vector<1x2x2x128xbf16>
    %70 = vector.shape_cast %69 : vector<1x2x2x128xbf16> to vector<2x2x128xbf16>
    %71 = vector.shape_cast %68 : vector<2x2x128xbf16> to vector<1x2x2x128xbf16>
    tpu.vector_store %arg4[%c0_74, %c0_75, %c0_76, %c0_77], %71 {strides = array<i32>} : memref<1x2x2x128xbf16, #tpu.memory_space<vmem>>, vector<1x2x2x128xbf16>,
    return
  }
  func.func @transform_0(%arg0: i32) -> (i32, i32, i32, i32, i32) {
    %c0_i32 = arith.constant 0 : i32
    %c0_i32_0 = arith.constant 0 : i32
    %c0_i32_1 = arith.constant 0 : i32
    %c0_i32_2 = arith.constant 0 : i32
    %c0_i32_3 = arith.constant 0 : i32
    return %c0_i32, %arg0, %c0_i32_0, %c0_i32_1, %c0_i32_2 : i32, i32, i32, i32, i32
  }
  func.func @transform_1(%arg0: i32) -> (i32, i32, i32) {
    %c0_i32 = arith.constant 0 : i32
    %c0_i32_0 = arith.constant 0 : i32
    %c0_i32_1 = arith.constant 0 : i32
    %c0_i32_2 = arith.constant 0 : i32
    return %c0_i32, %c0_i32_0, %c0_i32_1 : i32, i32, i32
  }
  func.func @transform_2(%arg0: i32) -> (i32, i32) {
    %c0_i32 = arith.constant 0 : i32
    %c0_i32_0 = arith.constant 0 : i32
    %c0_i32_1 = arith.constant 0 : i32
    return %c0_i32, %c0_i32_0 : i32, i32
  }
  func.func @transform_3(%arg0: i32) -> (i32, i32, i32, i32) {
    %c0_i32 = arith.constant 0 : i32
    %c0_i32_0 = arith.constant 0 : i32
    %c0_i32_1 = arith.constant 0 : i32
    %c0_i32_2 = arith.constant 0 : i32
    return %arg0, %c0_i32, %c0_i32_0, %c0_i32_1 : i32, i32, i32, i32
  }
}

module attributes {stable_mosaic.version = 11 : i64} {
  func.func @_conv_bn_fused_kernel(%arg0: i32, %arg1: memref<1x1x4x4x128xbf16, #tpu.memory_space<vmem>>, %arg2: memref<9x128x128xbf16, #tpu.memory_space<vmem>>, %arg3: memref<1x128xf32, #tpu.memory_space<vmem>>, %arg4: memref<1x2x2x128xbf16, #tpu.memory_space<vmem>>, %arg5: memref<1x2x2x128xbf16, #tpu.memory_space<vmem>>) attributes {dimension_semantics = [#tpu.dimension_semantics<parallel>], iteration_bounds = array<i64: 2>, scalar_prefetch = 0 : i64, scratch_operands = 0 : i64, tpu.core_type = #tpu.core_type<tc>, window_params = [{transform_indices = @transform_0, window_bounds = array<i64: 1, 1, 4, 4, 128>}, {pipeline_mode = #tpu.pipeline_mode<synchronous>, transform_indices = @transform_1, window_bounds = array<i64: 9, 128, 128>}, {pipeline_mode = #tpu.pipeline_mode<synchronous>, transform_indices = @transform_2, window_bounds = array<i64: 1, 128>}, {transform_indices = @transform_3, window_bounds = array<i64: 1, 2, 2, 128>}, {transform_indices = @transform_4, window_bounds = array<i64: 1, 2, 2, 128>}]} {
    %c0 = arith.constant 0 : index
    %c0_0 = arith.constant 0 : index
    %c0_1 = arith.constant 0 : index
    %c0_2 = arith.constant 0 : index
    %c0_3 = arith.constant 0 : index
    %0 = vector.load %arg1[%c0, %c0_0, %c0_1, %c0_2, %c0_3] : memref<1x1x4x4x128xbf16, #tpu.memory_space<vmem>>, vector<1x1x2x2x128xbf16>
    %1 = vector.shape_cast %0 : vector<1x1x2x2x128xbf16> to vector<2x2x128xbf16>
    %2 = vector.shape_cast %1 : vector<2x2x128xbf16> to vector<4x128xbf16>
    %c0_4 = arith.constant 0 : index
    %c0_5 = arith.constant 0 : index
    %c0_6 = arith.constant 0 : index
    %3 = vector.load %arg2[%c0_4, %c0_5, %c0_6] : memref<9x128x128xbf16, #tpu.memory_space<vmem>>, vector<1x128x128xbf16>
    %4 = vector.shape_cast %3 : vector<1x128x128xbf16> to vector<128x128xbf16>
    %cst = arith.constant dense<0.000000e+00> : vector<4x128xf32>
    %5 = tpu.matmul %2, %4, %cst {dimension_numbers = #tpu.dot_dimension_numbers<[1], [0], [0], [1], [0, 0, 1, 1], [], []>} : vector<4x128xbf16>, vector<128x128xbf16>, vector<4x128xf32> -> vector<4x128xf32>
    %c0_7 = arith.constant 0 : index
    %c0_8 = arith.constant 0 : index
    %c0_9 = arith.constant 0 : index
    %c1 = arith.constant 1 : index
    %c0_10 = arith.constant 0 : index
    %6 = vector.load %arg1[%c0_7, %c0_8, %c0_9, %c1, %c0_10] : memref<1x1x4x4x128xbf16, #tpu.memory_space<vmem>>, vector<1x1x2x2x128xbf16>
    %7 = vector.shape_cast %6 : vector<1x1x2x2x128xbf16> to vector<2x2x128xbf16>
    %8 = vector.shape_cast %7 : vector<2x2x128xbf16> to vector<4x128xbf16>
    %c1_11 = arith.constant 1 : index
    %c0_12 = arith.constant 0 : index
    %c0_13 = arith.constant 0 : index
    %9 = vector.load %arg2[%c1_11, %c0_12, %c0_13] : memref<9x128x128xbf16, #tpu.memory_space<vmem>>, vector<1x128x128xbf16>
    %10 = vector.shape_cast %9 : vector<1x128x128xbf16> to vector<128x128xbf16>
    %cst_14 = arith.constant dense<0.000000e+00> : vector<4x128xf32>
    %11 = tpu.matmul %8, %10, %cst_14 {dimension_numbers = #tpu.dot_dimension_numbers<[1], [0], [0], [1], [0, 0, 1, 1], [], []>} : vector<4x128xbf16>, vector<128x128xbf16>, vector<4x128xf32> -> vector<4x128xf32>
    %12 = arith.addf %5, %11 : vector<4x128xf32>
    %c0_15 = arith.constant 0 : index
    %c0_16 = arith.constant 0 : index
    %c0_17 = arith.constant 0 : index
    %c2 = arith.constant 2 : index
    %c0_18 = arith.constant 0 : index
    %13 = vector.load %arg1[%c0_15, %c0_16, %c0_17, %c2, %c0_18] : memref<1x1x4x4x128xbf16, #tpu.memory_space<vmem>>, vector<1x1x2x2x128xbf16>
    %14 = vector.shape_cast %13 : vector<1x1x2x2x128xbf16> to vector<2x2x128xbf16>
    %15 = vector.shape_cast %14 : vector<2x2x128xbf16> to vector<4x128xbf16>
    %c2_19 = arith.constant 2 : index
    %c0_20 = arith.constant 0 : index
    %c0_21 = arith.constant 0 : index
    %16 = vector.load %arg2[%c2_19, %c0_20, %c0_21] : memref<9x128x128xbf16, #tpu.memory_space<vmem>>, vector<1x128x128xbf16>
    %17 = vector.shape_cast %16 : vector<1x128x128xbf16> to vector<128x128xbf16>
    %cst_22 = arith.constant dense<0.000000e+00> : vector<4x128xf32>
    %18 = tpu.matmul %15, %17, %cst_22 {dimension_numbers = #tpu.dot_dimension_numbers<[1], [0], [0], [1], [0, 0, 1, 1], [], []>} : vector<4x128xbf16>, vector<128x128xbf16>, vector<4x128xf32> -> vector<4x128xf32>
    %19 = arith.addf %12, %18 : vector<4x128xf32>
    %c0_23 = arith.constant 0 : index
    %c0_24 = arith.constant 0 : index
    %c1_25 = arith.constant 1 : index
    %c0_26 = arith.constant 0 : index
    %c0_27 = arith.constant 0 : index
    %20 = vector.load %arg1[%c0_23, %c0_24, %c1_25, %c0_26, %c0_27] : memref<1x1x4x4x128xbf16, #tpu.memory_space<vmem>>, vector<1x1x2x2x128xbf16>
    %21 = vector.shape_cast %20 : vector<1x1x2x2x128xbf16> to vector<2x2x128xbf16>
    %22 = vector.shape_cast %21 : vector<2x2x128xbf16> to vector<4x128xbf16>
    %c3 = arith.constant 3 : index
    %c0_28 = arith.constant 0 : index
    %c0_29 = arith.constant 0 : index
    %23 = vector.load %arg2[%c3, %c0_28, %c0_29] : memref<9x128x128xbf16, #tpu.memory_space<vmem>>, vector<1x128x128xbf16>
    %24 = vector.shape_cast %23 : vector<1x128x128xbf16> to vector<128x128xbf16>
    %cst_30 = arith.constant dense<0.000000e+00> : vector<4x128xf32>
    %25 = tpu.matmul %22, %24, %cst_30 {dimension_numbers = #tpu.dot_dimension_numbers<[1], [0], [0], [1], [0, 0, 1, 1], [], []>} : vector<4x128xbf16>, vector<128x128xbf16>, vector<4x128xf32> -> vector<4x128xf32>
    %26 = arith.addf %19, %25 : vector<4x128xf32>
    %c0_31 = arith.constant 0 : index
    %c0_32 = arith.constant 0 : index
    %c1_33 = arith.constant 1 : index
    %c1_34 = arith.constant 1 : index
    %c0_35 = arith.constant 0 : index
    %27 = vector.load %arg1[%c0_31, %c0_32, %c1_33, %c1_34, %c0_35] : memref<1x1x4x4x128xbf16, #tpu.memory_space<vmem>>, vector<1x1x2x2x128xbf16>
    %28 = vector.shape_cast %27 : vector<1x1x2x2x128xbf16> to vector<2x2x128xbf16>
    %29 = vector.shape_cast %28 : vector<2x2x128xbf16> to vector<4x128xbf16>
    %c4 = arith.constant 4 : index
    %c0_36 = arith.constant 0 : index
    %c0_37 = arith.constant 0 : index
    %30 = vector.load %arg2[%c4, %c0_36, %c0_37] : memref<9x128x128xbf16, #tpu.memory_space<vmem>>, vector<1x128x128xbf16>
    %31 = vector.shape_cast %30 : vector<1x128x128xbf16> to vector<128x128xbf16>
    %cst_38 = arith.constant dense<0.000000e+00> : vector<4x128xf32>
    %32 = tpu.matmul %29, %31, %cst_38 {dimension_numbers = #tpu.dot_dimension_numbers<[1], [0], [0], [1], [0, 0, 1, 1], [], []>} : vector<4x128xbf16>, vector<128x128xbf16>, vector<4x128xf32> -> vector<4x128xf32>
    %33 = arith.addf %26, %32 : vector<4x128xf32>
    %c0_39 = arith.constant 0 : index
    %c0_40 = arith.constant 0 : index
    %c1_41 = arith.constant 1 : index
    %c2_42 = arith.constant 2 : index
    %c0_43 = arith.constant 0 : index
    %34 = vector.load %arg1[%c0_39, %c0_40, %c1_41, %c2_42, %c0_43] : memref<1x1x4x4x128xbf16, #tpu.memory_space<vmem>>, vector<1x1x2x2x128xbf16>
    %35 = vector.shape_cast %34 : vector<1x1x2x2x128xbf16> to vector<2x2x128xbf16>
    %36 = vector.shape_cast %35 : vector<2x2x128xbf16> to vector<4x128xbf16>
    %c5 = arith.constant 5 : index
    %c0_44 = arith.constant 0 : index
    %c0_45 = arith.constant 0 : index
    %37 = vector.load %arg2[%c5, %c0_44, %c0_45] : memref<9x128x128xbf16, #tpu.memory_space<vmem>>, vector<1x128x128xbf16>
    %38 = vector.shape_cast %37 : vector<1x128x128xbf16> to vector<128x128xbf16>
    %cst_46 = arith.constant dense<0.000000e+00> : vector<4x128xf32>
    %39 = tpu.matmul %36, %38, %cst_46 {dimension_numbers = #tpu.dot_dimension_numbers<[1], [0], [0], [1], [0, 0, 1, 1], [], []>} : vector<4x128xbf16>, vector<128x128xbf16>, vector<4x128xf32> -> vector<4x128xf32>
    %40 = arith.addf %33, %39 : vector<4x128xf32>
    %c0_47 = arith.constant 0 : index
    %c0_48 = arith.constant 0 : index
    %c2_49 = arith.constant 2 : index
    %c0_50 = arith.constant 0 : index
    %c0_51 = arith.constant 0 : index
    %41 = vector.load %arg1[%c0_47, %c0_48, %c2_49, %c0_50, %c0_51] : memref<1x1x4x4x128xbf16, #tpu.memory_space<vmem>>, vector<1x1x2x2x128xbf16>
    %42 = vector.shape_cast %41 : vector<1x1x2x2x128xbf16> to vector<2x2x128xbf16>
    %43 = vector.shape_cast %42 : vector<2x2x128xbf16> to vector<4x128xbf16>
    %c6 = arith.constant 6 : index
    %c0_52 = arith.constant 0 : index
    %c0_53 = arith.constant 0 : index
    %44 = vector.load %arg2[%c6, %c0_52, %c0_53] : memref<9x128x128xbf16, #tpu.memory_space<vmem>>, vector<1x128x128xbf16>
    %45 = vector.shape_cast %44 : vector<1x128x128xbf16> to vector<128x128xbf16>
    %cst_54 = arith.constant dense<0.000000e+00> : vector<4x128xf32>
    %46 = tpu.matmul %43, %45, %cst_54 {dimension_numbers = #tpu.dot_dimension_numbers<[1], [0], [0], [1], [0, 0, 1, 1], [], []>} : vector<4x128xbf16>, vector<128x128xbf16>, vector<4x128xf32> -> vector<4x128xf32>
    %47 = arith.addf %40, %46 : vector<4x128xf32>
    %c0_55 = arith.constant 0 : index
    %c0_56 = arith.constant 0 : index
    %c2_57 = arith.constant 2 : index
    %c1_58 = arith.constant 1 : index
    %c0_59 = arith.constant 0 : index
    %48 = vector.load %arg1[%c0_55, %c0_56, %c2_57, %c1_58, %c0_59] : memref<1x1x4x4x128xbf16, #tpu.memory_space<vmem>>, vector<1x1x2x2x128xbf16>
    %49 = vector.shape_cast %48 : vector<1x1x2x2x128xbf16> to vector<2x2x128xbf16>
    %50 = vector.shape_cast %49 : vector<2x2x128xbf16> to vector<4x128xbf16>
    %c7 = arith.constant 7 : index
    %c0_60 = arith.constant 0 : index
    %c0_61 = arith.constant 0 : index
    %51 = vector.load %arg2[%c7, %c0_60, %c0_61] : memref<9x128x128xbf16, #tpu.memory_space<vmem>>, vector<1x128x128xbf16>
    %52 = vector.shape_cast %51 : vector<1x128x128xbf16> to vector<128x128xbf16>
    %cst_62 = arith.constant dense<0.000000e+00> : vector<4x128xf32>
    %53 = tpu.matmul %50, %52, %cst_62 {dimension_numbers = #tpu.dot_dimension_numbers<[1], [0], [0], [1], [0, 0, 1, 1], [], []>} : vector<4x128xbf16>, vector<128x128xbf16>, vector<4x128xf32> -> vector<4x128xf32>
    %54 = arith.addf %47, %53 : vector<4x128xf32>
    %c0_63 = arith.constant 0 : index
    %c0_64 = arith.constant 0 : index
    %c2_65 = arith.constant 2 : index
    %c2_66 = arith.constant 2 : index
    %c0_67 = arith.constant 0 : index
    %55 = vector.load %arg1[%c0_63, %c0_64, %c2_65, %c2_66, %c0_67] : memref<1x1x4x4x128xbf16, #tpu.memory_space<vmem>>, vector<1x1x2x2x128xbf16>
    %56 = vector.shape_cast %55 : vector<1x1x2x2x128xbf16> to vector<2x2x128xbf16>
    %57 = vector.shape_cast %56 : vector<2x2x128xbf16> to vector<4x128xbf16>
    %c8 = arith.constant 8 : index
    %c0_68 = arith.constant 0 : index
    %c0_69 = arith.constant 0 : index
    %58 = vector.load %arg2[%c8, %c0_68, %c0_69] : memref<9x128x128xbf16, #tpu.memory_space<vmem>>, vector<1x128x128xbf16>
    %59 = vector.shape_cast %58 : vector<1x128x128xbf16> to vector<128x128xbf16>
    %cst_70 = arith.constant dense<0.000000e+00> : vector<4x128xf32>
    %60 = tpu.matmul %57, %59, %cst_70 {dimension_numbers = #tpu.dot_dimension_numbers<[1], [0], [0], [1], [0, 0, 1, 1], [], []>} : vector<4x128xbf16>, vector<128x128xbf16>, vector<4x128xf32> -> vector<4x128xf32>
    %61 = arith.addf %54, %60 : vector<4x128xf32>
    %c0_71 = arith.constant 0 : index
    %c0_72 = arith.constant 0 : index
    %62 = vector.load %arg3[%c0_71, %c0_72] : memref<1x128xf32, #tpu.memory_space<vmem>>, vector<1x128xf32>
    %63 = vector.broadcast %62 : vector<1x128xf32> to vector<4x128xf32>
    %64 = arith.addf %61, %63 : vector<4x128xf32>
    %c0_73 = arith.constant 0 : index
    %c0_74 = arith.constant 0 : index
    %c0_75 = arith.constant 0 : index
    %c0_76 = arith.constant 0 : index
    %65 = vector.load %arg4[%c0_73, %c0_74, %c0_75, %c0_76] : memref<1x2x2x128xbf16, #tpu.memory_space<vmem>>, vector<1x2x2x128xbf16>
    %66 = vector.shape_cast %65 : vector<1x2x2x128xbf16> to vector<2x2x128xbf16>
    %67 = vector.shape_cast %66 : vector<2x2x128xbf16> to vector<4x128xbf16>
    %68 = arith.extf %67 : vector<4x128xbf16> to vector<4x128xf32>
    %69 = arith.addf %64, %68 : vector<4x128xf32>
    %cst_77 = arith.constant 0.000000e+00 : f32
    %70 = vector.broadcast %cst_77 : f32 to vector<4x128xf32>
    %71 = arith.maximumf %69, %70 : vector<4x128xf32>
    %72 = vector.shape_cast %71 : vector<4x128xf32> to vector<2x2x128xf32>
    %73 = arith.truncf %72 : vector<2x2x128xf32> to vector<2x2x128xbf16>
    %c0_78 = arith.constant 0 : index
    %c0_79 = arith.constant 0 : index
    %c0_80 = arith.constant 0 : index
    %c0_81 = arith.constant 0 : index
    %74 = vector.load %arg5[%c0_78, %c0_79, %c0_80, %c0_81] : memref<1x2x2x128xbf16, #tpu.memory_space<vmem>>, vector<1x2x2x128xbf16>
    %75 = vector.shape_cast %74 : vector<1x2x2x128xbf16> to vector<2x2x128xbf16>
    %76 = vector.shape_cast %73 : vector<2x2x128xbf16> to vector<1x2x2x128xbf16>
    tpu.vector_store %arg5[%c0_78, %c0_79, %c0_80, %c0_81], %76 {strides = array<i32>} : memref<1x2x2x128xbf16, #tpu.memory_space<vmem>>, vector<1x2x2x128xbf16>,
    return
  }
  func.func @transform_0(%arg0: i32) -> (i32, i32, i32, i32, i32) {
    %c0_i32 = arith.constant 0 : i32
    %c0_i32_0 = arith.constant 0 : i32
    %c0_i32_1 = arith.constant 0 : i32
    %c0_i32_2 = arith.constant 0 : i32
    %c0_i32_3 = arith.constant 0 : i32
    return %c0_i32, %arg0, %c0_i32_0, %c0_i32_1, %c0_i32_2 : i32, i32, i32, i32, i32
  }
  func.func @transform_1(%arg0: i32) -> (i32, i32, i32) {
    %c0_i32 = arith.constant 0 : i32
    %c0_i32_0 = arith.constant 0 : i32
    %c0_i32_1 = arith.constant 0 : i32
    %c0_i32_2 = arith.constant 0 : i32
    return %c0_i32, %c0_i32_0, %c0_i32_1 : i32, i32, i32
  }
  func.func @transform_2(%arg0: i32) -> (i32, i32) {
    %c0_i32 = arith.constant 0 : i32
    %c0_i32_0 = arith.constant 0 : i32
    %c0_i32_1 = arith.constant 0 : i32
    return %c0_i32, %c0_i32_0 : i32, i32
  }
  func.func @transform_3(%arg0: i32) -> (i32, i32, i32, i32) {
    %c0_i32 = arith.constant 0 : i32
    %c0_i32_0 = arith.constant 0 : i32
    %c0_i32_1 = arith.constant 0 : i32
    %c0_i32_2 = arith.constant 0 : i32
    return %arg0, %c0_i32, %c0_i32_0, %c0_i32_1 : i32, i32, i32, i32
  }
  func.func @transform_4(%arg0: i32) -> (i32, i32, i32, i32) {
    %c0_i32 = arith.constant 0 : i32
    %c0_i32_0 = arith.constant 0 : i32
    %c0_i32_1 = arith.constant 0 : i32
    %c0_i32_2 = arith.constant 0 : i32
    return %arg0, %c0_i32, %c0_i32_0, %c0_i32_1 : i32, i32, i32, i32
  }
}

</mosaic_0001>

<bundles_post_ra>
// kernel: resnet_forward.8
= control target key start
LH: loop header
LB: loop body
LE: loop exit
PB: predicated region body
PF: predicated region fallthrough
CT: control target
= control target key end

     0   :  { %s550_s6 = smov 0   ;;  %s552_s7 = smov 0   ;;  %s664_s0 = inlined_call_operand.vmem [shape: bf16[4,2,5,5,64], index: 0, kind: input, shape index: {}]   ;;  %s665_s1 = inlined_call_operand.vmem [shape: bf16[2,4,4,64], index: 1, kind: output, shape index: {}]  }
   0x1   :  { %s554_s8 = smov 0  }
   0x2 LB: > { %s450_s9 = sadd.s32 4294967295, %s538_s8   ;;  %s567_s10 = sadd.s32 1, %s538_s8   ;;  %s538_s8 = sphi %s554_s8, %s669_s8   ;;  %s534_s7 = sphi %s552_s7, %s668_s7   ;;  %s530_s6 = sphi %s550_s6, %s667_s6  }
   0x3   : > { %s15_s11 = ssub.s32 %s538_s8, %s567_s10  ;;  %s18_s12 = sadd.s32 1, %s534_s7 }
   0x4   : > { %p16_p0 = scmp.eq.s32.totalorder %s15_s11, 0  ;;  %p25_p1 = scmp.ne.s32.totalorder %s534_s7, %s530_s6 }
   0x5   : > { %p26_p2 = scmp.eq.s32.totalorder %s538_s8, 0  ;;  %p453_p4 = scmp.ge.s32.totalorder %s538_s8, 2 }
   0x6   : > { %s576_s13 = scalar_select %p16_p0, %s534_s7, %s18_s12  }
   0x7   : > { %p27_p3 = por %p26_p2, %p25_p1  ;;  %77 = sbr.rel (%p453_p4) target bundleno = 25 (0x19), region = 16 }
   0xe   : > { %80 = sbr.rel (!%p27_p3) target bundleno = 25 (0x19), region = 20  ;;  %s82_s14 = sand.u32 (%p27_p3), 1, %s534_s7  }
   0xf   : > { %s490_s15 = smul.u32 (%p27_p3), 20, %s538_s8 }
  0x10   : > { %s489_s16 = smul.u32 (%p27_p3), 80, %s82_s14 }
  0x11   : > { %s87_s19 = scalar_lea.vmem (%p27_p3), %s664_s0, %s490_s15 }
  0x12   : > { %v103_v0 = vld [vmem:[%s87_s19] sm:$0xff] (%p27_p3)   ;;  %v107_v1 = vld [vmem:[%s87_s19 + $0x8] sm:$0xff] (%p27_p3)   ;;  %v111_v2 = vld [vmem:[%s87_s19 + $0x10] sm:$0xf] (%p27_p3)  ;;  %s84_s20 = scalar_lea.vmem (%p27_p3), [#allocation2], %s489_s16 }
  0x13   : > { %104 = vst [vmem:[%s84_s20] sm:$0xff] (%p27_p3), %v103_v0   ;;  %108 = vst [vmem:[%s84_s20 + $0x8] sm:$0xff] (%p27_p3), %v107_v1   ;;  %v113_v3 = vld [vmem:[%s87_s19 + $0x28] sm:$0xff] (%p27_p3)   ;;  %v117_v4 = vld [vmem:[%s87_s19 + $0x30] sm:$0xff] (%p27_p3)  }
  0x14   : > { %112 = vst [vmem:[%s84_s20 + $0x10] sm:$0xf] (%p27_p3), %v111_v2  ;;  %v121_v5 = vld [vmem:[%s87_s19 + $0x38] sm:$0xf] (%p27_p3)  ;;  %114 = vst [vmem:[%s84_s20 + $0x14] sm:$0xff] (%p27_p3), %v113_v3   ;;  %v123_v6 = vld [vmem:[%s87_s19 + $0x50] sm:$0xff] (%p27_p3)  }
  0x15   : > { %118 = vst [vmem:[%s84_s20 + $0x1c] sm:$0xff] %v117_v4   ;;  %122 = vst [vmem:[%s84_s20 + $0x24] sm:$0xf] %v121_v5  ;;  %v127_v7 = vld [vmem:[%s87_s19 + $0x58] sm:$0xff]   ;;  %v131_v8 = vld [vmem:[%s87_s19 + $0x60] sm:$0xf] }
  0x16   : > { %124 = vst [vmem:[%s84_s20 + $0x28] sm:$0xff] %v123_v6   ;;  %128 = vst [vmem:[%s84_s20 + $0x30] sm:$0xff] %v127_v7   ;;  %v133_v9 = vld [vmem:[%s87_s19 + $0x78] sm:$0xff]   ;;  %v137_v10 = vld [vmem:[%s87_s19 + $0x80] sm:$0xff]  }
  0x17   : > { %132 = vst [vmem:[%s84_s20 + $0x38] sm:$0xf] %v131_v8  ;;  %v141_v11 = vld [vmem:[%s87_s19 + $0x88] sm:$0xf]  ;;  %134 = vst [vmem:[%s84_s20 + $0x3c] sm:$0xff] %v133_v9  }
  0x18   : > { %138 = vst [vmem:[%s84_s20 + $0x44] sm:$0xff] %v137_v10   ;;  %142 = vst [vmem:[%s84_s20 + $0x4c] sm:$0xf] %v141_v11 }
  0x19 PF: > { %p455_p5 = scmp.ge.s32.totalorder %s538_s8, 1  ;;  %p204_p6 = scmp.lt.s32.totalorder %s538_s8, 3 }
  0x1b   : > { %p205_p7 = pnand %p455_p5, %p204_p6 }
  0x1c   : > { %s211_s21 = sand.u32 (!%p205_p7), 1, %s530_s6   ;;  %p604_p8 = scmp.lt.s32.totalorder (!%p205_p7), %s450_s9, 1  ;;  %vm384_vm0 = vcmask (!%p205_p7), 517120  }
  0x1d   : > { %208 = sbr.rel (%p205_p7) target bundleno = 65 (0x41), region = 61 }
  0x1e   : > { %s491_s22 = smul.u32 (!%p205_p7), 80, %s211_s21 }
  0x20   : > { %s587_s23 = scalar_lea.vmem (!%p205_p7), [#allocation2], %s491_s22 }
  0x21   : > { %v235_v12 = vld [vmem:[%s587_s23] sm:$0x3] (!%p205_p7)  ;;  %v458_v13 = vld [vmem:[%s587_s23 + $0x14] sm:$0x3] (!%p205_p7)  ;;  %v462_v17 = vld [vmem:[%s587_s23 + $0x28] sm:$0x3] (!%p205_p7) }
  0x22   : > { %v239_v14 = vunpack.c.l.bf16 (!%p205_p7), %v235_v12  ;;  %v248_v15 = vunpack.c.l.bf16 (!%p205_p7), %v458_v13  ;;  %v256_v16 = vld [vmem:[%s587_s23] sm:$0x7] (!%p205_p7)  ;;  %v466_v19 = vld [vmem:[%s587_s23 + $0x3c] sm:$0x3] (!%p205_p7)  ;;  %v470_v20 = vld [vmem:[%s587_s23 + $0x28] sm:$0x7] (!%p205_p7)  ;;  %v285_v22 = vunpack.c.l.bf16 (!%p205_p7), %v462_v17 }
  0x23   : > { %v260_v18 = vunpack.c.l.bf16 (!%p205_p7), %v256_v16  ;;  %v310_v23 = vunpack.c.l.bf16 (!%p205_p7), %v470_v20  ;;  %v482_v24 = vld [vmem:[%s587_s23 + $0x4] sm:$0x7] (!%p205_p7)  ;;  %v459_v26 = vld [vmem:[%s587_s23 + $0x18] sm:$0x3] (!%p205_p7)  ;;  %v463_v32 = vld [vmem:[%s587_s23 + $0x2c] sm:$0x3] (!%p205_p7)  ;;  %v298_v37 = vunpack.c.l.bf16 (!%p205_p7), %v466_v19 }
  0x24   : > { %v252_v21 = vmax.f32 %v239_v14, %v248_v15  ;;  %v236_v25 = vld [vmem:[%s587_s23 + $0x4] sm:$0x3]  ;;  %v360_v28 = vunpack.c.l.bf16 %v482_v24  ;;  %v249_v30 = vunpack.c.l.bf16 %v459_v26  ;;  %v471_v35 = vld [vmem:[%s587_s23 + $0x2c] sm:$0x7]  ;;  %v467_v40 = vld [vmem:[%s587_s23 + $0x40] sm:$0x3]  ;;  %v286_v44 = vunpack.c.l.bf16 %v463_v32 }
  0x25   : > { %v268_v27 = vrot.slane %v260_v18, 1  ;;  %v240_v29 = vunpack.c.l.bf16 %v236_v25  ;;  %v257_v31 = vld [vmem:[%s587_s23 + $0x4] sm:$0x7]  ;;  %v318_v38 = vrot.slane %v310_v23, 1  ;;  %v478_v41 = vld [vmem:[%s587_s23 + $0x18] sm:$0x3]  ;;  %v311_v45 = vunpack.c.l.bf16 %v471_v35 }
  0x26   : > { %v474_v33 = vld [vmem:[%s587_s23 + $0x4] sm:$0x3]  ;;  %v261_v34 = vunpack.c.l.bf16 %v257_v31  ;;  %v610_v42 = vrot.slane %v360_v28, 1  ;;  %v483_v46 = vld [vmem:[%s587_s23 + $0x8] sm:$0x7]  ;;  %v299_v55 = vunpack.c.l.bf16 %v467_v40  ;;  %s671_s9 = smov (!%p604_p8, %s450_s9), 1  ;;  %v348_v8 = vunpack.c.l.bf16 %v478_v41 }
  0x27   : > { %v276_v36 = vmax.f32 %v252_v21, %v268_v27  ;;  %v253_v39 = vmax.f32 %v240_v29, %v249_v30  ;;  %v237_v47 = vld [vmem:[%s587_s23 + $0x8] sm:$0x3]  ;;  %v335_v49 = vunpack.c.l.bf16 %v474_v33  ;;  %v460_v51 = vld [vmem:[%s587_s23 + $0x1c] sm:$0x3]  ;;  %v464_v53 = vld [vmem:[%s587_s23 + $0x30] sm:$0x3]  ;;  %v361_v63 = vunpack.c.l.bf16 %v483_v46 }
  0x28   : > { %v269_v43 = vrot.slane %v261_v34, 1  ;;  %v241_v50 = vunpack.c.l.bf16 %v237_v47  ;;  %v258_v52 = vld [vmem:[%s587_s23 + $0x8] sm:$0x7]  ;;  %v479_v57 = vld [vmem:[%s587_s23 + $0x1c] sm:$0x3]  ;;  %v250_v58 = vunpack.c.l.bf16 %v460_v51  ;;  %v319_v62 = vrot.slane %v311_v45, 1 }
  0x29   : > { %v289_v48 = vmax.f32 %v276_v36, %v285_v22  ;;  %v475_v56 = vld [vmem:[%s587_s23 + $0x8] sm:$0x3]  ;;  %v262_v59 = vunpack.c.l.bf16 %v258_v52  ;;  %v472_v60 = vld [vmem:[%s587_s23 + $0x30] sm:$0x7]  ;;  %v287_v0 = vunpack.c.l.bf16 %v464_v53  ;;  %v468_v1 = vld [vmem:[%s587_s23 + $0x44] sm:$0x3]  ;;  %v349_v10 = vunpack.c.l.bf16 %v479_v57 }
  0x2a   : > { %v277_v54 = vmax.f32 %v253_v39, %v269_v43  ;;  %v254_v3 = vmax.f32 %v241_v50, %v250_v58  ;;  %v312_v5 = vunpack.c.l.bf16 %v472_v60  ;;  %v238_v6 = vld [vmem:[%s587_s23 + $0xc] sm:$0x3]  ;;  %v336_v9 = vunpack.c.l.bf16 %v475_v56  ;;  %v461_v11 = vld [vmem:[%s587_s23 + $0x20] sm:$0x3]  ;;  %v465_v13 = vld [vmem:[%s587_s23 + $0x34] sm:$0x3] }
  0x2b   : > { %v302_v61 = vmax.f32 %v289_v48, %v298_v37  ;;  %v270_v4 = vrot.slane %v262_v59, 1  ;;  %v259_v12 = vld [vmem:[%s587_s23 + $0xc] sm:$0x7]  ;;  %v300_v16 = vunpack.c.l.bf16 %v468_v1  ;;  %v242_v17 = vunpack.c.l.bf16 %v238_v6  ;;  %v473_v18 = vld [vmem:[%s587_s23 + $0x34] sm:$0x7]  ;;  %s488_s25 = sshll.u32 %s671_s9, 3 }
  0x2c   : > { %v290_v2 = vmax.f32 %v277_v54, %v286_v44  ;;  %v369_v20 = vrot.slane %v361_v63, 1  ;;  %v476_v21 = vld [vmem:[%s587_s23 + $0xc] sm:$0x3]  ;;  %v251_v23 = vunpack.c.l.bf16 %v461_v11  ;;  %v263_v24 = vunpack.c.l.bf16 %v259_v12  ;;  %v469_v29 = vld [vmem:[%s587_s23 + $0x48] sm:$0x3]  ;;  %s641_s28 = scalar_lea.vmem %s665_s1, %s488_s25 }
  0x2d   : > { %v326_v7 = vmax.f32 %v302_v61, %v318_v38  ;;  %v278_v15 = vmax.f32 %v254_v3, %v270_v4  ;;  %v484_v22 = vld [vmem:[%s587_s23 + $0xc] sm:$0x7]  ;;  %v320_v27 = vrot.slane %v312_v5, 1  ;;  %v288_v28 = vunpack.c.l.bf16 %v465_v13  ;;  %v480_v31 = vld [vmem:[%s587_s23 + $0x20] sm:$0x3] }
  0x2e   : > { %v303_v14 = vmax.f32 %v290_v2, %v299_v55  ;;  %v255_v32 = vmax.f32 %v242_v17, %v251_v23  ;;  %v271_v33 = vrot.slane %v263_v24, 1  ;;  %v313_v34 = vunpack.c.l.bf16 %v473_v18  ;;  %v477_v46 = vld [vmem:[%s587_s23 + $0x10] sm:$0x3]  ;;  %v481_v53 = vld [vmem:[%s587_s23 + $0x24] sm:$0x3] }
  0x2f   : > { %v339_v19 = vmax.f32 %v326_v7, %v335_v49  ;;  %v291_v26 = vmax.f32 %v278_v15, %v287_v0  ;;  %v337_v37 = vunpack.c.l.bf16 %v476_v21  ;;  %v362_v38 = vunpack.c.l.bf16 %v484_v22  ;;  %v485_v47 = vld [vmem:[%s587_s23 + $0x10] sm:$0x7] }
  0x30   : > { %v327_v25 = vmax.f32 %v303_v14, %v319_v62  ;;  %v279_v40 = vmax.f32 %v255_v32, %v271_v33  ;;  %v301_v41 = vunpack.c.l.bf16 %v469_v29  ;;  %v350_v45 = vunpack.c.l.bf16 %v480_v31 }
  0x31   : > { %v352_v30 = vmax.f32 %v339_v19, %v348_v8  ;;  %v304_v36 = vmax.f32 %v291_v26, %v300_v16  ;;  %v321_v50 = vrot.slane %v313_v34, 1  ;;  %v370_v52 = vrot.slane %v362_v38, 1 }
  0x32   : > { %v340_v35 = vmax.f32 %v327_v25, %v336_v9  ;;  %v292_v49 = vmax.f32 %v279_v40, %v288_v28  ;;  %v338_v55 = vunpack.c.l.bf16 %v477_v46  ;;  %v363_v56 = vunpack.c.l.bf16 %v485_v47 }
  0x33   : > { %v376_v39 = vmax.f32 %v352_v30, %v610_v42  ;;  %v328_v44 = vmax.f32 %v304_v36, %v320_v27  ;;  %v351_v60 = vunpack.c.l.bf16 %v481_v53 }
  0x34   : > { %v353_v43 = vmax.f32 %v340_v35, %v349_v10  ;;  %v305_v54 = vmax.f32 %v292_v49, %v301_v41  ;;  %v371_v63 = vrot.slane %v363_v56, 1 }
  0x35   : > { %v380_v48 = vpack.c.bf16 %v376_v39, %v376_v39  ;;  %v341_v51 = vmax.f32 %v328_v44, %v337_v37 }
  0x36   : > { %v377_v42 = vmax.f32 %v353_v43, %v369_v20  ;;  %v329_v59 = vmax.f32 %v305_v54, %v321_v50 }
  0x37   : > { %385 = vst.msk [vmem:[%s641_s28] sm:$0x3] %vm384_vm0, %v380_v48  ;;  %v354_v58 = vmax.f32 %v341_v51, %v350_v45 }
  0x38   : > { %v381_v57 = vpack.c.bf16 %v377_v42, %v377_v42  ;;  %v342_v62 = vmax.f32 %v329_v59, %v338_v55 }
  0x39   : > { %v378_v61 = vmax.f32 %v354_v58, %v370_v52 }
  0x3a   : > { %386 = vst.msk [vmem:[%s641_s28 + $0x2] sm:$0x3] %vm384_vm0, %v381_v57  ;;  %v355_v1 = vmax.f32 %v342_v62, %v351_v60 }
  0x3b   : > { %v382_v0 = vpack.c.bf16 %v378_v61, %v378_v61 }
  0x3c   : > { %v379_v2 = vmax.f32 %v355_v1, %v371_v63 }
  0x3d   : > { %387 = vst.msk [vmem:[%s641_s28 + $0x4] sm:$0x3] %vm384_vm0, %v382_v0 }
  0x3e   : > { %v383_v3 = vpack.c.bf16 %v379_v2, %v379_v2 }
  0x40   : > { %388 = vst.msk [vmem:[%s641_s28 + $0x6] sm:$0x3] %vm384_vm0, %v383_v3 }
  0x41 PF: > { %p8_p9 = scmp.ge.s32.totalorder %s567_s10, 4   ;;  %s667_s6 = smov %s534_s7 }
  0x42   : > { %s668_s7 = smov %s576_s13  ;;  %s669_s8 = smov %s567_s10 }
  0x43   :  { %10 = sbr.rel (!%p8_p9) target bundleno = 2 (0x2), region = 105 }

// kernel: resnet_forward.10
= control target key start
LH: loop header
LB: loop body
LE: loop exit
PB: predicated region body
PF: predicated region fallthrough
CT: control target
= control target key end

     0   :  { %s2119_s15 = smov 0   ;;  %s2438_s0 = inlined_call_operand.vmem [shape: bf16[1,2,6,6,64], index: 0, kind: input, shape index: {}]   ;;  %s2439_s1 = inlined_call_operand.vmem [shape: bf16[9,64,64], index: 1, kind: input, shape index: {}]   ;;  %s2440_s2 = inlined_call_operand.vmem [shape: f32[1,64], index: 2, kind: input, shape index: {}]   ;;  %s2441_s3 = inlined_call_operand.vmem [shape: bf16[2,4,4,64], index: 3, kind: input, shape index: {}]   ;;  %s2442_s4 = inlined_call_operand.vmem [shape: bf16[2,4,4,64], index: 4, kind: output, shape index: {}]  }
   0x1 LB: > { %s1686_s16 = sadd.s32 4294967295, %s2089_s15   ;;  %p1690_p0 = scmp.ge.s32.totalorder %s2089_s15, 1  ;;  %s2089_s15 = sphi %s2119_s15, %s14_s15  }
   0x2   : > { %p172_p1 = scmp.lt.s32.totalorder %s2089_s15, 3 }
   0x4   : > { %p173_p2 = pnand %p1690_p0, %p172_p1 }
   0x5   : > { %v2035_v0 = vld [vmem:[%s2439_s1 + $0x20] sm:$0xff] (!%p173_p2)   ;;  %v2091_v1 = vmov (!%p173_p2), 0.0   ;;  %v2037_v3 = vld [vmem:[%s2439_s1 + $0x28] sm:$0xff] (!%p173_p2)   ;;  %vm2092_vm0 = vmmov (!%p173_p2), 0   ;;  %p203_p3 = scmp.lt.s32.totalorder (!%p173_p2), %s1686_s16, 1  ;;  %v2039_v5 = vld [vmem:[%s2439_s1 + $0x30] sm:$0xff] (!%p173_p2)   ;;  %v348_v23 = vlaneseq (!%p173_p2) }
   0x6   : > { %176 = sbr.rel (%p173_p2) target bundleno = 331 (0x14b), region = 36  ;;  %1915 = vmatprep.subr.bf16.mxu0 (!%p173_p2), %v2091_v1  ;;  %1927 = vmatprep.subr.bf16.mxu1 (!%p173_p2), %v2091_v1  ;;  %v2036_v2 = vld [vmem:[%s2439_s1] sm:$0xff] (!%p173_p2)   ;;  %v2038_v4 = vld [vmem:[%s2439_s1 + $0x8] sm:$0xff] (!%p173_p2)   ;;  %v2040_v6 = vld [vmem:[%s2439_s1 + $0x10] sm:$0xff] (!%p173_p2)   ;;  %vm271_vm1 = vsmask.f32 (!%p173_p2), 1280 }
   0x7   : > { %1916 = vmatpush3.bf16.msra.mxu0 (!%p173_p2), %v2035_v0  ;;  %1923 = vmatprep.mubr.msk.bf16.mxu0 (!%p173_p2), %vm2092_vm0, %v2091_v1  ;;  %v2041_v7 = vld [vmem:[%s2439_s1 + $0x38] sm:$0xff] (!%p173_p2)   ;;  %vm272_vm2 = vsmask.f32 (!%p173_p2), 3336  ;;  %vm274_vm3 = vsmask.f32 (!%p173_p2), 5392  ;;  %v349_v45 = vshrl.u32 (!%p173_p2), %v348_v23, 7 }
   0x8   : > { %1928 = vmatpush3.bf16.msra.mxu1 (!%p173_p2), %v2036_v2  ;;  %1917 = vmatprep.subr.bf16.mxu0 (!%p173_p2), %v2091_v1  ;;  %v2042_v8 = vld [vmem:[%s2439_s1 + $0x18] sm:$0xff] (!%p173_p2)   ;;  %vm276_vm4 = vsmask.f32 (!%p173_p2), 7448  ;;  %vm2171_vm5 = vmor (!%p173_p2), %vm271_vm1, %vm272_vm2  ;;  %v2093_v52 = vmov (!%p173_p2), 1983009808   ;;  %vm558_vm8 = vcmask (!%p173_p2), 1040384  }
   0x9   : > { %1929 = vmatprep.subr.bf16.mxu1 (!%p173_p2), %v2091_v1  ;;  %1935 = vmatprep.mubr.msk.bf16.mxu1 (!%p173_p2), %vm2092_vm0, %v2091_v1  ;;  %vm2182_vm6 = vmor (!%p173_p2), %vm2171_vm5, %vm274_vm3  ;;  %v346_v53 = vunpack.c.l.s4 (!%p173_p2), %v2093_v52  ;;  %vm559_vm9 = vcmask (!%p173_p2), 1042434   ;;  %vm384_vm10 = vcmask (!%p173_p2), 523264   ;;  %vm561_vm12 = vcmask (!%p173_p2), 1044484   ;;  %v2048_v12 = vld [vmem:[%s2439_s1 + $0x68] sm:$0xff] (!%p173_p2)  }
   0xa   : > { %vm2190_vm7 = vmor (!%p173_p2), %vm2182_vm6, %vm276_vm4  ;;  %vm563_vm14 = vcmask (!%p173_p2), 1046534   ;;  %v2065_v37 = vld [vmem:[%s2439_s1 + $0xc8] sm:$0xff] (!%p173_p2)  }
   0xb   : > { %1918 = vmatpush3.bf16.msra.mxu0 (!%p173_p2), %v2037_v3  ;;  %v347_v59 = vunpack.c.0.s8 (!%p173_p2), %v346_v53  ;;  %vm560_vm11 = vmor (!%p173_p2), %vm558_vm8, %vm559_vm9 }
   0xc   : > { %1930 = vmatpush3.bf16.msra.mxu1 (!%p173_p2), %v2038_v4  ;;  %1919 = vmatprep.subr.bf16.mxu0 (!%p173_p2), %v2091_v1  ;;  %v2046_v4 = vld [vmem:[%s2439_s1 + $0x60] sm:$0xff] (!%p173_p2)   ;;  %vm2225_vm13 = vmor (!%p173_p2), %vm560_vm11, %vm561_vm12 }
   0xd   : > { %s2454_s16 = smov (!%p203_p3, %s1686_s16), 1  ;;  %1931 = vmatprep.subr.bf16.mxu1 %v2091_v1  ;;  %v2208_v63 = vsub.s32 %v347_v59, %v349_v45  ;;  %vm2242_vm15 = vmor %vm2225_vm13, %vm563_vm14 }
   0xe   : > { %s2023_s27 = smul.u32 24, %s2454_s16  ;;  %s1868_s22 = sshll.u32 %s2454_s16, 3 }
   0xf   : > { %1920 = vmatpush3.bf16.msra.mxu0 %v2039_v5  ;;  %s212_s25 = scalar_lea.vmem %s2441_s3, %s1868_s22  ;;  %s217_s29 = scalar_lea.vmem %s2442_s4, %s1868_s22 }
  0x10   : > { %s2164_s8 = scalar_lea.vmem %s2438_s0, %s2023_s27  ;;  %1932 = vmatpush3.bf16.msra.mxu1 %v2040_v6  ;;  %1921 = vmatprep.subr.bf16.mxu0 %v2091_v1 }
  0x11   : > { %v1696_v9 = vld.sshfl [vmem:[%s2164_s8] sm:$0x13 pattern:$0x76325410]  ;;  %1933 = vmatprep.subr.bf16.mxu1 %v2091_v1 }
  0x12   : > { %v1697_v10 = vld.sshfl [vmem:[%s2164_s8 + $0x4] sm:$0x13 pattern:$0x76325410]  ;;  %v246_v11 = vcombine.high %v1696_v9, %v1696_v9  ;;  %v279_v13 = vshrl.u32 %v1696_v9, 16  ;;  %v282_v14 = vshll.u32 %v1696_v9, 16 }
  0x13   : > { %v1698_v15 = vld.sshfl [vmem:[%s2164_s8 + $0x8] sm:$0x13 pattern:$0x76325410]  ;;  %v254_v16 = vcombine.high %v1697_v10, %v1697_v10  ;;  %v293_v17 = vshrl.u32 %v1697_v10, 16  ;;  %v296_v18 = vshll.u32 %v1697_v10, 16  ;;  %1922 = vmatpush3.bf16.msra.mxu0 %v2041_v7 }
  0x14   : > { %v1699_v19 = vld.sshfl [vmem:[%s2164_s8 + $0xc] sm:$0x13 pattern:$0x76325410]  ;;  %v262_v20 = vcombine.high %v1698_v15, %v1698_v15  ;;  %v281_v21 = vrot.slane %v279_v13, 6  ;;  %v284_v22 = vrot.slane %v282_v14, 7  ;;  %1934 = vmatpush3.bf16.msra.mxu1 %v2042_v8  ;;  %1939 = vmatprep.subr.bf16.mxu0 %v2091_v1 }
  0x15   : > { %v270_v24 = vcombine.high %v1699_v19, %v1699_v19  ;;  %v288_v26 = vshll.u32 %v246_v11, 16  ;;  %v295_v27 = vrot.slane %v293_v17, 6  ;;  %v298_v28 = vrot.slane %v296_v18, 7  ;;  %1951 = vmatprep.subr.bf16.mxu1 %v2091_v1  ;;  %v2045_v7 = vld [vmem:[%s2439_s1 + $0x40] sm:$0xff]  }
  0x16   : > { %v285_v29 = vor.u32 %v284_v22, %v281_v21  ;;  %v302_v30 = vshll.u32 %v254_v16, 16  ;;  %v307_v31 = vshrl.u32 %v1698_v15, 16  ;;  %v310_v32 = vshll.u32 %v1698_v15, 16 }
  0x17   : > { %v290_v33 = vrot.slane %v288_v26, 7  ;;  %v299_v34 = vor.u32 %v298_v28, %v295_v27  ;;  %v316_v35 = vshll.u32 %v262_v20, 16  ;;  %v321_v36 = vshrl.u32 %v1699_v19, 16  ;;  %v2047_v26 = vld [vmem:[%s2439_s1 + $0x48] sm:$0xff]   ;;  %v2050_v28 = vld [vmem:[%s2439_s1 + $0x70] sm:$0xff]  }
  0x18   : > { %v286_v38 = vrot.slane %v285_v29, 2  ;;  %v304_v39 = vrot.slane %v302_v30, 7  ;;  %v309_v40 = vrot.slane %v307_v31, 6  ;;  %v312_v41 = vrot.slane %v310_v32, 7 }
  0x19   : > { %v300_v42 = vrot.slane %v299_v34, 2  ;;  %v323_v43 = vrot.slane %v321_v36, 6  ;;  %v324_v44 = vshll.u32 %v1699_v19, 16  ;;  %v318_v47 = vrot.slane %v316_v35, 7 }
  0x1a   : > { %v313_v46 = vor.u32 %v312_v41, %v309_v40  ;;  %v330_v48 = vshll.u32 %v270_v24, 16  ;;  %v291_v49 = vsel %vm2190_vm7, %v286_v38, %v290_v33  ;;  %v2077_v54 = vld.sshfl [vmem:[%s2164_s8] sm:$0xf pattern:$0x76325410]  ;;  %v2052_v40 = vld [vmem:[%s2439_s1 + $0x78] sm:$0xff]  }
  0x1b   : > { %v2199_v50 = vsel %vm2190_vm7, %v300_v42, %v304_v39  ;;  %v326_v51 = vrot.slane %v324_v44, 7  ;;  %v2078_v55 = vld.sshfl [vmem:[%s2164_s8 + $0x8] sm:$0xf pattern:$0x76325410]  ;;  %v2049_v39 = vld [vmem:[%s2439_s1 + $0x50] sm:$0xff]  }
  0x1c   : > { %v314_v56 = vrot.slane %v313_v46, 2  ;;  %v332_v57 = vrot.slane %v330_v48, 7  ;;  %v343_v60 = vcombine.low %v291_v49, %v2199_v50  ;;  %v1718_v5 = vld.sshfl [vmem:[%s2164_s8] sm:$0x12 pattern:$0x76325410]  ;;  %v449_v6 = vcombine.low %v2077_v54, %v2078_v55 }
  0x1d   : > { %v327_v58 = vor.u32 %v326_v51, %v323_v43  ;;  %v1719_v8 = vld.sshfl [vmem:[%s2164_s8 + $0x4] sm:$0x12 pattern:$0x76325410]  ;;  %v533_v9 = vcombine.high %v1718_v5, %v1718_v5  ;;  %v1722_v15 = vrot.slane %v1718_v5, 9  ;;  %v2051_v44 = vld [vmem:[%s2439_s1 + $0x58] sm:$0xff]  }
  0x1e   : > { %v2206_v61 = vsel %vm2190_vm7, %v314_v56, %v318_v47  ;;  %v351_v3 = vrot.slane %v343_v60, %v2208_v63  ;;  %v1720_v13 = vld.sshfl [vmem:[%s2164_s8 + $0x8] sm:$0x12 pattern:$0x76325410]  ;;  %v541_v14 = vcombine.high %v1719_v8, %v1719_v8  ;;  %v1723_v16 = vrot.slane %v1719_v8, 9  ;;  %1936 = vmatmul.mubr.msk.bf16.vlgmr.msra.gmra.mrb[0].mxu1 %vm384_vm10, %v449_v6  ;;  %v2056_v46 = vld [vmem:[%s2439_s1 + $0xa0] sm:$0xff]  }
  0x1f   : > { %v328_v62 = vrot.slane %v327_v58, 2  ;;  %v1721_v17 = vld.sshfl [vmem:[%s2164_s8 + $0xc] sm:$0x12 pattern:$0x76325410]  ;;  %v549_v18 = vcombine.high %v1720_v13, %v1720_v13  ;;  %v567_v19 = vrot.slane %v533_v9, 7  ;;  %1952 = vmatpush3.bf16.msra.mxu1 %v2046_v4  ;;  %1959 = vmatprep.mubr.msk.bf16.mxu1 %vm2092_vm0, %v2091_v1  ;;  %v887_v10 = vcombine.low %v2199_v50, %v2206_v61 }
  0x20   : > { %v1724_v20 = vrot.slane %v1720_v13, 9  ;;  %v557_v22 = vcombine.high %v1721_v17, %v1721_v17  ;;  %v571_v24 = vrot.slane %v541_v14, 7  ;;  %v1725_v25 = vrot.slane %v1721_v17, 9  ;;  %1953 = vmatprep.subr.bf16.mxu1 %v2091_v1  ;;  %v2057_v5 = vld [vmem:[%s2439_s1 + $0x88] sm:$0xff]   ;;  %v2060_v6 = vld [vmem:[%s2439_s1 + $0xb0] sm:$0xff]   ;;  %v2062_v50 = vld [vmem:[%s2439_s1 + $0xb8] sm:$0xff]  }
  0x21   : > { %v2212_v0 = vsel %vm2190_vm7, %v328_v62, %v332_v57  ;;  %v575_v27 = vrot.slane %v549_v18, 7  ;;  %v568_v30 = vsel %vm2242_vm15, %v1722_v15, %v567_v19  ;;  %v2079_v33 = vld.sshfl [vmem:[%s2164_s8 + $0x4] sm:$0xf pattern:$0x76325410] }
  0x22   : > { %v344_v2 = vcombine.low %v2206_v61, %v2212_v0  ;;  %v579_v29 = vrot.slane %v557_v22, 7  ;;  %v2262_v31 = vsel %vm2242_vm15, %v1723_v16, %v571_v24  ;;  %v2080_v34 = vld.sshfl [vmem:[%s2164_s8 + $0xc] sm:$0xf pattern:$0x76325410]  ;;  %v2053_v57 = vld [vmem:[%s2439_s1 + $0x80] sm:$0xff]  }
  0x23   : > { %v2266_v32 = vsel %vm2242_vm15, %v1724_v20, %v575_v27  ;;  %1954 = vmatpush3.bf16.msra.mxu1 %v2048_v12  ;;  %v590_v36 = vcombine.low %v568_v30, %v2262_v31  ;;  %v1763_v43 = vld.sshfl [vmem:[%s2164_s8 + $0x10] sm:$0x13 pattern:$0x76325410]  ;;  %v711_v45 = vcombine.low %v2079_v33, %v2080_v34  ;;  %v2061_v24 = vld [vmem:[%s2439_s1 + $0x98] sm:$0xff]   ;;  %v2064_v27 = vld [vmem:[%s2439_s1 + $0xe0] sm:$0xff]  }
  0x24   : > { %v2230_v11 = vrot.slane %v344_v2, %v2208_v63  ;;  %v580_v35 = vsel %vm2242_vm15, %v1725_v25, %v579_v29  ;;  %1955 = vmatprep.subr.bf16.mxu1 %v2091_v1  ;;  %v821_v47 = vcombine.high %v1763_v43, %v1763_v43  ;;  %v865_v48 = vshrl.u32 %v1763_v43, 16  ;;  %v1784_v51 = vld.sshfl [vmem:[%s2164_s8 + $0x10] sm:$0x12 pattern:$0x76325410]  ;;  %v2058_v2 = vld [vmem:[%s2439_s1 + $0xa8] sm:$0xff]  }
  0x25   : > { %v591_v38 = vcombine.low %v2266_v32, %v580_v35  ;;  %v598_v41 = vrot.slane %v590_v36, %v2208_v63  ;;  %v868_v49 = vshll.u32 %v1763_v43, 16  ;;  %v1013_v55 = vcombine.high %v1784_v51, %v1784_v51  ;;  %v2059_v12 = vld [vmem:[%s2439_s1 + $0x90] sm:$0xff]   ;;  %v2066_v36 = vld [vmem:[%s2439_s1 + $0xe8] sm:$0xff]  }
  0x26   : > { %v359_v21 = vcombine.low %v351_v3, %v2230_v11  ;;  %v867_v52 = vrot.slane %v865_v48, 6  ;;  %v874_v54 = vshll.u32 %v821_v47, 16  ;;  %v1788_v58 = vrot.slane %v1784_v51, 9  ;;  %v2068_v43 = vld [vmem:[%s2439_s1 + $0xf0] sm:$0xff]   ;;  %v2070_v48 = vld [vmem:[%s2439_s1 + $0xf8] sm:$0xff]  }
  0x27   : > { %1956 = vmatpush3.bf16.msra.mxu1 %v2050_v28  ;;  %v2286_v42 = vrot.slane %v591_v38, %v2208_v63  ;;  %v870_v53 = vrot.slane %v868_v49, 7  ;;  %v1028_v62 = vrot.slane %v1013_v55, 7  ;;  %v1039_v8 = vcombine.low %v2262_v31, %v2266_v32  ;;  %v1826_v16 = vld.sshfl [vmem:[%s2164_s8 + $0x14] sm:$0x13 pattern:$0x76325410] }
  0x28   : > { %1924 = vmatmul.mubr.msk.bf16.vlgmr.msra.gmra.mrb[0].mxu0 %vm384_vm10, %v359_v21  ;;  %1957 = vmatprep.subr.bf16.mxu1 %v2091_v1  ;;  %v876_v60 = vrot.slane %v874_v54, 7  ;;  %v1270_v61 = vcombine.high %v1826_v16, %v1826_v16  ;;  %v1314_v17 = vshrl.u32 %v1826_v16, 16  ;;  %v1317_v18 = vshll.u32 %v1826_v16, 16  ;;  %v2069_v49 = vld [vmem:[%s2439_s1 + $0xd8] sm:$0xff]  }
  0x29   : > { %1940 = vmatpush3.bf16.msra.mxu0 %v2045_v7  ;;  %1947 = vmatprep.mubr.msk.bf16.mxu0 %vm2092_vm0, %v2091_v1  ;;  %v606_v56 = vcombine.low %v598_v41, %v2286_v42  ;;  %v871_v59 = vor.u32 %v870_v53, %v867_v52  ;;  %v2312_v4 = vsel %vm2242_vm15, %v1788_v58, %v1028_v62  ;;  %v2073_v52 = vld [vmem:[%s2439_s1 + $0x100] sm:$0xff]   ;;  %v2075_v53 = vld [vmem:[%s2439_s1 + $0x110] sm:$0xff]   ;;  %v2076_v54 = vld [vmem:[%s2439_s1 + $0x118] sm:$0xff]  }
  0x2a   : > { %1941 = vmatprep.subr.bf16.mxu0 %v2091_v1  ;;  %v1040_v9 = vcombine.low %v580_v35, %v2312_v4  ;;  %v1047_v14 = vrot.slane %v1039_v8, %v2208_v63  ;;  %v1316_v20 = vrot.slane %v1314_v17, 6  ;;  %v1319_v21 = vrot.slane %v1317_v18, 7  ;;  %v2063_v35 = vld [vmem:[%s2439_s1 + $0xc0] sm:$0xff]  }
  0x2b   : > { %1958 = vmatpush3.bf16.msra.mxu1 %v2052_v40  ;;  %v872_v3 = vrot.slane %v871_v59, 2  ;;  %v1323_v22 = vshll.u32 %v1270_v61, 16 }
  0x2c   : > { %1975 = vmatprep.subr.bf16.mxu1 %v2091_v1  ;;  %v1054_v15 = vrot.slane %v1040_v9, %v2208_v63  ;;  %v1320_v28 = vor.u32 %v1319_v21, %v1316_v20 }
  0x2d   : > { %1942 = vmatpush3.bf16.msra.mxu0 %v2047_v26  ;;  %v2325_v7 = vsel %vm2190_vm7, %v872_v3, %v876_v60  ;;  %v1847_v26 = vld.sshfl [vmem:[%s2164_s8 + $0x14] sm:$0x12 pattern:$0x76325410]  ;;  %v1325_v29 = vrot.slane %v1323_v22, 7 }
  0x2e   : > { %1943 = vmatprep.subr.bf16.mxu0 %v2091_v1  ;;  %1960 = vmatmul.mubr.msk.bf16.vlgmr.msra.gmra.mrb[4].mxu1 %vm384_vm10, %v711_v45  ;;  %v888_v13 = vcombine.low %v2212_v0, %v2325_v7  ;;  %v895_v0 = vrot.slane %v887_v10, %v2208_v63  ;;  %v1055_v25 = vcombine.low %v1047_v14, %v1054_v15  ;;  %v1851_v31 = vrot.slane %v1847_v26, 9  ;;  %v2082_v45 = vld.sshfl [vmem:[%s2164_s8 + $0x10] sm:$0xf pattern:$0x76325410] }
  0x2f   : > { %1976 = vmatpush3.bf16.msra.mxu1 %v2056_v46  ;;  %1983 = vmatprep.mubr.msk.bf16.mxu1 %vm2092_vm0, %v2091_v1  ;;  %v1462_v30 = vcombine.high %v1847_v26, %v1847_v26  ;;  %v1321_v33 = vrot.slane %v1320_v28, 2  ;;  %v2067_v46 = vld [vmem:[%s2439_s1 + $0xd0] sm:$0xff]  }
  0x30   : > { %1977 = vmatprep.subr.bf16.mxu1 %v2091_v1  ;;  %v902_v19 = vrot.slane %v888_v13, %v2208_v63 }
  0x31   : > { %1944 = vmatpush3.bf16.msra.mxu0 %v2049_v39  ;;  %v1477_v34 = vrot.slane %v1462_v30, 7  ;;  %v1326_v38 = vsel %vm2190_vm7, %v1321_v33, %v1325_v29 }
  0x32   : > { %1945 = vmatprep.subr.bf16.mxu0 %v2091_v1  ;;  %v903_v32 = vcombine.low %v895_v0, %v902_v19  ;;  %v1337_v23 = vcombine.low %v2325_v7, %v1326_v38 }
  0x33   : > { %1978 = vmatpush3.bf16.msra.mxu1 %v2058_v2  ;;  %v1478_v39 = vsel %vm2242_vm15, %v1851_v31, %v1477_v34 }
  0x34   : > { %1979 = vmatprep.subr.bf16.mxu1 %v2091_v1  ;;  %v1489_v40 = vcombine.low %v2312_v4, %v1478_v39  ;;  %v1351_v47 = vrot.slane %v1337_v23, %v2208_v63  ;;  %v1586_v23 = vld [vmem:[%s212_s25 + $0x4] sm:$0x3] }
  0x35   : > { %1946 = vmatpush3.bf16.msra.mxu0 %v2051_v44  ;;  %v2081_v44 = vld.sshfl [vmem:[%s2164_s8 + $0x8] sm:$0xf pattern:$0x76325410] }
  0x36   : > { %1963 = vmatprep.subr.bf16.mxu0 %v2091_v1  ;;  %v1503_v41 = vrot.slane %v1489_v40, %v2208_v63  ;;  %v1352_v51 = vcombine.low %v2230_v11, %v1351_v47  ;;  %v1160_v63 = vcombine.low %v2081_v44, %v2082_v45  ;;  %v2074_v11 = vld [vmem:[%s2439_s1 + $0x108] sm:$0xff]   ;;  %v1584_v40 = vld [vmem:[%s212_s25] sm:$0x3]  ;;  %v1590_v45 = vunpack.c.l.bf16 %v1586_v23 }
  0x37   : > { %1980 = vmatpush3.bf16.msra.mxu1 %v2060_v6 }
  0x38   : > { %1948 = vmatmul.mubr.msk.bf16.vlgmr.msra.gmra.mrb[4].mxu0 %vm384_vm10, %v606_v56  ;;  %1981 = vmatprep.subr.bf16.mxu1 %v2091_v1  ;;  %v1504_v55 = vcombine.low %v2286_v42, %v1503_v41  ;;  %v1587_v41 = vld [vmem:[%s212_s25 + $0x6] sm:$0x3] }
  0x39   : > { %1964 = vmatpush3.bf16.msra.mxu0 %v2053_v57  ;;  %1971 = vmatprep.mubr.msk.bf16.mxu0 %vm2092_vm0, %v2091_v1 }
  0x3a   : > { %1965 = vmatprep.subr.bf16.mxu0 %v2091_v1 }
  0x3b   : > { %1982 = vmatpush3.bf16.msra.mxu1 %v2062_v50 }
  0x3c   : > { %1999 = vmatprep.subr.bf16.mxu1 %v2091_v1 }
  0x3d   : > { %1966 = vmatpush3.bf16.msra.mxu0 %v2057_v5 }
  0x3e   : > { %1967 = vmatprep.subr.bf16.mxu0 %v2091_v1  ;;  %1984 = vmatmul.mubr.msk.bf16.vlgmr.msra.gmra.mrb[8].mxu1 %vm384_vm10, %v1055_v25 }
  0x3f   : > { %2000 = vmatpush3.bf16.msra.mxu1 %v2064_v27  ;;  %2007 = vmatprep.mubr.msk.bf16.mxu1 %vm2092_vm0, %v2091_v1 }
  0x40   : > { %2001 = vmatprep.subr.bf16.mxu1 %v2091_v1 }
  0x41   : > { %1968 = vmatpush3.bf16.msra.mxu0 %v2059_v12 }
  0x42   : > { %1969 = vmatprep.subr.bf16.mxu0 %v2091_v1 }
  0x43   : > { %2002 = vmatpush3.bf16.msra.mxu1 %v2066_v36 }
  0x44   : > { %2003 = vmatprep.subr.bf16.mxu1 %v2091_v1 }
  0x45   : > { %1970 = vmatpush3.bf16.msra.mxu0 %v2061_v24 }
  0x46   : > { %1987 = vmatprep.subr.bf16.mxu0 %v2091_v1 }
  0x47   : > { %2004 = vmatpush3.bf16.msra.mxu1 %v2068_v43  ;;  %v1588_v43 = vunpack.c.l.bf16 %v1584_v40 }
  0x48   : > { %1972 = vmatmul.mubr.msk.bf16.vlgmr.msra.gmra.mrb[8].mxu0 %vm384_vm10, %v903_v32  ;;  %2005 = vmatprep.subr.bf16.mxu1 %v2091_v1 }
  0x49   : > { %1988 = vmatpush3.bf16.msra.mxu0 %v2063_v35  ;;  %1995 = vmatprep.mubr.msk.bf16.mxu0 %vm2092_vm0, %v2091_v1 }
  0x4a   : > { %1989 = vmatprep.subr.bf16.mxu0 %v2091_v1 }
  0x4b   : > { %2006 = vmatpush3.bf16.msra.mxu1 %v2070_v48  ;;  %v1865_v48 = vld [vmem:[%s2440_s2] ss:$0 sm:$0xff] }
  0x4d   : > { %1990 = vmatpush3.bf16.msra.mxu0 %v2065_v37  ;;  %v1585_v37 = vld [vmem:[%s212_s25 + $0x2] sm:$0x3] }
  0x4e   : > { %1991 = vmatprep.subr.bf16.mxu0 %v2091_v1  ;;  %2008 = vmatmul.mubr.msk.bf16.vlgmr.msra.gmra.mrb[12].mxu1 %vm384_vm10, %v1352_v51  ;;  %v1589_v44 = vunpack.c.l.bf16 %v1585_v37 }
  0x50   : > { %v1596_v51 = vcombine.low %v1588_v43, %v1589_v44 }
  0x51   : > { %1992 = vmatpush3.bf16.msra.mxu0 %v2067_v46  ;;  %v1591_v46 = vunpack.c.l.bf16 %v1587_v41 }
  0x52   : > { %1993 = vmatprep.subr.bf16.mxu0 %v2091_v1 }
  0x55   : > { %1994 = vmatpush3.bf16.msra.mxu0 %v2069_v49 }
  0x56   : > { %2011 = vmatprep.subr.bf16.mxu0 %v2091_v1 }
  0x58   : > { %1996 = vmatmul.mubr.msk.bf16.vlgmr.msra.gmra.mrb[12].mxu0 %vm384_vm10, %v1160_v63 }
  0x59   : > { %2012 = vmatpush3.bf16.msra.mxu0 %v2073_v52  ;;  %2019 = vmatprep.mubr.msk.bf16.mxu0 %vm2092_vm0, %v2091_v1  ;;  %vm1614_vm0 = vcmask 517120  }
  0x5a   : > { %2013 = vmatprep.subr.bf16.mxu0 %v2091_v1 }
  0x5d   : > { %2014 = vmatpush3.bf16.msra.mxu0 %v2074_v11 }
  0x5e   : > { %2015 = vmatprep.subr.bf16.mxu0 %v2091_v1 }
  0x61   : > { %2016 = vmatpush3.bf16.msra.mxu0 %v2075_v53 }
  0x62   : > { %2017 = vmatprep.subr.bf16.mxu0 %v2091_v1 }
  0x65   : > { %2018 = vmatpush3.bf16.msra.mxu0 %v2076_v54  ;;  %v1597_v54 = vcombine.low %v1590_v45, %v1591_v46 }
  0x68   : > { %2020 = vmatmul.mubr.msk.bf16.vlgmr.msra.gmra.mrb[16].mxu0 %vm384_vm10, %v1504_v55 }
  0xf1   : > { %v511_v56 = vpop.f32.mrb[0].mxu1 }
  0xf2   : > { %v1937_v57 = vpop.f32.mrb[1].mxu1 }
  0xf3   : > { %v514_v58 = vpop.f32.mrb[2].mxu1 }
  0xf4   : > { %v1938_v60 = vpop.f32.mrb[3].mxu1 }
  0xfb   : > { %v422_v59 = vpop.f32.mrb[0].mxu0 }
  0xfc   : > { %v512_v62 = vadd.f32 %v511_v56, %v422_v59  ;;  %v1925_v2 = vpop.f32.mrb[1].mxu0 }
  0xfd   : > { %v425_v3 = vpop.f32.mrb[2].mxu0 }
  0xfe   : > { %v515_v4 = vadd.f32 %v514_v58, %v425_v3  ;;  %v1926_v5 = vpop.f32.mrb[3].mxu0 }
 0x101   : > { %v773_v6 = vpop.f32.mrb[4].mxu1 }
 0x102   : > { %v1961_v7 = vpop.f32.mrb[5].mxu1 }
 0x103   : > { %v776_v8 = vpop.f32.mrb[6].mxu1 }
 0x104   : > { %v1962_v1 = vpop.f32.mrb[7].mxu1 }
 0x10b   : > { %v668_v9 = vpop.f32.mrb[4].mxu0 }
 0x10c   : > { %v675_v10 = vadd.f32 %v668_v9, %v512_v62  ;;  %v1949_v42 = vpop.f32.mrb[5].mxu0 }
 0x10d   : > { %v671_v12 = vpop.f32.mrb[6].mxu0 }
 0x10e   : > { %v676_v13 = vadd.f32 %v671_v12, %v515_v4  ;;  %v780_v14 = vadd.f32 %v773_v6, %v675_v10  ;;  %v1950_v15 = vpop.f32.mrb[7].mxu0 }
 0x110   : > { %v781_v16 = vadd.f32 %v776_v8, %v676_v13 }
 0x111   : > { %v1117_v50 = vpop.f32.mrb[8].mxu1 }
 0x112   : > { %v1985_v61 = vpop.f32.mrb[9].mxu1 }
 0x113   : > { %v1120_v17 = vpop.f32.mrb[10].mxu1 }
 0x114   : > { %v1986_v0 = vpop.f32.mrb[11].mxu1 }
 0x11b   : > { %v965_v18 = vpop.f32.mrb[8].mxu0 }
 0x11c   : > { %v972_v19 = vadd.f32 %v965_v18, %v780_v14  ;;  %v1973_v20 = vpop.f32.mrb[9].mxu0 }
 0x11d   : > { %v968_v21 = vpop.f32.mrb[10].mxu0 }
 0x11e   : > { %v973_v22 = vadd.f32 %v968_v21, %v781_v16  ;;  %v1124_v24 = vadd.f32 %v1117_v50, %v972_v19  ;;  %v1974_v25 = vpop.f32.mrb[11].mxu0 }
 0x120   : > { %v1125_v26 = vadd.f32 %v1120_v17, %v973_v22 }
 0x121   : > { %v1414_v27 = vpop.f32.mrb[12].mxu1 }
 0x122   : > { %v2009_v28 = vpop.f32.mrb[13].mxu1 }
 0x123   : > { %v1417_v29 = vpop.f32.mrb[14].mxu1 }
 0x124   : > { %v2010_v31 = vpop.f32.mrb[15].mxu1 }
 0x12b   : > { %v1222_v30 = vpop.f32.mrb[12].mxu0 }
 0x12c   : > { %v1229_v32 = vadd.f32 %v1222_v30, %v1124_v24  ;;  %v1997_v33 = vpop.f32.mrb[13].mxu0 }
 0x12d   : > { %v1225_v34 = vpop.f32.mrb[14].mxu0 }
 0x12e   : > { %v1230_v35 = vadd.f32 %v1225_v34, %v1125_v26  ;;  %v1421_v36 = vadd.f32 %v1414_v27, %v1229_v32  ;;  %v1998_v38 = vpop.f32.mrb[15].mxu0 }
 0x130   : > { %v1422_v39 = vadd.f32 %v1417_v29, %v1230_v35 }
 0x13b   : > { %v1566_v47 = vpop.f32.mrb[16].mxu0 }
 0x13c   : > { %v1573_v49 = vadd.f32 %v1566_v47, %v1421_v36  ;;  %v2021_v63 = vpop.f32.mrb[17].mxu0 }
 0x13d   : > { %v1569_v52 = vpop.f32.mrb[18].mxu0 }
 0x13e   : > { %v1582_v11 = vadd.f32 %v1865_v48, %v1573_v49  ;;  %v1574_v53 = vadd.f32 %v1569_v52, %v1422_v39  ;;  %v2022_v55 = vpop.f32.mrb[19].mxu0 }
 0x140   : > { %v1600_v56 = vadd.f32 %v1596_v51, %v1582_v11  ;;  %v1583_v57 = vadd.f32 %v1865_v48, %v1574_v53 }
 0x142   : > { %v1602_v58 = vmax.f32 %v1600_v56, 0.0  ;;  %v1601_v59 = vadd.f32 %v1597_v54, %v1583_v57 }
 0x144   : > { %v1606_v60 = vcombine.high %v1602_v58, %v1602_v58  ;;  %v1610_v62 = vpack.c.bf16 %v1602_v58, %v1602_v58  ;;  %v1603_v2 = vmax.f32 %v1601_v59, 0.0 }
 0x146   : > { %v1611_v3 = vpack.c.bf16 %v1606_v60, %v1606_v60  ;;  %1615 = vst.msk [vmem:[%s217_s29] sm:$0x3] %vm1614_vm0, %v1610_v62  ;;  %v1607_v4 = vcombine.high %v1603_v2, %v1603_v2  ;;  %v1612_v5 = vpack.c.bf16 %v1603_v2, %v1603_v2 }
 0x148   : > { %1616 = vst.msk [vmem:[%s217_s29 + $0x2] sm:$0x3] %vm1614_vm0, %v1611_v3  ;;  %v1613_v6 = vpack.c.bf16 %v1607_v4, %v1607_v4  ;;  %1617 = vst.msk [vmem:[%s217_s29 + $0x4] sm:$0x3] %vm1614_vm0, %v1612_v5 }
 0x14a   : > { %1618 = vst.msk [vmem:[%s217_s29 + $0x6] sm:$0x3] %vm1614_vm0, %v1613_v6 }
 0x14b PF: > { %s14_s15 = sadd.s32 1, %s2089_s15  }
 0x14c   : > { %p11_p4 = scmp.ge.s32.totalorder %s14_s15, 4  }
 0x14e   :  { %13 = sbr.rel (!%p11_p4) target bundleno = 1 (0x1), region = 79 }

// kernel: resnet_forward.9
= control target key start
LH: loop header
LB: loop body
LE: loop exit
PB: predicated region body
PF: predicated region fallthrough
CT: control target
= control target key end

     0   :  { %s2034_s12 = smov 0   ;;  %s2350_s0 = inlined_call_operand.vmem [shape: bf16[1,2,6,6,64], index: 0, kind: input, shape index: {}]   ;;  %s2351_s1 = inlined_call_operand.vmem [shape: bf16[9,64,64], index: 1, kind: input, shape index: {}]   ;;  %s2352_s2 = inlined_call_operand.vmem [shape: f32[1,64], index: 2, kind: input, shape index: {}]   ;;  %s2353_s3 = inlined_call_operand.vmem [shape: bf16[2,4,4,64], index: 3, kind: output, shape index: {}]  }
   0x1 LB: > { %s1609_s13 = sadd.s32 4294967295, %s2009_s12   ;;  %p1613_p0 = scmp.ge.s32.totalorder %s2009_s12, 1  ;;  %s2009_s12 = sphi %s2034_s12, %s13_s12  }
   0x2   : > { %p137_p1 = scmp.lt.s32.totalorder %s2009_s12, 3 }
   0x4   : > { %p138_p2 = pnand %p1613_p0, %p137_p1 }
   0x5   : > { %v1955_v0 = vld [vmem:[%s2351_s1 + $0x20] sm:$0xff] (!%p138_p2)   ;;  %v2011_v1 = vmov (!%p138_p2), 0.0   ;;  %v1957_v3 = vld [vmem:[%s2351_s1 + $0x28] sm:$0xff] (!%p138_p2)   ;;  %vm2012_vm0 = vmmov (!%p138_p2), 0   ;;  %p161_p3 = scmp.lt.s32.totalorder (!%p138_p2), %s1609_s13, 1  ;;  %v1959_v5 = vld [vmem:[%s2351_s1 + $0x30] sm:$0xff] (!%p138_p2)   ;;  %v301_v23 = vlaneseq (!%p138_p2) }
   0x6   : > { %141 = sbr.rel (%p138_p2) target bundleno = 329 (0x149), region = 32  ;;  %1835 = vmatprep.subr.bf16.mxu0 (!%p138_p2), %v2011_v1  ;;  %1847 = vmatprep.subr.bf16.mxu1 (!%p138_p2), %v2011_v1  ;;  %v1956_v2 = vld [vmem:[%s2351_s1] sm:$0xff] (!%p138_p2)   ;;  %v1958_v4 = vld [vmem:[%s2351_s1 + $0x8] sm:$0xff] (!%p138_p2)   ;;  %v1960_v6 = vld [vmem:[%s2351_s1 + $0x10] sm:$0xff] (!%p138_p2)   ;;  %vm224_vm1 = vsmask.f32 (!%p138_p2), 1280 }
   0x7   : > { %1836 = vmatpush3.bf16.msra.mxu0 (!%p138_p2), %v1955_v0  ;;  %1843 = vmatprep.mubr.msk.bf16.mxu0 (!%p138_p2), %vm2012_vm0, %v2011_v1  ;;  %v1961_v7 = vld [vmem:[%s2351_s1 + $0x38] sm:$0xff] (!%p138_p2)   ;;  %vm225_vm2 = vsmask.f32 (!%p138_p2), 3336  ;;  %vm227_vm3 = vsmask.f32 (!%p138_p2), 5392  ;;  %v302_v45 = vshrl.u32 (!%p138_p2), %v301_v23, 7 }
   0x8   : > { %1848 = vmatpush3.bf16.msra.mxu1 (!%p138_p2), %v1956_v2  ;;  %1837 = vmatprep.subr.bf16.mxu0 (!%p138_p2), %v2011_v1  ;;  %v1962_v8 = vld [vmem:[%s2351_s1 + $0x18] sm:$0xff] (!%p138_p2)   ;;  %vm229_vm4 = vsmask.f32 (!%p138_p2), 7448  ;;  %vm2086_vm5 = vmor (!%p138_p2), %vm224_vm1, %vm225_vm2  ;;  %v2013_v52 = vmov (!%p138_p2), 1983009808   ;;  %vm511_vm8 = vcmask (!%p138_p2), 1040384  }
   0x9   : > { %1849 = vmatprep.subr.bf16.mxu1 (!%p138_p2), %v2011_v1  ;;  %1855 = vmatprep.mubr.msk.bf16.mxu1 (!%p138_p2), %vm2012_vm0, %v2011_v1  ;;  %vm2097_vm6 = vmor (!%p138_p2), %vm2086_vm5, %vm227_vm3  ;;  %v299_v53 = vunpack.c.l.s4 (!%p138_p2), %v2013_v52  ;;  %vm512_vm9 = vcmask (!%p138_p2), 1042434   ;;  %vm337_vm10 = vcmask (!%p138_p2), 523264   ;;  %vm514_vm12 = vcmask (!%p138_p2), 1044484   ;;  %v1968_v12 = vld [vmem:[%s2351_s1 + $0x68] sm:$0xff] (!%p138_p2)  }
   0xa   : > { %vm2105_vm7 = vmor (!%p138_p2), %vm2097_vm6, %vm229_vm4  ;;  %vm516_vm14 = vcmask (!%p138_p2), 1046534   ;;  %v1985_v37 = vld [vmem:[%s2351_s1 + $0xc8] sm:$0xff] (!%p138_p2)  }
   0xb   : > { %1838 = vmatpush3.bf16.msra.mxu0 (!%p138_p2), %v1957_v3  ;;  %v300_v59 = vunpack.c.0.s8 (!%p138_p2), %v299_v53  ;;  %vm513_vm11 = vmor (!%p138_p2), %vm511_vm8, %vm512_vm9 }
   0xc   : > { %1850 = vmatpush3.bf16.msra.mxu1 (!%p138_p2), %v1958_v4  ;;  %1839 = vmatprep.subr.bf16.mxu0 (!%p138_p2), %v2011_v1  ;;  %v1966_v4 = vld [vmem:[%s2351_s1 + $0x60] sm:$0xff] (!%p138_p2)   ;;  %vm2140_vm13 = vmor (!%p138_p2), %vm513_vm11, %vm514_vm12 }
   0xd   : > { %s2365_s13 = smov (!%p161_p3, %s1609_s13), 1  ;;  %1851 = vmatprep.subr.bf16.mxu1 %v2011_v1  ;;  %v2123_v63 = vsub.s32 %v300_v59, %v302_v45  ;;  %vm2157_vm15 = vmor %vm2140_vm13, %vm516_vm14 }
   0xe   : > { %s1943_s24 = smul.u32 24, %s2365_s13  ;;  %s1789_s18 = sshll.u32 %s2365_s13, 3 }
   0xf   : > { %1840 = vmatpush3.bf16.msra.mxu0 %v1959_v5  ;;  %s170_s21 = scalar_lea.vmem %s2353_s3, %s1789_s18 }
  0x10   : > { %s2079_s4 = scalar_lea.vmem %s2350_s0, %s1943_s24  ;;  %1852 = vmatpush3.bf16.msra.mxu1 %v1960_v6  ;;  %1841 = vmatprep.subr.bf16.mxu0 %v2011_v1 }
  0x11   : > { %v1617_v9 = vld.sshfl [vmem:[%s2079_s4] sm:$0x13 pattern:$0x76325410]  ;;  %1853 = vmatprep.subr.bf16.mxu1 %v2011_v1 }
  0x12   : > { %v1618_v10 = vld.sshfl [vmem:[%s2079_s4 + $0x4] sm:$0x13 pattern:$0x76325410]  ;;  %v199_v11 = vcombine.high %v1617_v9, %v1617_v9  ;;  %v232_v13 = vshrl.u32 %v1617_v9, 16  ;;  %v235_v14 = vshll.u32 %v1617_v9, 16 }
  0x13   : > { %v1619_v15 = vld.sshfl [vmem:[%s2079_s4 + $0x8] sm:$0x13 pattern:$0x76325410]  ;;  %v207_v16 = vcombine.high %v1618_v10, %v1618_v10  ;;  %v246_v17 = vshrl.u32 %v1618_v10, 16  ;;  %v249_v18 = vshll.u32 %v1618_v10, 16  ;;  %1842 = vmatpush3.bf16.msra.mxu0 %v1961_v7 }
  0x14   : > { %v1620_v19 = vld.sshfl [vmem:[%s2079_s4 + $0xc] sm:$0x13 pattern:$0x76325410]  ;;  %v215_v20 = vcombine.high %v1619_v15, %v1619_v15  ;;  %v234_v21 = vrot.slane %v232_v13, 6  ;;  %v237_v22 = vrot.slane %v235_v14, 7  ;;  %1854 = vmatpush3.bf16.msra.mxu1 %v1962_v8  ;;  %1859 = vmatprep.subr.bf16.mxu0 %v2011_v1 }
  0x15   : > { %v223_v24 = vcombine.high %v1620_v19, %v1620_v19  ;;  %v241_v26 = vshll.u32 %v199_v11, 16  ;;  %v248_v27 = vrot.slane %v246_v17, 6  ;;  %v251_v28 = vrot.slane %v249_v18, 7  ;;  %1871 = vmatprep.subr.bf16.mxu1 %v2011_v1  ;;  %v1965_v7 = vld [vmem:[%s2351_s1 + $0x40] sm:$0xff]  }
  0x16   : > { %v238_v29 = vor.u32 %v237_v22, %v234_v21  ;;  %v255_v30 = vshll.u32 %v207_v16, 16  ;;  %v260_v31 = vshrl.u32 %v1619_v15, 16  ;;  %v263_v32 = vshll.u32 %v1619_v15, 16 }
  0x17   : > { %v243_v33 = vrot.slane %v241_v26, 7  ;;  %v252_v34 = vor.u32 %v251_v28, %v248_v27  ;;  %v269_v35 = vshll.u32 %v215_v20, 16  ;;  %v274_v36 = vshrl.u32 %v1620_v19, 16  ;;  %v1967_v26 = vld [vmem:[%s2351_s1 + $0x48] sm:$0xff]   ;;  %v1970_v28 = vld [vmem:[%s2351_s1 + $0x70] sm:$0xff]  }
  0x18   : > { %v239_v38 = vrot.slane %v238_v29, 2  ;;  %v257_v39 = vrot.slane %v255_v30, 7  ;;  %v262_v40 = vrot.slane %v260_v31, 6  ;;  %v265_v41 = vrot.slane %v263_v32, 7 }
  0x19   : > { %v253_v42 = vrot.slane %v252_v34, 2  ;;  %v276_v43 = vrot.slane %v274_v36, 6  ;;  %v277_v44 = vshll.u32 %v1620_v19, 16  ;;  %v271_v47 = vrot.slane %v269_v35, 7 }
  0x1a   : > { %v266_v46 = vor.u32 %v265_v41, %v262_v40  ;;  %v283_v48 = vshll.u32 %v223_v24, 16  ;;  %v244_v49 = vsel %vm2105_vm7, %v239_v38, %v243_v33  ;;  %v1997_v54 = vld.sshfl [vmem:[%s2079_s4] sm:$0xf pattern:$0x76325410]  ;;  %v1972_v40 = vld [vmem:[%s2351_s1 + $0x78] sm:$0xff]  }
  0x1b   : > { %v2114_v50 = vsel %vm2105_vm7, %v253_v42, %v257_v39  ;;  %v279_v51 = vrot.slane %v277_v44, 7  ;;  %v1998_v55 = vld.sshfl [vmem:[%s2079_s4 + $0x8] sm:$0xf pattern:$0x76325410]  ;;  %v1969_v39 = vld [vmem:[%s2351_s1 + $0x50] sm:$0xff]  }
  0x1c   : > { %v267_v56 = vrot.slane %v266_v46, 2  ;;  %v285_v57 = vrot.slane %v283_v48, 7  ;;  %v296_v60 = vcombine.low %v244_v49, %v2114_v50  ;;  %v1639_v5 = vld.sshfl [vmem:[%s2079_s4] sm:$0x12 pattern:$0x76325410]  ;;  %v402_v6 = vcombine.low %v1997_v54, %v1998_v55 }
  0x1d   : > { %v280_v58 = vor.u32 %v279_v51, %v276_v43  ;;  %v1640_v8 = vld.sshfl [vmem:[%s2079_s4 + $0x4] sm:$0x12 pattern:$0x76325410]  ;;  %v486_v9 = vcombine.high %v1639_v5, %v1639_v5  ;;  %v1643_v15 = vrot.slane %v1639_v5, 9  ;;  %v1971_v44 = vld [vmem:[%s2351_s1 + $0x58] sm:$0xff]  }
  0x1e   : > { %v2121_v61 = vsel %vm2105_vm7, %v267_v56, %v271_v47  ;;  %v304_v3 = vrot.slane %v296_v60, %v2123_v63  ;;  %v1641_v13 = vld.sshfl [vmem:[%s2079_s4 + $0x8] sm:$0x12 pattern:$0x76325410]  ;;  %v494_v14 = vcombine.high %v1640_v8, %v1640_v8  ;;  %v1644_v16 = vrot.slane %v1640_v8, 9  ;;  %1856 = vmatmul.mubr.msk.bf16.vlgmr.msra.gmra.mrb[0].mxu1 %vm337_vm10, %v402_v6  ;;  %v1976_v46 = vld [vmem:[%s2351_s1 + $0xa0] sm:$0xff]  }
  0x1f   : > { %v281_v62 = vrot.slane %v280_v58, 2  ;;  %v1642_v17 = vld.sshfl [vmem:[%s2079_s4 + $0xc] sm:$0x12 pattern:$0x76325410]  ;;  %v502_v18 = vcombine.high %v1641_v13, %v1641_v13  ;;  %v520_v19 = vrot.slane %v486_v9, 7  ;;  %1872 = vmatpush3.bf16.msra.mxu1 %v1966_v4  ;;  %1879 = vmatprep.mubr.msk.bf16.mxu1 %vm2012_vm0, %v2011_v1  ;;  %v840_v10 = vcombine.low %v2114_v50, %v2121_v61 }
  0x20   : > { %v1645_v20 = vrot.slane %v1641_v13, 9  ;;  %v510_v22 = vcombine.high %v1642_v17, %v1642_v17  ;;  %v524_v24 = vrot.slane %v494_v14, 7  ;;  %v1646_v25 = vrot.slane %v1642_v17, 9  ;;  %1873 = vmatprep.subr.bf16.mxu1 %v2011_v1  ;;  %v1977_v5 = vld [vmem:[%s2351_s1 + $0x88] sm:$0xff]   ;;  %v1980_v6 = vld [vmem:[%s2351_s1 + $0xb0] sm:$0xff]   ;;  %v1982_v50 = vld [vmem:[%s2351_s1 + $0xb8] sm:$0xff]  }
  0x21   : > { %v2127_v0 = vsel %vm2105_vm7, %v281_v62, %v285_v57  ;;  %v528_v27 = vrot.slane %v502_v18, 7  ;;  %v521_v30 = vsel %vm2157_vm15, %v1643_v15, %v520_v19  ;;  %v1999_v33 = vld.sshfl [vmem:[%s2079_s4 + $0x4] sm:$0xf pattern:$0x76325410] }
  0x22   : > { %v297_v2 = vcombine.low %v2121_v61, %v2127_v0  ;;  %v532_v29 = vrot.slane %v510_v22, 7  ;;  %v2177_v31 = vsel %vm2157_vm15, %v1644_v16, %v524_v24  ;;  %v2000_v34 = vld.sshfl [vmem:[%s2079_s4 + $0xc] sm:$0xf pattern:$0x76325410]  ;;  %v1973_v57 = vld [vmem:[%s2351_s1 + $0x80] sm:$0xff]  }
  0x23   : > { %v2181_v32 = vsel %vm2157_vm15, %v1645_v20, %v528_v27  ;;  %1874 = vmatpush3.bf16.msra.mxu1 %v1968_v12  ;;  %v543_v36 = vcombine.low %v521_v30, %v2177_v31  ;;  %v1684_v43 = vld.sshfl [vmem:[%s2079_s4 + $0x10] sm:$0x13 pattern:$0x76325410]  ;;  %v664_v45 = vcombine.low %v1999_v33, %v2000_v34  ;;  %v1981_v24 = vld [vmem:[%s2351_s1 + $0x98] sm:$0xff]   ;;  %v1984_v27 = vld [vmem:[%s2351_s1 + $0xe0] sm:$0xff]  }
  0x24   : > { %v2145_v11 = vrot.slane %v297_v2, %v2123_v63  ;;  %v533_v35 = vsel %vm2157_vm15, %v1646_v25, %v532_v29  ;;  %1875 = vmatprep.subr.bf16.mxu1 %v2011_v1  ;;  %v774_v47 = vcombine.high %v1684_v43, %v1684_v43  ;;  %v818_v48 = vshrl.u32 %v1684_v43, 16  ;;  %v1705_v51 = vld.sshfl [vmem:[%s2079_s4 + $0x10] sm:$0x12 pattern:$0x76325410]  ;;  %v1978_v2 = vld [vmem:[%s2351_s1 + $0xa8] sm:$0xff]  }
  0x25   : > { %v544_v38 = vcombine.low %v2181_v32, %v533_v35  ;;  %v551_v41 = vrot.slane %v543_v36, %v2123_v63  ;;  %v821_v49 = vshll.u32 %v1684_v43, 16  ;;  %v966_v55 = vcombine.high %v1705_v51, %v1705_v51  ;;  %v1979_v12 = vld [vmem:[%s2351_s1 + $0x90] sm:$0xff]   ;;  %v1986_v36 = vld [vmem:[%s2351_s1 + $0xe8] sm:$0xff]  }
  0x26   : > { %v312_v21 = vcombine.low %v304_v3, %v2145_v11  ;;  %v820_v52 = vrot.slane %v818_v48, 6  ;;  %v827_v54 = vshll.u32 %v774_v47, 16  ;;  %v1709_v58 = vrot.slane %v1705_v51, 9  ;;  %v1988_v43 = vld [vmem:[%s2351_s1 + $0xf0] sm:$0xff]   ;;  %v1990_v48 = vld [vmem:[%s2351_s1 + $0xf8] sm:$0xff]  }
  0x27   : > { %1876 = vmatpush3.bf16.msra.mxu1 %v1970_v28  ;;  %v2201_v42 = vrot.slane %v544_v38, %v2123_v63  ;;  %v823_v53 = vrot.slane %v821_v49, 7  ;;  %v981_v62 = vrot.slane %v966_v55, 7  ;;  %v992_v8 = vcombine.low %v2177_v31, %v2181_v32  ;;  %v1747_v16 = vld.sshfl [vmem:[%s2079_s4 + $0x14] sm:$0x13 pattern:$0x76325410] }
  0x28   : > { %1844 = vmatmul.mubr.msk.bf16.vlgmr.msra.gmra.mrb[0].mxu0 %vm337_vm10, %v312_v21  ;;  %1877 = vmatprep.subr.bf16.mxu1 %v2011_v1  ;;  %v829_v60 = vrot.slane %v827_v54, 7  ;;  %v1223_v61 = vcombine.high %v1747_v16, %v1747_v16  ;;  %v1267_v17 = vshrl.u32 %v1747_v16, 16  ;;  %v1270_v18 = vshll.u32 %v1747_v16, 16  ;;  %v1989_v49 = vld [vmem:[%s2351_s1 + $0xd8] sm:$0xff]  }
  0x29   : > { %1860 = vmatpush3.bf16.msra.mxu0 %v1965_v7  ;;  %1867 = vmatprep.mubr.msk.bf16.mxu0 %vm2012_vm0, %v2011_v1  ;;  %v559_v56 = vcombine.low %v551_v41, %v2201_v42  ;;  %v824_v59 = vor.u32 %v823_v53, %v820_v52  ;;  %v2227_v4 = vsel %vm2157_vm15, %v1709_v58, %v981_v62  ;;  %v1993_v52 = vld [vmem:[%s2351_s1 + $0x100] sm:$0xff]   ;;  %v1995_v53 = vld [vmem:[%s2351_s1 + $0x110] sm:$0xff]   ;;  %v1996_v54 = vld [vmem:[%s2351_s1 + $0x118] sm:$0xff]  }
  0x2a   : > { %1861 = vmatprep.subr.bf16.mxu0 %v2011_v1  ;;  %v993_v9 = vcombine.low %v533_v35, %v2227_v4  ;;  %v1000_v14 = vrot.slane %v992_v8, %v2123_v63  ;;  %v1269_v20 = vrot.slane %v1267_v17, 6  ;;  %v1272_v21 = vrot.slane %v1270_v18, 7  ;;  %v1983_v35 = vld [vmem:[%s2351_s1 + $0xc0] sm:$0xff]  }
  0x2b   : > { %1878 = vmatpush3.bf16.msra.mxu1 %v1972_v40  ;;  %v825_v3 = vrot.slane %v824_v59, 2  ;;  %v1276_v22 = vshll.u32 %v1223_v61, 16 }
  0x2c   : > { %1895 = vmatprep.subr.bf16.mxu1 %v2011_v1  ;;  %v1007_v15 = vrot.slane %v993_v9, %v2123_v63  ;;  %v1273_v28 = vor.u32 %v1272_v21, %v1269_v20 }
  0x2d   : > { %1862 = vmatpush3.bf16.msra.mxu0 %v1967_v26  ;;  %v2240_v7 = vsel %vm2105_vm7, %v825_v3, %v829_v60  ;;  %v1768_v26 = vld.sshfl [vmem:[%s2079_s4 + $0x14] sm:$0x12 pattern:$0x76325410]  ;;  %v1278_v29 = vrot.slane %v1276_v22, 7 }
  0x2e   : > { %1863 = vmatprep.subr.bf16.mxu0 %v2011_v1  ;;  %1880 = vmatmul.mubr.msk.bf16.vlgmr.msra.gmra.mrb[4].mxu1 %vm337_vm10, %v664_v45  ;;  %v841_v13 = vcombine.low %v2127_v0, %v2240_v7  ;;  %v848_v0 = vrot.slane %v840_v10, %v2123_v63  ;;  %v1008_v25 = vcombine.low %v1000_v14, %v1007_v15  ;;  %v1772_v31 = vrot.slane %v1768_v26, 9  ;;  %v2002_v45 = vld.sshfl [vmem:[%s2079_s4 + $0x10] sm:$0xf pattern:$0x76325410] }
  0x2f   : > { %1896 = vmatpush3.bf16.msra.mxu1 %v1976_v46  ;;  %1903 = vmatprep.mubr.msk.bf16.mxu1 %vm2012_vm0, %v2011_v1  ;;  %v1415_v30 = vcombine.high %v1768_v26, %v1768_v26  ;;  %v1274_v33 = vrot.slane %v1273_v28, 2  ;;  %v1987_v46 = vld [vmem:[%s2351_s1 + $0xd0] sm:$0xff]  }
  0x30   : > { %1897 = vmatprep.subr.bf16.mxu1 %v2011_v1  ;;  %v855_v19 = vrot.slane %v841_v13, %v2123_v63 }
  0x31   : > { %1864 = vmatpush3.bf16.msra.mxu0 %v1969_v39  ;;  %v1430_v34 = vrot.slane %v1415_v30, 7  ;;  %v1279_v38 = vsel %vm2105_vm7, %v1274_v33, %v1278_v29 }
  0x32   : > { %1865 = vmatprep.subr.bf16.mxu0 %v2011_v1  ;;  %v856_v32 = vcombine.low %v848_v0, %v855_v19  ;;  %v1290_v23 = vcombine.low %v2240_v7, %v1279_v38 }
  0x33   : > { %1898 = vmatpush3.bf16.msra.mxu1 %v1978_v2  ;;  %v1431_v39 = vsel %vm2157_vm15, %v1772_v31, %v1430_v34 }
  0x34   : > { %1899 = vmatprep.subr.bf16.mxu1 %v2011_v1  ;;  %v1442_v40 = vcombine.low %v2227_v4, %v1431_v39  ;;  %v1304_v47 = vrot.slane %v1290_v23, %v2123_v63 }
  0x35   : > { %1866 = vmatpush3.bf16.msra.mxu0 %v1971_v44  ;;  %v2001_v44 = vld.sshfl [vmem:[%s2079_s4 + $0x8] sm:$0xf pattern:$0x76325410] }
  0x36   : > { %1883 = vmatprep.subr.bf16.mxu0 %v2011_v1  ;;  %v1456_v41 = vrot.slane %v1442_v40, %v2123_v63  ;;  %v1305_v51 = vcombine.low %v2145_v11, %v1304_v47  ;;  %v1113_v63 = vcombine.low %v2001_v44, %v2002_v45  ;;  %v1994_v11 = vld [vmem:[%s2351_s1 + $0x108] sm:$0xff]  }
  0x37   : > { %1900 = vmatpush3.bf16.msra.mxu1 %v1980_v6 }
  0x38   : > { %1868 = vmatmul.mubr.msk.bf16.vlgmr.msra.gmra.mrb[4].mxu0 %vm337_vm10, %v559_v56  ;;  %1901 = vmatprep.subr.bf16.mxu1 %v2011_v1  ;;  %v1457_v55 = vcombine.low %v2201_v42, %v1456_v41 }
  0x39   : > { %1884 = vmatpush3.bf16.msra.mxu0 %v1973_v57  ;;  %1891 = vmatprep.mubr.msk.bf16.mxu0 %vm2012_vm0, %v2011_v1 }
  0x3a   : > { %1885 = vmatprep.subr.bf16.mxu0 %v2011_v1 }
  0x3b   : > { %1902 = vmatpush3.bf16.msra.mxu1 %v1982_v50 }
  0x3c   : > { %1919 = vmatprep.subr.bf16.mxu1 %v2011_v1 }
  0x3d   : > { %1886 = vmatpush3.bf16.msra.mxu0 %v1977_v5 }
  0x3e   : > { %1887 = vmatprep.subr.bf16.mxu0 %v2011_v1  ;;  %1904 = vmatmul.mubr.msk.bf16.vlgmr.msra.gmra.mrb[8].mxu1 %vm337_vm10, %v1008_v25 }
  0x3f   : > { %1920 = vmatpush3.bf16.msra.mxu1 %v1984_v27  ;;  %1927 = vmatprep.mubr.msk.bf16.mxu1 %vm2012_vm0, %v2011_v1 }
  0x40   : > { %1921 = vmatprep.subr.bf16.mxu1 %v2011_v1 }
  0x41   : > { %1888 = vmatpush3.bf16.msra.mxu0 %v1979_v12 }
  0x42   : > { %1889 = vmatprep.subr.bf16.mxu0 %v2011_v1 }
  0x43   : > { %1922 = vmatpush3.bf16.msra.mxu1 %v1986_v36 }
  0x44   : > { %1923 = vmatprep.subr.bf16.mxu1 %v2011_v1 }
  0x45   : > { %1890 = vmatpush3.bf16.msra.mxu0 %v1981_v24 }
  0x46   : > { %1907 = vmatprep.subr.bf16.mxu0 %v2011_v1 }
  0x47   : > { %1924 = vmatpush3.bf16.msra.mxu1 %v1988_v43 }
  0x48   : > { %1892 = vmatmul.mubr.msk.bf16.vlgmr.msra.gmra.mrb[8].mxu0 %vm337_vm10, %v856_v32  ;;  %1925 = vmatprep.subr.bf16.mxu1 %v2011_v1 }
  0x49   : > { %1908 = vmatpush3.bf16.msra.mxu0 %v1983_v35  ;;  %1915 = vmatprep.mubr.msk.bf16.mxu0 %vm2012_vm0, %v2011_v1 }
  0x4a   : > { %1909 = vmatprep.subr.bf16.mxu0 %v2011_v1 }
  0x4b   : > { %1926 = vmatpush3.bf16.msra.mxu1 %v1990_v48 }
  0x4d   : > { %1910 = vmatpush3.bf16.msra.mxu0 %v1985_v37  ;;  %v1786_v37 = vld [vmem:[%s2352_s2] ss:$0 sm:$0xff] }
  0x4e   : > { %1911 = vmatprep.subr.bf16.mxu0 %v2011_v1  ;;  %1928 = vmatmul.mubr.msk.bf16.vlgmr.msra.gmra.mrb[12].mxu1 %vm337_vm10, %v1305_v51 }
  0x51   : > { %1912 = vmatpush3.bf16.msra.mxu0 %v1987_v46 }
  0x52   : > { %1913 = vmatprep.subr.bf16.mxu0 %v2011_v1 }
  0x55   : > { %1914 = vmatpush3.bf16.msra.mxu0 %v1989_v49 }
  0x56   : > { %1931 = vmatprep.subr.bf16.mxu0 %v2011_v1 }
  0x58   : > { %1916 = vmatmul.mubr.msk.bf16.vlgmr.msra.gmra.mrb[12].mxu0 %vm337_vm10, %v1113_v63 }
  0x59   : > { %1932 = vmatpush3.bf16.msra.mxu0 %v1993_v52  ;;  %1939 = vmatprep.mubr.msk.bf16.mxu0 %vm2012_vm0, %v2011_v1  ;;  %vm1549_vm0 = vcmask 517120  }
  0x5a   : > { %1933 = vmatprep.subr.bf16.mxu0 %v2011_v1 }
  0x5d   : > { %1934 = vmatpush3.bf16.msra.mxu0 %v1994_v11 }
  0x5e   : > { %1935 = vmatprep.subr.bf16.mxu0 %v2011_v1 }
  0x61   : > { %1936 = vmatpush3.bf16.msra.mxu0 %v1995_v53 }
  0x62   : > { %1937 = vmatprep.subr.bf16.mxu0 %v2011_v1 }
  0x65   : > { %1938 = vmatpush3.bf16.msra.mxu0 %v1996_v54 }
  0x68   : > { %1940 = vmatmul.mubr.msk.bf16.vlgmr.msra.gmra.mrb[16].mxu0 %vm337_vm10, %v1457_v55 }
  0xf1   : > { %v464_v56 = vpop.f32.mrb[0].mxu1 }
  0xf2   : > { %v1857_v57 = vpop.f32.mrb[1].mxu1 }
  0xf3   : > { %v467_v58 = vpop.f32.mrb[2].mxu1 }
  0xf4   : > { %v1858_v60 = vpop.f32.mrb[3].mxu1 }
  0xfb   : > { %v375_v59 = vpop.f32.mrb[0].mxu0 }
  0xfc   : > { %v465_v62 = vadd.f32 %v464_v56, %v375_v59  ;;  %v1845_v2 = vpop.f32.mrb[1].mxu0 }
  0xfd   : > { %v378_v3 = vpop.f32.mrb[2].mxu0 }
  0xfe   : > { %v468_v4 = vadd.f32 %v467_v58, %v378_v3  ;;  %v1846_v5 = vpop.f32.mrb[3].mxu0 }
 0x101   : > { %v726_v6 = vpop.f32.mrb[4].mxu1 }
 0x102   : > { %v1881_v7 = vpop.f32.mrb[5].mxu1 }
 0x103   : > { %v729_v8 = vpop.f32.mrb[6].mxu1 }
 0x104   : > { %v1882_v1 = vpop.f32.mrb[7].mxu1 }
 0x10b   : > { %v621_v9 = vpop.f32.mrb[4].mxu0 }
 0x10c   : > { %v628_v10 = vadd.f32 %v621_v9, %v465_v62  ;;  %v1869_v42 = vpop.f32.mrb[5].mxu0 }
 0x10d   : > { %v624_v12 = vpop.f32.mrb[6].mxu0 }
 0x10e   : > { %v629_v13 = vadd.f32 %v624_v12, %v468_v4  ;;  %v733_v14 = vadd.f32 %v726_v6, %v628_v10  ;;  %v1870_v15 = vpop.f32.mrb[7].mxu0 }
 0x110   : > { %v734_v16 = vadd.f32 %v729_v8, %v629_v13 }
 0x111   : > { %v1070_v50 = vpop.f32.mrb[8].mxu1 }
 0x112   : > { %v1905_v61 = vpop.f32.mrb[9].mxu1 }
 0x113   : > { %v1073_v17 = vpop.f32.mrb[10].mxu1 }
 0x114   : > { %v1906_v0 = vpop.f32.mrb[11].mxu1 }
 0x11b   : > { %v918_v18 = vpop.f32.mrb[8].mxu0 }
 0x11c   : > { %v925_v19 = vadd.f32 %v918_v18, %v733_v14  ;;  %v1893_v20 = vpop.f32.mrb[9].mxu0 }
 0x11d   : > { %v921_v21 = vpop.f32.mrb[10].mxu0 }
 0x11e   : > { %v926_v22 = vadd.f32 %v921_v21, %v734_v16  ;;  %v1077_v24 = vadd.f32 %v1070_v50, %v925_v19  ;;  %v1894_v25 = vpop.f32.mrb[11].mxu0 }
 0x120   : > { %v1078_v26 = vadd.f32 %v1073_v17, %v926_v22 }
 0x121   : > { %v1367_v27 = vpop.f32.mrb[12].mxu1 }
 0x122   : > { %v1929_v28 = vpop.f32.mrb[13].mxu1 }
 0x123   : > { %v1370_v29 = vpop.f32.mrb[14].mxu1 }
 0x124   : > { %v1930_v31 = vpop.f32.mrb[15].mxu1 }
 0x12b   : > { %v1175_v30 = vpop.f32.mrb[12].mxu0 }
 0x12c   : > { %v1182_v32 = vadd.f32 %v1175_v30, %v1077_v24  ;;  %v1917_v33 = vpop.f32.mrb[13].mxu0 }
 0x12d   : > { %v1178_v34 = vpop.f32.mrb[14].mxu0 }
 0x12e   : > { %v1183_v35 = vadd.f32 %v1178_v34, %v1078_v26  ;;  %v1374_v36 = vadd.f32 %v1367_v27, %v1182_v32  ;;  %v1918_v38 = vpop.f32.mrb[15].mxu0 }
 0x130   : > { %v1375_v39 = vadd.f32 %v1370_v29, %v1183_v35 }
 0x13b   : > { %v1519_v40 = vpop.f32.mrb[16].mxu0 }
 0x13c   : > { %v1526_v23 = vadd.f32 %v1519_v40, %v1374_v36  ;;  %v1941_v41 = vpop.f32.mrb[17].mxu0 }
 0x13d   : > { %v1522_v43 = vpop.f32.mrb[18].mxu0 }
 0x13e   : > { %v1535_v44 = vadd.f32 %v1786_v37, %v1526_v23  ;;  %v1527_v45 = vadd.f32 %v1522_v43, %v1375_v39  ;;  %v1942_v46 = vpop.f32.mrb[19].mxu0 }
 0x140   : > { %v1537_v47 = vmax.f32 %v1535_v44, 0.0  ;;  %v1536_v48 = vadd.f32 %v1786_v37, %v1527_v45 }
 0x142   : > { %v1541_v49 = vcombine.high %v1537_v47, %v1537_v47  ;;  %v1545_v51 = vpack.c.bf16 %v1537_v47, %v1537_v47  ;;  %v1538_v63 = vmax.f32 %v1536_v48, 0.0 }
 0x144   : > { %v1546_v52 = vpack.c.bf16 %v1541_v49, %v1541_v49  ;;  %1550 = vst.msk [vmem:[%s170_s21] sm:$0x3] %vm1549_vm0, %v1545_v51  ;;  %v1542_v11 = vcombine.high %v1538_v63, %v1538_v63  ;;  %v1547_v53 = vpack.c.bf16 %v1538_v63, %v1538_v63 }
 0x146   : > { %1551 = vst.msk [vmem:[%s170_s21 + $0x2] sm:$0x3] %vm1549_vm0, %v1546_v52  ;;  %v1548_v54 = vpack.c.bf16 %v1542_v11, %v1542_v11  ;;  %1552 = vst.msk [vmem:[%s170_s21 + $0x4] sm:$0x3] %vm1549_vm0, %v1547_v53 }
 0x148   : > { %1553 = vst.msk [vmem:[%s170_s21 + $0x6] sm:$0x3] %vm1549_vm0, %v1548_v54 }
 0x149 PF: > { %s13_s12 = sadd.s32 1, %s2009_s12  }
 0x14a   : > { %p10_p4 = scmp.ge.s32.totalorder %s13_s12, 4  }
 0x14c   :  { %12 = sbr.rel (!%p10_p4) target bundleno = 1 (0x1), region = 72 }

// kernel: resnet_forward.12
= control target key start
LH: loop header
LB: loop body
LE: loop exit
PB: predicated region body
PF: predicated region fallthrough
CT: control target
= control target key end

     0   :  { %s513_s12 = smov 0   ;;  %s515_s13 = smov 0   ;;  %s582_s0 = inlined_call_operand.vmem [shape: bf16[4,2,2,2,64], index: 0, kind: input, shape index: {}]   ;;  %s583_s1 = inlined_call_operand.vmem [shape: bf16[1,64,128], index: 1, kind: input, shape index: {}]   ;;  %s584_s2 = inlined_call_operand.vmem [shape: f32[1,128], index: 2, kind: input, shape index: {}]   ;;  %s585_s3 = inlined_call_operand.vmem [shape: bf16[2,2,2,128], index: 3, kind: output, shape index: {}]  }
   0x1   :  { %s517_s14 = smov 0  }
   0x2 LB: > { %s399_s15 = sadd.s32 4294967295, %s487_s14   ;;  %s530_s16 = sadd.s32 1, %s487_s14   ;;  %s487_s14 = sphi %s517_s14, %s588_s14   ;;  %s483_s13 = sphi %s515_s13, %s587_s13   ;;  %s479_s12 = sphi %s513_s12, %s586_s12  }
   0x3   : > { %s17_s17 = ssub.s32 %s487_s14, %s530_s16  ;;  %s20_s18 = sadd.s32 1, %s483_s13 }
   0x4   : > { %p18_p0 = scmp.eq.s32.totalorder %s17_s17, 0  ;;  %p27_p1 = scmp.ne.s32.totalorder %s483_s13, %s479_s12 }
   0x5   : > { %p28_p2 = scmp.eq.s32.totalorder %s487_s14, 0  ;;  %p402_p4 = scmp.ge.s32.totalorder %s487_s14, 2 }
   0x6   : > { %s539_s19 = scalar_select %p18_p0, %s483_s13, %s20_s18  }
   0x7   : > { %p29_p3 = por %p28_p2, %p27_p1  ;;  %127 = sbr.rel (%p402_p4) target bundleno = 21 (0x15), region = 24 }
   0xe   : > { %130 = sbr.rel (!%p29_p3) target bundleno = 21 (0x15), region = 28  ;;  %s132_s20 = sand.u32 (%p29_p3), 1, %s483_s13  }
   0xf   : > { %s404_s21 = sshll.u32 (%p29_p3), %s487_s14, 1  ;;  %s403_s22 = sshll.u32 (%p29_p3), %s132_s20, 3 }
  0x10   : > { %s136_s25 = scalar_lea.vmem (%p29_p3), %s582_s0, %s404_s21  ;;  %s134_s26 = scalar_lea.vmem (%p29_p3), [#allocation2], %s403_s22 }
  0x11   : > { %v152_v0 = vld [vmem:[%s136_s25] sm:$0x3] (%p29_p3)  ;;  %v154_v1 = vld [vmem:[%s136_s25 + $0x4] sm:$0x3] (%p29_p3)  ;;  %v156_v2 = vld [vmem:[%s136_s25 + $0x8] sm:$0x3] (%p29_p3) }
  0x12   : > { %153 = vst [vmem:[%s134_s26] sm:$0x3] (%p29_p3), %v152_v0  ;;  %155 = vst [vmem:[%s134_s26 + $0x2] sm:$0x3] (%p29_p3), %v154_v1  ;;  %v158_v3 = vld [vmem:[%s136_s25 + $0xc] sm:$0x3] (%p29_p3) }
  0x13   : > { %157 = vst [vmem:[%s134_s26 + $0x4] sm:$0x3] (%p29_p3), %v156_v2  ;;  %159 = vst [vmem:[%s134_s26 + $0x6] sm:$0x3] (%p29_p3), %v158_v3 }
  0x15 PF: > { %p405_p5 = scmp.ge.s32.totalorder %s487_s14, 1  ;;  %p189_p6 = scmp.lt.s32.totalorder %s487_s14, 3 }
  0x17   : > { %p190_p7 = pnand %p405_p5, %p189_p6 }
  0x18   : > { %v461_v4 = vld [vmem:[%s583_s1] sm:$0xff] (!%p190_p7)   ;;  %v489_v5 = vmov (!%p190_p7), 0.0   ;;  %v246_v6 = vlaneseq (!%p190_p7)  ;;  %v462_v7 = vld [vmem:[%s583_s1 + $0x8] sm:$0xff] (!%p190_p7)   ;;  %vm490_vm0 = vmmov (!%p190_p7), 0   ;;  %s196_s4 = sand.u32 (!%p190_p7), 1, %s479_s12   ;;  %v463_v13 = vld [vmem:[%s583_s1 + $0x10] sm:$0xff] (!%p190_p7)  }
  0x19   : > { %193 = sbr.rel (%p190_p7) target bundleno = 262 (0x106), region = 69  ;;  %421 = vmatprep.subr.bf16.mxu0 (!%p190_p7), %v489_v5  ;;  %429 = vmatprep.mubr.msk.bf16.mxu0 (!%p190_p7), %vm490_vm0, %v489_v5  ;;  %s406_s5 = sshll.u32 (!%p190_p7), %s196_s4, 3  ;;  %v491_v10 = vmov (!%p190_p7), 1966171168   ;;  %v464_v17 = vld [vmem:[%s583_s1 + $0x18] sm:$0xff] (!%p190_p7)   ;;  %vm281_vm1 = vcmask (!%p190_p7), 523264  }
  0x1a   : > { %422 = vmatpush3.bf16.msra.mxu0 (!%p190_p7), %v461_v4  ;;  %s198_s6 = scalar_lea.vmem (!%p190_p7), [#allocation2], %s406_s5  ;;  %v244_v11 = vunpack.c.l.s4 (!%p190_p7), %v491_v10  ;;  %v247_v12 = vshrl.u32 (!%p190_p7), %v246_v6, 7  ;;  %v492_v20 = vmov (!%p190_p7), 1983009808   ;;  %p218_p8 = scmp.lt.s32.totalorder (!%p190_p7), %s399_s15, 1 }
  0x1b   : > { %423 = vmatprep.subr.bf16.mxu0 (!%p190_p7), %v489_v5  ;;  %v223_v8 = vld [vmem:[%s198_s6] sm:$0x1] (!%p190_p7)  ;;  %v224_v9 = vld [vmem:[%s198_s6 + $0x1] sm:$0x1] (!%p190_p7)  ;;  %v327_v21 = vunpack.c.l.s4 (!%p190_p7), %v492_v20 }
  0x1c   : > { %v242_v14 = vcombine.low (!%p190_p7), %v223_v8, %v224_v9  ;;  %v245_v15 = vunpack.c.0.s8 (!%p190_p7), %v244_v11  ;;  %v408_v23 = vld [vmem:[%s584_s2] ss:$0 sm:$0xff] (!%p190_p7) }
  0x1d   : > { %v328_v22 = vunpack.c.0.s8 (!%p190_p7), %v327_v21 }
  0x1e   : > { %424 = vmatpush3.bf16.msra.mxu0 (!%p190_p7), %v462_v7  ;;  %v248_v16 = vsub.s32 (!%p190_p7), %v245_v15, %v247_v12 }
  0x1f   : > { %425 = vmatprep.subr.bf16.mxu0 (!%p190_p7), %v489_v5  ;;  %v331_v24 = vsub.s32 (!%p190_p7), %v328_v22, %v247_v12 }
  0x20   : > { %v249_v18 = vrot.slane %v242_v14, %v248_v16  ;;  %s590_s15 = smov (!%p218_p8, %s399_s15), 1 }
  0x21   : > { %s407_s17 = sshll.u32 %s590_s15, 1 }
  0x22   : > { %426 = vmatpush3.bf16.msra.mxu0 %v463_v13  ;;  %v256_v19 = vrot.slane %v249_v18, %v248_v16  ;;  %s221_s21 = scalar_lea.vmem %s585_s3, %s407_s17 }
  0x23   : > { %427 = vmatprep.subr.bf16.mxu0 %v489_v5 }
  0x26   : > { %428 = vmatpush3.bf16.msra.mxu0 %v464_v17 }
  0x29   : > { %430 = vmatmul.mubr.msk.bf16.vlgmr.msra.gmra.mrb[0].mxu0 %vm281_vm1, %v256_v19 }
  0xfc   : > { %v319_v25 = vpop.f32.mrb[0].mxu0 }
  0xfd   : > { %v320_v26 = vadd.f32 %v408_v23, %v319_v25  ;;  %v431_v27 = vpop.f32.mrb[1].mxu0 }
  0xfe   : > { %v322_v28 = vpop.f32.mrb[2].mxu0 }
  0xff   : > { %v332_v29 = vrot.slane %v320_v26, %v331_v24  ;;  %v432_v30 = vpop.f32.mrb[3].mxu0 }
 0x101   : > { %v333_v31 = vcombine.high %v332_v29, %v332_v29  ;;  %v336_v32 = vpack.c.bf16 %v332_v29, %v332_v29 }
 0x103   : > { %v337_v33 = vpack.c.bf16 %v333_v31, %v333_v31  ;;  %338 = vst [vmem:[%s221_s21] sm:$0x1] %v336_v32 }
 0x105   : > { %339 = vst [vmem:[%s221_s21 + $0x1] sm:$0x1] %v337_v33 }
 0x106 PF: > { %p10_p9 = scmp.ge.s32.totalorder %s530_s16, 4   ;;  %s586_s12 = smov %s483_s13 }
 0x107   : > { %s587_s13 = smov %s539_s19  ;;  %s588_s14 = smov %s530_s16 }
 0x108   :  { %12 = sbr.rel (!%p10_p9) target bundleno = 2 (0x2), region = 108 }

// kernel: resnet_forward.11
= control target key start
LH: loop header
LB: loop body
LE: loop exit
PB: predicated region body
PF: predicated region fallthrough
CT: control target
= control target key end

     0   :  { %s1736_s12 = smov 0   ;;  %s1738_s13 = smov 0   ;;  %s2028_s0 = inlined_call_operand.vmem [shape: bf16[4,2,3,3,64], index: 0, kind: input, shape index: {}]   ;;  %s2029_s1 = inlined_call_operand.vmem [shape: bf16[9,64,128], index: 1, kind: input, shape index: {}]   ;;  %s2030_s2 = inlined_call_operand.vmem [shape: f32[1,128], index: 2, kind: input, shape index: {}]   ;;  %s2031_s3 = inlined_call_operand.vmem [shape: bf16[2,2,2,128], index: 3, kind: output, shape index: {}]  }
   0x1   :  { %s1740_s14 = smov 0  }
   0x2 LB: > { %s1323_s15 = sadd.s32 4294967295, %s1710_s14   ;;  %s1753_s16 = sadd.s32 1, %s1710_s14   ;;  %s1710_s14 = sphi %s1740_s14, %s2036_s14   ;;  %s1706_s13 = sphi %s1738_s13, %s2035_s13   ;;  %s1702_s12 = sphi %s1736_s12, %s2034_s12  }
   0x3   : > { %s17_s17 = ssub.s32 %s1710_s14, %s1753_s16  ;;  %s20_s18 = sadd.s32 1, %s1706_s13 }
   0x4   : > { %p18_p0 = scmp.eq.s32.totalorder %s17_s17, 0  ;;  %p27_p1 = scmp.ne.s32.totalorder %s1706_s13, %s1702_s12 }
   0x5   : > { %p28_p2 = scmp.eq.s32.totalorder %s1710_s14, 0  ;;  %p1326_p4 = scmp.ge.s32.totalorder %s1710_s14, 2 }
   0x6   : > { %s1762_s19 = scalar_select %p18_p0, %s1706_s13, %s20_s18  }
   0x7   : > { %p29_p3 = por %p28_p2, %p27_p1  ;;  %127 = sbr.rel (%p1326_p4) target bundleno = 24 (0x18), region = 24 }
   0xe   : > { %130 = sbr.rel (!%p29_p3) target bundleno = 24 (0x18), region = 28  ;;  %s132_s20 = sand.u32 (%p29_p3), 1, %s1706_s13  }
   0xf   : > { %s1622_s21 = smul.u32 (%p29_p3), 6, %s1710_s14 }
  0x10   : > { %s1621_s22 = smul.u32 (%p29_p3), 24, %s132_s20 }
  0x11   : > { %s137_s25 = scalar_lea.vmem (%p29_p3), %s2028_s0, %s1622_s21 }
  0x12   : > { %v153_v0 = vld [vmem:[%s137_s25] sm:$0xf] (%p29_p3)   ;;  %v157_v1 = vld [vmem:[%s137_s25 + $0x4] sm:$0x3] (%p29_p3)  ;;  %s134_s26 = scalar_lea.vmem (%p29_p3), [#allocation2], %s1621_s22 }
  0x13   : > { %154 = vst [vmem:[%s134_s26] sm:$0xf] (%p29_p3), %v153_v0   ;;  %158 = vst [vmem:[%s134_s26 + $0x4] sm:$0x3] (%p29_p3), %v157_v1  ;;  %v159_v2 = vld [vmem:[%s137_s25 + $0xc] sm:$0xf] (%p29_p3)  }
  0x14   : > { %v163_v3 = vld [vmem:[%s137_s25 + $0x10] sm:$0x3] (%p29_p3)  ;;  %v165_v4 = vld [vmem:[%s137_s25 + $0x18] sm:$0xf] (%p29_p3)   ;;  %160 = vst [vmem:[%s134_s26 + $0x6] sm:$0xf] (%p29_p3), %v159_v2  }
  0x15   : > { %164 = vst [vmem:[%s134_s26 + $0xa] sm:$0x3] %v163_v3  ;;  %166 = vst [vmem:[%s134_s26 + $0xc] sm:$0xf] %v165_v4   ;;  %v169_v5 = vld [vmem:[%s137_s25 + $0x1c] sm:$0x3] }
  0x16   : > { %v171_v6 = vld [vmem:[%s137_s25 + $0x24] sm:$0xf]   ;;  %v175_v7 = vld [vmem:[%s137_s25 + $0x28] sm:$0x3]  ;;  %170 = vst [vmem:[%s134_s26 + $0x10] sm:$0x3] %v169_v5 }
  0x17   : > { %172 = vst [vmem:[%s134_s26 + $0x12] sm:$0xf] %v171_v6   ;;  %176 = vst [vmem:[%s134_s26 + $0x16] sm:$0x3] %v175_v7 }
  0x18 PF: > { %p1328_p5 = scmp.ge.s32.totalorder %s1710_s14, 1  ;;  %p222_p6 = scmp.lt.s32.totalorder %s1710_s14, 3 }
  0x1a   : > { %p223_p7 = pnand %p1328_p5, %p222_p6 }
  0x1b   : > { %v1652_v8 = vld [vmem:[%s2029_s1 + $0x20] sm:$0xff] (!%p223_p7)   ;;  %v1712_v9 = vmov (!%p223_p7), 0.0   ;;  %v1654_v11 = vld [vmem:[%s2029_s1 + $0x28] sm:$0xff] (!%p223_p7)   ;;  %vm1713_vm0 = vmmov (!%p223_p7), 0   ;;  %s229_s6 = sand.u32 (!%p223_p7), 1, %s1702_s12   ;;  %v284_v13 = vlaneseq (!%p223_p7)  ;;  %v1656_v14 = vld [vmem:[%s2029_s1 + $0x30] sm:$0xff] (!%p223_p7)  }
  0x1c   : > { %226 = sbr.rel (%p223_p7) target bundleno = 333 (0x14d), region = 69  ;;  %1513 = vmatprep.subr.bf16.mxu0 (!%p223_p7), %v1712_v9  ;;  %1525 = vmatprep.subr.bf16.mxu1 (!%p223_p7), %v1712_v9  ;;  %v1653_v10 = vld [vmem:[%s2029_s1] sm:$0xff] (!%p223_p7)   ;;  %v1655_v12 = vld [vmem:[%s2029_s1 + $0x8] sm:$0xff] (!%p223_p7)   ;;  %v1657_v15 = vld [vmem:[%s2029_s1 + $0x10] sm:$0xff] (!%p223_p7)   ;;  %v1714_v19 = vmov (!%p223_p7), 1966171168  }
  0x1d   : > { %1514 = vmatpush3.bf16.msra.mxu0 (!%p223_p7), %v1652_v8  ;;  %1521 = vmatprep.mubr.msk.bf16.mxu0 (!%p223_p7), %vm1713_vm0, %v1712_v9  ;;  %s1623_s9 = smul.u32 (!%p223_p7), 24, %s229_s6  ;;  %v1800_v16 = vshrl.u32 (!%p223_p7), %v284_v13, 7  ;;  %v282_v20 = vunpack.c.l.s4 (!%p223_p7), %v1714_v19  ;;  %v1658_v23 = vld [vmem:[%s2029_s1 + $0x38] sm:$0xff] (!%p223_p7)   ;;  %v1660_v31 = vld [vmem:[%s2029_s1 + $0x40] sm:$0xff] (!%p223_p7)   ;;  %vm319_vm1 = vcmask (!%p223_p7), 523264   ;;  %v1662_v35 = vld [vmem:[%s2029_s1 + $0x48] sm:$0xff] (!%p223_p7)  }
  0x1e   : > { %1526 = vmatpush3.bf16.msra.mxu1 (!%p223_p7), %v1653_v10  ;;  %1515 = vmatprep.subr.bf16.mxu0 (!%p223_p7), %v1712_v9  ;;  %v1659_v24 = vld [vmem:[%s2029_s1 + $0x18] sm:$0xff] (!%p223_p7)   ;;  %v1661_v32 = vld [vmem:[%s2029_s1 + $0x60] sm:$0xff] (!%p223_p7)   ;;  %vm467_vm2 = vsmask.f32 (!%p223_p7), 256  ;;  %v1663_v36 = vld [vmem:[%s2029_s1 + $0x68] sm:$0xff] (!%p223_p7)   ;;  %p251_p8 = scmp.lt.s32.totalorder (!%p223_p7), %s1323_s15, 1 }
  0x1f   : > { %1527 = vmatprep.subr.bf16.mxu1 (!%p223_p7), %v1712_v9  ;;  %1533 = vmatprep.mubr.msk.bf16.mxu1 (!%p223_p7), %vm1713_vm0, %v1712_v9  ;;  %s1803_s18 = scalar_lea.vmem (!%p223_p7), [#allocation2], %s1623_s9  ;;  %v283_v26 = vunpack.c.0.s8 (!%p223_p7), %v282_v20  ;;  %vm468_vm3 = vsmask.f32 (!%p223_p7), 1284  ;;  %vm470_vm5 = vsmask.f32 (!%p223_p7), 2312  ;;  %v1664_v43 = vld [vmem:[%s2029_s1 + $0x50] sm:$0xff] (!%p223_p7)  }
  0x20   : > { %v1330_v17 = vld [vmem:[%s1803_s18 + $0x6] sm:$0x1] (!%p223_p7)  ;;  %v1331_v18 = vld [vmem:[%s1803_s18 + $0x8] sm:$0x1] (!%p223_p7)  ;;  %v256_v21 = vld [vmem:[%s1803_s18] sm:$0x1] (!%p223_p7) }
  0x21   : > { %1516 = vmatpush3.bf16.msra.mxu0 (!%p223_p7), %v1654_v11  ;;  %v257_v22 = vld [vmem:[%s1803_s18 + $0x2] sm:$0x1] (!%p223_p7)  ;;  %v280_v25 = vcombine.low (!%p223_p7), %v1330_v17, %v1331_v18  ;;  %v1818_v28 = vsub.s32 (!%p223_p7), %v283_v26, %v1800_v16  ;;  %v1350_v37 = vld.sshfl [vmem:[%s1803_s18] sm:$0x11 pattern:$0x75316420] (!%p223_p7)  ;;  %vm469_vm4 = vmor (!%p223_p7), %vm467_vm2, %vm468_vm3 }
  0x22   : > { %1528 = vmatpush3.bf16.msra.mxu1 (!%p223_p7), %v1655_v12  ;;  %1517 = vmatprep.subr.bf16.mxu0 (!%p223_p7), %v1712_v9  ;;  %v365_v27 = vcombine.low (!%p223_p7), %v256_v21, %v257_v22  ;;  %v1351_v38 = vld.sshfl [vmem:[%s1803_s18 + $0x2] sm:$0x11 pattern:$0x75316420] (!%p223_p7)  ;;  %v458_v39 = vcombine.high (!%p223_p7), %v1350_v37, %v1350_v37  ;;  %vm471_vm6 = vmor (!%p223_p7), %vm469_vm4, %vm470_vm5  ;;  %vm472_vm7 = vsmask.f32 (!%p223_p7), 3340 }
  0x23   : > { %1529 = vmatprep.subr.bf16.mxu1 %v1712_v9  ;;  %v287_v29 = vrot.slane %v280_v25, %v1818_v28  ;;  %v466_v40 = vcombine.high %v1351_v38, %v1351_v38  ;;  %vm474_vm8 = vsmask.f32 4368  ;;  %vm476_vm9 = vsmask.f32 5396  ;;  %vm473_vm10 = vmor %vm471_vm6, %vm472_vm7  ;;  %v1665_v44 = vld [vmem:[%s2029_s1 + $0x70] sm:$0xff]   ;;  %v1666_v53 = vld [vmem:[%s2029_s1 + $0x58] sm:$0xff]  }
  0x24   : > { %v372_v30 = vrot.slane %v365_v27, %v1818_v28  ;;  %vm478_vm11 = vsmask.f32 6424  ;;  %vm480_vm12 = vsmask.f32 7452  ;;  %v483_v41 = vshrl.u32 %v1350_v37, 16  ;;  %vm475_vm13 = vmor %vm473_vm10, %vm474_vm8  ;;  %v1667_v56 = vld [vmem:[%s2029_s1 + $0x78] sm:$0xff]  }
  0x25   : > { %1518 = vmatpush3.bf16.msra.mxu0 %v1656_v14  ;;  %v294_v33 = vrot.slane %v287_v29, %v1818_v28  ;;  %v488_v42 = vshll.u32 %v458_v39, 16  ;;  %v492_v45 = vshrl.u32 %v1351_v38, 16  ;;  %v497_v46 = vshll.u32 %v466_v40, 16  ;;  %vm477_vm14 = vmor %vm475_vm13, %vm476_vm9  ;;  %v1367_v47 = vld [vmem:[%s1803_s18 + $0xc] sm:$0x1]  ;;  %v1672_v11 = vld [vmem:[%s2029_s1 + $0x90] sm:$0xff]  }
  0x26   : > { %1530 = vmatpush3.bf16.msra.mxu1 %v1657_v15  ;;  %1519 = vmatprep.subr.bf16.mxu0 %v1712_v9  ;;  %v379_v34 = vrot.slane %v372_v30, %v1818_v28  ;;  %v1368_v48 = vld [vmem:[%s1803_s18 + $0xe] sm:$0x1]  ;;  %vm479_vm15 = vmor %vm477_vm14, %vm478_vm11  ;;  %v1399_v62 = vld.sshfl [vmem:[%s1803_s18 + $0xc] sm:$0x11 pattern:$0x75316420] }
  0x27   : > { %1531 = vmatprep.subr.bf16.mxu1 %v1712_v9  ;;  %v606_v49 = vcombine.low %v1367_v47, %v1368_v48  ;;  %vm1861_vm2 = vmor %vm479_vm15, %vm480_vm12  ;;  %v1668_v59 = vld [vmem:[%s2029_s1 + $0x80] sm:$0xff]   ;;  %v1382_v63 = vld [vmem:[%s1803_s18 + $0x12] sm:$0x1]  ;;  %v797_v2 = vcombine.high %v1399_v62, %v1399_v62  ;;  %v807_v3 = vshrl.u32 %v1399_v62, 16  ;;  %s2038_s15 = smov (!%p251_p8, %s1323_s15), 1 }
  0x28   : > { %v490_v51 = vsel %vm1861_vm2, %v483_v41, %v488_v42  ;;  %v1869_v52 = vsel %vm1861_vm2, %v492_v45, %v497_v46  ;;  %v1669_v61 = vld [vmem:[%s2029_s1 + $0xa0] sm:$0xff]   ;;  %v1383_v0 = vld [vmem:[%s1803_s18 + $0x14] sm:$0x1]  ;;  %v1674_v18 = vld [vmem:[%s2029_s1 + $0x98] sm:$0xff]   ;;  %s1329_s12 = sshll.u32 %s2038_s15, 1 }
  0x29   : > { %1520 = vmatpush3.bf16.msra.mxu0 %v1658_v23  ;;  %v509_v54 = vcombine.low %v490_v51, %v1869_v52  ;;  %v613_v55 = vrot.slane %v606_v49, %v1818_v28  ;;  %v1400_v1 = vld.sshfl [vmem:[%s1803_s18 + $0xe] sm:$0x11 pattern:$0x75316420]  ;;  %v812_v8 = vshll.u32 %v797_v2, 16  ;;  %v703_v13 = vcombine.low %v1382_v63, %v1383_v0  ;;  %v1673_v15 = vld [vmem:[%s2029_s1 + $0xb0] sm:$0xff]   ;;  %s254_s21 = scalar_lea.vmem %s2031_s3, %s1329_s12 }
  0x2a   : > { %1532 = vmatpush3.bf16.msra.mxu1 %v1659_v24  ;;  %1537 = vmatprep.subr.bf16.mxu0 %v1712_v9  ;;  %v1670_v4 = vld [vmem:[%s2029_s1 + $0x88] sm:$0xff]   ;;  %v805_v5 = vcombine.high %v1400_v1, %v1400_v1  ;;  %v816_v6 = vshrl.u32 %v1400_v1, 16  ;;  %v1675_v21 = vld [vmem:[%s2029_s1 + $0xb8] sm:$0xff]   ;;  %v1676_v24 = vld [vmem:[%s2029_s1 + $0xc0] sm:$0xff]  }
  0x2b   : > { %1549 = vmatprep.subr.bf16.mxu1 %v1712_v9  ;;  %v516_v57 = vrot.slane %v509_v54, %v1818_v28  ;;  %v620_v60 = vrot.slane %v613_v55, %v1818_v28  ;;  %v1671_v7 = vld [vmem:[%s2029_s1 + $0xa8] sm:$0xff]   ;;  %v814_v12 = vsel %vm1861_vm2, %v807_v3, %v812_v8  ;;  %v710_v19 = vrot.slane %v703_v13, %v1818_v28  ;;  %v1677_v25 = vld [vmem:[%s2029_s1 + $0xe0] sm:$0xff]   ;;  %v1682_v40 = vld [vmem:[%s2029_s1 + $0xd8] sm:$0xff]  }
  0x2c   : > { %1522 = vmatmul.mubr.msk.bf16.vlgmr.msra.gmra.mrb[0].mxu0 %vm319_vm1, %v294_v33  ;;  %v821_v10 = vshll.u32 %v805_v5, 16  ;;  %v1678_v26 = vld [vmem:[%s2029_s1 + $0xc8] sm:$0xff]   ;;  %v1416_v29 = vld [vmem:[%s1803_s18 + $0x2] sm:$0x1]  ;;  %v1417_v30 = vld [vmem:[%s1803_s18 + $0x4] sm:$0x1] }
  0x2d   : > { %1534 = vmatmul.mubr.msk.bf16.vlgmr.msra.gmra.mrb[0].mxu1 %vm319_vm1, %v379_v34  ;;  %1538 = vmatpush3.bf16.msra.mxu0 %v1660_v31  ;;  %v523_v58 = vrot.slane %v516_v57, %v1818_v28  ;;  %v717_v22 = vrot.slane %v710_v19, %v1818_v28  ;;  %v1679_v27 = vld [vmem:[%s2029_s1 + $0xe8] sm:$0xff]   ;;  %v930_v33 = vcombine.low %v1416_v29, %v1417_v30  ;;  %v1449_v37 = vld.sshfl [vmem:[%s1803_s18 + $0x4] sm:$0x11 pattern:$0x75316420] }
  0x2e   : > { %1550 = vmatpush3.bf16.msra.mxu1 %v1661_v32  ;;  %1539 = vmatprep.subr.bf16.mxu0 %v1712_v9  ;;  %v823_v14 = vsel %vm1861_vm2, %v816_v6, %v821_v10  ;;  %v1431_v31 = vld [vmem:[%s1803_s18 + $0x8] sm:$0x1]  ;;  %v1432_v32 = vld [vmem:[%s1803_s18 + $0xa] sm:$0x1]  ;;  %v1683_v41 = vld [vmem:[%s2029_s1 + $0xf8] sm:$0xff]   ;;  %v1129_v42 = vcombine.high %v1449_v37, %v1449_v37  ;;  %v1140_v46 = vshrl.u32 %v1449_v37, 16 }
  0x2f   : > { %1551 = vmatprep.subr.bf16.mxu1 %v1712_v9  ;;  %1545 = vmatprep.mubr.msk.bf16.mxu0 %vm1713_vm0, %v1712_v9  ;;  %v833_v17 = vcombine.low %v814_v12, %v823_v14  ;;  %v1027_v34 = vcombine.low %v1431_v31, %v1432_v32  ;;  %v937_v38 = vrot.slane %v930_v33, %v1818_v28  ;;  %v1684_v45 = vld [vmem:[%s2029_s1 + $0x100] sm:$0xff]   ;;  %v1685_v48 = vld [vmem:[%s2029_s1 + $0x108] sm:$0xff]   ;;  %v1687_v55 = vld [vmem:[%s2029_s1 + $0x118] sm:$0xff]   ;;  %v1715_v31 = vmov 1983009808  }
  0x30   : > { %1557 = vmatprep.mubr.msk.bf16.mxu1 %vm1713_vm0, %v1712_v9  ;;  %v1145_v47 = vshll.u32 %v1129_v42, 16  ;;  %v1251_v32 = vunpack.c.l.s4 %v1715_v31 }
  0x31   : > { %1540 = vmatpush3.bf16.msra.mxu0 %v1662_v35  ;;  %v840_v20 = vrot.slane %v833_v17, %v1818_v28  ;;  %v1680_v35 = vld [vmem:[%s2029_s1 + $0xd0] sm:$0xff]   ;;  %v1034_v39 = vrot.slane %v1027_v34, %v1818_v28 }
  0x32   : > { %1552 = vmatpush3.bf16.msra.mxu1 %v1663_v36  ;;  %1541 = vmatprep.subr.bf16.mxu0 %v1712_v9  ;;  %v1681_v36 = vld [vmem:[%s2029_s1 + $0xf0] sm:$0xff]   ;;  %v1147_v49 = vsel %vm1861_vm2, %v1140_v46, %v1145_v47  ;;  %v1252_v33 = vunpack.c.0.s8 %v1251_v32 }
  0x33   : > { %1553 = vmatprep.subr.bf16.mxu1 %v1712_v9  ;;  %v847_v23 = vrot.slane %v840_v20, %v1818_v28  ;;  %v1157_v51 = vcombine.low %v1869_v52, %v1147_v49 }
  0x35   : > { %1542 = vmatpush3.bf16.msra.mxu0 %v1664_v43  ;;  %v944_v43 = vrot.slane %v937_v38, %v1818_v28  ;;  %v1164_v54 = vrot.slane %v1157_v51, %v1818_v28 }
  0x36   : > { %1554 = vmatpush3.bf16.msra.mxu1 %v1665_v44  ;;  %1543 = vmatprep.subr.bf16.mxu0 %v1712_v9  ;;  %v1041_v44 = vrot.slane %v1034_v39, %v1818_v28 }
  0x37   : > { %1555 = vmatprep.subr.bf16.mxu1 %v1712_v9  ;;  %v1171_v50 = vrot.slane %v1164_v54, %v1818_v28 }
  0x39   : > { %1544 = vmatpush3.bf16.msra.mxu0 %v1666_v53  ;;  %v1686_v53 = vld [vmem:[%s2029_s1 + $0x110] sm:$0xff]  }
  0x3a   : > { %1556 = vmatpush3.bf16.msra.mxu1 %v1667_v56  ;;  %1561 = vmatprep.subr.bf16.mxu0 %v1712_v9 }
  0x3b   : > { %1573 = vmatprep.subr.bf16.mxu1 %v1712_v9 }
  0x3c   : > { %1546 = vmatmul.mubr.msk.bf16.vlgmr.msra.gmra.mrb[4].mxu0 %vm319_vm1, %v523_v58 }
  0x3d   : > { %1558 = vmatmul.mubr.msk.bf16.vlgmr.msra.gmra.mrb[4].mxu1 %vm319_vm1, %v620_v60  ;;  %1562 = vmatpush3.bf16.msra.mxu0 %v1668_v59 }
  0x3e   : > { %1574 = vmatpush3.bf16.msra.mxu1 %v1669_v61  ;;  %1563 = vmatprep.subr.bf16.mxu0 %v1712_v9 }
  0x3f   : > { %1575 = vmatprep.subr.bf16.mxu1 %v1712_v9  ;;  %1569 = vmatprep.mubr.msk.bf16.mxu0 %vm1713_vm0, %v1712_v9 }
  0x40   : > { %1581 = vmatprep.mubr.msk.bf16.mxu1 %vm1713_vm0, %v1712_v9 }
  0x41   : > { %1564 = vmatpush3.bf16.msra.mxu0 %v1670_v4 }
  0x42   : > { %1576 = vmatpush3.bf16.msra.mxu1 %v1671_v7  ;;  %1565 = vmatprep.subr.bf16.mxu0 %v1712_v9 }
  0x43   : > { %1577 = vmatprep.subr.bf16.mxu1 %v1712_v9 }
  0x45   : > { %1566 = vmatpush3.bf16.msra.mxu0 %v1672_v11 }
  0x46   : > { %1578 = vmatpush3.bf16.msra.mxu1 %v1673_v15  ;;  %1567 = vmatprep.subr.bf16.mxu0 %v1712_v9 }
  0x47   : > { %1579 = vmatprep.subr.bf16.mxu1 %v1712_v9 }
  0x49   : > { %1568 = vmatpush3.bf16.msra.mxu0 %v1674_v18 }
  0x4a   : > { %1580 = vmatpush3.bf16.msra.mxu1 %v1675_v21  ;;  %1585 = vmatprep.subr.bf16.mxu0 %v1712_v9 }
  0x4b   : > { %1597 = vmatprep.subr.bf16.mxu1 %v1712_v9 }
  0x4c   : > { %1570 = vmatmul.mubr.msk.bf16.vlgmr.msra.gmra.mrb[8].mxu0 %vm319_vm1, %v717_v22 }
  0x4d   : > { %1582 = vmatmul.mubr.msk.bf16.vlgmr.msra.gmra.mrb[8].mxu1 %vm319_vm1, %v847_v23  ;;  %1586 = vmatpush3.bf16.msra.mxu0 %v1676_v24 }
  0x4e   : > { %1598 = vmatpush3.bf16.msra.mxu1 %v1677_v25  ;;  %1587 = vmatprep.subr.bf16.mxu0 %v1712_v9 }
  0x4f   : > { %1599 = vmatprep.subr.bf16.mxu1 %v1712_v9  ;;  %1593 = vmatprep.mubr.msk.bf16.mxu0 %vm1713_vm0, %v1712_v9 }
  0x50   : > { %1605 = vmatprep.mubr.msk.bf16.mxu1 %vm1713_vm0, %v1712_v9 }
  0x51   : > { %1588 = vmatpush3.bf16.msra.mxu0 %v1678_v26 }
  0x52   : > { %1600 = vmatpush3.bf16.msra.mxu1 %v1679_v27  ;;  %1589 = vmatprep.subr.bf16.mxu0 %v1712_v9 }
  0x53   : > { %1601 = vmatprep.subr.bf16.mxu1 %v1712_v9 }
  0x55   : > { %1590 = vmatpush3.bf16.msra.mxu0 %v1680_v35  ;;  %v1465_v35 = vld [vmem:[%s2030_s2] ss:$0 sm:$0xff] }
  0x56   : > { %1602 = vmatpush3.bf16.msra.mxu1 %v1681_v36  ;;  %1591 = vmatprep.subr.bf16.mxu0 %v1712_v9 }
  0x57   : > { %1603 = vmatprep.subr.bf16.mxu1 %v1712_v9 }
  0x59   : > { %1592 = vmatpush3.bf16.msra.mxu0 %v1682_v40  ;;  %v1255_v40 = vsub.s32 %v1252_v33, %v1800_v16 }
  0x5a   : > { %1604 = vmatpush3.bf16.msra.mxu1 %v1683_v41  ;;  %1609 = vmatprep.subr.bf16.mxu0 %v1712_v9 }
  0x5c   : > { %1594 = vmatmul.mubr.msk.bf16.vlgmr.msra.gmra.mrb[12].mxu0 %vm319_vm1, %v944_v43 }
  0x5d   : > { %1606 = vmatmul.mubr.msk.bf16.vlgmr.msra.gmra.mrb[12].mxu1 %vm319_vm1, %v1041_v44  ;;  %1610 = vmatpush3.bf16.msra.mxu0 %v1684_v45 }
  0x5e   : > { %1617 = vmatprep.mubr.msk.bf16.mxu0 %vm1713_vm0, %v1712_v9  ;;  %1611 = vmatprep.subr.bf16.mxu0 %v1712_v9 }
  0x61   : > { %1612 = vmatpush3.bf16.msra.mxu0 %v1685_v48 }
  0x62   : > { %1613 = vmatprep.subr.bf16.mxu0 %v1712_v9 }
  0x65   : > { %1614 = vmatpush3.bf16.msra.mxu0 %v1686_v53 }
  0x66   : > { %1615 = vmatprep.subr.bf16.mxu0 %v1712_v9 }
  0x69   : > { %1616 = vmatpush3.bf16.msra.mxu0 %v1687_v55 }
  0x6c   : > { %1618 = vmatmul.mubr.msk.bf16.vlgmr.msra.gmra.mrb[16].mxu0 %vm319_vm1, %v1171_v50 }
  0xff   : > { %v357_v52 = vpop.f32.mrb[0].mxu0 }
 0x100   : > { %v441_v56 = vpop.f32.mrb[0].mxu1  ;;  %v1523_v57 = vpop.f32.mrb[1].mxu0 }
 0x101   : > { %v442_v58 = vadd.f32 %v441_v56, %v357_v52  ;;  %v1535_v59 = vpop.f32.mrb[1].mxu1  ;;  %v360_v60 = vpop.f32.mrb[2].mxu0 }
 0x102   : > { %v444_v61 = vpop.f32.mrb[2].mxu1  ;;  %v1524_v62 = vpop.f32.mrb[3].mxu0 }
 0x103   : > { %v1536_v63 = vpop.f32.mrb[3].mxu1 }
 0x10f   : > { %v585_v0 = vpop.f32.mrb[4].mxu0 }
 0x110   : > { %v682_v1 = vpop.f32.mrb[4].mxu1  ;;  %v591_v2 = vadd.f32 %v585_v0, %v442_v58  ;;  %v1547_v3 = vpop.f32.mrb[5].mxu0 }
 0x111   : > { %v1559_v4 = vpop.f32.mrb[5].mxu1  ;;  %v588_v9 = vpop.f32.mrb[6].mxu0 }
 0x112   : > { %v685_v5 = vpop.f32.mrb[6].mxu1  ;;  %v688_v28 = vadd.f32 %v682_v1, %v591_v2  ;;  %v1548_v6 = vpop.f32.mrb[7].mxu0 }
 0x113   : > { %v1560_v7 = vpop.f32.mrb[7].mxu1 }
 0x11f   : > { %v779_v8 = vpop.f32.mrb[8].mxu0 }
 0x120   : > { %v909_v10 = vpop.f32.mrb[8].mxu1  ;;  %v785_v11 = vadd.f32 %v779_v8, %v688_v28  ;;  %v1571_v12 = vpop.f32.mrb[9].mxu0 }
 0x121   : > { %v1583_v13 = vpop.f32.mrb[9].mxu1  ;;  %v782_v14 = vpop.f32.mrb[10].mxu0 }
 0x122   : > { %v912_v15 = vpop.f32.mrb[10].mxu1  ;;  %v915_v17 = vadd.f32 %v909_v10, %v785_v11  ;;  %v1572_v18 = vpop.f32.mrb[11].mxu0 }
 0x123   : > { %v1584_v19 = vpop.f32.mrb[11].mxu1 }
 0x12f   : > { %v1006_v20 = vpop.f32.mrb[12].mxu0 }
 0x130   : > { %v1103_v21 = vpop.f32.mrb[12].mxu1  ;;  %v1012_v22 = vadd.f32 %v1006_v20, %v915_v17  ;;  %v1595_v23 = vpop.f32.mrb[13].mxu0 }
 0x131   : > { %v1607_v24 = vpop.f32.mrb[13].mxu1  ;;  %v1009_v25 = vpop.f32.mrb[14].mxu0 }
 0x132   : > { %v1106_v26 = vpop.f32.mrb[14].mxu1  ;;  %v1109_v27 = vadd.f32 %v1103_v21, %v1012_v22  ;;  %v1596_v29 = vpop.f32.mrb[15].mxu0 }
 0x133   : > { %v1608_v30 = vpop.f32.mrb[15].mxu1 }
 0x13f   : > { %v1233_v34 = vpop.f32.mrb[16].mxu0 }
 0x140   : > { %v1239_v36 = vadd.f32 %v1233_v34, %v1109_v27  ;;  %v1619_v37 = vpop.f32.mrb[17].mxu0 }
 0x141   : > { %v1236_v38 = vpop.f32.mrb[18].mxu0 }
 0x142   : > { %v1247_v39 = vadd.f32 %v1465_v35, %v1239_v36  ;;  %v1620_v41 = vpop.f32.mrb[19].mxu0 }
 0x144   : > { %v1248_v42 = vmax.f32 %v1247_v39, 0.0 }
 0x146   : > { %v1256_v43 = vrot.slane %v1248_v42, %v1255_v40 }
 0x148   : > { %v1257_v44 = vcombine.high %v1256_v43, %v1256_v43  ;;  %v1260_v45 = vpack.c.bf16 %v1256_v43, %v1256_v43 }
 0x14a   : > { %v1261_v46 = vpack.c.bf16 %v1257_v44, %v1257_v44  ;;  %1262 = vst [vmem:[%s254_s21] sm:$0x1] %v1260_v45 }
 0x14c   : > { %1263 = vst [vmem:[%s254_s21 + $0x1] sm:$0x1] %v1261_v46 }
 0x14d PF: > { %p10_p9 = scmp.ge.s32.totalorder %s1753_s16, 4   ;;  %s2034_s12 = smov %s1706_s13 }
 0x14e   : > { %s2035_s13 = smov %s1762_s19  ;;  %s2036_s14 = smov %s1753_s16 }
 0x14f   :  { %12 = sbr.rel (!%p10_p9) target bundleno = 2 (0x2), region = 121 }

// kernel: resnet_forward.13
= control target key start
LH: loop header
LB: loop body
LE: loop exit
PB: predicated region body
PF: predicated region fallthrough
CT: control target
= control target key end

     0   :  { %s2245_s15 = smov 0   ;;  %s2655_s0 = inlined_call_operand.vmem [shape: bf16[1,2,4,4,128], index: 0, kind: input, shape index: {}]   ;;  %s2656_s1 = inlined_call_operand.vmem [shape: bf16[9,128,128], index: 1, kind: input, shape index: {}]   ;;  %s2657_s2 = inlined_call_operand.vmem [shape: f32[1,128], index: 2, kind: input, shape index: {}]   ;;  %s2658_s3 = inlined_call_operand.vmem [shape: bf16[2,2,2,128], index: 3, kind: input, shape index: {}]   ;;  %s2659_s4 = inlined_call_operand.vmem [shape: bf16[2,2,2,128], index: 4, kind: output, shape index: {}]  }
   0x1 LB: > { %s1617_s16 = sadd.s32 4294967295, %s2214_s15   ;;  %p1621_p0 = scmp.ge.s32.totalorder %s2214_s15, 1  ;;  %s2214_s15 = sphi %s2245_s15, %s14_s15  }
   0x2   : > { %p171_p1 = scmp.lt.s32.totalorder %s2214_s15, 3 }
   0x4   : > { %p172_p2 = pnand %p1621_p0, %p171_p1 }
   0x5   : > { %v2136_v0 = vld [vmem:[%s2656_s1 + $0x40] sm:$0xff] (!%p172_p2)   ;;  %v2216_v1 = vmov (!%p172_p2), 0.0   ;;  %v2138_v3 = vld [vmem:[%s2656_s1 + $0x48] sm:$0xff] (!%p172_p2)   ;;  %vm2217_vm0 = vmmov (!%p172_p2), 0   ;;  %p200_p3 = scmp.lt.s32.totalorder (!%p172_p2), %s1617_s16, 1  ;;  %v2140_v5 = vld [vmem:[%s2656_s1 + $0x50] sm:$0xff] (!%p172_p2)   ;;  %v306_v16 = vlaneseq (!%p172_p2) }
   0x6   : > { %175 = sbr.rel (%p172_p2) target bundleno = 393 (0x189), region = 36  ;;  %1944 = vmatprep.subr.bf16.mxu0 (!%p172_p2), %v2216_v1  ;;  %1964 = vmatprep.subr.bf16.mxu1 (!%p172_p2), %v2216_v1  ;;  %v2137_v2 = vld [vmem:[%s2656_s1] sm:$0xff] (!%p172_p2)   ;;  %v2139_v4 = vld [vmem:[%s2656_s1 + $0x8] sm:$0xff] (!%p172_p2)   ;;  %v2141_v6 = vld [vmem:[%s2656_s1 + $0x10] sm:$0xff] (!%p172_p2)   ;;  %vm252_vm1 = vsmask.f32 (!%p172_p2), 256 }
   0x7   : > { %1945 = vmatpush3.bf16.msra.mxu0 (!%p172_p2), %v2136_v0  ;;  %1960 = vmatprep.mubr.msk.bf16.mxu0 (!%p172_p2), %vm2217_vm0, %v2216_v1  ;;  %v2142_v7 = vld [vmem:[%s2656_s1 + $0x58] sm:$0xff] (!%p172_p2)   ;;  %v2144_v9 = vld [vmem:[%s2656_s1 + $0x60] sm:$0xff] (!%p172_p2)   ;;  %v2146_v11 = vld [vmem:[%s2656_s1 + $0x68] sm:$0xff] (!%p172_p2)   ;;  %vm253_vm2 = vsmask.f32 (!%p172_p2), 1284  ;;  %v2325_v28 = vshrl.u32 (!%p172_p2), %v306_v16, 7 }
   0x8   : > { %1965 = vmatpush3.bf16.msra.mxu1 (!%p172_p2), %v2137_v2  ;;  %1946 = vmatprep.subr.bf16.mxu0 (!%p172_p2), %v2216_v1  ;;  %v2143_v8 = vld [vmem:[%s2656_s1 + $0x18] sm:$0xff] (!%p172_p2)   ;;  %v2145_v10 = vld [vmem:[%s2656_s1 + $0x20] sm:$0xff] (!%p172_p2)   ;;  %v2147_v13 = vld [vmem:[%s2656_s1 + $0x28] sm:$0xff] (!%p172_p2)   ;;  %vm255_vm4 = vsmask.f32 (!%p172_p2), 2312 }
   0x9   : > { %1966 = vmatprep.subr.bf16.mxu1 (!%p172_p2), %v2216_v1  ;;  %1980 = vmatprep.mubr.msk.bf16.mxu1 (!%p172_p2), %vm2217_vm0, %v2216_v1  ;;  %vm254_vm3 = vmor (!%p172_p2), %vm252_vm1, %vm253_vm2  ;;  %vm257_vm5 = vsmask.f32 (!%p172_p2), 3340  ;;  %vm259_vm6 = vsmask.f32 (!%p172_p2), 4368  ;;  %vm261_vm8 = vsmask.f32 (!%p172_p2), 5396 }
   0xa   : > { %vm256_vm7 = vmor (!%p172_p2), %vm254_vm3, %vm255_vm4  ;;  %vm263_vm9 = vsmask.f32 (!%p172_p2), 6424  ;;  %vm265_vm10 = vsmask.f32 (!%p172_p2), 7452  ;;  %v2148_v18 = vld [vmem:[%s2656_s1 + $0x70] sm:$0xff] (!%p172_p2)   ;;  %v2150_v34 = vld [vmem:[%s2656_s1 + $0x78] sm:$0xff] (!%p172_p2)  }
   0xb   : > { %1947 = vmatpush3.bf16.msra.mxu0 (!%p172_p2), %v2138_v3  ;;  %vm258_vm11 = vmor (!%p172_p2), %vm256_vm7, %vm257_vm5  ;;  %v2149_v25 = vld [vmem:[%s2656_s1 + $0x30] sm:$0xff] (!%p172_p2)   ;;  %v2218_v26 = vmov (!%p172_p2), 1966171168   ;;  %v2151_v37 = vld [vmem:[%s2656_s1 + $0x38] sm:$0xff] (!%p172_p2)  }
   0xc   : > { %1967 = vmatpush3.bf16.msra.mxu1 (!%p172_p2), %v2139_v4  ;;  %1948 = vmatprep.subr.bf16.mxu0 (!%p172_p2), %v2216_v1  ;;  %vm260_vm12 = vmor (!%p172_p2), %vm258_vm11, %vm259_vm6  ;;  %v304_v27 = vunpack.c.l.s4 (!%p172_p2), %v2218_v26  ;;  %v2152_v42 = vld [vmem:[%s2656_s1 + $0x80] sm:$0xff] (!%p172_p2)   ;;  %v2154_v44 = vld [vmem:[%s2656_s1 + $0x88] sm:$0xff] (!%p172_p2)  }
   0xd   : > { %s2663_s16 = smov (!%p200_p3, %s1617_s16), 1  ;;  %1968 = vmatprep.subr.bf16.mxu1 %v2216_v1  ;;  %vm262_vm13 = vmor %vm260_vm12, %vm261_vm8  ;;  %v2153_v43 = vld [vmem:[%s2656_s1 + $0xc0] sm:$0xff]   ;;  %v2155_v45 = vld [vmem:[%s2656_s1 + $0xc8] sm:$0xff]  }
   0xe   : > { %s1862_s5 = sshll.u32 %s2663_s16, 3  ;;  %vm264_vm14 = vmor %vm262_vm13, %vm263_vm9  ;;  %v305_v30 = vunpack.c.0.s8 %v304_v27  ;;  %v2156_v46 = vld [vmem:[%s2656_s1 + $0x90] sm:$0xff]   ;;  %v2158_v48 = vld [vmem:[%s2656_s1 + $0x98] sm:$0xff]  }
   0xf   : > { %1949 = vmatpush3.bf16.msra.mxu0 %v2140_v5  ;;  %s2295_s10 = scalar_lea.vmem %s2655_s0, %s1862_s5  ;;  %vm2331_vm15 = vmor %vm264_vm14, %vm265_vm10  ;;  %v2157_v47 = vld [vmem:[%s2656_s1 + $0xd0] sm:$0xff]   ;;  %v2159_v49 = vld [vmem:[%s2656_s1 + $0xd8] sm:$0xff]  }
  0x10   : > { %1969 = vmatpush3.bf16.msra.mxu1 %v2141_v6  ;;  %1950 = vmatprep.subr.bf16.mxu0 %v2216_v1  ;;  %v1626_v12 = vld.sshfl [vmem:[%s2295_s10] sm:$0x11 pattern:$0x75316420]  ;;  %v215_v24 = vld [vmem:[%s2295_s10 + $0x2] sm:$0x1]  ;;  %v2346_v36 = vsub.s32 %v305_v30, %v2325_v28 }
  0x11   : > { %1970 = vmatprep.subr.bf16.mxu1 %v2216_v1  ;;  %v1627_v14 = vld.sshfl [vmem:[%s2295_s10 + $0x2] sm:$0x11 pattern:$0x75316420]  ;;  %v243_v15 = vcombine.high %v1626_v12, %v1626_v12  ;;  %v268_v19 = vshrl.u32 %v1626_v12, 16  ;;  %v2162_v52 = vld [vmem:[%s2656_s1 + $0xa8] sm:$0xff]  }
  0x12   : > { %v251_v17 = vcombine.high %v1627_v14, %v1627_v14  ;;  %v277_v21 = vshrl.u32 %v1627_v14, 16  ;;  %v214_v23 = vld [vmem:[%s2295_s10] sm:$0x1]  ;;  %v2163_v55 = vld [vmem:[%s2656_s1 + $0xe8] sm:$0xff]   ;;  %v1689_v56 = vld [vmem:[%s2295_s10 + $0x2] sm:$0x1] }
  0x13   : > { %1951 = vmatpush3.bf16.msra.mxu0 %v2142_v7  ;;  %v273_v20 = vshll.u32 %v243_v15, 16  ;;  %v408_v31 = vcombine.low %v214_v23, %v215_v24  ;;  %v2160_v50 = vld [vmem:[%s2656_s1 + $0xa0] sm:$0xff]   ;;  %v2164_v59 = vld [vmem:[%s2656_s1 + $0xb0] sm:$0xff]   ;;  %v2166_v3 = vld [vmem:[%s2656_s1 + $0xb8] sm:$0xff]  }
  0x14   : > { %1971 = vmatpush3.bf16.msra.mxu1 %v2143_v8  ;;  %1952 = vmatprep.subr.bf16.mxu0 %v2216_v1  ;;  %v282_v22 = vshll.u32 %v251_v17, 16  ;;  %v2161_v51 = vld [vmem:[%s2656_s1 + $0xe0] sm:$0xff]   ;;  %v2165_v61 = vld [vmem:[%s2656_s1 + $0xf0] sm:$0xff]   ;;  %v2167_v5 = vld [vmem:[%s2656_s1 + $0xf8] sm:$0xff]  }
  0x15   : > { %1972 = vmatprep.subr.bf16.mxu1 %v2216_v1  ;;  %v275_v32 = vsel %vm2331_vm15, %v268_v19, %v273_v20  ;;  %v415_v39 = vrot.slane %v408_v31, %v2346_v36  ;;  %v1662_v53 = vld.sshfl [vmem:[%s2295_s10] sm:$0x10 pattern:$0x75316420]  ;;  %v1690_v57 = vld [vmem:[%s2295_s10 + $0x4] sm:$0x1] }
  0x16   : > { %v2339_v33 = vsel %vm2331_vm15, %v277_v21, %v282_v22  ;;  %v2406_v54 = vld.sshfl [vmem:[%s2295_s10 + $0x2] sm:$0x10 pattern:$0x75316420]  ;;  %v676_v60 = vcombine.low %v1689_v56, %v1690_v57  ;;  %v2170_v14 = vld [vmem:[%s2656_s1 + $0x108] sm:$0xff]   ;;  %v2172_v17 = vld [vmem:[%s2656_s1 + $0x110] sm:$0xff]  }
  0x17   : > { %1953 = vmatpush3.bf16.msra.mxu0 %v2144_v9  ;;  %v302_v35 = vcombine.low %v275_v32, %v2339_v33  ;;  %v422_v41 = vrot.slane %v415_v39, %v2346_v36  ;;  %v1680_v58 = vcombine.high %v1662_v53, %v2406_v54  ;;  %v1718_v62 = vld.sshfl [vmem:[%s2295_s10 + $0x4] sm:$0x11 pattern:$0x75316420]  ;;  %v2171_v16 = vld [vmem:[%s2656_s1 + $0x148] sm:$0xff]   ;;  %v2174_v19 = vld [vmem:[%s2656_s1 + $0x118] sm:$0xff]  }
  0x18   : > { %1973 = vmatpush3.bf16.msra.mxu1 %v2145_v10  ;;  %1954 = vmatprep.subr.bf16.mxu0 %v2216_v1  ;;  %v800_v0 = vcombine.high %v1718_v62, %v1718_v62  ;;  %v811_v2 = vshrl.u32 %v1718_v62, 16  ;;  %v683_v4 = vrot.slane %v676_v60, %v2346_v36  ;;  %v2168_v9 = vld [vmem:[%s2656_s1 + $0x100] sm:$0xff]   ;;  %v2175_v20 = vld [vmem:[%s2656_s1 + $0x158] sm:$0xff]   ;;  %v2178_v31 = vld [vmem:[%s2656_s1 + $0x128] sm:$0xff]  }
  0x19   : > { %1974 = vmatprep.subr.bf16.mxu1 %v2216_v1  ;;  %v309_v38 = vrot.slane %v302_v35, %v2346_v36  ;;  %v556_v63 = vrot.slane %v1680_v58, %v2346_v36  ;;  %v2169_v12 = vld [vmem:[%s2656_s1 + $0x140] sm:$0xff]   ;;  %v2179_v32 = vld [vmem:[%s2656_s1 + $0x168] sm:$0xff]   ;;  %v2180_v35 = vld [vmem:[%s2656_s1 + $0x130] sm:$0xff]  }
  0x1a   : > { %v816_v6 = vshll.u32 %v800_v0, 16  ;;  %v690_v10 = vrot.slane %v683_v4, %v2346_v36  ;;  %v1803_v21 = vld.sshfl [vmem:[%s2295_s10 + $0x6] sm:$0x11 pattern:$0x75316420]  ;;  %v2182_v39 = vld [vmem:[%s2656_s1 + $0x138] sm:$0xff]  }
  0x1b   : > { %1955 = vmatpush3.bf16.msra.mxu0 %v2146_v11  ;;  %v316_v40 = vrot.slane %v309_v38, %v2346_v36  ;;  %v563_v7 = vrot.slane %v556_v63, %v2346_v36  ;;  %v1229_v22 = vcombine.high %v1803_v21, %v1803_v21  ;;  %v1240_v23 = vshrl.u32 %v1803_v21, 16  ;;  %v2176_v24 = vld [vmem:[%s2656_s1 + $0x120] sm:$0xff]   ;;  %v2181_v38 = vld [vmem:[%s2656_s1 + $0x170] sm:$0xff]   ;;  %v2194_v53 = vld [vmem:[%s2656_s1 + $0x1a8] sm:$0xff]  }
  0x1c   : > { %1975 = vmatpush3.bf16.msra.mxu1 %v2147_v13  ;;  %1956 = vmatprep.subr.bf16.mxu0 %v2216_v1  ;;  %v818_v8 = vsel %vm2331_vm15, %v811_v2, %v816_v6  ;;  %v2177_v26 = vld [vmem:[%s2656_s1 + $0x160] sm:$0xff]   ;;  %v2195_v56 = vld [vmem:[%s2656_s1 + $0x1e8] sm:$0xff]   ;;  %v2196_v58 = vld [vmem:[%s2656_s1 + $0x1b0] sm:$0xff]  }
  0x1d   : > { %1976 = vmatprep.subr.bf16.mxu1 %v2216_v1  ;;  %v836_v11 = vcombine.low %v2339_v33, %v818_v8  ;;  %v2500_v33 = vld.sshfl [vmem:[%s2295_s10 + $0x4] sm:$0x10 pattern:$0x75316420]  ;;  %v2199_v62 = vld [vmem:[%s2656_s1 + $0x1f8] sm:$0xff]   ;;  %v2201_v2 = vld [vmem:[%s2656_s1 + $0x208] sm:$0xff]  }
  0x1e   : > { %v2200_v0 = vld [vmem:[%s2656_s1 + $0x200] sm:$0xff]   ;;  %v2203_v4 = vld [vmem:[%s2656_s1 + $0x218] sm:$0xff]   ;;  %v2205_v6 = vld [vmem:[%s2656_s1 + $0x228] sm:$0xff]  }
  0x1f   : > { %1957 = vmatpush3.bf16.msra.mxu0 %v2148_v18  ;;  %v2449_v13 = vrot.slane %v836_v11, %v2346_v36  ;;  %v2173_v18 = vld [vmem:[%s2656_s1 + $0x150] sm:$0xff]   ;;  %v2207_v11 = vld [vmem:[%s2656_s1 + $0x238] sm:$0xff]  }
  0x20   : > { %1977 = vmatpush3.bf16.msra.mxu1 %v2149_v25  ;;  %1958 = vmatprep.subr.bf16.mxu0 %v2216_v1  ;;  %v1245_v25 = vshll.u32 %v1229_v22, 16 }
  0x21   : > { %1978 = vmatprep.subr.bf16.mxu1 %v2216_v1  ;;  %v850_v15 = vrot.slane %v2449_v13, %v2346_v36 }
  0x22   : > { %v1247_v27 = vsel %vm2331_vm15, %v1240_v23, %v1245_v25 }
  0x23   : > { %1959 = vmatpush3.bf16.msra.mxu0 %v2150_v34  ;;  %v1265_v30 = vcombine.low %v818_v8, %v1247_v27 }
  0x24   : > { %1979 = vmatpush3.bf16.msra.mxu1 %v2151_v37  ;;  %1984 = vmatprep.subr.bf16.mxu0 %v2216_v1  ;;  %v1765_v37 = vcombine.high %v2406_v54, %v2500_v33  ;;  %v1774_v54 = vld [vmem:[%s2295_s10 + $0x4] sm:$0x1] }
  0x25   : > { %2004 = vmatprep.subr.bf16.mxu1 %v2216_v1  ;;  %v2503_v34 = vrot.slane %v1265_v30, %v2346_v36 }
  0x26   : > { %1961 = vmatmul.mubr.bf16.vlgmr.msra.gmra.mrb[0].mxu0 %v316_v40  ;;  %v985_v40 = vrot.slane %v1765_v37, %v2346_v36 }
  0x27   : > { %1981 = vmatmul.mubr.bf16.vlgmr.msra.gmra.mrb[0].mxu1 %v422_v41  ;;  %1985 = vmatpush3.bf16.msra.mxu0 %v2152_v42  ;;  %v1279_v29 = vrot.slane %v2503_v34, %v2346_v36  ;;  %v2183_v41 = vld [vmem:[%s2656_s1 + $0x178] sm:$0xff]   ;;  %v2184_v42 = vld [vmem:[%s2656_s1 + $0x180] sm:$0xff]  }
  0x28   : > { %2005 = vmatpush3.bf16.msra.mxu1 %v2153_v43  ;;  %1986 = vmatprep.subr.bf16.mxu0 %v2216_v1  ;;  %v992_v43 = vrot.slane %v985_v40, %v2346_v36 }
  0x29   : > { %2006 = vmatprep.subr.bf16.mxu1 %v2216_v1  ;;  %2000 = vmatprep.mubr.msk.bf16.mxu0 %vm2217_vm0, %v2216_v1 }
  0x2a   : > { %2020 = vmatprep.mubr.msk.bf16.mxu1 %vm2217_vm0, %v2216_v1 }
  0x2b   : > { %1987 = vmatpush3.bf16.msra.mxu0 %v2154_v44  ;;  %v2185_v44 = vld [vmem:[%s2656_s1 + $0x1c0] sm:$0xff]  }
  0x2c   : > { %2007 = vmatpush3.bf16.msra.mxu1 %v2155_v45  ;;  %1988 = vmatprep.subr.bf16.mxu0 %v2216_v1  ;;  %v2186_v45 = vld [vmem:[%s2656_s1 + $0x188] sm:$0xff]  }
  0x2d   : > { %2008 = vmatprep.subr.bf16.mxu1 %v2216_v1 }
  0x2f   : > { %1989 = vmatpush3.bf16.msra.mxu0 %v2156_v46  ;;  %v2187_v46 = vld [vmem:[%s2656_s1 + $0x1c8] sm:$0xff]  }
  0x30   : > { %2009 = vmatpush3.bf16.msra.mxu1 %v2157_v47  ;;  %1990 = vmatprep.subr.bf16.mxu0 %v2216_v1  ;;  %v2188_v47 = vld [vmem:[%s2656_s1 + $0x190] sm:$0xff]  }
  0x31   : > { %2010 = vmatprep.subr.bf16.mxu1 %v2216_v1 }
  0x33   : > { %1991 = vmatpush3.bf16.msra.mxu0 %v2158_v48  ;;  %v2189_v48 = vld [vmem:[%s2656_s1 + $0x1d0] sm:$0xff]  }
  0x34   : > { %2011 = vmatpush3.bf16.msra.mxu1 %v2159_v49  ;;  %1992 = vmatprep.subr.bf16.mxu0 %v2216_v1  ;;  %v2190_v49 = vld [vmem:[%s2656_s1 + $0x198] sm:$0xff]  }
  0x35   : > { %2012 = vmatprep.subr.bf16.mxu1 %v2216_v1 }
  0x37   : > { %1993 = vmatpush3.bf16.msra.mxu0 %v2160_v50  ;;  %v2191_v50 = vld [vmem:[%s2656_s1 + $0x1d8] sm:$0xff]  }
  0x38   : > { %2013 = vmatpush3.bf16.msra.mxu1 %v2161_v51  ;;  %1994 = vmatprep.subr.bf16.mxu0 %v2216_v1  ;;  %v2192_v51 = vld [vmem:[%s2656_s1 + $0x1a0] sm:$0xff]  }
  0x39   : > { %2014 = vmatprep.subr.bf16.mxu1 %v2216_v1 }
  0x3b   : > { %1995 = vmatpush3.bf16.msra.mxu0 %v2162_v52  ;;  %v2193_v52 = vld [vmem:[%s2656_s1 + $0x1e0] sm:$0xff]  }
  0x3c   : > { %2015 = vmatpush3.bf16.msra.mxu1 %v2163_v55  ;;  %1996 = vmatprep.subr.bf16.mxu0 %v2216_v1  ;;  %v1775_v55 = vld [vmem:[%s2295_s10 + $0x6] sm:$0x1] }
  0x3d   : > { %2016 = vmatprep.subr.bf16.mxu1 %v2216_v1  ;;  %v1105_v57 = vcombine.low %v1774_v54, %v1775_v55 }
  0x3f   : > { %1997 = vmatpush3.bf16.msra.mxu0 %v2164_v59  ;;  %v2197_v59 = vld [vmem:[%s2656_s1 + $0x1f0] sm:$0xff]   ;;  %v1112_v60 = vrot.slane %v1105_v57, %v2346_v36 }
  0x40   : > { %2017 = vmatpush3.bf16.msra.mxu1 %v2165_v61  ;;  %1998 = vmatprep.subr.bf16.mxu0 %v2216_v1  ;;  %v2198_v61 = vld [vmem:[%s2656_s1 + $0x1b8] sm:$0xff]  }
  0x41   : > { %2018 = vmatprep.subr.bf16.mxu1 %v2216_v1  ;;  %v1119_v63 = vrot.slane %v1112_v60, %v2346_v36 }
  0x43   : > { %1999 = vmatpush3.bf16.msra.mxu0 %v2166_v3  ;;  %v2202_v3 = vld [vmem:[%s2656_s1 + $0x210] sm:$0xff]  }
  0x44   : > { %2019 = vmatpush3.bf16.msra.mxu1 %v2167_v5  ;;  %2024 = vmatprep.subr.bf16.mxu0 %v2216_v1  ;;  %v2204_v5 = vld [vmem:[%s2656_s1 + $0x220] sm:$0xff]  }
  0x45   : > { %2044 = vmatprep.subr.bf16.mxu1 %v2216_v1 }
  0x46   : > { %2001 = vmatmul.mubr.bf16.vlgmr.msra.gmra.mrb[4].mxu0 %v563_v7  ;;  %v1833_v7 = vld.sshfl [vmem:[%s2295_s10 + $0x6] sm:$0x10 pattern:$0x75316420]  ;;  %s1624_s10 = sshll.u32 %s2663_s16, 1 }
  0x47   : > { %2025 = vmatpush3.bf16.msra.mxu0 %v2168_v9  ;;  %2021 = vmatmul.mubr.bf16.vlgmr.msra.gmra.mrb[4].mxu1 %v690_v10  ;;  %v1850_v8 = vcombine.high %v2500_v33, %v1833_v7  ;;  %v2206_v9 = vld [vmem:[%s2656_s1 + $0x230] sm:$0xff]   ;;  %s208_s28 = scalar_lea.vmem %s2658_s3, %s1624_s10  ;;  %s212_s6 = scalar_lea.vmem %s2659_s4, %s1624_s10 }
  0x48   : > { %2045 = vmatpush3.bf16.msra.mxu1 %v2169_v12  ;;  %2026 = vmatprep.subr.bf16.mxu0 %v2216_v1  ;;  %v1520_v54 = vld [vmem:[%s208_s28] sm:$0x1]  ;;  %v1521_v55 = vld [vmem:[%s208_s28 + $0x1] sm:$0x1] }
  0x49   : > { %2046 = vmatprep.subr.bf16.mxu1 %v2216_v1  ;;  %2040 = vmatprep.mubr.msk.bf16.mxu0 %vm2217_vm0, %v2216_v1  ;;  %v1414_v10 = vrot.slane %v1850_v8, %v2346_v36  ;;  %v1523_v57 = vunpack.c.l.bf16 %v1521_v55 }
  0x4a   : > { %2060 = vmatprep.mubr.msk.bf16.mxu1 %vm2217_vm0, %v2216_v1 }
  0x4b   : > { %2027 = vmatpush3.bf16.msra.mxu0 %v2170_v14  ;;  %v1421_v12 = vrot.slane %v1414_v10, %v2346_v36 }
  0x4c   : > { %2047 = vmatpush3.bf16.msra.mxu1 %v2171_v16  ;;  %2028 = vmatprep.subr.bf16.mxu0 %v2216_v1 }
  0x4d   : > { %2048 = vmatprep.subr.bf16.mxu1 %v2216_v1 }
  0x4f   : > { %2029 = vmatpush3.bf16.msra.mxu0 %v2172_v17 }
  0x50   : > { %2049 = vmatpush3.bf16.msra.mxu1 %v2173_v18  ;;  %2030 = vmatprep.subr.bf16.mxu0 %v2216_v1 }
  0x51   : > { %2050 = vmatprep.subr.bf16.mxu1 %v2216_v1 }
  0x53   : > { %2031 = vmatpush3.bf16.msra.mxu0 %v2174_v19 }
  0x54   : > { %2051 = vmatpush3.bf16.msra.mxu1 %v2175_v20  ;;  %2032 = vmatprep.subr.bf16.mxu0 %v2216_v1 }
  0x55   : > { %2052 = vmatprep.subr.bf16.mxu1 %v2216_v1 }
  0x57   : > { %2033 = vmatpush3.bf16.msra.mxu0 %v2176_v24 }
  0x58   : > { %2053 = vmatpush3.bf16.msra.mxu1 %v2177_v26  ;;  %2034 = vmatprep.subr.bf16.mxu0 %v2216_v1 }
  0x59   : > { %2054 = vmatprep.subr.bf16.mxu1 %v2216_v1 }
  0x5b   : > { %2035 = vmatpush3.bf16.msra.mxu0 %v2178_v31 }
  0x5c   : > { %2055 = vmatpush3.bf16.msra.mxu1 %v2179_v32  ;;  %2036 = vmatprep.subr.bf16.mxu0 %v2216_v1 }
  0x5d   : > { %2056 = vmatprep.subr.bf16.mxu1 %v2216_v1 }
  0x5f   : > { %2037 = vmatpush3.bf16.msra.mxu0 %v2180_v35 }
  0x60   : > { %2057 = vmatpush3.bf16.msra.mxu1 %v2181_v38  ;;  %2038 = vmatprep.subr.bf16.mxu0 %v2216_v1 }
  0x61   : > { %2058 = vmatprep.subr.bf16.mxu1 %v2216_v1 }
  0x63   : > { %2039 = vmatpush3.bf16.msra.mxu0 %v2182_v39 }
  0x64   : > { %2059 = vmatpush3.bf16.msra.mxu1 %v2183_v41  ;;  %2064 = vmatprep.subr.bf16.mxu0 %v2216_v1 }
  0x65   : > { %2084 = vmatprep.subr.bf16.mxu1 %v2216_v1 }
  0x66   : > { %2041 = vmatmul.mubr.bf16.vlgmr.msra.gmra.mrb[8].mxu0 %v850_v15 }
  0x67   : > { %2065 = vmatpush3.bf16.msra.mxu0 %v2184_v42  ;;  %2061 = vmatmul.mubr.bf16.vlgmr.msra.gmra.mrb[8].mxu1 %v992_v43 }
  0x68   : > { %2085 = vmatpush3.bf16.msra.mxu1 %v2185_v44  ;;  %2066 = vmatprep.subr.bf16.mxu0 %v2216_v1 }
  0x69   : > { %2086 = vmatprep.subr.bf16.mxu1 %v2216_v1  ;;  %2080 = vmatprep.mubr.msk.bf16.mxu0 %vm2217_vm0, %v2216_v1 }
  0x6a   : > { %2100 = vmatprep.mubr.msk.bf16.mxu1 %vm2217_vm0, %v2216_v1 }
  0x6b   : > { %2067 = vmatpush3.bf16.msra.mxu0 %v2186_v45 }
  0x6c   : > { %2087 = vmatpush3.bf16.msra.mxu1 %v2187_v46  ;;  %2068 = vmatprep.subr.bf16.mxu0 %v2216_v1 }
  0x6d   : > { %2088 = vmatprep.subr.bf16.mxu1 %v2216_v1 }
  0x6f   : > { %2069 = vmatpush3.bf16.msra.mxu0 %v2188_v47 }
  0x70   : > { %2089 = vmatpush3.bf16.msra.mxu1 %v2189_v48  ;;  %2070 = vmatprep.subr.bf16.mxu0 %v2216_v1 }
  0x71   : > { %2090 = vmatprep.subr.bf16.mxu1 %v2216_v1 }
  0x73   : > { %2071 = vmatpush3.bf16.msra.mxu0 %v2190_v49 }
  0x74   : > { %2091 = vmatpush3.bf16.msra.mxu1 %v2191_v50  ;;  %2072 = vmatprep.subr.bf16.mxu0 %v2216_v1 }
  0x75   : > { %2092 = vmatprep.subr.bf16.mxu1 %v2216_v1 }
  0x77   : > { %2073 = vmatpush3.bf16.msra.mxu0 %v2192_v51 }
  0x78   : > { %2093 = vmatpush3.bf16.msra.mxu1 %v2193_v52  ;;  %2074 = vmatprep.subr.bf16.mxu0 %v2216_v1  ;;  %v2219_v52 = vmov 1983009808  }
  0x79   : > { %2094 = vmatprep.subr.bf16.mxu1 %v2216_v1 }
  0x7b   : > { %2075 = vmatpush3.bf16.msra.mxu0 %v2194_v53  ;;  %v1528_v53 = vunpack.c.l.s4 %v2219_v52 }
  0x7c   : > { %2095 = vmatpush3.bf16.msra.mxu1 %v2195_v56  ;;  %2076 = vmatprep.subr.bf16.mxu0 %v2216_v1  ;;  %v1522_v56 = vunpack.c.l.bf16 %v1520_v54 }
  0x7d   : > { %2096 = vmatprep.subr.bf16.mxu1 %v2216_v1 }
  0x7f   : > { %2077 = vmatpush3.bf16.msra.mxu0 %v2196_v58  ;;  %v1529_v58 = vunpack.c.0.s8 %v1528_v53 }
  0x80   : > { %2097 = vmatpush3.bf16.msra.mxu1 %v2197_v59  ;;  %2078 = vmatprep.subr.bf16.mxu0 %v2216_v1  ;;  %v1526_v59 = vcombine.low %v1522_v56, %v1523_v57 }
  0x81   : > { %2098 = vmatprep.subr.bf16.mxu1 %v2216_v1  ;;  %v1532_v60 = vsub.s32 %v1529_v58, %v2325_v28 }
  0x83   : > { %2079 = vmatpush3.bf16.msra.mxu0 %v2198_v61 }
  0x84   : > { %2099 = vmatpush3.bf16.msra.mxu1 %v2199_v62  ;;  %2104 = vmatprep.subr.bf16.mxu0 %v2216_v1  ;;  %v1859_v62 = vld [vmem:[%s2657_s2] ss:$0 sm:$0xff] }
  0x86   : > { %2081 = vmatmul.mubr.bf16.vlgmr.msra.gmra.mrb[12].mxu0 %v1119_v63 }
  0x87   : > { %2105 = vmatpush3.bf16.msra.mxu0 %v2200_v0  ;;  %2101 = vmatmul.mubr.bf16.vlgmr.msra.gmra.mrb[12].mxu1 %v1279_v29  ;;  %v1533_v0 = vrot.slane %v1526_v59, %v1532_v60 }
  0x88   : > { %2106 = vmatprep.subr.bf16.mxu0 %v2216_v1  ;;  %2120 = vmatprep.mubr.msk.bf16.mxu0 %vm2217_vm0, %v2216_v1 }
  0x8b   : > { %2107 = vmatpush3.bf16.msra.mxu0 %v2201_v2 }
  0x8c   : > { %2108 = vmatprep.subr.bf16.mxu0 %v2216_v1 }
  0x8f   : > { %2109 = vmatpush3.bf16.msra.mxu0 %v2202_v3 }
  0x90   : > { %2110 = vmatprep.subr.bf16.mxu0 %v2216_v1 }
  0x93   : > { %2111 = vmatpush3.bf16.msra.mxu0 %v2203_v4 }
  0x94   : > { %2112 = vmatprep.subr.bf16.mxu0 %v2216_v1 }
  0x97   : > { %2113 = vmatpush3.bf16.msra.mxu0 %v2204_v5 }
  0x98   : > { %2114 = vmatprep.subr.bf16.mxu0 %v2216_v1 }
  0x9b   : > { %2115 = vmatpush3.bf16.msra.mxu0 %v2205_v6 }
  0x9c   : > { %2116 = vmatprep.subr.bf16.mxu0 %v2216_v1 }
  0x9f   : > { %2117 = vmatpush3.bf16.msra.mxu0 %v2206_v9 }
  0xa0   : > { %2118 = vmatprep.subr.bf16.mxu0 %v2216_v1 }
  0xa3   : > { %2119 = vmatpush3.bf16.msra.mxu0 %v2207_v11 }
  0xa6   : > { %2121 = vmatmul.mubr.bf16.vlgmr.msra.gmra.mrb[16].mxu0 %v1421_v12 }
  0xf9   : > { %v400_v13 = vpop.f32.mrb[0].mxu0 }
  0xfa   : > { %v1962_v14 = vpop.f32.mrb[1].mxu0  ;;  %v506_v15 = vpop.f32.mrb[0].mxu1 }
  0xfb   : > { %v507_v16 = vadd.f32 %v506_v15, %v400_v13  ;;  %v403_v17 = vpop.f32.mrb[2].mxu0  ;;  %v1982_v18 = vpop.f32.mrb[1].mxu1 }
  0xfc   : > { %v1963_v19 = vpop.f32.mrb[3].mxu0  ;;  %v509_v20 = vpop.f32.mrb[2].mxu1 }
  0xfd   : > { %v1983_v21 = vpop.f32.mrb[3].mxu1 }
 0x119   : > { %v647_v22 = vpop.f32.mrb[4].mxu0 }
 0x11a   : > { %v653_v23 = vadd.f32 %v647_v22, %v507_v16  ;;  %v2002_v24 = vpop.f32.mrb[5].mxu0  ;;  %v774_v25 = vpop.f32.mrb[4].mxu1 }
 0x11b   : > { %v650_v26 = vpop.f32.mrb[6].mxu0  ;;  %v2022_v27 = vpop.f32.mrb[5].mxu1 }
 0x11c   : > { %v780_v1 = vadd.f32 %v774_v25, %v653_v23  ;;  %v2003_v30 = vpop.f32.mrb[7].mxu0  ;;  %v777_v36 = vpop.f32.mrb[6].mxu1 }
 0x11d   : > { %v2023_v31 = vpop.f32.mrb[7].mxu1 }
 0x139   : > { %v934_v32 = vpop.f32.mrb[8].mxu0 }
 0x13a   : > { %v940_v33 = vadd.f32 %v934_v32, %v780_v1  ;;  %v2042_v34 = vpop.f32.mrb[9].mxu0  ;;  %v1076_v29 = vpop.f32.mrb[8].mxu1 }
 0x13b   : > { %v937_v35 = vpop.f32.mrb[10].mxu0  ;;  %v2062_v37 = vpop.f32.mrb[9].mxu1 }
 0x13c   : > { %v1082_v38 = vadd.f32 %v1076_v29, %v940_v33  ;;  %v2043_v39 = vpop.f32.mrb[11].mxu0  ;;  %v1079_v40 = vpop.f32.mrb[10].mxu1 }
 0x13d   : > { %v2063_v41 = vpop.f32.mrb[11].mxu1 }
 0x159   : > { %v1203_v42 = vpop.f32.mrb[12].mxu0 }
 0x15a   : > { %v1209_v43 = vadd.f32 %v1203_v42, %v1082_v38  ;;  %v2082_v44 = vpop.f32.mrb[13].mxu0  ;;  %v1363_v45 = vpop.f32.mrb[12].mxu1 }
 0x15b   : > { %v1206_v46 = vpop.f32.mrb[14].mxu0  ;;  %v2102_v47 = vpop.f32.mrb[13].mxu1 }
 0x15c   : > { %v1369_v48 = vadd.f32 %v1363_v45, %v1209_v43  ;;  %v2083_v49 = vpop.f32.mrb[15].mxu0  ;;  %v1366_v50 = vpop.f32.mrb[14].mxu1 }
 0x15d   : > { %v2103_v51 = vpop.f32.mrb[15].mxu1 }
 0x179   : > { %v1505_v61 = vpop.f32.mrb[16].mxu0 }
 0x17a   : > { %v1511_v63 = vadd.f32 %v1505_v61, %v1369_v48  ;;  %v2122_v2 = vpop.f32.mrb[17].mxu0 }
 0x17b   : > { %v1508_v3 = vpop.f32.mrb[18].mxu0 }
 0x17c   : > { %v1519_v4 = vadd.f32 %v1859_v62, %v1511_v63  ;;  %v2123_v5 = vpop.f32.mrb[19].mxu0 }
 0x17e   : > { %v1535_v6 = vadd.f32 %v1533_v0, %v1519_v4 }
 0x180   : > { %v1536_v7 = vmax.f32 %v1535_v6, 0.0 }
 0x182   : > { %v1544_v8 = vrot.slane %v1536_v7, %v1532_v60 }
 0x184   : > { %v1545_v9 = vcombine.high %v1544_v8, %v1544_v8  ;;  %v1548_v28 = vpack.c.bf16 %v1544_v8, %v1544_v8 }
 0x186   : > { %v1549_v10 = vpack.c.bf16 %v1545_v9, %v1545_v9  ;;  %1550 = vst [vmem:[%s212_s6] sm:$0x1] %v1548_v28 }
 0x188   : > { %1551 = vst [vmem:[%s212_s6 + $0x1] sm:$0x1] %v1549_v10 }
 0x189 PF: > { %s14_s15 = sadd.s32 1, %s2214_s15  }
 0x18a   : > { %p11_p4 = scmp.ge.s32.totalorder %s14_s15, 4  }
 0x18c   :  { %13 = sbr.rel (!%p11_p4) target bundleno = 1 (0x1), region = 79 }

// kernel: resnet_forward.7
= control target key start
LH: loop header
LB: loop body
LE: loop exit
PB: predicated region body
PF: predicated region fallthrough
CT: control target
= control target key end

     0   :  { %s11867_s12 = smov 0   ;;  %s11869_s13 = smov 0   ;;  %s14488_s0 = inlined_call_operand.vmem [shape: bf16[4,2,11,11,4], index: 0, kind: input, shape index: {}]   ;;  %s14489_s1 = inlined_call_operand.vmem [shape: bf16[49,4,64], index: 1, kind: input, shape index: {}]   ;;  %s14490_s2 = inlined_call_operand.vmem [shape: f32[1,64], index: 2, kind: input, shape index: {}]   ;;  %s14491_s3 = inlined_call_operand.vmem [shape: bf16[2,8,8,64], index: 3, kind: output, shape index: {}]  }
   0x1   :  { %s11871_s14 = smov 0  }
   0x2 LB: > { %s9532_s15 = sadd.s32 4294967295, %s11845_s14   ;;  %s11884_s16 = sadd.s32 1, %s11845_s14   ;;  %s11845_s14 = sphi %s11871_s14, %s14500_s14   ;;  %s11841_s13 = sphi %s11869_s13, %s14499_s13   ;;  %s11837_s12 = sphi %s11867_s12, %s14498_s12  }
   0x3   : > { %s17_s17 = ssub.s32 %s11845_s14, %s11884_s16  ;;  %s20_s18 = sadd.s32 1, %s11841_s13 }
   0x4   : > { %p18_p0 = scmp.eq.s32.totalorder %s17_s17, 0  ;;  %p27_p1 = scmp.ne.s32.totalorder %s11841_s13, %s11837_s12 }
   0x5   : > { %p28_p2 = scmp.eq.s32.totalorder %s11845_s14, 0  ;;  %p9535_p4 = scmp.ge.s32.totalorder %s11845_s14, 2 }
   0x6   : > { %s11893_s19 = scalar_select %p18_p0, %s11841_s13, %s20_s18  }
   0x7   : > { %p29_p3 = por %p28_p2, %p27_p1  ;;  %127 = sbr.rel (%p9535_p4) target bundleno = 41 (0x29), region = 24 }
   0xe   : > { %130 = sbr.rel (!%p29_p3) target bundleno = 41 (0x29), region = 28  ;;  %s132_s20 = sand.u32 (%p29_p3), 1, %s11841_s13  }
   0xf   : > { %s11732_s21 = smul.u32 (%p29_p3), 88, %s11845_s14 }
  0x10   : > { %s11731_s22 = smul.u32 (%p29_p3), 352, %s132_s20 }
  0x11   : > { %s11901_s25 = scalar_lea.vmem (%p29_p3), %s14488_s0, %s11732_s21 }
  0x12   : > { %v153_v0 = vld [vmem:[%s11901_s25] sm:$0xff] (%p29_p3)   ;;  %v157_v1 = vld [vmem:[%s11901_s25 + $0x8] sm:$0xff] (%p29_p3)   ;;  %v161_v2 = vld [vmem:[%s11901_s25 + $0x10] sm:$0xff] (%p29_p3)   ;;  %s11906_s26 = scalar_lea.vmem (%p29_p3), [#allocation2], %s11731_s22 }
  0x13   : > { %154 = vst [vmem:[%s11906_s26] sm:$0xff] (%p29_p3), %v153_v0   ;;  %158 = vst [vmem:[%s11906_s26 + $0x8] sm:$0xff] (%p29_p3), %v157_v1   ;;  %v165_v3 = vld [vmem:[%s11901_s25 + $0x18] sm:$0xff] (%p29_p3)   ;;  %v169_v4 = vld [vmem:[%s11901_s25 + $0x20] sm:$0xff] (%p29_p3)  }
  0x14   : > { %162 = vst [vmem:[%s11906_s26 + $0x10] sm:$0xff] (%p29_p3), %v161_v2   ;;  %v173_v5 = vld [vmem:[%s11901_s25 + $0x28] sm:$0xff] (%p29_p3)   ;;  %166 = vst [vmem:[%s11906_s26 + $0x18] sm:$0xff] (%p29_p3), %v165_v3   ;;  %v177_v6 = vld [vmem:[%s11901_s25 + $0x30] sm:$0xff] (%p29_p3)  }
  0x15   : > { %170 = vst [vmem:[%s11906_s26 + $0x20] sm:$0xff] %v169_v4   ;;  %174 = vst [vmem:[%s11906_s26 + $0x28] sm:$0xff] %v173_v5   ;;  %v181_v7 = vld [vmem:[%s11901_s25 + $0x38] sm:$0xff]   ;;  %v185_v8 = vld [vmem:[%s11901_s25 + $0x40] sm:$0xff]  }
  0x16   : > { %178 = vst [vmem:[%s11906_s26 + $0x30] sm:$0xff] %v177_v6   ;;  %182 = vst [vmem:[%s11906_s26 + $0x38] sm:$0xff] %v181_v7   ;;  %v189_v9 = vld [vmem:[%s11901_s25 + $0x48] sm:$0xff]   ;;  %v193_v10 = vld [vmem:[%s11901_s25 + $0x50] sm:$0xff]  }
  0x17   : > { %186 = vst [vmem:[%s11906_s26 + $0x40] sm:$0xff] %v185_v8   ;;  %v197_v11 = vld [vmem:[%s11901_s25 + $0xb0] sm:$0xff]   ;;  %190 = vst [vmem:[%s11906_s26 + $0x48] sm:$0xff] %v189_v9   ;;  %v201_v12 = vld [vmem:[%s11901_s25 + $0xb8] sm:$0xff]  }
  0x18   : > { %194 = vst [vmem:[%s11906_s26 + $0x50] sm:$0xff] %v193_v10   ;;  %198 = vst [vmem:[%s11906_s26 + $0x58] sm:$0xff] %v197_v11   ;;  %v205_v13 = vld [vmem:[%s11901_s25 + $0xc0] sm:$0xff]   ;;  %v209_v14 = vld [vmem:[%s11901_s25 + $0xc8] sm:$0xff]  }
  0x19   : > { %202 = vst [vmem:[%s11906_s26 + $0x60] sm:$0xff] %v201_v12   ;;  %206 = vst [vmem:[%s11906_s26 + $0x68] sm:$0xff] %v205_v13   ;;  %v213_v15 = vld [vmem:[%s11901_s25 + $0xd0] sm:$0xff]   ;;  %v217_v16 = vld [vmem:[%s11901_s25 + $0xd8] sm:$0xff]  }
  0x1a   : > { %210 = vst [vmem:[%s11906_s26 + $0x70] sm:$0xff] %v209_v14   ;;  %v221_v17 = vld [vmem:[%s11901_s25 + $0xe0] sm:$0xff]   ;;  %214 = vst [vmem:[%s11906_s26 + $0x78] sm:$0xff] %v213_v15   ;;  %v225_v18 = vld [vmem:[%s11901_s25 + $0xe8] sm:$0xff]  }
  0x1b   : > { %218 = vst [vmem:[%s11906_s26 + $0x80] sm:$0xff] %v217_v16   ;;  %222 = vst [vmem:[%s11906_s26 + $0x88] sm:$0xff] %v221_v17   ;;  %v229_v19 = vld [vmem:[%s11901_s25 + $0xf0] sm:$0xff]   ;;  %v233_v20 = vld [vmem:[%s11901_s25 + $0xf8] sm:$0xff]  }
  0x1c   : > { %226 = vst [vmem:[%s11906_s26 + $0x90] sm:$0xff] %v225_v18   ;;  %230 = vst [vmem:[%s11906_s26 + $0x98] sm:$0xff] %v229_v19   ;;  %v237_v21 = vld [vmem:[%s11901_s25 + $0x100] sm:$0xff]   ;;  %v245_v23 = vld [vmem:[%s11901_s25 + $0x168] sm:$0xff]  }
  0x1d   : > { %234 = vst [vmem:[%s11906_s26 + $0xa0] sm:$0xff] %v233_v20   ;;  %v241_v22 = vld [vmem:[%s11901_s25 + $0x160] sm:$0xff]   ;;  %238 = vst [vmem:[%s11906_s26 + $0xa8] sm:$0xff] %v237_v21   ;;  %v249_v24 = vld [vmem:[%s11901_s25 + $0x170] sm:$0xff]  }
  0x1e   : > { %242 = vst [vmem:[%s11906_s26 + $0xb0] sm:$0xff] %v241_v22   ;;  %246 = vst [vmem:[%s11906_s26 + $0xb8] sm:$0xff] %v245_v23   ;;  %v253_v25 = vld [vmem:[%s11901_s25 + $0x178] sm:$0xff]   ;;  %v257_v26 = vld [vmem:[%s11901_s25 + $0x180] sm:$0xff]  }
  0x1f   : > { %250 = vst [vmem:[%s11906_s26 + $0xc0] sm:$0xff] %v249_v24   ;;  %254 = vst [vmem:[%s11906_s26 + $0xc8] sm:$0xff] %v253_v25   ;;  %v261_v27 = vld [vmem:[%s11901_s25 + $0x188] sm:$0xff]   ;;  %v265_v28 = vld [vmem:[%s11901_s25 + $0x190] sm:$0xff]  }
  0x20   : > { %258 = vst [vmem:[%s11906_s26 + $0xd0] sm:$0xff] %v257_v26   ;;  %v269_v29 = vld [vmem:[%s11901_s25 + $0x198] sm:$0xff]   ;;  %262 = vst [vmem:[%s11906_s26 + $0xd8] sm:$0xff] %v261_v27   ;;  %v273_v30 = vld [vmem:[%s11901_s25 + $0x1a0] sm:$0xff]  }
  0x21   : > { %266 = vst [vmem:[%s11906_s26 + $0xe0] sm:$0xff] %v265_v28   ;;  %270 = vst [vmem:[%s11906_s26 + $0xe8] sm:$0xff] %v269_v29   ;;  %v277_v31 = vld [vmem:[%s11901_s25 + $0x1a8] sm:$0xff]   ;;  %v281_v32 = vld [vmem:[%s11901_s25 + $0x1b0] sm:$0xff]  }
  0x22   : > { %274 = vst [vmem:[%s11906_s26 + $0xf0] sm:$0xff] %v273_v30   ;;  %278 = vst [vmem:[%s11906_s26 + $0xf8] sm:$0xff] %v277_v31   ;;  %v285_v33 = vld [vmem:[%s11901_s25 + $0x210] sm:$0xff]   ;;  %v289_v34 = vld [vmem:[%s11901_s25 + $0x218] sm:$0xff]  }
  0x23   : > { %282 = vst [vmem:[%s11906_s26 + $0x100] sm:$0xff] %v281_v32   ;;  %v293_v35 = vld [vmem:[%s11901_s25 + $0x220] sm:$0xff]   ;;  %286 = vst [vmem:[%s11906_s26 + $0x108] sm:$0xff] %v285_v33   ;;  %v297_v36 = vld [vmem:[%s11901_s25 + $0x228] sm:$0xff]  }
  0x24   : > { %290 = vst [vmem:[%s11906_s26 + $0x110] sm:$0xff] %v289_v34   ;;  %294 = vst [vmem:[%s11906_s26 + $0x118] sm:$0xff] %v293_v35   ;;  %v301_v37 = vld [vmem:[%s11901_s25 + $0x230] sm:$0xff]   ;;  %v305_v38 = vld [vmem:[%s11901_s25 + $0x238] sm:$0xff]  }
  0x25   : > { %298 = vst [vmem:[%s11906_s26 + $0x120] sm:$0xff] %v297_v36   ;;  %302 = vst [vmem:[%s11906_s26 + $0x128] sm:$0xff] %v301_v37   ;;  %v309_v39 = vld [vmem:[%s11901_s25 + $0x240] sm:$0xff]   ;;  %v313_v40 = vld [vmem:[%s11901_s25 + $0x248] sm:$0xff]  }
  0x26   : > { %306 = vst [vmem:[%s11906_s26 + $0x130] sm:$0xff] %v305_v38   ;;  %v317_v41 = vld [vmem:[%s11901_s25 + $0x250] sm:$0xff]   ;;  %310 = vst [vmem:[%s11906_s26 + $0x138] sm:$0xff] %v309_v39   ;;  %v321_v42 = vld [vmem:[%s11901_s25 + $0x258] sm:$0xff]  }
  0x27   : > { %314 = vst [vmem:[%s11906_s26 + $0x140] sm:$0xff] %v313_v40   ;;  %318 = vst [vmem:[%s11906_s26 + $0x148] sm:$0xff] %v317_v41   ;;  %v325_v43 = vld [vmem:[%s11901_s25 + $0x260] sm:$0xff]  }
  0x28   : > { %322 = vst [vmem:[%s11906_s26 + $0x150] sm:$0xff] %v321_v42   ;;  %326 = vst [vmem:[%s11906_s26 + $0x158] sm:$0xff] %v325_v43  }
  0x29 PF: > { %p9537_p5 = scmp.ge.s32.totalorder %s11845_s14, 1  ;;  %p526_p6 = scmp.lt.s32.totalorder %s11845_s14, 3 }
  0x2b   : > { %p527_p7 = pnand %p9537_p5, %p526_p6 }
  0x2c   : > { %v9548_v44 = vld [vmem:[%s14489_s1 + $0x2] sm:$0x3] (!%p527_p7)  ;;  %vm615_vm0 = vcmask (!%p527_p7), 1041408   ;;  %s533_s29 = sand.u32 (!%p527_p7), 1, %s11837_s12   ;;  %v10027_v46 = vld [vmem:[%s14489_s1 + $0x30] sm:$0x3] (!%p527_p7) }
  0x2d   : > { %530 = sbr.rel (%p527_p7) target bundleno = 832 (0x340), region = 69  ;;  %11681 = vmatprep.subr.msk.bf16.mxu1 (!%p527_p7), %vm615_vm0, %v9548_v44  ;;  %v617_v45 = vsel (!%p527_p7), %vm615_vm0, %v9548_v44, 0  ;;  %v570_v47 = vld [vmem:[%s14489_s1] sm:$0x3] (!%p527_p7)  ;;  %vm602_vm1 = vcmask (!%p527_p7), 31744   ;;  %11705 = vmatprep.subr.msk.bf16.mxu0 (!%p527_p7), %vm615_vm0, %v10027_v46  ;;  %v12009_v48 = vsel (!%p527_p7), %vm615_vm0, %v10027_v46, 0 }
  0x2e   : > { %s11733_s30 = smul.u32 (!%p527_p7), 352, %s533_s29  ;;  %10806 = vmatpush3.bf16.msra.mxu1 (!%p527_p7), %v617_v45  ;;  %11046 = vmatpush3.bf16.msra.mxu0 (!%p527_p7), %v12009_v48  ;;  %vm800_vm2 = vsmask.f32 (!%p527_p7), 3328  ;;  %v12016_v49 = vld [vmem:[%s14489_s1 + $0x32] sm:$0x3] (!%p527_p7)  ;;  %v717_v50 = vsel (!%p527_p7), %vm615_vm0, %v570_v47, 0 }
  0x2f   : > { %11682 = vmatprep.subr.msk.bf16.mxu1 (!%p527_p7), %vm615_vm0, %v570_v47  ;;  %11707 = vmatprep.subr.msk.bf16.mxu0 (!%p527_p7), %vm615_vm0, %v12016_v49  ;;  %vm801_vm3 = vsmask.f32 (!%p527_p7), 7440  ;;  %vm1271_vm4 = vcmask (!%p527_p7), 1042432   ;;  %vm1272_vm5 = vcmask (!%p527_p7), 1046532   ;;  %v10077_v46 = vld [vmem:[%s14489_s1 + $0x34] sm:$0x3] (!%p527_p7) }
  0x30   : > { %s12019_s10 = scalar_lea.vmem (!%p527_p7), [#allocation2], %s11733_s30  ;;  %vm12053_vm6 = vmor (!%p527_p7), %vm800_vm2, %vm801_vm3  ;;  %vm1574_vm8 = vsmask.f32 (!%p527_p7), 2304  ;;  %vm1575_vm9 = vsmask.f32 (!%p527_p7), 6416  ;;  %p556_p8 = scmp.lt.s32.totalorder (!%p527_p7), %s9532_s15, 1 }
  0x31   : > { %v11758_v51 = vld [vmem:[%s12019_s10 + $0x58] ss:$8 sps:$4 sm:$0xff] (!%p527_p7)   ;;  %v11759_v52 = vld [vmem:[%s12019_s10 + $0x68] ss:$8 sps:$4 sm:$0xff] (!%p527_p7)   ;;  %v12031_v55 = vld [vmem:[%s12019_s10 + $0x114] sm:$0x1] (!%p527_p7) }
  0x32   : > { %10807 = vmatprep.mubr.msk.bf16.mxu1 (!%p527_p7), %vm602_vm1, %v11758_v51  ;;  %v11760_v53 = vld [vmem:[%s12019_s10 + $0x78] ss:$8 sps:$4 sm:$0xff] (!%p527_p7)   ;;  %v10011_v54 = vld [vmem:[%s12019_s10 + $0x110] sm:$0xf] (!%p527_p7)  ;;  %v12036_v58 = vld [vmem:[%s12019_s10 + $0x11c] sm:$0x1] (!%p527_p7) }
  0x33   : > { %10808 = vmatmul.mubr.msk.bf16.vlgmr.msra.gmra.mrb[0].mxu1 (!%p527_p7), %vm602_vm1, %v11759_v52  ;;  %v10013_v56 = vld [vmem:[%s12019_s10 + $0x118] sm:$0xf] (!%p527_p7)  ;;  %v11761_v57 = vld [vmem:[%s12019_s10 + $0x88] ss:$8 sps:$4 sm:$0xff] (!%p527_p7)   ;;  %v4844_v59 = vshrl.u32 (!%p527_p7), %v10011_v54, 16  ;;  %v4847_v60 = vshll.u32 (!%p527_p7), %v10011_v54, 16  ;;  %vm12072_vm7 = vmor (!%p527_p7), %vm1271_vm4, %vm1272_vm5 }
  0x34   : > { %10811 = vmatprep.mubr.msk.bf16.mxu1 %vm602_vm1, %v11760_v53  ;;  %10816 = vmatpush3.bf16.msra.mxu1 %v717_v50  ;;  %v4853_v61 = vshll.u32 %v12031_v55, 16  ;;  %v4858_v62 = vshrl.u32 %v10013_v56, 16  ;;  %v4861_v63 = vshll.u32 %v10013_v56, 16  ;;  %v4867_v0 = vshll.u32 %v12036_v58, 16  ;;  %v10015_v3 = vld [vmem:[%s12019_s10 + $0x120] sm:$0xf]  ;;  %vm12341_vm10 = vmor %vm1574_vm8, %vm1575_vm9 }
  0x35   : > { %v5241_v1 = vrot.slane %v12031_v55, 5  ;;  %v5245_v2 = vrot.slane %v12036_v58, 5  ;;  %v4846_v4 = vrot.slane %v4844_v59, 4  ;;  %v4849_v5 = vrot.slane %v4847_v60, 5  ;;  %v12044_v8 = vld [vmem:[%s12019_s10 + $0x124] sm:$0x1] }
  0x36   : > { %v4855_v6 = vrot.slane %v4853_v61, 5  ;;  %v4860_v7 = vrot.slane %v4858_v62, 4  ;;  %v4863_v9 = vrot.slane %v4861_v63, 5  ;;  %v4869_v10 = vrot.slane %v4867_v0, 5  ;;  %v10017_v11 = vld [vmem:[%s12019_s10 + $0x128] sm:$0xf] }
  0x37   : > { %v12048_v12 = vld [vmem:[%s12019_s10 + $0x12c] sm:$0x1]  ;;  %v4850_v13 = vor.u32 %v4849_v5, %v4846_v4  ;;  %v4872_v14 = vshrl.u32 %v10015_v3, 16  ;;  %v4875_v15 = vshll.u32 %v10015_v3, 16  ;;  %v4881_v16 = vshll.u32 %v12044_v8, 16  ;;  %s14502_s15 = smov (!%p556_p8, %s9532_s15), 1 }
  0x38   : > { %v4864_v18 = vor.u32 %v4863_v9, %v4860_v7  ;;  %v4886_v19 = vshrl.u32 %v10017_v11, 16  ;;  %v4889_v20 = vshll.u32 %v10017_v11, 16  ;;  %v4895_v21 = vshll.u32 %v12048_v12, 16  ;;  %v11762_v26 = vld [vmem:[%s12019_s10] ss:$8 sps:$4 sm:$0xff]   ;;  %s10559_s25 = sshll.u32 %s14502_s15, 5 }
  0x39   : > { %v4851_v22 = vrot.slane %v4850_v13, 4  ;;  %v4874_v23 = vrot.slane %v4872_v14, 4  ;;  %v4877_v24 = vrot.slane %v4875_v15, 5  ;;  %v4883_v25 = vrot.slane %v4881_v16, 5  ;;  %v11763_v37 = vld [vmem:[%s12019_s10 + $0x10] ss:$8 sps:$4 sm:$0xff]   ;;  %s14460_s27 = scalar_lea.vmem %s14491_s3, %s10559_s25 }
  0x3a   : > { %v4865_v27 = vrot.slane %v4864_v18, 4  ;;  %v4888_v28 = vrot.slane %v4886_v19, 4  ;;  %v4891_v29 = vrot.slane %v4889_v20, 5  ;;  %v4897_v30 = vrot.slane %v4895_v21, 5  ;;  %v9987_v38 = vld [vmem:[%s12019_s10 + $0xbc] sm:$0x1] }
  0x3b   : > { %10812 = vmatmul.mubr.msk.bf16.gmra.mrb[4].mxu1 %vm602_vm1, %v11761_v57  ;;  %v4856_v31 = vsel %vm12053_vm6, %v4851_v22, %v4855_v6  ;;  %v4878_v32 = vor.u32 %v4877_v24, %v4874_v23  ;;  %v5249_v33 = vrot.slane %v12044_v8, 5  ;;  %v5253_v34 = vrot.slane %v12048_v12, 5  ;;  %v9989_v39 = vld [vmem:[%s12019_s10 + $0xc4] sm:$0x1]  ;;  %v12077_v43 = vld [vmem:[%s12019_s10 + $0xb8] sm:$0xe] }
  0x3c   : > { %10817 = vmatprep.mubr.msk.bf16.mxu1 %vm602_vm1, %v11762_v26  ;;  %v4870_v35 = vsel %vm12053_vm6, %v4865_v27, %v4869_v10  ;;  %v4892_v36 = vor.u32 %v4891_v29, %v4888_v28  ;;  %v12080_v44 = vld [vmem:[%s12019_s10 + $0xc0] sm:$0xe]  ;;  %v5083_v45 = vrot.slane %v9987_v38, 5  ;;  %v10044_v50 = vrot.slane %v12077_v43, 9  ;;  %v9991_v53 = vld [vmem:[%s12019_s10 + $0xcc] sm:$0x1] }
  0x3d   : > { %v10028_v40 = vcombine.low %v4856_v31, %v4870_v35  ;;  %v4879_v41 = vrot.slane %v4878_v32, 4  ;;  %v10045_v51 = vrot.slane %v12080_v44, 9  ;;  %v5087_v52 = vrot.slane %v9989_v39, 5  ;;  %v9993_v56 = vld [vmem:[%s12019_s10 + $0xd4] sm:$0x1] }
  0x3e   : > { %v4893_v47 = vrot.slane %v4892_v36, 4  ;;  %v4651_v57 = vshll.u32 %v9991_v53, 16  ;;  %v10038_v59 = vld [vmem:[%s12019_s10 + $0xc8] sm:$0xe]  ;;  %v5091_v60 = vrot.slane %v9991_v53, 5  ;;  %v5084_v62 = vsel %vm12072_vm7, %v10044_v50, %v5083_v45 }
  0x3f   : > { %11047 = vmatprep.mubr.msk.bf16.mxu0 %vm602_vm1, %v10028_v40  ;;  %v4884_v54 = vsel %vm12053_vm6, %v4879_v41, %v4883_v25  ;;  %v5088_v63 = vsel %vm12072_vm7, %v10045_v51, %v5087_v52  ;;  %v4665_v0 = vshll.u32 %v9993_v56, 16  ;;  %v10039_v3 = vld [vmem:[%s12019_s10 + $0xd0] sm:$0xe]  ;;  %v5140_v5 = vsel %vm615_vm0, %v12016_v49, 0  ;;  %v11764_v9 = vld [vmem:[%s12019_s10 + $0x20] ss:$8 sps:$4 sm:$0xff]  }
  0x40   : > { %v4898_v61 = vsel %vm12053_vm6, %v4893_v47, %v4897_v30  ;;  %v10053_v6 = vcombine.low %v5084_v62, %v5088_v63  ;;  %v10046_v7 = vrot.slane %v10038_v59, 9  ;;  %v10047_v10 = vrot.slane %v10039_v3, 9  ;;  %v11765_v23 = vld [vmem:[%s12019_s10 + $0x30] ss:$8 sps:$4 sm:$0xff]   ;;  %v9565_v24 = vld [vmem:[%s14489_s1 + $0x4] sm:$0x3] }
  0x41   : > { %v10029_v4 = vcombine.low %v4884_v54, %v4898_v61  ;;  %v5095_v11 = vrot.slane %v9993_v56, 5  ;;  %v5418_v13 = vshrl.u32 %v10038_v59, 16  ;;  %v12105_v14 = vsel %vm615_vm0, %v10077_v46, 0  ;;  %11683 = vmatprep.subr.msk.bf16.mxu1 %vm615_vm0, %v9565_v24  ;;  %v9995_v28 = vld [vmem:[%s12019_s10 + $0xdc] sm:$0x1] }
  0x42   : > { %v12108_v15 = vrot.slane %v4651_v57, 5  ;;  %v5421_v16 = vshll.u32 %v10038_v59, 16  ;;  %v5436_v18 = vshrl.u32 %v10039_v3, 16  ;;  %v5439_v49 = vshll.u32 %v10039_v3, 16  ;;  %v9997_v31 = vld [vmem:[%s12019_s10 + $0xe4] sm:$0x1] }
  0x43   : > { %10818 = vmatmul.mubr.msk.bf16.vlgmr.msra.gmra.mrb[0].mxu1 %vm602_vm1, %v11763_v37  ;;  %11048 = vmatmul.mubr.msk.bf16.vlgmr.msra.gmra.mrb[0].mxu0 %vm602_vm1, %v10029_v4  ;;  %v12112_v19 = vrot.slane %v4665_v0, 5  ;;  %v5092_v20 = vsel %vm12072_vm7, %v10046_v7, %v5091_v60  ;;  %v5096_v21 = vsel %vm12072_vm7, %v10047_v10, %v5095_v11  ;;  %v12118_v22 = vrot.slane %v5418_v13, 5  ;;  %v12137_v32 = vld [vmem:[%s12019_s10 + $0xd8] sm:$0xe]  ;;  %v12140_v36 = vld [vmem:[%s12019_s10 + $0xe0] sm:$0xe] }
  0x44   : > { %10821 = vmatprep.mubr.msk.bf16.mxu1 %vm602_vm1, %v11764_v9  ;;  %11056 = vmatpush3.bf16.msra.mxu0 %v5140_v5  ;;  %v12125_v25 = vrot.slane %v5421_v16, 6  ;;  %v12127_v26 = vrot.slane %v5436_v18, 5  ;;  %v12129_v27 = vrot.slane %v5439_v49, 6  ;;  %v5382_v29 = vshrl.u32 %v12077_v43, 16  ;;  %v9999_v39 = vld [vmem:[%s12019_s10 + $0xec] sm:$0x1] }
  0x45   : > { %11057 = vmatprep.mubr.msk.bf16.mxu0 %vm602_vm1, %v10053_v6  ;;  %11708 = vmatprep.subr.msk.bf16.mxu0 %vm615_vm0, %v10077_v46  ;;  %v942_v30 = vsel %vm615_vm0, %v9565_v24, 0  ;;  %v5099_v35 = vrot.slane %v9995_v28, 5  ;;  %v10048_v37 = vrot.slane %v12137_v32, 9  ;;  %v5103_v38 = vrot.slane %v9997_v31, 5  ;;  %v10001_v45 = vld [vmem:[%s12019_s10 + $0xf4] sm:$0x1] }
  0x46   : > { %10826 = vmatpush3.bf16.msra.mxu1 %v942_v30  ;;  %v10054_v40 = vcombine.low %v5092_v20, %v5096_v21  ;;  %v10049_v41 = vrot.slane %v12140_v36, 9  ;;  %v12147_v46 = vld [vmem:[%s12019_s10 + $0xe8] sm:$0xe]  ;;  %v5107_v47 = vrot.slane %v9999_v39, 5  ;;  %v12153_v51 = vld [vmem:[%s12019_s10 + $0xf0] sm:$0xe]  ;;  %v5424_v56 = vor.u32 %v12125_v25, %v12118_v22 }
  0x47   : > { %v5100_v50 = vsel %vm12072_vm7, %v10048_v37, %v5099_v35  ;;  %v10050_v52 = vrot.slane %v12147_v46, 9  ;;  %v5111_v53 = vrot.slane %v10001_v45, 5  ;;  %v784_v54 = vld [vmem:[%s12019_s10] sm:$0xf]  ;;  %v10051_v59 = vrot.slane %v12153_v51, 9 }
  0x48   : > { %v5104_v57 = vsel %vm12072_vm7, %v10049_v41, %v5103_v38  ;;  %v12163_v60 = vld [vmem:[%s12019_s10 + $0x4] sm:$0x1]  ;;  %v786_v61 = vld [vmem:[%s12019_s10 + $0x8] sm:$0xf]  ;;  %v804_v62 = vshrl.u32 %v784_v54, 16  ;;  %v5442_v63 = vor.u32 %v12129_v27, %v12127_v26  ;;  %v807_v5 = vshll.u32 %v784_v54, 16 }
  0x49   : > { %v10055_v0 = vcombine.low %v5100_v50, %v5104_v57  ;;  %v12170_v3 = vsel %vm12072_vm7, %v10050_v52, %v5107_v47  ;;  %v12173_v4 = vld [vmem:[%s12019_s10 + $0xc] sm:$0x1]  ;;  %v813_v6 = vshll.u32 %v12163_v60, 16  ;;  %v788_v7 = vld [vmem:[%s12019_s10 + $0x10] sm:$0xf]  ;;  %v5112_v9 = vsel %vm12072_vm7, %v10051_v59, %v5111_v53 }
  0x4a   : > { %v806_v10 = vrot.slane %v804_v62, 4  ;;  %v818_v11 = vshrl.u32 %v786_v61, 16  ;;  %v821_v13 = vshll.u32 %v786_v61, 16  ;;  %v12180_v16 = vld [vmem:[%s12019_s10 + $0x14] sm:$0x1]  ;;  %v10056_v18 = vcombine.low %v12170_v3, %v5112_v9 }
  0x4b   : > { %10822 = vmatmul.mubr.msk.bf16.gmra.mrb[4].mxu1 %vm602_vm1, %v11765_v23  ;;  %v809_v49 = vrot.slane %v807_v5, 5  ;;  %v815_v20 = vrot.slane %v813_v6, 5  ;;  %v827_v21 = vshll.u32 %v12173_v4, 16  ;;  %v790_v23 = vld [vmem:[%s12019_s10 + $0x18] sm:$0xf]  ;;  %v832_v31 = vshrl.u32 %v788_v7, 16 }
  0x4c   : > { %v820_v24 = vrot.slane %v818_v11, 4  ;;  %v823_v28 = vrot.slane %v821_v13, 5  ;;  %v12186_v30 = vld [vmem:[%s12019_s10 + $0x1c] sm:$0x1]  ;;  %v835_v35 = vshll.u32 %v788_v7, 16  ;;  %v841_v39 = vshll.u32 %v12180_v16, 16 }
  0x4d   : > { %v810_v37 = vor.u32 %v809_v49, %v806_v10  ;;  %v829_v38 = vrot.slane %v827_v21, 5  ;;  %v846_v41 = vshrl.u32 %v790_v23, 16  ;;  %v10061_v45 = vld [vmem:[%s12019_s10 + $0x110] sm:$0xe]  ;;  %v834_v50 = vrot.slane %v832_v31, 4 }
  0x4e   : > { %v824_v47 = vor.u32 %v823_v28, %v820_v24  ;;  %v837_v52 = vrot.slane %v835_v35, 5  ;;  %v849_v53 = vshll.u32 %v790_v23, 16  ;;  %v10062_v54 = vld [vmem:[%s12019_s10 + $0x118] sm:$0xe]  ;;  %v843_v59 = vrot.slane %v841_v39, 5 }
  0x4f   : > { %11058 = vmatmul.mubr.msk.bf16.vlgmr.msra.gmra.mrb[0].mxu0 %vm602_vm1, %v10054_v40  ;;  %v811_v57 = vrot.slane %v810_v37, 4  ;;  %v848_v40 = vrot.slane %v846_v41, 4  ;;  %v855_v61 = vshll.u32 %v12186_v30, 16  ;;  %v10094_v62 = vld [vmem:[%s14489_s1 + $0x36] sm:$0x3]  ;;  %v10069_v5 = vrot.slane %v10061_v45, 9 }
  0x50   : > { %11066 = vmatpush3.bf16.msra.mxu0 %v12105_v14  ;;  %11061 = vmatprep.mubr.msk.bf16.mxu0 %vm602_vm1, %v10055_v0  ;;  %v825_v14 = vrot.slane %v824_v47, 4  ;;  %v838_v0 = vor.u32 %v837_v52, %v834_v50  ;;  %v851_v3 = vrot.slane %v849_v53, 5  ;;  %v10063_v6 = vld [vmem:[%s12019_s10 + $0x120] sm:$0xe]  ;;  %v10070_v10 = vrot.slane %v10062_v54, 9 }
  0x51   : > { %11709 = vmatprep.subr.msk.bf16.mxu0 %vm615_vm0, %v10094_v62  ;;  %v816_v7 = vsel %vm12053_vm6, %v811_v57, %v815_v20  ;;  %v857_v9 = vrot.slane %v855_v61, 5  ;;  %v10064_v11 = vld [vmem:[%s12019_s10 + $0x128] sm:$0xe]  ;;  %v10071_v13 = vrot.slane %v10063_v6, 9  ;;  %v5242_v24 = vsel %vm12072_vm7, %v10069_v5, %v5241_v1  ;;  %v792_v28 = vld [vmem:[%s12019_s10 + $0x20] sm:$0xf] }
  0x52   : > { %v830_v49 = vsel %vm12053_vm6, %v825_v14, %v829_v38  ;;  %v839_v21 = vrot.slane %v838_v0, 4  ;;  %v852_v23 = vor.u32 %v851_v3, %v848_v40  ;;  %v12211_v31 = vld [vmem:[%s12019_s10 + $0x24] sm:$0x1]  ;;  %v5246_v35 = vsel %vm12072_vm7, %v10070_v10, %v5245_v2  ;;  %v794_v55 = vld [vmem:[%s12019_s10 + $0x28] sm:$0xf] }
  0x53   : > { %v9566_v20 = vcombine.low %v816_v7, %v830_v49  ;;  %v5250_v37 = vsel %vm12072_vm7, %v10071_v13, %v5249_v33  ;;  %v10072_v38 = vrot.slane %v10064_v11, 9  ;;  %v10078_v41 = vcombine.low %v5242_v24, %v5246_v35  ;;  %v12226_v58 = vld [vmem:[%s12019_s10 + $0x2c] sm:$0x1]  ;;  %v796_v47 = vld [vmem:[%s12019_s10 + $0x30] sm:$0xf] }
  0x54   : > { %v844_v1 = vsel %vm12053_vm6, %v839_v21, %v843_v59  ;;  %v853_v39 = vrot.slane %v852_v23, 4  ;;  %v5552_v45 = vsel %vm615_vm0, %v10094_v62, 0  ;;  %v860_v8 = vshrl.u32 %v792_v28, 16  ;;  %v12237_v52 = vld [vmem:[%s12019_s10 + $0x34] sm:$0x1] }
  0x55   : > { %10827 = vmatprep.mubr.msk.bf16.mxu1 %vm602_vm1, %v9566_v20  ;;  %v5254_v2 = vsel %vm12072_vm7, %v10072_v38, %v5253_v34  ;;  %v863_v33 = vshll.u32 %v792_v28, 16  ;;  %v869_v50 = vshll.u32 %v12211_v31, 16  ;;  %v874_v54 = vshrl.u32 %v794_v55, 16  ;;  %v798_v59 = vld [vmem:[%s12019_s10 + $0x38] sm:$0xf] }
  0x56   : > { %v858_v53 = vsel %vm12053_vm6, %v853_v39, %v857_v9  ;;  %v877_v57 = vshll.u32 %v794_v55, 16  ;;  %v9590_v12 = vld [vmem:[%s14489_s1 + $0x6] sm:$0x3]  ;;  %v862_v40 = vrot.slane %v860_v8, 4  ;;  %v883_v3 = vshll.u32 %v12226_v58, 16 }
  0x57   : > { %11062 = vmatmul.mubr.msk.bf16.gmra.mrb[4].mxu0 %vm602_vm1, %v10056_v18  ;;  %v10079_v18 = vcombine.low %v5250_v37, %v5254_v2  ;;  %v9567_v34 = vcombine.low %v844_v1, %v858_v53  ;;  %v865_v61 = vrot.slane %v863_v33, 5  ;;  %v871_v62 = vrot.slane %v869_v50, 5  ;;  %11684 = vmatprep.subr.msk.bf16.mxu1 %vm615_vm0, %v9590_v12  ;;  %v12249_v5 = vld [vmem:[%s12019_s10 + $0x3c] sm:$0x1]  ;;  %v10020_v13 = vld [vmem:[%s12019_s10 + $0x134] sm:$0x1] }
  0x58   : > { %11067 = vmatprep.mubr.msk.bf16.mxu0 %vm602_vm1, %v10078_v41  ;;  %v876_v14 = vrot.slane %v874_v54, 4  ;;  %v879_v0 = vrot.slane %v877_v57, 5  ;;  %v888_v6 = vshrl.u32 %v796_v47, 16  ;;  %v891_v9 = vshll.u32 %v796_v47, 16  ;;  %v10065_v28 = vld [vmem:[%s12019_s10 + $0x130] sm:$0xe] }
  0x59   : > { %10828 = vmatmul.mubr.msk.bf16.vlgmr.msra.gmra.mrb[0].mxu1 %vm602_vm1, %v9567_v34  ;;  %v866_v7 = vor.u32 %v865_v61, %v862_v40  ;;  %v897_v10 = vshll.u32 %v12237_v52, 16  ;;  %v902_v11 = vshrl.u32 %v798_v59, 16  ;;  %v885_v21 = vrot.slane %v883_v3, 5  ;;  %v10066_v55 = vld [vmem:[%s12019_s10 + $0x138] sm:$0xe] }
  0x5a   : > { %v880_v49 = vor.u32 %v879_v0, %v876_v14  ;;  %v890_v23 = vrot.slane %v888_v6, 4  ;;  %v905_v24 = vshll.u32 %v798_v59, 16  ;;  %v893_v35 = vrot.slane %v891_v9, 5  ;;  %v10022_v2 = vld [vmem:[%s12019_s10 + $0x13c] sm:$0x1] }
  0x5b   : > { %v867_v20 = vrot.slane %v866_v7, 4  ;;  %v899_v37 = vrot.slane %v897_v10, 5  ;;  %v904_v38 = vrot.slane %v902_v11, 4  ;;  %v911_v41 = vshll.u32 %v12249_v5, 16  ;;  %v10067_v54 = vld [vmem:[%s12019_s10 + $0x140] sm:$0xe] }
  0x5c   : > { %v881_v1 = vrot.slane %v880_v49, 4  ;;  %v907_v39 = vrot.slane %v905_v24, 5  ;;  %v1172_v47 = vsel %vm615_vm0, %v9590_v12, 0  ;;  %v894_v33 = vor.u32 %v893_v35, %v890_v23  ;;  %v10024_v40 = vld [vmem:[%s12019_s10 + $0x144] sm:$0x1] }
  0x5d   : > { %v872_v8 = vsel %vm12053_vm6, %v867_v20, %v871_v62  ;;  %10836 = vmatpush3.bf16.msra.mxu1 %v1172_v47  ;;  %v10073_v50 = vrot.slane %v10065_v28, 9  ;;  %v5257_v53 = vrot.slane %v10020_v13, 5  ;;  %v913_v34 = vrot.slane %v911_v41, 5  ;;  %v10068_v61 = vld [vmem:[%s12019_s10 + $0x148] sm:$0xe] }
  0x5e   : > { %v886_v57 = vsel %vm12053_vm6, %v881_v1, %v885_v21  ;;  %v908_v59 = vor.u32 %v907_v39, %v904_v38  ;;  %v10074_v12 = vrot.slane %v10066_v55, 9  ;;  %v895_v62 = vrot.slane %v894_v33, 4  ;;  %v10026_v3 = vld [vmem:[%s12019_s10 + $0x14c] sm:$0x1]  ;;  %v9574_v10 = vld [vmem:[%s12019_s10 + $0x58] sm:$0xf] }
  0x5f   : > { %11068 = vmatmul.mubr.msk.bf16.vlgmr.msra.gmra.mrb[0].mxu0 %vm602_vm1, %v10079_v18  ;;  %v9568_v18 = vcombine.low %v872_v8, %v886_v57  ;;  %v5258_v14 = vsel %vm12072_vm7, %v10073_v50, %v5257_v53  ;;  %v5261_v0 = vrot.slane %v10022_v2, 5  ;;  %v4951_v7 = vshll.u32 %v10026_v3, 16  ;;  %v12277_v23 = vld [vmem:[%s12019_s10 + $0x5c] sm:$0x1]  ;;  %v9576_v24 = vld [vmem:[%s12019_s10 + $0x60] sm:$0xf] }
  0x60   : > { %11076 = vmatpush3.bf16.msra.mxu0 %v5552_v45  ;;  %v909_v6 = vrot.slane %v908_v59, 4  ;;  %v4937_v45 = vshll.u32 %v10024_v40, 16  ;;  %v10075_v9 = vrot.slane %v10067_v54, 9  ;;  %v900_v11 = vsel %vm12053_vm6, %v895_v62, %v899_v37  ;;  %v12287_v55 = vld [vmem:[%s12019_s10 + $0x64] sm:$0x1] }
  0x61   : > { %10831 = vmatprep.mubr.msk.bf16.mxu1 %vm602_vm1, %v9568_v18  ;;  %v5262_v13 = vsel %vm12072_vm7, %v10074_v12, %v5261_v0  ;;  %v5265_v49 = vrot.slane %v10024_v40, 5  ;;  %v10076_v21 = vrot.slane %v10068_v61, 9  ;;  %v12284_v38 = vrot.slane %v4951_v7, 5  ;;  %v9578_v37 = vld [vmem:[%s12019_s10 + $0x68] sm:$0xf] }
  0x62   : > { %v914_v28 = vsel %vm12053_vm6, %v909_v6, %v913_v34  ;;  %v10080_v20 = vcombine.low %v5258_v14, %v5262_v13  ;;  %v12282_v35 = vrot.slane %v4937_v45, 5  ;;  %v5269_v41 = vrot.slane %v10026_v3, 5  ;;  %v12295_v2 = vld [vmem:[%s14489_s1 + $0x38] sm:$0x3]  ;;  %v12300_v54 = vld [vmem:[%s12019_s10 + $0x6c] sm:$0x1] }
  0x63   : > { %v9569_v1 = vcombine.low %v900_v11, %v914_v28  ;;  %v5266_v39 = vsel %vm12072_vm7, %v10075_v9, %v5265_v49  ;;  %v1034_v47 = vshrl.u32 %v9574_v10, 16  ;;  %v1037_v8 = vshll.u32 %v9574_v10, 16  ;;  %11710 = vmatprep.subr.msk.bf16.mxu0 %vm615_vm0, %v12295_v2  ;;  %v9580_v12 = vld [vmem:[%s12019_s10 + $0x70] sm:$0xf]  ;;  %v12310_v0 = vld [vmem:[%s12019_s10 + $0x74] sm:$0x1] }
  0x64   : > { %11071 = vmatprep.mubr.msk.bf16.mxu0 %vm602_vm1, %v10080_v20  ;;  %v1043_v33 = vshll.u32 %v12277_v23, 16  ;;  %v1048_v50 = vshrl.u32 %v9576_v24, 16  ;;  %v1051_v53 = vshll.u32 %v9576_v24, 16  ;;  %v5270_v57 = vsel %vm12072_vm7, %v10076_v21, %v5269_v41  ;;  %v10086_v41 = vld [vmem:[%s12019_s10 + $0xbc] sm:$0x3] }
  0x65   : > { %10832 = vmatmul.mubr.msk.bf16.gmra.mrb[4].mxu1 %vm602_vm1, %v9569_v1  ;;  %v1036_v59 = vrot.slane %v1034_v47, 4  ;;  %v1057_v34 = vshll.u32 %v12287_v55, 16  ;;  %v1062_v40 = vshrl.u32 %v9578_v37, 16  ;;  %v10081_v61 = vcombine.low %v5266_v39, %v5270_v57 }
  0x66   : > { %v1039_v18 = vrot.slane %v1037_v8, 5  ;;  %v1045_v62 = vrot.slane %v1043_v33, 5  ;;  %v1050_v14 = vrot.slane %v1048_v50, 4  ;;  %v1053_v3 = vrot.slane %v1051_v53, 5  ;;  %v10087_v53 = vld [vmem:[%s12019_s10 + $0xc4] sm:$0x3] }
  0x67   : > { %v1059_v6 = vrot.slane %v1057_v34, 5  ;;  %v1064_v45 = vrot.slane %v1062_v40, 4  ;;  %v1065_v7 = vshll.u32 %v9578_v37, 16  ;;  %11072 = vmatmul.mubr.msk.bf16.gmra.mrb[4].mxu0 %vm602_vm1, %v10081_v61  ;;  %v1071_v10 = vshll.u32 %v12300_v54, 16 }
  0x68   : > { %v1040_v9 = vor.u32 %v1039_v18, %v1036_v59  ;;  %v1076_v11 = vshrl.u32 %v9580_v12, 16  ;;  %v1079_v13 = vshll.u32 %v9580_v12, 16  ;;  %v1054_v49 = vor.u32 %v1053_v3, %v1050_v14  ;;  %v12327_v18 = vld [vmem:[%s14489_s1 + $0x8] sm:$0x3] }
  0x69   : > { %v1067_v21 = vrot.slane %v1065_v7, 5  ;;  %v1085_v24 = vshll.u32 %v12310_v0, 16  ;;  %v1073_v20 = vrot.slane %v1071_v10, 5  ;;  %v5384_v57 = vrot.slane %v5382_v29, 5  ;;  %11685 = vmatprep.subr.msk.bf16.mxu1 %vm615_vm0, %v12327_v18 }
  0x6a   : > { %v1041_v28 = vrot.slane %v1040_v9, 4  ;;  %v1078_v1 = vrot.slane %v1076_v11, 4  ;;  %v1081_v39 = vrot.slane %v1079_v13, 5  ;;  %v1055_v47 = vrot.slane %v1054_v49, 4  ;;  %v10088_v9 = vld [vmem:[%s12019_s10 + $0xcc] sm:$0x3] }
  0x6b   : > { %v1068_v37 = vor.u32 %v1067_v21, %v1064_v45  ;;  %v1087_v8 = vrot.slane %v1085_v24, 5  ;;  %v5385_v59 = vshll.u32 %v12077_v43, 16  ;;  %v5391_v40 = vshrl.u32 %v10086_v41, 16  ;;  %v10556_v24 = vld [vmem:[%s14490_s2] ss:$0 sm:$0xff] }
  0x6c   : > { %v1046_v33 = vsel %vm12053_vm6, %v1041_v28, %v1045_v62  ;;  %v1082_v50 = vor.u32 %v1081_v39, %v1078_v1  ;;  %v1060_v34 = vsel %vm12053_vm6, %v1055_v47, %v1059_v6  ;;  %v5394_v61 = vshll.u32 %v10086_v41, 16  ;;  %v10089_v1 = vld [vmem:[%s12019_s10 + $0xd4] sm:$0x3]  ;;  %v9582_v39 = vld [vmem:[%s12019_s10 + $0x78] sm:$0xf] }
  0x6d   : > { %v1069_v12 = vrot.slane %v1068_v37, 4  ;;  %v9591_v62 = vcombine.low %v1046_v33, %v1060_v34  ;;  %v5387_v3 = vrot.slane %v5385_v59, 6  ;;  %v5400_v45 = vshrl.u32 %v12080_v44, 16  ;;  %v12351_v33 = vld [vmem:[%s12019_s10 + $0x7c] sm:$0x1] }
  0x6e   : > { %v1083_v14 = vrot.slane %v1082_v50, 4  ;;  %v5393_v29 = vrot.slane %v5391_v40, 5  ;;  %v5396_v6 = vrot.slane %v5394_v61, 6  ;;  %v5403_v7 = vshll.u32 %v12080_v44, 16  ;;  %v9584_v34 = vld [vmem:[%s12019_s10 + $0x80] sm:$0xf] }
  0x6f   : > { %v1074_v43 = vsel %vm12053_vm6, %v1069_v12, %v1073_v20  ;;  %10837 = vmatprep.mubr.msk.bf16.mxu1 %vm602_vm1, %v9591_v62  ;;  %v5388_v11 = vor.u32 %v5387_v3, %v5384_v57  ;;  %v5402_v13 = vrot.slane %v5400_v45, 5  ;;  %v5409_v49 = vshrl.u32 %v10087_v53, 16 }
  0x70   : > { %v1088_v10 = vsel %vm12053_vm6, %v1083_v14, %v1087_v8  ;;  %v5397_v28 = vor.u32 %v5396_v6, %v5393_v29  ;;  %v5405_v44 = vrot.slane %v5403_v7, 6  ;;  %v5412_v20 = vshll.u32 %v10087_v53, 16 }
  0x71   : > { %v9592_v21 = vcombine.low %v1074_v43, %v1088_v10  ;;  %v5389_v41 = vrot.slane %v5388_v11, 4  ;;  %v5411_v47 = vrot.slane %v5409_v49, 5  ;;  %v5425_v37 = vrot.slane %v5424_v56, 4  ;;  %v12363_v43 = vld [vmem:[%s12019_s10 + $0x84] sm:$0x1] }
  0x72   : > { %v5427_v8 = vshrl.u32 %v10088_v9, 16  ;;  %v5406_v50 = vor.u32 %v5405_v44, %v5402_v13  ;;  %v5414_v57 = vrot.slane %v5412_v20, 6  ;;  %v5430_v59 = vshll.u32 %v10088_v9, 16  ;;  %v9586_v9 = vld [vmem:[%s12019_s10 + $0x88] sm:$0xf] }
  0x73   : > { %10838 = vmatmul.mubr.msk.bf16.vlgmr.msra.gmra.mrb[0].mxu1 %vm602_vm1, %v9592_v21  ;;  %v5443_v53 = vrot.slane %v5442_v63, 4  ;;  %v5398_v12 = vsel %vm12341_vm10, %v5389_v41, %v5397_v28  ;;  %v5445_v22 = vshrl.u32 %v10089_v1, 16  ;;  %v5448_v25 = vshll.u32 %v10089_v1, 16  ;;  %v12370_v49 = vld [vmem:[%s12019_s10 + $0x8c] sm:$0x1] }
  0x74   : > { %v5429_v40 = vrot.slane %v5427_v8, 5  ;;  %v5407_v56 = vrot.slane %v5406_v50, 4  ;;  %v5415_v61 = vor.u32 %v5414_v57, %v5411_v47  ;;  %v5432_v62 = vrot.slane %v5430_v59, 6  ;;  %v9588_v1 = vld [vmem:[%s12019_s10 + $0x90] sm:$0xf] }
  0x75   : > { %v5671_v14 = vsel %vm615_vm0, %v12295_v2, 0  ;;  %v5447_v3 = vrot.slane %v5445_v22, 5  ;;  %v5450_v45 = vrot.slane %v5448_v25, 6  ;;  %v1090_v26 = vshrl.u32 %v9582_v39, 16  ;;  %v12380_v8 = vld [vmem:[%s12019_s10 + $0x94] sm:$0x1] }
  0x76   : > { %v1093_v27 = vshll.u32 %v9582_v39, 16  ;;  %v5416_v63 = vsel %vm12341_vm10, %v5407_v56, %v5415_v61  ;;  %v5433_v29 = vor.u32 %v5432_v62, %v5429_v40  ;;  %v1099_v6 = vshll.u32 %v12351_v33, 16  ;;  %v10090_v40 = vld [vmem:[%s12019_s10 + $0xdc] sm:$0x3]  ;;  %v12392_v61 = vld [vmem:[%s14489_s1 + $0xa] sm:$0x3] }
  0x77   : > { %v1104_v7 = vshrl.u32 %v9584_v34, 16  ;;  %v10095_v10 = vcombine.low %v5398_v12, %v5416_v63  ;;  %v5451_v11 = vor.u32 %v5450_v45, %v5447_v3  ;;  %v1092_v13 = vrot.slane %v1090_v26, 4 }
  0x78   : > { %v1095_v2 = vrot.slane %v1093_v27, 5  ;;  %v5434_v21 = vsel %vm12341_vm10, %v5425_v37, %v5433_v29  ;;  %v1101_v28 = vrot.slane %v1099_v6, 5  ;;  %v1107_v20 = vshll.u32 %v9584_v34, 16  ;;  %v12387_v34 = vld [vmem:[%s14489_s1 + $0x3a] sm:$0x3] }
  0x79   : > { %v1106_v44 = vrot.slane %v1104_v7, 4  ;;  %11077 = vmatprep.mubr.msk.bf16.mxu0 %vm602_vm1, %v10095_v10  ;;  %v5452_v39 = vsel %vm12341_vm10, %v5443_v53, %v5451_v11  ;;  %v1113_v47 = vshll.u32 %v12363_v43, 16  ;;  %v1118_v50 = vshrl.u32 %v9586_v9, 16 }
  0x7a   : > { %v1096_v41 = vor.u32 %v1095_v2, %v1092_v13  ;;  %v10096_v57 = vcombine.low %v5434_v21, %v5452_v39  ;;  %v1109_v59 = vrot.slane %v1107_v20, 5  ;;  %v1121_v12 = vshll.u32 %v9586_v9, 16  ;;  %v10091_v20 = vld [vmem:[%s12019_s10 + $0xe4] sm:$0x3] }
  0x7b   : > { %v1127_v37 = vshll.u32 %v12370_v49, 16  ;;  %v1115_v25 = vrot.slane %v1113_v47, 5  ;;  %v1120_v53 = vrot.slane %v1118_v50, 4  ;;  %v1132_v56 = vshrl.u32 %v9588_v1, 16 }
  0x7c   : > { %v1097_v22 = vrot.slane %v1096_v41, 4  ;;  %11078 = vmatmul.mubr.msk.bf16.vlgmr.msra.gmra.mrb[0].mxu0 %vm602_vm1, %v10096_v57  ;;  %v1110_v62 = vor.u32 %v1109_v59, %v1106_v44  ;;  %v1123_v3 = vrot.slane %v1121_v12, 5  ;;  %v1135_v26 = vshll.u32 %v9588_v1, 16 }
  0x7d   : > { %v1129_v45 = vrot.slane %v1127_v37, 5  ;;  %11086 = vmatpush3.bf16.msra.mxu0 %v5671_v14  ;;  %v1134_v63 = vrot.slane %v1132_v56, 4  ;;  %v1141_v29 = vshll.u32 %v12380_v8, 16  ;;  %v1333_v6 = vsel %vm615_vm0, %v12327_v18, 0 }
  0x7e   : > { %v1102_v27 = vsel %vm12053_vm6, %v1097_v22, %v1101_v28  ;;  %v1111_v7 = vrot.slane %v1110_v62, 4  ;;  %v1124_v9 = vor.u32 %v1123_v3, %v1120_v53  ;;  %v1137_v10 = vrot.slane %v1135_v26, 5  ;;  %10846 = vmatpush3.bf16.msra.mxu1 %v1333_v6  ;;  %11711 = vmatprep.subr.msk.bf16.mxu0 %vm615_vm0, %v12387_v34  ;;  %v10092_v53 = vld [vmem:[%s12019_s10 + $0xec] sm:$0x3]  ;;  %v10093_v6 = vld [vmem:[%s12019_s10 + $0xf4] sm:$0x3] }
  0x7f   : > { %v5454_v11 = vshrl.u32 %v12137_v32, 16  ;;  %v1143_v14 = vrot.slane %v1141_v29, 5  ;;  %v5457_v13 = vshll.u32 %v12137_v32, 16  ;;  %v5463_v2 = vshrl.u32 %v10090_v40, 16  ;;  %11686 = vmatprep.subr.msk.bf16.mxu1 %vm615_vm0, %v12392_v61 }
  0x80   : > { %v5466_v21 = vshll.u32 %v10090_v40, 16  ;;  %v1116_v18 = vsel %vm12053_vm6, %v1111_v7, %v1115_v25  ;;  %v1125_v28 = vrot.slane %v1124_v9, 4  ;;  %v1138_v44 = vor.u32 %v1137_v10, %v1134_v63 }
  0x81   : > { %v5456_v1 = vrot.slane %v5454_v11, 5  ;;  %v9593_v39 = vcombine.low %v1102_v27, %v1116_v18  ;;  %v5459_v41 = vrot.slane %v5457_v13, 6  ;;  %v5465_v47 = vrot.slane %v5463_v2, 5 }
  0x82   : > { %v5468_v50 = vrot.slane %v5466_v21, 6  ;;  %v1130_v32 = vsel %vm12053_vm6, %v1125_v28, %v1129_v45  ;;  %v1139_v57 = vrot.slane %v1138_v44, 4  ;;  %v5472_v59 = vshrl.u32 %v12140_v36, 16  ;;  %v12425_v21 = vld [vmem:[%s12019_s10] sm:$0xe] }
  0x83   : > { %v5475_v12 = vshll.u32 %v12140_v36, 16  ;;  %10841 = vmatprep.mubr.msk.bf16.mxu1 %vm602_vm1, %v9593_v39  ;;  %v5460_v37 = vor.u32 %v5459_v41, %v5456_v1  ;;  %v5481_v22 = vshrl.u32 %v10091_v20, 16  ;;  %v5484_v25 = vshll.u32 %v10091_v20, 16 }
  0x84   : > { %v5469_v40 = vor.u32 %v5468_v50, %v5465_v47  ;;  %v1144_v56 = vsel %vm12053_vm6, %v1139_v57, %v1143_v14  ;;  %v5474_v62 = vrot.slane %v5472_v59, 5  ;;  %v5490_v45 = vshrl.u32 %v12147_v46, 16  ;;  %v12429_v47 = vld [vmem:[%s12019_s10 + $0x8] sm:$0xe] }
  0x85   : > { %v5477_v3 = vrot.slane %v5475_v12, 6  ;;  %v9594_v26 = vcombine.low %v1130_v32, %v1144_v56  ;;  %v5461_v27 = vrot.slane %v5460_v37, 4  ;;  %v5483_v63 = vrot.slane %v5481_v22, 5  ;;  %v12435_v12 = vld [vmem:[%s12019_s10 + $0x10] sm:$0xe] }
  0x86   : > { %v5486_v36 = vrot.slane %v5484_v25, 6  ;;  %v5492_v7 = vrot.slane %v5490_v45, 5  ;;  %v5493_v9 = vshll.u32 %v12147_v46, 16  ;;  %v5499_v10 = vshrl.u32 %v10092_v53, 16  ;;  %v12438_v25 = vld [vmem:[%s12019_s10 + $0x18] sm:$0xe] }
  0x87   : > { %v5478_v29 = vor.u32 %v5477_v3, %v5474_v62  ;;  %10842 = vmatmul.mubr.msk.bf16.gmra.mrb[4].mxu1 %vm602_vm1, %v9594_v26  ;;  %v5470_v11 = vsel %vm12341_vm10, %v5461_v27, %v5469_v40  ;;  %v5502_v13 = vshll.u32 %v10092_v53, 16  ;;  %v5508_v2 = vshrl.u32 %v12153_v51, 16  ;;  %v12441_v53 = vld [vmem:[%s12019_s10 + $0x20] sm:$0xe]  ;;  %v12446_v26 = vld [vmem:[%s12019_s10 + $0x28] sm:$0xe] }
  0x88   : > { %v5487_v14 = vor.u32 %v5486_v36, %v5483_v63  ;;  %v5495_v28 = vrot.slane %v5493_v9, 6  ;;  %v5501_v44 = vrot.slane %v5499_v10, 5  ;;  %v5511_v46 = vshll.u32 %v12153_v51, 16  ;;  %v12458_v10 = vld [vmem:[%s12019_s10 + $0x30] sm:$0xe] }
  0x89   : > { %v5479_v18 = vrot.slane %v5478_v29, 4  ;;  %v5504_v20 = vrot.slane %v5502_v13, 6  ;;  %v5510_v1 = vrot.slane %v5508_v2, 5  ;;  %v5517_v39 = vshrl.u32 %v10093_v6, 16 }
  0x8a   : > { %v5520_v41 = vshll.u32 %v10093_v6, 16  ;;  %v5496_v32 = vor.u32 %v5495_v28, %v5492_v7  ;;  %v5513_v57 = vrot.slane %v5511_v46, 6  ;;  %v9599_v59 = vrot.slane %v12425_v21, 9  ;;  %v12475_v46 = vld [vmem:[%s12019_s10 + $0x38] sm:$0xe] }
  0x8b   : > { %v5488_v50 = vsel %vm12341_vm10, %v5479_v18, %v5487_v14  ;;  %v5505_v40 = vor.u32 %v5504_v20, %v5501_v44  ;;  %v5519_v51 = vrot.slane %v5517_v39, 5  ;;  %v1276_v3 = vrot.slane %v12163_v60, 5  ;;  %v11766_v18 = vld [vmem:[%s12019_s10 + $0x10] ss:$8 sps:$4 sm:$0xff]  }
  0x8c   : > { %v10097_v37 = vcombine.low %v5470_v11, %v5488_v50  ;;  %v5522_v22 = vrot.slane %v5520_v41, 6  ;;  %v5497_v56 = vrot.slane %v5496_v32, 4  ;;  %v5514_v62 = vor.u32 %v5513_v57, %v5510_v1  ;;  %v9616_v39 = vld [vmem:[%s12019_s10 + $0x58] sm:$0xe]  ;;  %v9617_v41 = vld [vmem:[%s12019_s10 + $0x60] sm:$0xe] }
  0x8d   : > { %v9600_v45 = vrot.slane %v12429_v47, 9  ;;  %v1280_v63 = vrot.slane %v12173_v4, 5  ;;  %v9601_v36 = vrot.slane %v12435_v12, 9  ;;  %v1284_v29 = vrot.slane %v12180_v16, 5 }
  0x8e   : > { %11081 = vmatprep.mubr.msk.bf16.mxu0 %vm602_vm1, %v10097_v37  ;;  %v5523_v27 = vor.u32 %v5522_v22, %v5519_v51  ;;  %v5506_v6 = vsel %vm12341_vm10, %v5497_v56, %v5505_v40  ;;  %v5515_v7 = vrot.slane %v5514_v62, 4  ;;  %v1277_v60 = vsel %vm12072_vm7, %v9599_v59, %v1276_v3  ;;  %v9618_v59 = vld [vmem:[%s12019_s10 + $0x68] sm:$0xe]  ;;  %v9619_v37 = vld [vmem:[%s12019_s10 + $0x70] sm:$0xe] }
  0x8f   : > { %v9602_v9 = vrot.slane %v12438_v25, 9  ;;  %v1281_v4 = vsel %vm12072_vm7, %v9600_v45, %v1280_v63  ;;  %v1285_v11 = vsel %vm12072_vm7, %v9601_v36, %v1284_v29  ;;  %v1288_v16 = vrot.slane %v12186_v30, 5  ;;  %v9620_v45 = vld [vmem:[%s12019_s10 + $0x78] sm:$0xe] }
  0x90   : > { %v12467_v14 = vsel %vm615_vm0, %v12387_v34, 0  ;;  %v5524_v13 = vsel %vm12341_vm10, %v5515_v7, %v5523_v27  ;;  %v9608_v2 = vcombine.low %v1277_v60, %v1281_v4  ;;  %v9603_v28 = vrot.slane %v12441_v53, 9  ;;  %v11767_v7 = vld [vmem:[%s12019_s10 + $0x20] ss:$8 sps:$4 sm:$0xff]  }
  0x91   : > { %v1292_v44 = vrot.slane %v12211_v31, 5  ;;  %v10098_v20 = vcombine.low %v5506_v6, %v5524_v13  ;;  %v1289_v30 = vsel %vm12072_vm7, %v9602_v9, %v1288_v16  ;;  %v9604_v34 = vrot.slane %v12446_v26, 9  ;;  %v9621_v6 = vld [vmem:[%s12019_s10 + $0x80] sm:$0xe] }
  0x92   : > { %v1296_v1 = vrot.slane %v12226_v58, 5  ;;  %10847 = vmatprep.mubr.msk.bf16.mxu1 %vm602_vm1, %v9608_v2  ;;  %v9609_v50 = vcombine.low %v1285_v11, %v1289_v30  ;;  %v9605_v31 = vrot.slane %v12458_v10, 9  ;;  %v1300_v57 = vrot.slane %v12237_v52, 5  ;;  %v9641_v52 = vld [vmem:[%s14489_s1 + $0xc] sm:$0x3] }
  0x93   : > { %v1293_v32 = vsel %vm12072_vm7, %v9603_v28, %v1292_v44  ;;  %11082 = vmatmul.mubr.msk.bf16.gmra.mrb[4].mxu0 %vm602_vm1, %v10098_v20  ;;  %v9606_v40 = vrot.slane %v12475_v46, 9  ;;  %v1304_v51 = vrot.slane %v12249_v5, 5  ;;  %v1491_v22 = vsel %vm615_vm0, %v12392_v61, 0  ;;  %v10153_v61 = vld [vmem:[%s14489_s1 + $0x3c] sm:$0x3] }
  0x94   : > { %v1297_v58 = vsel %vm12072_vm7, %v9604_v34, %v1296_v1  ;;  %10848 = vmatmul.mubr.msk.bf16.vlgmr.msra.gmra.mrb[0].mxu1 %vm602_vm1, %v9609_v50  ;;  %11087 = vmatprep.mubr.msk.bf16.mxu0 %vm602_vm1, %v11766_v18  ;;  %v1301_v62 = vsel %vm12072_vm7, %v9605_v31, %v1300_v57  ;;  %v9624_v3 = vrot.slane %v9616_v39, 9  ;;  %v1434_v5 = vrot.slane %v12277_v23, 5  ;;  %v9622_v11 = vld [vmem:[%s12019_s10 + $0x88] sm:$0xe]  ;;  %v9623_v18 = vld [vmem:[%s12019_s10 + $0x90] sm:$0xe] }
  0x95   : > { %v9610_v56 = vcombine.low %v1293_v32, %v1297_v58  ;;  %v1305_v27 = vsel %vm12072_vm7, %v9606_v40, %v1304_v51  ;;  %10856 = vmatpush3.bf16.msra.mxu1 %v1491_v22  ;;  %v9625_v63 = vrot.slane %v9617_v41, 9  ;;  %v1438_v36 = vrot.slane %v12287_v55, 5  ;;  %v11768_v28 = vld [vmem:[%s12019_s10 + $0x30] ss:$8 sps:$4 sm:$0xff]   ;;  %v1566_v41 = vld [vmem:[%s12019_s10 + $0x4] sm:$0x3] }
  0x96   : > { %v9626_v29 = vrot.slane %v9618_v59, 9  ;;  %v9611_v23 = vcombine.low %v1301_v62, %v1305_v27  ;;  %v1435_v60 = vsel %vm12072_vm7, %v9624_v3, %v1434_v5  ;;  %v1442_v9 = vrot.slane %v12300_v54, 5  ;;  %11687 = vmatprep.subr.msk.bf16.mxu1 %vm615_vm0, %v9641_v52  ;;  %v1567_v59 = vld [vmem:[%s12019_s10 + $0xc] sm:$0x3]  ;;  %v11769_v22 = vld [vmem:[%s12019_s10 + $0x40] ss:$8 sps:$4 sm:$0xff]  }
  0x97   : > { %10851 = vmatprep.mubr.msk.bf16.mxu1 %vm602_vm1, %v9610_v56  ;;  %v9627_v4 = vrot.slane %v9619_v37, 9  ;;  %v1439_v55 = vsel %vm12072_vm7, %v9625_v63, %v1438_v36  ;;  %v1446_v16 = vrot.slane %v12310_v0, 5  ;;  %v12524_v13 = vsel %vm615_vm0, %v10153_v61, 0  ;;  %v1568_v27 = vld [vmem:[%s12019_s10 + $0x14] sm:$0x3] }
  0x98   : > { %v9628_v2 = vrot.slane %v9620_v45, 9  ;;  %v9633_v44 = vcombine.low %v1435_v60, %v1439_v55  ;;  %v12530_v54 = vsel %vm12072_vm7, %v9626_v29, %v1442_v9  ;;  %v1450_v20 = vrot.slane %v12351_v33, 5  ;;  %v11770_v63 = vld [vmem:[%s12019_s10 + $0x68] ss:$8 sps:$4 sm:$0xff]  }
  0x99   : > { %v9629_v30 = vrot.slane %v9621_v6, 9  ;;  %v1447_v34 = vsel %vm12072_vm7, %v9627_v4, %v1446_v16  ;;  %v1454_v0 = vrot.slane %v12363_v43, 5  ;;  %v9630_v1 = vrot.slane %v9622_v11, 9  ;;  %v1569_v4 = vld [vmem:[%s12019_s10 + $0x1c] sm:$0x3] }
  0x9a   : > { %v1458_v39 = vrot.slane %v12370_v49, 5  ;;  %v9634_v50 = vcombine.low %v12530_v54, %v1447_v34  ;;  %v1451_v32 = vsel %vm12072_vm7, %v9628_v2, %v1450_v20  ;;  %v9631_v31 = vrot.slane %v9623_v18, 9  ;;  %v12576_v18 = vld [vmem:[%s14489_s1 + $0xe] sm:$0x3] }
  0x9b   : > { %v1462_v57 = vrot.slane %v12380_v8, 5  ;;  %11088 = vmatmul.mubr.msk.bf16.vlgmr.msra.gmra.mrb[0].mxu0 %vm602_vm1, %v11767_v7  ;;  %v1455_v33 = vsel %vm12072_vm7, %v9629_v30, %v1454_v0  ;;  %v1748_v49 = vsel %vm615_vm0, %v9641_v52, 0  ;;  %v1578_v37 = vshrl.u32 %v12425_v21, 16 }
  0x9c   : > { %v12547_v43 = vsel %vm12072_vm7, %v9630_v1, %v1458_v39  ;;  %11096 = vmatpush3.bf16.msra.mxu0 %v12467_v14  ;;  %10852 = vmatmul.mubr.msk.bf16.gmra.mrb[4].mxu1 %vm602_vm1, %v9611_v23  ;;  %v9635_v58 = vcombine.low %v1451_v32, %v1455_v33  ;;  %v1581_v40 = vshll.u32 %v12425_v21, 16  ;;  %v1587_v51 = vshrl.u32 %v1566_v41, 16 }
  0x9d   : > { %v12556_v8 = vsel %vm12072_vm7, %v9631_v31, %v1462_v57  ;;  %11091 = vmatprep.mubr.msk.bf16.mxu0 %vm602_vm1, %v11768_v28  ;;  %10857 = vmatprep.mubr.msk.bf16.mxu1 %vm602_vm1, %v9633_v44  ;;  %v1580_v52 = vrot.slane %v1578_v37, 5  ;;  %v1590_v56 = vshll.u32 %v1566_v41, 16  ;;  %v1596_v62 = vshrl.u32 %v12429_v47, 16  ;;  %v12586_v31 = vld [vmem:[%s12019_s10 + $0x14] sm:$0x1] }
  0x9e   : > { %v9636_v14 = vcombine.low %v12547_v43, %v12556_v8  ;;  %11712 = vmatprep.subr.msk.bf16.mxu0 %vm615_vm0, %v10153_v61  ;;  %v1583_v3 = vrot.slane %v1581_v40, 6  ;;  %v1589_v5 = vrot.slane %v1587_v51, 5  ;;  %v1599_v21 = vshll.u32 %v12429_v47, 16  ;;  %v10137_v47 = vld [vmem:[%s12019_s10 + $0x10] sm:$0xf] }
  0x9f   : > { %v1605_v45 = vshrl.u32 %v1567_v59, 16  ;;  %v1592_v36 = vrot.slane %v1590_v56, 6  ;;  %v1598_v29 = vrot.slane %v1596_v62, 5  ;;  %v1608_v6 = vshll.u32 %v1567_v59, 16  ;;  %v11771_v59 = vld [vmem:[%s12019_s10 + $0x78] ss:$8 sps:$4 sm:$0xff]  }
  0xa0   : > { %v1614_v7 = vshrl.u32 %v12435_v12, 16  ;;  %v1584_v23 = vor.u32 %v1583_v3, %v1580_v52  ;;  %v1601_v60 = vrot.slane %v1599_v21, 6  ;;  %v1617_v11 = vshll.u32 %v12435_v12, 16  ;;  %v12596_v3 = vld [vmem:[%s12019_s10 + $0x1c] sm:$0x1] }
  0xa1   : > { %v1607_v9 = vrot.slane %v1605_v45, 5  ;;  %v1593_v61 = vor.u32 %v1592_v36, %v1589_v5  ;;  %v1610_v55 = vrot.slane %v1608_v6, 6  ;;  %v1623_v2 = vshrl.u32 %v1568_v27, 16  ;;  %v10141_v5 = vld [vmem:[%s12019_s10 + $0x20] sm:$0xf] }
  0xa2   : > { %v1616_v16 = vrot.slane %v1614_v7, 5  ;;  %v1585_v28 = vrot.slane %v1584_v23, 4  ;;  %v1602_v44 = vor.u32 %v1601_v60, %v1598_v29  ;;  %v1619_v54 = vrot.slane %v1617_v11, 6  ;;  %v11772_v21 = vld [vmem:[%s12019_s10 + $0x88] ss:$8 sps:$4 sm:$0xff]  }
  0xa3   : > { %v1626_v20 = vshll.u32 %v1568_v27, 16  ;;  %11092 = vmatmul.mubr.msk.bf16.gmra.mrb[4].mxu0 %vm602_vm1, %v11769_v22  ;;  %v1611_v30 = vor.u32 %v1610_v55, %v1607_v9  ;;  %v1625_v34 = vrot.slane %v1623_v2, 5  ;;  %v1632_v12 = vshrl.u32 %v12438_v25, 16  ;;  %v10139_v22 = vld [vmem:[%s12019_s10 + $0x18] sm:$0xf] }
  0xa4   : > { %v1635_v0 = vshll.u32 %v12438_v25, 16  ;;  %10858 = vmatmul.mubr.msk.bf16.vlgmr.msra.gmra.mrb[0].mxu1 %vm602_vm1, %v9634_v50  ;;  %11097 = vmatprep.mubr.msk.bf16.mxu0 %vm602_vm1, %v11770_v63  ;;  %v1594_v1 = vsel %vm12341_vm10, %v1585_v28, %v1593_v61  ;;  %v1603_v39 = vrot.slane %v1602_v44, 4  ;;  %v1620_v41 = vor.u32 %v1619_v54, %v1616_v16  ;;  %v10178_v60 = vld [vmem:[%s14489_s1 + $0x3e] sm:$0x3]  ;;  %v12609_v9 = vld [vmem:[%s12019_s10 + $0x24] sm:$0x1] }
  0xa5   : > { %v1628_v32 = vrot.slane %v1626_v20, 6  ;;  %10861 = vmatprep.mubr.msk.bf16.mxu1 %vm602_vm1, %v9635_v58  ;;  %10866 = vmatpush3.bf16.msra.mxu1 %v1748_v49  ;;  %v1634_v57 = vrot.slane %v1632_v12, 5  ;;  %v1641_v50 = vshrl.u32 %v1569_v4, 16  ;;  %v1644_v33 = vshll.u32 %v1569_v4, 16  ;;  %v10143_v55 = vld [vmem:[%s12019_s10 + $0x28] sm:$0xf] }
  0xa6   : > { %v1637_v25 = vrot.slane %v1635_v0, 6  ;;  %v1612_v37 = vsel %vm12341_vm10, %v1603_v39, %v1611_v30  ;;  %v1621_v40 = vrot.slane %v1620_v41, 4  ;;  %v5882_v52 = vshrl.u32 %v10137_v47, 16  ;;  %11688 = vmatprep.subr.msk.bf16.mxu1 %vm615_vm0, %v12576_v18  ;;  %v12617_v44 = vld [vmem:[%s12019_s10 + $0x2c] sm:$0x1] }
  0xa7   : > { %v1629_v51 = vor.u32 %v1628_v32, %v1625_v34  ;;  %v9642_v58 = vcombine.low %v1594_v1, %v1612_v37  ;;  %v1643_v56 = vrot.slane %v1641_v50, 5  ;;  %v1646_v62 = vrot.slane %v1644_v33, 6  ;;  %v1570_v0 = vld [vmem:[%s12019_s10 + $0x24] sm:$0x3]  ;;  %v11773_v1 = vld [vmem:[%s12019_s10 + $0x98] ss:$8 sps:$4 sm:$0xff]  }
  0xa8   : > { %v1638_v49 = vor.u32 %v1637_v25, %v1634_v57  ;;  %v5884_v27 = vrot.slane %v5882_v52, 4  ;;  %v5885_v63 = vshll.u32 %v10137_v47, 16  ;;  %v5891_v36 = vshll.u32 %v12586_v31, 16  ;;  %v1571_v37 = vld [vmem:[%s12019_s10 + $0x2c] sm:$0x3] }
  0xa9   : > { %v12602_v45 = vsel %vm12341_vm10, %v1621_v40, %v1629_v51  ;;  %v1647_v6 = vor.u32 %v1646_v62, %v1643_v56  ;;  %v5896_v7 = vshrl.u32 %v10139_v22, 16  ;;  %v5899_v23 = vshll.u32 %v10139_v22, 16 }
  0xaa   : > { %v1639_v29 = vrot.slane %v1638_v49, 4  ;;  %v5887_v4 = vrot.slane %v5885_v63, 5  ;;  %v5893_v11 = vrot.slane %v5891_v36, 5  ;;  %v5905_v61 = vshll.u32 %v12596_v3, 16 }
  0xab   : > { %v5910_v16 = vshrl.u32 %v10141_v5, 16  ;;  %11098 = vmatmul.mubr.msk.bf16.vlgmr.msra.gmra.mrb[0].mxu0 %vm602_vm1, %v11771_v59  ;;  %v5898_v47 = vrot.slane %v5896_v7, 4  ;;  %v5901_v28 = vrot.slane %v5899_v23, 5  ;;  %v5913_v54 = vshll.u32 %v10141_v5, 16 }
  0xac   : > { %v1648_v2 = vsel %vm12341_vm10, %v1639_v29, %v1647_v6  ;;  %11106 = vmatpush3.bf16.msra.mxu0 %v12524_v13  ;;  %10862 = vmatmul.mubr.msk.bf16.gmra.mrb[4].mxu1 %vm602_vm1, %v9636_v14  ;;  %v5888_v30 = vor.u32 %v5887_v4, %v5884_v27  ;;  %v5907_v34 = vrot.slane %v5905_v61, 5  ;;  %v5919_v13 = vshll.u32 %v12609_v9, 16 }
  0xad   : > { %v9643_v20 = vcombine.low %v12602_v45, %v1648_v2  ;;  %v5912_v12 = vrot.slane %v5910_v16, 4  ;;  %11101 = vmatprep.mubr.msk.bf16.mxu0 %vm602_vm1, %v11772_v21  ;;  %10867 = vmatprep.mubr.msk.bf16.mxu1 %vm602_vm1, %v9642_v58  ;;  %v5902_v39 = vor.u32 %v5901_v28, %v5898_v47  ;;  %v5915_v41 = vrot.slane %v5913_v54, 5 }
  0xae   : > { %v5924_v32 = vshrl.u32 %v10143_v55, 16  ;;  %v5889_v43 = vrot.slane %v5888_v30, 4  ;;  %11713 = vmatprep.subr.msk.bf16.mxu0 %vm615_vm0, %v10178_v60  ;;  %v5927_v8 = vshll.u32 %v10143_v55, 16  ;;  %v5933_v14 = vshll.u32 %v12617_v44, 16  ;;  %v1572_v55 = vld [vmem:[%s12019_s10 + $0x34] sm:$0x3] }
  0xaf   : > { %v12633_v57 = vsel %vm615_vm0, %v10178_v60, 0  ;;  %v5903_v25 = vrot.slane %v5902_v39, 4  ;;  %v5916_v50 = vor.u32 %v5915_v41, %v5912_v12  ;;  %v5921_v33 = vrot.slane %v5919_v13, 5 }
  0xb0   : > { %v5926_v59 = vrot.slane %v5924_v32, 4  ;;  %v5894_v40 = vsel %vm12053_vm6, %v5889_v43, %v5893_v11  ;;  %v5929_v51 = vrot.slane %v5927_v8, 5  ;;  %v5935_v22 = vrot.slane %v5933_v14, 5  ;;  %v10145_v14 = vld [vmem:[%s12019_s10 + $0x30] sm:$0xf] }
  0xb1   : > { %v1650_v52 = vshrl.u32 %v12441_v53, 16  ;;  %v5908_v58 = vsel %vm12053_vm6, %v5903_v25, %v5907_v34  ;;  %v5917_v49 = vrot.slane %v5916_v50, 4  ;;  %v1653_v56 = vshll.u32 %v12441_v53, 16  ;;  %v12661_v25 = vld [vmem:[%s12019_s10 + $0x34] sm:$0x1] }
  0xb2   : > { %v1659_v62 = vshrl.u32 %v1570_v0, 16  ;;  %v10154_v5 = vcombine.low %v5894_v40, %v5908_v58  ;;  %v5930_v21 = vor.u32 %v5929_v51, %v5926_v59  ;;  %v1662_v27 = vshll.u32 %v1570_v0, 16  ;;  %v1573_v0 = vld [vmem:[%s12019_s10 + $0x3c] sm:$0x3]  ;;  %v12666_v50 = vld [vmem:[%s14489_s1 + $0x40] sm:$0x3] }
  0xb3   : > { %v1652_v45 = vrot.slane %v1650_v52, 5  ;;  %11102 = vmatmul.mubr.msk.bf16.gmra.mrb[4].mxu0 %vm602_vm1, %v11773_v1  ;;  %v5922_v63 = vsel %vm12053_vm6, %v5917_v49, %v5921_v33  ;;  %v1655_v36 = vrot.slane %v1653_v56, 6  ;;  %v1668_v6 = vshrl.u32 %v12446_v26, 16  ;;  %v10147_v40 = vld [vmem:[%s12019_s10 + $0x38] sm:$0xf] }
  0xb4   : > { %v1661_v29 = vrot.slane %v1659_v62, 5  ;;  %10868 = vmatmul.mubr.msk.bf16.vlgmr.msra.gmra.mrb[0].mxu1 %vm602_vm1, %v9643_v20  ;;  %11107 = vmatprep.mubr.msk.bf16.mxu0 %vm602_vm1, %v10154_v5  ;;  %v5931_v53 = vrot.slane %v5930_v21, 4  ;;  %v1664_v7 = vrot.slane %v1662_v27, 6  ;;  %v1671_v23 = vshll.u32 %v12446_v26, 16  ;;  %v12673_v58 = vld [vmem:[%s14489_s1 + $0x10] sm:$0x3] }
  0xb5   : > { %v1677_v60 = vshrl.u32 %v1571_v37, 16  ;;  %v1656_v4 = vor.u32 %v1655_v36, %v1652_v45  ;;  %v1670_v11 = vrot.slane %v1668_v6, 5  ;;  %v1680_v61 = vshll.u32 %v1571_v37, 16  ;;  %v12681_v36 = vld [vmem:[%s12019_s10 + $0x3c] sm:$0x1] }
  0xb6   : > { %v1686_v16 = vshrl.u32 %v12458_v10, 16  ;;  %v5936_v2 = vsel %vm12053_vm6, %v5931_v53, %v5935_v22  ;;  %v1665_v47 = vor.u32 %v1664_v7, %v1661_v29  ;;  %v1673_v28 = vrot.slane %v1671_v23, 6  ;;  %v10149_v29 = vld [vmem:[%s12019_s10 + $0x40] sm:$0xf] }
  0xb7   : > { %v1679_v54 = vrot.slane %v1677_v60, 5  ;;  %v10155_v20 = vcombine.low %v5922_v63, %v5936_v2  ;;  %v1657_v30 = vrot.slane %v1656_v4, 4  ;;  %v1682_v34 = vrot.slane %v1680_v61, 6  ;;  %v10151_v61 = vld [vmem:[%s12019_s10 + $0x48] sm:$0xf] }
  0xb8   : > { %v1688_v26 = vrot.slane %v1686_v16, 5  ;;  %v1674_v12 = vor.u32 %v1673_v28, %v1670_v11  ;;  %v1689_v1 = vshll.u32 %v12458_v10, 16  ;;  %v1695_v39 = vshrl.u32 %v1572_v55, 16  ;;  %v12697_v28 = vld [vmem:[%s12019_s10 + $0x4c] sm:$0x1] }
  0xb9   : > { %v1698_v41 = vshll.u32 %v1572_v55, 16  ;;  %v1666_v13 = vsel %vm12341_vm10, %v1657_v30, %v1665_v47  ;;  %v1683_v32 = vor.u32 %v1682_v34, %v1679_v54  ;;  %v1704_v43 = vshrl.u32 %v12475_v46, 16  ;;  %v11774_v54 = vld [vmem:[%s12019_s10 + $0xb0] ss:$8 sps:$4 sm:$0xff]  }
  0xba   : > { %v1707_v8 = vshll.u32 %v12475_v46, 16  ;;  %v1675_v33 = vrot.slane %v1674_v12, 4  ;;  %v1691_v10 = vrot.slane %v1689_v1, 6  ;;  %v1697_v59 = vrot.slane %v1695_v39, 5  ;;  %v10162_v12 = vld [vmem:[%s12019_s10 + $0x68] sm:$0xf] }
  0xbb   : > { %v1700_v37 = vrot.slane %v1698_v41, 6  ;;  %11108 = vmatmul.mubr.msk.bf16.vlgmr.msra.gmra.mrb[0].mxu0 %vm602_vm1, %v10155_v20  ;;  %v1706_v51 = vrot.slane %v1704_v43, 5  ;;  %v1713_v46 = vshrl.u32 %v1573_v0, 16  ;;  %v1716_v52 = vshll.u32 %v1573_v0, 16 }
  0xbc   : > { %v1709_v22 = vrot.slane %v1707_v8, 6  ;;  %11116 = vmatpush3.bf16.msra.mxu0 %v12633_v57  ;;  %v1684_v49 = vsel %vm12341_vm10, %v1675_v33, %v1683_v32  ;;  %v1692_v56 = vor.u32 %v1691_v10, %v1688_v26  ;;  %v1867_v5 = vsel %vm615_vm0, %v12576_v18, 0  ;;  %v12688_v18 = vld [vmem:[%s12019_s10 + $0x44] sm:$0x1] }
  0xbd   : > { %v1701_v62 = vor.u32 %v1700_v37, %v1697_v59  ;;  %v9644_v21 = vcombine.low %v1666_v13, %v1684_v49  ;;  %v1715_v27 = vrot.slane %v1713_v46, 5  ;;  %v1718_v63 = vrot.slane %v1716_v52, 6  ;;  %10876 = vmatpush3.bf16.msra.mxu1 %v1867_v5  ;;  %11714 = vmatprep.subr.msk.bf16.mxu0 %vm615_vm0, %v12666_v50  ;;  %v12715_v5 = vld [vmem:[%s12019_s10 + $0x74] sm:$0x1] }
  0xbe   : > { %v1710_v45 = vor.u32 %v1709_v22, %v1706_v51  ;;  %v1693_v57 = vrot.slane %v1692_v56, 4  ;;  %v5938_v6 = vshrl.u32 %v10145_v14, 16  ;;  %v5941_v53 = vshll.u32 %v10145_v14, 16  ;;  %11689 = vmatprep.subr.msk.bf16.mxu1 %vm615_vm0, %v12673_v58  ;;  %v12706_v14 = vld [vmem:[%s12019_s10 + $0x6c] sm:$0x1] }
  0xbf   : > { %v5947_v7 = vshll.u32 %v12661_v25, 16  ;;  %10871 = vmatprep.mubr.msk.bf16.mxu1 %vm602_vm1, %v9644_v21  ;;  %v1719_v60 = vor.u32 %v1718_v63, %v1715_v27  ;;  %v5952_v4 = vshrl.u32 %v10147_v40, 16  ;;  %v5955_v11 = vshll.u32 %v10147_v40, 16 }
  0xc0   : > { %v1711_v23 = vrot.slane %v1710_v45, 4  ;;  %v1702_v55 = vsel %vm12341_vm10, %v1693_v57, %v1701_v62  ;;  %v5940_v16 = vrot.slane %v5938_v6, 4  ;;  %v5943_v2 = vrot.slane %v5941_v53, 5  ;;  %v10164_v62 = vld [vmem:[%s12019_s10 + $0x70] sm:$0xf] }
  0xc1   : > { %v5949_v47 = vrot.slane %v5947_v7, 5  ;;  %v5954_v30 = vrot.slane %v5952_v4, 4  ;;  %v5957_v34 = vrot.slane %v5955_v11, 5  ;;  %v5961_v26 = vshll.u32 %v12681_v36, 16  ;;  %v10166_v57 = vld [vmem:[%s12019_s10 + $0x78] sm:$0xf] }
  0xc2   : > { %v1720_v20 = vsel %vm12341_vm10, %v1711_v23, %v1719_v60  ;;  %v5944_v1 = vor.u32 %v5943_v2, %v5940_v16  ;;  %v5966_v39 = vshrl.u32 %v10149_v29, 16  ;;  %v5969_v41 = vshll.u32 %v10149_v29, 16  ;;  %v11775_v23 = vld [vmem:[%s12019_s10 + $0xc0] ss:$8 sps:$4 sm:$0xff]   ;;  %v12723_v4 = vld [vmem:[%s12019_s10 + $0x7c] sm:$0x1] }
  0xc3   : > { %v9645_v0 = vcombine.low %v1702_v55, %v1720_v20  ;;  %v5958_v13 = vor.u32 %v5957_v34, %v5954_v30  ;;  %v5963_v32 = vrot.slane %v5961_v26, 5  ;;  %v5975_v43 = vshll.u32 %v12688_v18, 16  ;;  %v11776_v2 = vld [vmem:[%s12019_s10 + $0xd0] ss:$8 sps:$4 sm:$0xff]   ;;  %v10168_v30 = vld [vmem:[%s12019_s10 + $0x80] sm:$0xf] }
  0xc4   : > { %v5980_v8 = vshrl.u32 %v10151_v61, 16  ;;  %v5945_v33 = vrot.slane %v5944_v1, 4  ;;  %v5968_v10 = vrot.slane %v5966_v39, 4  ;;  %v5971_v59 = vrot.slane %v5969_v41, 5  ;;  %v12732_v1 = vld [vmem:[%s12019_s10 + $0x84] sm:$0x1] }
  0xc5   : > { %10872 = vmatmul.mubr.msk.bf16.gmra.mrb[4].mxu1 %vm602_vm1, %v9645_v0  ;;  %v5983_v37 = vshll.u32 %v10151_v61, 16  ;;  %v5959_v40 = vrot.slane %v5958_v13, 4  ;;  %v5977_v51 = vrot.slane %v5975_v43, 5  ;;  %v5989_v46 = vshll.u32 %v12697_v28, 16 }
  0xc6   : > { %v5982_v22 = vrot.slane %v5980_v8, 4  ;;  %10877 = vmatprep.mubr.msk.bf16.mxu1 %vm602_vm1, %v11774_v54  ;;  %v5950_v52 = vsel %vm12053_vm6, %v5945_v33, %v5949_v47  ;;  %v5972_v49 = vor.u32 %v5971_v59, %v5968_v10  ;;  %v6112_v21 = vshrl.u32 %v10162_v12, 16 }
  0xc7   : > { %v5985_v56 = vrot.slane %v5983_v37, 5  ;;  %v5964_v45 = vsel %vm12053_vm6, %v5959_v40, %v5963_v32  ;;  %v5991_v27 = vrot.slane %v5989_v46, 5  ;;  %v6115_v63 = vshll.u32 %v10162_v12, 16  ;;  %v10170_v37 = vld [vmem:[%s12019_s10 + $0x88] sm:$0xf] }
  0xc8   : > { %v6121_v29 = vshll.u32 %v12706_v14, 16  ;;  %v10156_v6 = vcombine.low %v5950_v52, %v5964_v45  ;;  %v5973_v53 = vrot.slane %v5972_v49, 4  ;;  %v6114_v60 = vrot.slane %v6112_v21, 4  ;;  %v11777_v52 = vld [vmem:[%s12019_s10 + $0xe0] ss:$8 sps:$4 sm:$0xff]  }
  0xc9   : > { %v5986_v7 = vor.u32 %v5985_v56, %v5982_v22  ;;  %v6117_v11 = vrot.slane %v6115_v63, 5  ;;  %v6126_v55 = vshrl.u32 %v10164_v62, 16  ;;  %v6129_v16 = vshll.u32 %v10164_v62, 16  ;;  %v12743_v49 = vld [vmem:[%s12019_s10 + $0x8c] sm:$0x1] }
  0xca   : > { %v6123_v61 = vrot.slane %v6121_v29, 5  ;;  %11111 = vmatprep.mubr.msk.bf16.mxu0 %vm602_vm1, %v10156_v6  ;;  %v5978_v47 = vsel %vm12053_vm6, %v5973_v53, %v5977_v51  ;;  %v6135_v20 = vshll.u32 %v12715_v5, 16  ;;  %v6140_v34 = vshrl.u32 %v10166_v57, 16  ;;  %v12754_v63 = vld [vmem:[%s14489_s1 + $0x12] sm:$0x3] }
  0xcb   : > { %v5987_v54 = vrot.slane %v5986_v7, 4  ;;  %v6118_v26 = vor.u32 %v6117_v11, %v6114_v60  ;;  %v6128_v12 = vrot.slane %v6126_v55, 4  ;;  %v6131_v0 = vrot.slane %v6129_v16, 5  ;;  %v12759_v7 = vld [vmem:[%s12019_s10 + $0x94] sm:$0x1] }
  0xcc   : > { %v6143_v39 = vshll.u32 %v10166_v57, 16  ;;  %v6137_v13 = vrot.slane %v6135_v20, 5  ;;  %v6142_v32 = vrot.slane %v6140_v34, 4  ;;  %v6149_v43 = vshll.u32 %v12723_v4, 16  ;;  %v12767_v20 = vld [vmem:[%s12019_s10 + $0x9c] sm:$0x1] }
  0xcd   : > { %v5992_v41 = vsel %vm12053_vm6, %v5987_v54, %v5991_v27  ;;  %10878 = vmatmul.mubr.msk.bf16.vlgmr.msra.gmra.mrb[0].mxu1 %vm602_vm1, %v11775_v23  ;;  %v6119_v33 = vrot.slane %v6118_v26, 4  ;;  %v6132_v10 = vor.u32 %v6131_v0, %v6128_v12  ;;  %v6154_v51 = vshrl.u32 %v10168_v30, 16  ;;  %v10172_v27 = vld [vmem:[%s12019_s10 + $0x90] sm:$0xf]  ;;  %v10174_v54 = vld [vmem:[%s12019_s10 + $0x98] sm:$0xf] }
  0xce   : > { %v10157_v8 = vcombine.low %v5978_v47, %v5992_v41  ;;  %v6145_v59 = vrot.slane %v6143_v39, 5  ;;  %10881 = vmatprep.mubr.msk.bf16.mxu1 %vm602_vm1, %v11776_v2  ;;  %v6151_v40 = vrot.slane %v6149_v43, 5  ;;  %v6157_v22 = vshll.u32 %v10168_v30, 16  ;;  %v10176_v12 = vld [vmem:[%s12019_s10 + $0xa0] sm:$0xf] }
  0xcf   : > { %v6163_v46 = vshll.u32 %v12732_v1, 16  ;;  %v6124_v56 = vsel %vm12053_vm6, %v6119_v33, %v6123_v61  ;;  %v6133_v62 = vrot.slane %v6132_v10, 4  ;;  %v6408_v45 = vsel %vm615_vm0, %v12666_v50, 0  ;;  %v11778_v61 = vld [vmem:[%s12019_s10 + $0x108] ss:$8 sps:$4 sm:$0xff]  }
  0xd0   : > { %11112 = vmatmul.mubr.msk.bf16.gmra.mrb[4].mxu0 %vm602_vm1, %v10157_v8  ;;  %v6146_v21 = vor.u32 %v6145_v59, %v6142_v32  ;;  %v6156_v29 = vrot.slane %v6154_v51, 4  ;;  %v6159_v57 = vrot.slane %v6157_v22, 5  ;;  %v1986_v53 = vsel %vm615_vm0, %v12673_v58, 0  ;;  %v12778_v8 = vld [vmem:[%s12019_s10 + $0xa4] sm:$0x1] }
  0xd1   : > { %v6165_v6 = vrot.slane %v6163_v46, 5  ;;  %v6138_v23 = vsel %vm12053_vm6, %v6133_v62, %v6137_v13  ;;  %10886 = vmatpush3.bf16.msra.mxu1 %v1986_v53  ;;  %v6168_v60 = vshrl.u32 %v10170_v37, 16  ;;  %v6171_v11 = vshll.u32 %v10170_v37, 16  ;;  %v11779_v22 = vld [vmem:[%s12019_s10 + $0x118] ss:$8 sps:$4 sm:$0xff]  }
  0xd2   : > { %v6147_v50 = vrot.slane %v6146_v21, 4  ;;  %v10179_v55 = vcombine.low %v6124_v56, %v6138_v23  ;;  %v6160_v16 = vor.u32 %v6159_v57, %v6156_v29  ;;  %v6177_v2 = vshll.u32 %v12743_v49, 16  ;;  %11690 = vmatprep.subr.msk.bf16.mxu1 %vm615_vm0, %v12754_v63  ;;  %v12786_v46 = vld [vmem:[%s12019_s10 + $0x10] sm:$0xe]  ;;  %v10228_v29 = vld [vmem:[%s14489_s1 + $0x42] sm:$0x3] }
  0xd3   : > { %v6182_v47 = vshrl.u32 %v10172_v27, 16  ;;  %v6170_v30 = vrot.slane %v6168_v60, 4  ;;  %v6173_v34 = vrot.slane %v6171_v11, 5  ;;  %v6185_v26 = vshll.u32 %v10172_v27, 16  ;;  %v12789_v27 = vld [vmem:[%s12019_s10 + $0x18] sm:$0xe] }
  0xd4   : > { %v6152_v58 = vsel %vm12053_vm6, %v6147_v50, %v6151_v40  ;;  %11117 = vmatprep.mubr.msk.bf16.mxu0 %vm602_vm1, %v10179_v55  ;;  %v6161_v0 = vrot.slane %v6160_v16, 4  ;;  %v6179_v39 = vrot.slane %v6177_v2, 5  ;;  %v6191_v13 = vshll.u32 %v12759_v7, 16  ;;  %v12795_v50 = vld [vmem:[%s12019_s10 + $0x20] sm:$0xe] }
  0xd5   : > { %10882 = vmatmul.mubr.msk.bf16.gmra.mrb[4].mxu1 %vm602_vm1, %v11777_v52  ;;  %v6184_v41 = vrot.slane %v6182_v47, 4  ;;  %v6174_v32 = vor.u32 %v6173_v34, %v6170_v30  ;;  %v6187_v43 = vrot.slane %v6185_v26, 5  ;;  %v6196_v33 = vshrl.u32 %v10174_v54, 16  ;;  %v11780_v16 = vld [vmem:[%s12019_s10 + $0x128] ss:$8 sps:$4 sm:$0xff]  }
  0xd6   : > { %v6199_v10 = vshll.u32 %v10174_v54, 16  ;;  %10887 = vmatprep.mubr.msk.bf16.mxu1 %vm602_vm1, %v11778_v61  ;;  %v6166_v59 = vsel %vm12053_vm6, %v6161_v0, %v6165_v6  ;;  %v6193_v37 = vrot.slane %v6191_v13, 5  ;;  %v6205_v40 = vshll.u32 %v12767_v20, 16  ;;  %v12806_v30 = vld [vmem:[%s12019_s10 + $0x28] sm:$0xe] }
  0xd7   : > { %v6210_v51 = vshrl.u32 %v10176_v12, 16  ;;  %v10180_v52 = vcombine.low %v6152_v58, %v6166_v59  ;;  %v6175_v56 = vrot.slane %v6174_v32, 4  ;;  %v6188_v62 = vor.u32 %v6187_v43, %v6184_v41  ;;  %v12817_v13 = vld [vmem:[%s12019_s10 + $0x30] sm:$0xe] }
  0xd8   : > { %v6198_v21 = vrot.slane %v6196_v33, 4  ;;  %v6201_v57 = vrot.slane %v6199_v10, 5  ;;  %v6207_v6 = vrot.slane %v6205_v40, 5  ;;  %v6213_v23 = vshll.u32 %v10176_v12, 16  ;;  %v12826_v10 = vld [vmem:[%s12019_s10 + $0x38] sm:$0xe] }
  0xd9   : > { %v6212_v53 = vrot.slane %v6210_v51, 4  ;;  %11118 = vmatmul.mubr.msk.bf16.vlgmr.msra.gmra.mrb[0].mxu0 %vm602_vm1, %v10180_v52  ;;  %v6180_v60 = vsel %vm12053_vm6, %v6175_v56, %v6179_v39  ;;  %v6189_v11 = vrot.slane %v6188_v62, 4  ;;  %v6219_v61 = vshll.u32 %v12778_v8, 16  ;;  %v12835_v51 = vld [vmem:[%s12019_s10 + $0x40] sm:$0xe] }
  0xda   : > { %v10195_v55 = vrot.slane %v12786_v46, 9  ;;  %11126 = vmatpush3.bf16.msra.mxu0 %v6408_v45  ;;  %v6202_v2 = vor.u32 %v6201_v57, %v6198_v21  ;;  %v6215_v47 = vrot.slane %v6213_v23, 5  ;;  %v6351_v54 = vrot.slane %v12586_v31, 5  ;;  %v12854_v21 = vld [vmem:[%s12019_s10 + $0x48] sm:$0xe] }
  0xdb   : > { %v10196_v58 = vrot.slane %v12789_v27, 9  ;;  %v6194_v34 = vsel %vm12053_vm6, %v6189_v11, %v6193_v37  ;;  %v6221_v26 = vrot.slane %v6219_v61, 5  ;;  %v6355_v12 = vrot.slane %v12596_v3, 5  ;;  %11715 = vmatprep.subr.msk.bf16.mxu0 %vm615_vm0, %v10228_v29  ;;  %v12865_v11 = vld [vmem:[%s12019_s10 + $0xb4] sm:$0x1] }
  0xdc   : > { %v10197_v45 = vrot.slane %v12795_v50, 9  ;;  %v10181_v0 = vcombine.low %v6180_v60, %v6194_v34  ;;  %v6203_v39 = vrot.slane %v6202_v2, 4  ;;  %v6216_v41 = vor.u32 %v6215_v47, %v6212_v53  ;;  %v11781_v53 = vld [vmem:[%s12019_s10 + $0x138] ss:$8 sps:$4 sm:$0xff]   ;;  %v12885_v34 = vld [vmem:[%s12019_s10 + $0xbc] sm:$0x1] }
  0xdd   : > { %10888 = vmatmul.mubr.msk.bf16.vlgmr.msra.gmra.mrb[0].mxu1 %vm602_vm1, %v11779_v22  ;;  %v6352_v31 = vsel %vm12072_vm7, %v10195_v55, %v6351_v54  ;;  %v6356_v32 = vsel %vm12072_vm7, %v10196_v58, %v6355_v12  ;;  %v6359_v3 = vrot.slane %v12609_v9, 5  ;;  %v10198_v43 = vrot.slane %v12806_v30, 9  ;;  %v9686_v2 = vld [vmem:[%s12019_s10 + $0xb8] sm:$0xf] }
  0xde   : > { %v6363_v33 = vrot.slane %v12617_v44, 5  ;;  %10891 = vmatprep.mubr.msk.bf16.mxu1 %vm602_vm1, %v11780_v16  ;;  %11121 = vmatprep.mubr.msk.bf16.mxu0 %vm602_vm1, %v10181_v0  ;;  %v6208_v59 = vsel %vm12053_vm6, %v6203_v39, %v6207_v6  ;;  %v6217_v37 = vrot.slane %v6216_v41, 4  ;;  %v10204_v40 = vcombine.low %v6352_v31, %v6356_v32  ;;  %v12840_v44 = vld [vmem:[%s14489_s1 + $0x14] sm:$0x3]  ;;  %v12896_v31 = vld [vmem:[%s12019_s10 + $0xc4] sm:$0x1] }
  0xdf   : > { %v12832_v9 = vsel %vm615_vm0, %v10228_v29, 0  ;;  %v12844_v22 = vsel %vm12072_vm7, %v10197_v45, %v6359_v3  ;;  %v2216_v56 = vsel %vm615_vm0, %v12754_v63, 0  ;;  %v10199_v62 = vrot.slane %v12817_v13, 9  ;;  %v9684_v29 = vld [vmem:[%s12019_s10 + $0xb0] sm:$0xf] }
  0xe0   : > { %v12848_v52 = vsel %vm12072_vm7, %v10198_v43, %v6363_v33  ;;  %v6222_v57 = vsel %vm12053_vm6, %v6217_v37, %v6221_v26  ;;  %10896 = vmatpush3.bf16.msra.mxu1 %v2216_v56  ;;  %v6367_v23 = vrot.slane %v12661_v25, 5  ;;  %v10200_v60 = vrot.slane %v12826_v10, 9  ;;  %v9688_v45 = vld [vmem:[%s12019_s10 + $0xc0] sm:$0xf]  ;;  %v9690_v32 = vld [vmem:[%s12019_s10 + $0xc8] sm:$0xf] }
  0xe1   : > { %v10205_v6 = vcombine.low %v12844_v22, %v12848_v52  ;;  %v10182_v63 = vcombine.low %v6208_v59, %v6222_v57  ;;  %v6371_v61 = vrot.slane %v12681_v36, 5  ;;  %v10201_v55 = vrot.slane %v12835_v51, 9  ;;  %11691 = vmatprep.subr.msk.bf16.mxu1 %vm615_vm0, %v12840_v44  ;;  %v12903_v22 = vld [vmem:[%s12019_s10 + $0xcc] sm:$0x1] }
  0xe2   : > { %v6375_v16 = vrot.slane %v12688_v18, 5  ;;  %v6368_v25 = vsel %vm12072_vm7, %v10199_v62, %v6367_v23  ;;  %v10202_v47 = vrot.slane %v12854_v21, 9  ;;  %v6379_v54 = vrot.slane %v12697_v28, 5  ;;  %v10212_v23 = vld [vmem:[%s12019_s10 + $0x68] sm:$0xe] }
  0xe3   : > { %v2078_v58 = vshrl.u32 %v9684_v29, 16  ;;  %11122 = vmatmul.mubr.msk.bf16.gmra.mrb[4].mxu0 %vm602_vm1, %v10182_v63  ;;  %v6372_v36 = vsel %vm12072_vm7, %v10200_v60, %v6371_v61  ;;  %v2081_v26 = vshll.u32 %v9684_v29, 16  ;;  %v2087_v12 = vshll.u32 %v12865_v11, 16 }
  0xe4   : > { %v12882_v18 = vsel %vm12072_vm7, %v10201_v55, %v6375_v16  ;;  %11127 = vmatprep.mubr.msk.bf16.mxu0 %vm602_vm1, %v10204_v40  ;;  %v10206_v28 = vcombine.low %v6368_v25, %v6372_v36  ;;  %v12893_v0 = vsel %vm12072_vm7, %v10202_v47, %v6379_v54  ;;  %v2092_v41 = vshrl.u32 %v9686_v2, 16  ;;  %v10213_v16 = vld [vmem:[%s12019_s10 + $0x70] sm:$0xe] }
  0xe5   : > { %10892 = vmatmul.mubr.msk.bf16.gmra.mrb[4].mxu1 %vm602_vm1, %v11781_v53  ;;  %v2080_v39 = vrot.slane %v2078_v58, 4  ;;  %v10207_v3 = vcombine.low %v12882_v18, %v12893_v0  ;;  %v2083_v43 = vrot.slane %v2081_v26, 5  ;;  %v2089_v33 = vrot.slane %v2087_v12, 5  ;;  %v10245_v58 = vld [vmem:[%s14489_s1 + $0x44] sm:$0x3] }
  0xe6   : > { %v2095_v59 = vshll.u32 %v9686_v2, 16  ;;  %v2094_v37 = vrot.slane %v2092_v41, 4  ;;  %v2101_v40 = vshll.u32 %v12885_v34, 16  ;;  %v2106_v52 = vshrl.u32 %v9688_v45, 16  ;;  %v10217_v18 = vld [vmem:[%s12019_s10 + $0x90] sm:$0xe] }
  0xe7   : > { %v2109_v56 = vshll.u32 %v9688_v45, 16  ;;  %v2084_v62 = vor.u32 %v2083_v43, %v2080_v39  ;;  %v2115_v57 = vshll.u32 %v12896_v31, 16  ;;  %v2120_v53 = vshrl.u32 %v9690_v32, 16  ;;  %v10214_v39 = vld [vmem:[%s12019_s10 + $0x78] sm:$0xe] }
  0xe8   : > { %v2097_v29 = vrot.slane %v2095_v59, 5  ;;  %v2103_v60 = vrot.slane %v2101_v40, 5  ;;  %v2108_v63 = vrot.slane %v2106_v52, 4  ;;  %v2123_v55 = vshll.u32 %v9690_v32, 16 }
  0xe9   : > { %v2111_v61 = vrot.slane %v2109_v56, 5  ;;  %v2085_v2 = vrot.slane %v2084_v62, 4  ;;  %v2117_v47 = vrot.slane %v2115_v57, 5  ;;  %v2122_v54 = vrot.slane %v2120_v53, 4  ;;  %v9692_v62 = vld [vmem:[%s12019_s10 + $0xd0] sm:$0xf] }
  0xea   : > { %v2098_v25 = vor.u32 %v2097_v29, %v2094_v37  ;;  %v2125_v26 = vrot.slane %v2123_v55, 5  ;;  %v2129_v12 = vshll.u32 %v12903_v22, 16  ;;  %v10220_v45 = vrot.slane %v10212_v23, 9  ;;  %v12933_v23 = vld [vmem:[%s12019_s10 + $0xd4] sm:$0x1] }
  0xeb   : > { %v2112_v36 = vor.u32 %v2111_v61, %v2108_v63  ;;  %11128 = vmatmul.mubr.msk.bf16.vlgmr.msra.gmra.mrb[0].mxu0 %vm602_vm1, %v10205_v6  ;;  %v2090_v41 = vsel %vm12053_vm6, %v2085_v2, %v2089_v33  ;;  %v6509_v43 = vrot.slane %v12706_v14, 5  ;;  %v10221_v59 = vrot.slane %v10213_v16, 9  ;;  %v10215_v6 = vld [vmem:[%s12019_s10 + $0x80] sm:$0xe]  ;;  %v12942_v16 = vld [vmem:[%s12019_s10 + $0xdc] sm:$0x1] }
  0xec   : > { %v2099_v32 = vrot.slane %v2098_v25, 4  ;;  %11136 = vmatpush3.bf16.msra.mxu0 %v12832_v9  ;;  %11131 = vmatprep.mubr.msk.bf16.mxu0 %vm602_vm1, %v10206_v28  ;;  %v2126_v40 = vor.u32 %v2125_v26, %v2122_v54  ;;  %v2131_v52 = vrot.slane %v2129_v12, 5  ;;  %v6513_v56 = vrot.slane %v12715_v5, 5 }
  0xed   : > { %v2113_v37 = vrot.slane %v2112_v36, 4  ;;  %v6510_v14 = vsel %vm12072_vm7, %v10220_v45, %v6509_v43  ;;  %11716 = vmatprep.subr.msk.bf16.mxu0 %vm615_vm0, %v10245_v58  ;;  %v10222_v9 = vrot.slane %v10214_v39, 9  ;;  %v6517_v28 = vrot.slane %v12723_v4, 5  ;;  %v9696_v36 = vld [vmem:[%s12019_s10 + $0xe0] sm:$0xf] }
  0xee   : > { %v2104_v33 = vsel %vm12053_vm6, %v2099_v32, %v2103_v60  ;;  %v2127_v5 = vrot.slane %v2126_v40, 4  ;;  %v6514_v53 = vsel %vm12072_vm7, %v10221_v59, %v6513_v56  ;;  %v9694_v60 = vld [vmem:[%s12019_s10 + $0xd8] sm:$0xf]  ;;  %v10223_v4 = vrot.slane %v10215_v6, 9  ;;  %v12955_v39 = vld [vmem:[%s12019_s10 + $0xe4] sm:$0x1] }
  0xef   : > { %v9701_v29 = vcombine.low %v2090_v41, %v2104_v33  ;;  %v2118_v57 = vsel %vm12053_vm6, %v2113_v37, %v2117_v47  ;;  %v10229_v63 = vcombine.low %v6510_v14, %v6514_v53  ;;  %v12938_v61 = vsel %vm12072_vm7, %v10222_v9, %v6517_v28  ;;  %v9698_v41 = vld [vmem:[%s12019_s10 + $0xe8] sm:$0xf]  ;;  %v12960_v37 = vld [vmem:[%s12019_s10 + $0xec] sm:$0x1] }
  0xf0   : > { %v6521_v55 = vrot.slane %v12732_v1, 5  ;;  %v2132_v2 = vsel %vm12053_vm6, %v2127_v5, %v2131_v52  ;;  %v12948_v25 = vsel %vm615_vm0, %v10245_v58, 0  ;;  %v2134_v47 = vshrl.u32 %v9692_v62, 16  ;;  %v10216_v33 = vld [vmem:[%s12019_s10 + $0x88] sm:$0xe] }
  0xf1   : > { %10897 = vmatprep.mubr.msk.bf16.mxu1 %vm602_vm1, %v9701_v29  ;;  %v2137_v54 = vshll.u32 %v9692_v62, 16  ;;  %v9702_v26 = vcombine.low %v2118_v57, %v2132_v2  ;;  %v2143_v1 = vshll.u32 %v12933_v23, 16  ;;  %v2148_v45 = vshrl.u32 %v9694_v60, 16  ;;  %v10218_v5 = vld [vmem:[%s12019_s10 + $0x98] sm:$0xe] }
  0xf2   : > { %v6522_v12 = vsel %vm12072_vm7, %v10223_v4, %v6521_v55  ;;  %v2136_v43 = vrot.slane %v2134_v47, 4  ;;  %v2151_v59 = vshll.u32 %v9694_v60, 16  ;;  %v2157_v56 = vshll.u32 %v12942_v16, 16 }
  0xf3   : > { %v10230_v32 = vcombine.low %v12938_v61, %v6522_v12  ;;  %v2139_v58 = vrot.slane %v2137_v54, 5  ;;  %11132 = vmatmul.mubr.msk.bf16.gmra.mrb[4].mxu0 %vm602_vm1, %v10207_v3  ;;  %10898 = vmatmul.mubr.msk.bf16.vlgmr.msra.gmra.mrb[0].mxu1 %vm602_vm1, %v9702_v26  ;;  %v2145_v40 = vrot.slane %v2143_v1, 5  ;;  %v2150_v52 = vrot.slane %v2148_v45, 4 }
  0xf4   : > { %v2162_v6 = vshrl.u32 %v9696_v36, 16  ;;  %11137 = vmatprep.mubr.msk.bf16.mxu0 %vm602_vm1, %v10229_v63  ;;  %v2153_v9 = vrot.slane %v2151_v59, 5  ;;  %v2165_v28 = vshll.u32 %v9696_v36, 16  ;;  %v2171_v62 = vshll.u32 %v12955_v39, 16  ;;  %v12976_v63 = vld [vmem:[%s14489_s1 + $0x16] sm:$0x3] }
  0xf5   : > { %v2140_v14 = vor.u32 %v2139_v58, %v2136_v43  ;;  %v2159_v0 = vrot.slane %v2157_v56, 5  ;;  %v2176_v29 = vshrl.u32 %v9698_v41, 16  ;;  %v2179_v57 = vshll.u32 %v9698_v41, 16  ;;  %v10219_v36 = vld [vmem:[%s12019_s10 + $0xa0] sm:$0xe] }
  0xf6   : > { %v2164_v3 = vrot.slane %v2162_v6, 4  ;;  %v2154_v60 = vor.u32 %v2153_v9, %v2150_v52  ;;  %v2167_v61 = vrot.slane %v2165_v28, 5  ;;  %v2173_v4 = vrot.slane %v2171_v62, 5  ;;  %v9709_v41 = vld [vmem:[%s12019_s10 + $0x108] sm:$0xf] }
  0xf7   : > { %v2141_v53 = vrot.slane %v2140_v14, 4  ;;  %v2178_v55 = vrot.slane %v2176_v29, 4  ;;  %v2181_v2 = vrot.slane %v2179_v57, 5  ;;  %v2185_v47 = vshll.u32 %v12960_v37, 16  ;;  %v12987_v56 = vld [vmem:[%s12019_s10 + $0x10c] sm:$0x1] }
  0xf8   : > { %v2446_v54 = vsel %vm615_vm0, %v12840_v44, 0  ;;  %v2155_v12 = vrot.slane %v2154_v60, 4  ;;  %v2168_v1 = vor.u32 %v2167_v61, %v2164_v3  ;;  %v10224_v45 = vrot.slane %v10216_v33, 9  ;;  %v12997_v14 = vld [vmem:[%s14489_s1 + $0x46] sm:$0x3] }
  0xf9   : > { %v2146_v26 = vsel %vm12053_vm6, %v2141_v53, %v2145_v40  ;;  %10906 = vmatpush3.bf16.msra.mxu1 %v2446_v54  ;;  %v2182_v43 = vor.u32 %v2181_v2, %v2178_v55  ;;  %v2187_v58 = vrot.slane %v2185_v47, 5  ;;  %v6525_v59 = vrot.slane %v12743_v49, 5  ;;  %v9713_v57 = vld [vmem:[%s12019_s10 + $0x118] sm:$0xf]  ;;  %v9715_v2 = vld [vmem:[%s12019_s10 + $0x120] sm:$0xf] }
  0xfa   : > { %v10225_v52 = vrot.slane %v10217_v18, 9  ;;  %11692 = vmatprep.subr.msk.bf16.mxu1 %vm615_vm0, %v12976_v63  ;;  %v2160_v44 = vsel %vm12053_vm6, %v2155_v12, %v2159_v0  ;;  %v2169_v40 = vrot.slane %v2168_v1, 4  ;;  %v6529_v6 = vrot.slane %v12759_v7, 5  ;;  %v9711_v18 = vld [vmem:[%s12019_s10 + $0x110] sm:$0xf] }
  0xfb   : > { %v10226_v33 = vrot.slane %v10218_v5, 9  ;;  %11138 = vmatmul.mubr.msk.bf16.vlgmr.msra.gmra.mrb[0].mxu0 %vm602_vm1, %v10230_v32  ;;  %v9703_v49 = vcombine.low %v2146_v26, %v2160_v44  ;;  %v2183_v9 = vrot.slane %v2182_v43, 4  ;;  %v6526_v28 = vsel %vm12072_vm7, %v10224_v45, %v6525_v59  ;;  %v13005_v0 = vld [vmem:[%s12019_s10 + $0x114] sm:$0x1]  ;;  %v13015_v5 = vld [vmem:[%s12019_s10 + $0x11c] sm:$0x1] }
  0xfc   : > { %v6533_v62 = vrot.slane %v12767_v20, 5  ;;  %11146 = vmatpush3.bf16.msra.mxu0 %v12948_v25  ;;  %v2174_v7 = vsel %vm12053_vm6, %v2169_v40, %v2173_v4  ;;  %v6530_v3 = vsel %vm12072_vm7, %v10225_v52, %v6529_v6  ;;  %v10227_v32 = vrot.slane %v10219_v36, 9 }
  0xfd   : > { %v6537_v29 = vrot.slane %v12778_v8, 5  ;;  %10901 = vmatprep.mubr.msk.bf16.mxu1 %vm602_vm1, %v9703_v49  ;;  %v2188_v20 = vsel %vm12053_vm6, %v2183_v9, %v2187_v58  ;;  %v10231_v53 = vcombine.low %v6526_v28, %v6530_v3  ;;  %v2308_v60 = vshrl.u32 %v9709_v41, 16  ;;  %11717 = vmatprep.subr.msk.bf16.mxu0 %vm615_vm0, %v12997_v14 }
  0xfe   : > { %v6534_v25 = vsel %vm12072_vm7, %v10226_v33, %v6533_v62  ;;  %v9704_v61 = vcombine.low %v2174_v7, %v2188_v20  ;;  %v2311_v4 = vshll.u32 %v9709_v41, 16  ;;  %v2317_v55 = vshll.u32 %v12987_v56, 16  ;;  %v13032_v41 = vld [vmem:[%s12019_s10 + $0x124] sm:$0x1]  ;;  %v10237_v7 = vld [vmem:[%s12019_s10 + $0x14] sm:$0x3] }
  0xff   : > { %v6538_v8 = vsel %vm12072_vm7, %v10227_v32, %v6537_v29  ;;  %11141 = vmatprep.mubr.msk.bf16.mxu0 %vm602_vm1, %v10231_v53  ;;  %v2310_v54 = vrot.slane %v2308_v60, 4  ;;  %v2322_v36 = vshrl.u32 %v9711_v18, 16  ;;  %v2325_v26 = vshll.u32 %v9711_v18, 16 }
 0x100   : > { %v10232_v47 = vcombine.low %v6534_v25, %v6538_v8  ;;  %10902 = vmatmul.mubr.msk.bf16.gmra.mrb[4].mxu1 %vm602_vm1, %v9704_v61  ;;  %v2313_v12 = vrot.slane %v2311_v4, 5  ;;  %v2319_v1 = vrot.slane %v2317_v55, 5  ;;  %v2331_v45 = vshll.u32 %v13005_v0, 16 }
 0x101   : > { %v2336_v43 = vshrl.u32 %v9713_v57, 16  ;;  %v2324_v58 = vrot.slane %v2322_v36, 4  ;;  %v2327_v59 = vrot.slane %v2325_v26, 5  ;;  %v2339_v52 = vshll.u32 %v9713_v57, 16  ;;  %v10238_v36 = vld [vmem:[%s12019_s10 + $0x1c] sm:$0x3] }
 0x102   : > { %v2345_v44 = vshll.u32 %v13015_v5, 16  ;;  %v2314_v40 = vor.u32 %v2313_v12, %v2310_v54  ;;  %v2333_v6 = vrot.slane %v2331_v45, 5  ;;  %v2350_v49 = vshrl.u32 %v9715_v2, 16 }
 0x103   : > { %v2338_v33 = vrot.slane %v2336_v43, 4  ;;  %11142 = vmatmul.mubr.msk.bf16.gmra.mrb[4].mxu0 %vm602_vm1, %v10232_v47  ;;  %v2328_v9 = vor.u32 %v2327_v59, %v2324_v58  ;;  %v2341_v28 = vrot.slane %v2339_v52, 5  ;;  %v2353_v18 = vshll.u32 %v9715_v2, 16 }
 0x104   : > { %v2347_v62 = vrot.slane %v2345_v44, 5  ;;  %v2315_v3 = vrot.slane %v2314_v40, 4  ;;  %v2352_v32 = vrot.slane %v2350_v49, 4  ;;  %v2359_v29 = vshll.u32 %v13032_v41, 16  ;;  %v10239_v49 = vld [vmem:[%s12019_s10 + $0x24] sm:$0x3] }
 0x105   : > { %v6650_v57 = vshrl.u32 %v12786_v46, 16  ;;  %v2329_v20 = vrot.slane %v2328_v9, 4  ;;  %v2342_v53 = vor.u32 %v2341_v28, %v2338_v33  ;;  %v2355_v25 = vrot.slane %v2353_v18, 5 }
 0x106   : > { %v6653_v60 = vshll.u32 %v12786_v46, 16  ;;  %v2320_v61 = vsel %vm12053_vm6, %v2315_v3, %v2319_v1  ;;  %v2361_v8 = vrot.slane %v2359_v29, 5  ;;  %v6659_v55 = vshrl.u32 %v10237_v7, 16 }
 0x107   : > { %v6652_v4 = vrot.slane %v6650_v57, 5  ;;  %v2334_v2 = vsel %vm12053_vm6, %v2329_v20, %v2333_v6  ;;  %v2343_v47 = vrot.slane %v2342_v53, 4  ;;  %v2356_v54 = vor.u32 %v2355_v25, %v2352_v32  ;;  %v10240_v57 = vld [vmem:[%s12019_s10 + $0x2c] sm:$0x3] }
 0x108   : > { %v6655_v26 = vrot.slane %v6653_v60, 6  ;;  %v9726_v12 = vcombine.low %v2320_v61, %v2334_v2  ;;  %v6661_v45 = vrot.slane %v6659_v55, 5  ;;  %v6662_v43 = vshll.u32 %v10237_v7, 16  ;;  %v9717_v55 = vld [vmem:[%s12019_s10 + $0x128] sm:$0xf] }
 0x109   : > { %v6668_v58 = vshrl.u32 %v12789_v27, 16  ;;  %v2348_v46 = vsel %vm12053_vm6, %v2343_v47, %v2347_v62  ;;  %v2357_v1 = vrot.slane %v2356_v54, 4  ;;  %v6671_v52 = vshll.u32 %v12789_v27, 16 }
 0x10a   : > { %v6656_v59 = vor.u32 %v6655_v26, %v6652_v4  ;;  %10907 = vmatprep.mubr.msk.bf16.mxu1 %vm602_vm1, %v9726_v12  ;;  %v6664_v44 = vrot.slane %v6662_v43, 6  ;;  %v6677_v6 = vshrl.u32 %v10238_v36, 16  ;;  %v6680_v33 = vshll.u32 %v10238_v36, 16  ;;  %v13063_v26 = vld [vmem:[%s12019_s10 + $0x12c] sm:$0x1] }
 0x10b   : > { %v6670_v40 = vrot.slane %v6668_v58, 5  ;;  %v2362_v9 = vsel %vm12053_vm6, %v2357_v1, %v2361_v8  ;;  %v6673_v18 = vrot.slane %v6671_v52, 6  ;;  %v6686_v62 = vshrl.u32 %v12795_v50, 16  ;;  %v9719_v52 = vld [vmem:[%s12019_s10 + $0x130] sm:$0xf] }
 0x10c   : > { %v6657_v28 = vrot.slane %v6656_v59, 4  ;;  %v9727_v7 = vcombine.low %v2348_v46, %v2362_v9  ;;  %v6665_v3 = vor.u32 %v6664_v44, %v6661_v45  ;;  %v6679_v32 = vrot.slane %v6677_v6, 5  ;;  %v13071_v9 = vld [vmem:[%s12019_s10 + $0x134] sm:$0x1] }
 0x10d   : > { %v6682_v27 = vrot.slane %v6680_v33, 6  ;;  %v6674_v29 = vor.u32 %v6673_v18, %v6670_v40  ;;  %v6688_v20 = vrot.slane %v6686_v62, 5  ;;  %v6689_v53 = vshll.u32 %v12795_v50, 16 }
 0x10e   : > { %v6695_v25 = vshrl.u32 %v10239_v49, 16  ;;  %10908 = vmatmul.mubr.msk.bf16.vlgmr.msra.gmra.mrb[0].mxu1 %vm602_vm1, %v9727_v7  ;;  %v6666_v60 = vsel %vm12341_vm10, %v6657_v28, %v6665_v3  ;;  %v6698_v8 = vshll.u32 %v10239_v49, 16  ;;  %v6704_v4 = vshrl.u32 %v12806_v30, 16 }
 0x10f   : > { %v6683_v61 = vor.u32 %v6682_v27, %v6679_v32  ;;  %v6675_v2 = vrot.slane %v6674_v29, 4  ;;  %v6691_v47 = vrot.slane %v6689_v53, 6  ;;  %v6707_v36 = vshll.u32 %v12806_v30, 16  ;;  %v9721_v32 = vld [vmem:[%s12019_s10 + $0x138] sm:$0xf] }
 0x110   : > { %v6697_v54 = vrot.slane %v6695_v25, 5  ;;  %v6700_v50 = vrot.slane %v6698_v8, 6  ;;  %v6706_v12 = vrot.slane %v6704_v4, 5  ;;  %v6713_v45 = vshrl.u32 %v10240_v57, 16  ;;  %v13079_v53 = vld [vmem:[%s12019_s10 + $0x13c] sm:$0x1] }
 0x111   : > { %v6716_v43 = vshll.u32 %v10240_v57, 16  ;;  %v6684_v58 = vsel %vm12341_vm10, %v6675_v2, %v6683_v61  ;;  %v6692_v46 = vor.u32 %v6691_v47, %v6688_v20  ;;  %v6709_v1 = vrot.slane %v6707_v36, 6  ;;  %v9723_v4 = vld [vmem:[%s12019_s10 + $0x140] sm:$0xf]  ;;  %v13086_v47 = vld [vmem:[%s12019_s10 + $0x144] sm:$0x1] }
 0x112   : > { %v6939_v59 = vsel %vm615_vm0, %v12997_v14, 0  ;;  %v10246_v44 = vcombine.low %v6666_v60, %v6684_v58  ;;  %v6701_v40 = vor.u32 %v6700_v50, %v6697_v54  ;;  %v6715_v30 = vrot.slane %v6713_v45, 5  ;;  %v10241_v58 = vld [vmem:[%s12019_s10 + $0x34] sm:$0x3] }
 0x113   : > { %v6718_v6 = vrot.slane %v6716_v43, 6  ;;  %v6693_v33 = vrot.slane %v6692_v46, 4  ;;  %v6710_v49 = vor.u32 %v6709_v1, %v6706_v12  ;;  %v2364_v28 = vshrl.u32 %v9717_v55, 16 }
 0x114   : > { %v2367_v18 = vshll.u32 %v9717_v55, 16  ;;  %11147 = vmatprep.mubr.msk.bf16.mxu0 %vm602_vm1, %v10246_v44  ;;  %v2373_v7 = vshll.u32 %v13063_v26, 16  ;;  %v2378_v14 = vshrl.u32 %v9719_v52, 16  ;;  %v2381_v3 = vshll.u32 %v9719_v52, 16 }
 0x115   : > { %v6719_v62 = vor.u32 %v6718_v6, %v6715_v30  ;;  %v6702_v27 = vsel %vm12341_vm10, %v6693_v33, %v6701_v40  ;;  %v6711_v29 = vrot.slane %v6710_v49, 4  ;;  %v2366_v57 = vrot.slane %v2364_v28, 4  ;;  %v13093_v40 = vld [vmem:[%s14489_s1 + $0x48] sm:$0x3]  ;;  %v13100_v28 = vld [vmem:[%s14489_s1 + $0x18] sm:$0x3] }
 0x116   : > { %v2369_v20 = vrot.slane %v2367_v18, 5  ;;  %v2375_v25 = vrot.slane %v2373_v7, 5  ;;  %v2380_v60 = vrot.slane %v2378_v14, 4  ;;  %v2383_v61 = vrot.slane %v2381_v3, 5 }
 0x117   : > { %v2387_v8 = vshll.u32 %v13071_v9, 16  ;;  %v6720_v55 = vsel %vm12341_vm10, %v6711_v29, %v6719_v62  ;;  %v2392_v54 = vshrl.u32 %v9721_v32, 16  ;;  %v2395_v36 = vshll.u32 %v9721_v32, 16 }
 0x118   : > { %v2370_v2 = vor.u32 %v2369_v20, %v2366_v57  ;;  %v10247_v50 = vcombine.low %v6702_v27, %v6720_v55  ;;  %v2384_v12 = vor.u32 %v2383_v61, %v2380_v60  ;;  %v2401_v43 = vshll.u32 %v13079_v53, 16  ;;  %v10242_v20 = vld [vmem:[%s12019_s10 + $0x3c] sm:$0x3] }
 0x119   : > { %v2389_v45 = vrot.slane %v2387_v8, 5  ;;  %v2394_v1 = vrot.slane %v2392_v54, 4  ;;  %v2397_v52 = vrot.slane %v2395_v36, 5  ;;  %v2406_v44 = vshrl.u32 %v9723_v4, 16 }
 0x11a   : > { %v2371_v46 = vrot.slane %v2370_v2, 4  ;;  %11148 = vmatmul.mubr.msk.bf16.vlgmr.msra.gmra.mrb[0].mxu0 %vm602_vm1, %v10247_v50  ;;  %v2385_v30 = vrot.slane %v2384_v12, 4  ;;  %v2403_v6 = vrot.slane %v2401_v43, 5  ;;  %v2409_v33 = vshll.u32 %v9723_v4, 16 }
 0x11b   : > { %v2415_v49 = vshll.u32 %v13086_v47, 16  ;;  %11156 = vmatpush3.bf16.msra.mxu0 %v6939_v59  ;;  %v2398_v62 = vor.u32 %v2397_v52, %v2394_v1  ;;  %v2408_v7 = vrot.slane %v2406_v44, 4  ;;  %v2604_v14 = vsel %vm615_vm0, %v12976_v63, 0 }
 0x11c   : > { %v2376_v18 = vsel %vm12053_vm6, %v2371_v46, %v2375_v25  ;;  %v2390_v3 = vsel %vm12053_vm6, %v2385_v30, %v2389_v45  ;;  %v2411_v32 = vrot.slane %v2409_v33, 5  ;;  %10916 = vmatpush3.bf16.msra.mxu1 %v2604_v14  ;;  %v6722_v29 = vshrl.u32 %v12817_v13, 16  ;;  %11718 = vmatprep.subr.msk.bf16.mxu0 %vm615_vm0, %v13093_v40 }
 0x11d   : > { %v2417_v27 = vrot.slane %v2415_v49, 5  ;;  %v9728_v59 = vcombine.low %v2376_v18, %v2390_v3  ;;  %v2399_v57 = vrot.slane %v2398_v62, 4  ;;  %v6725_v25 = vshll.u32 %v12817_v13, 16  ;;  %11693 = vmatprep.subr.msk.bf16.mxu1 %vm615_vm0, %v13100_v28 }
 0x11e   : > { %v6731_v60 = vshrl.u32 %v10241_v58, 16  ;;  %v2412_v63 = vor.u32 %v2411_v32, %v2408_v7  ;;  %v6724_v61 = vrot.slane %v6722_v29, 5  ;;  %v6734_v8 = vshll.u32 %v10241_v58, 16  ;;  %v10243_v58 = vld [vmem:[%s12019_s10 + $0x44] sm:$0x3] }
 0x11f   : > { %v6740_v4 = vshrl.u32 %v12826_v10, 16  ;;  %10911 = vmatprep.mubr.msk.bf16.mxu1 %vm602_vm1, %v9728_v59  ;;  %v2404_v55 = vsel %vm12053_vm6, %v2399_v57, %v2403_v6  ;;  %v6727_v2 = vrot.slane %v6725_v25, 6  ;;  %v6743_v36 = vshll.u32 %v12826_v10, 16  ;;  %v10244_v7 = vld [vmem:[%s12019_s10 + $0x4c] sm:$0x3] }
 0x120   : > { %v6733_v54 = vrot.slane %v6731_v60, 5  ;;  %v2413_v13 = vrot.slane %v2412_v63, 4  ;;  %v6736_v50 = vrot.slane %v6734_v8, 6  ;;  %v6749_v45 = vshrl.u32 %v10242_v20, 16  ;;  %v13127_v59 = vld [vmem:[%s12019_s10 + $0xb0] sm:$0xe] }
 0x121   : > { %v6742_v12 = vrot.slane %v6740_v4, 5  ;;  %v6728_v43 = vor.u32 %v6727_v2, %v6724_v61  ;;  %v6745_v46 = vrot.slane %v6743_v36, 6  ;;  %v6752_v1 = vshll.u32 %v10242_v20, 16  ;;  %v13134_v25 = vld [vmem:[%s12019_s10 + $0xb8] sm:$0xe] }
 0x122   : > { %v6758_v52 = vshrl.u32 %v12835_v51, 16  ;;  %v2418_v44 = vsel %vm12053_vm6, %v2413_v13, %v2417_v27  ;;  %v6737_v30 = vor.u32 %v6736_v50, %v6733_v54  ;;  %v6751_v6 = vrot.slane %v6749_v45, 5  ;;  %v13140_v36 = vld [vmem:[%s12019_s10 + $0xc0] sm:$0xe] }
 0x123   : > { %v6761_v33 = vshll.u32 %v12835_v51, 16  ;;  %v9729_v10 = vcombine.low %v2404_v55, %v2418_v44  ;;  %v6729_v49 = vrot.slane %v6728_v43, 4  ;;  %v6746_v18 = vor.u32 %v6745_v46, %v6742_v12 }
 0x124   : > { %v6754_v62 = vrot.slane %v6752_v1, 6  ;;  %v6760_v14 = vrot.slane %v6758_v52, 5  ;;  %v6767_v32 = vshrl.u32 %v10243_v58, 16  ;;  %v6770_v29 = vshll.u32 %v10243_v58, 16  ;;  %v13145_v58 = vld [vmem:[%s12019_s10 + $0xc8] sm:$0xe] }
 0x125   : > { %v6763_v3 = vrot.slane %v6761_v33, 6  ;;  %10912 = vmatmul.mubr.msk.bf16.gmra.mrb[4].mxu1 %vm602_vm1, %v9729_v10  ;;  %v6738_v27 = vsel %vm12341_vm10, %v6729_v49, %v6737_v30  ;;  %v6747_v57 = vrot.slane %v6746_v18, 4  ;;  %v6776_v20 = vshrl.u32 %v12854_v21, 16  ;;  %v13153_v33 = vld [vmem:[%s12019_s10 + $0xd0] sm:$0xe] }
 0x126   : > { %v6755_v51 = vor.u32 %v6754_v62, %v6751_v6  ;;  %v6769_v63 = vrot.slane %v6767_v32, 5  ;;  %v6772_v61 = vrot.slane %v6770_v29, 6  ;;  %v6779_v8 = vshll.u32 %v12854_v21, 16  ;;  %v13160_v62 = vld [vmem:[%s12019_s10 + $0xd8] sm:$0xe] }
 0x127   : > { %v6764_v60 = vor.u32 %v6763_v3, %v6760_v14  ;;  %v6778_v55 = vrot.slane %v6776_v20, 5  ;;  %v6785_v2 = vshrl.u32 %v10244_v7, 16  ;;  %v6788_v54 = vshll.u32 %v10244_v7, 16  ;;  %v11782_v32 = vld [vmem:[%s12019_s10 + $0xc0] ss:$8 sps:$4 sm:$0xff]  }
 0x128   : > { %v6756_v4 = vsel %vm12341_vm10, %v6747_v57, %v6755_v51  ;;  %v6773_v12 = vor.u32 %v6772_v61, %v6769_v63  ;;  %v6781_v45 = vrot.slane %v6779_v8, 6  ;;  %v9742_v1 = vrot.slane %v13127_v59, 9  ;;  %v13168_v29 = vld [vmem:[%s12019_s10 + $0xe0] sm:$0xe]  ;;  %v13178_v20 = vld [vmem:[%s12019_s10 + $0xe8] sm:$0xe] }
 0x129   : > { %v10248_v13 = vcombine.low %v6738_v27, %v6756_v4  ;;  %v6765_v50 = vrot.slane %v6764_v60, 4  ;;  %v6787_v43 = vrot.slane %v6785_v2, 5  ;;  %v6790_v46 = vrot.slane %v6788_v54, 6  ;;  %v9759_v60 = vld [vmem:[%s12019_s10 + $0x108] sm:$0xe] }
 0x12a   : > { %v2547_v21 = vrot.slane %v12865_v11, 5  ;;  %v6782_v44 = vor.u32 %v6781_v45, %v6778_v55  ;;  %v9743_v30 = vrot.slane %v13134_v25, 9  ;;  %v2551_v6 = vrot.slane %v12885_v34, 5  ;;  %v9760_v4 = vld [vmem:[%s12019_s10 + $0x110] sm:$0xe] }
 0x12b   : > { %11151 = vmatprep.mubr.msk.bf16.mxu0 %vm602_vm1, %v10248_v13  ;;  %v6774_v52 = vsel %vm12341_vm10, %v6765_v50, %v6773_v12  ;;  %v6791_v10 = vor.u32 %v6790_v46, %v6787_v43  ;;  %v9744_v49 = vrot.slane %v13140_v36, 9  ;;  %v2555_v18 = vrot.slane %v12896_v31, 5  ;;  %v9761_v55 = vld [vmem:[%s12019_s10 + $0x118] sm:$0xe]  ;;  %v9762_v50 = vld [vmem:[%s12019_s10 + $0x120] sm:$0xe] }
 0x12c   : > { %v2548_v11 = vsel %vm12072_vm7, %v9742_v1, %v2547_v21  ;;  %v6783_v7 = vrot.slane %v6782_v44, 4  ;;  %v2552_v14 = vsel %vm12072_vm7, %v9743_v30, %v2551_v6  ;;  %v9745_v34 = vrot.slane %v13145_v58, 9  ;;  %v13196_v12 = vld [vmem:[%s14489_s1 + $0x4a] sm:$0x3]  ;;  %v9792_v1 = vld [vmem:[%s14489_s1 + $0x1a] sm:$0x3] }
 0x12d   : > { %v2559_v3 = vrot.slane %v12903_v22, 5  ;;  %v9751_v27 = vcombine.low %v2548_v11, %v2552_v14  ;;  %v2556_v57 = vsel %vm12072_vm7, %v9744_v49, %v2555_v18  ;;  %v13174_v31 = vsel %vm615_vm0, %v13093_v40, 0  ;;  %v9764_v11 = vld [vmem:[%s12019_s10 + $0x130] sm:$0xe] }
 0x12e   : > { %v9746_v51 = vrot.slane %v13153_v33, 9  ;;  %v6792_v22 = vsel %vm12341_vm10, %v6783_v7, %v6791_v10  ;;  %v2563_v61 = vrot.slane %v12933_v23, 5  ;;  %v9747_v8 = vrot.slane %v13160_v62, 9  ;;  %v11783_v49 = vld [vmem:[%s12019_s10 + $0xd0] ss:$8 sps:$4 sm:$0xff]  }
 0x12f   : > { %v2560_v63 = vsel %vm12072_vm7, %v9745_v34, %v2559_v3  ;;  %v10249_v40 = vcombine.low %v6774_v52, %v6792_v22  ;;  %10917 = vmatprep.mubr.msk.bf16.mxu1 %vm602_vm1, %v9751_v27  ;;  %v2567_v54 = vrot.slane %v12942_v16, 5  ;;  %v9748_v13 = vrot.slane %v13168_v29, 9  ;;  %v9763_v16 = vld [vmem:[%s12019_s10 + $0x128] sm:$0xe]  ;;  %v9765_v27 = vld [vmem:[%s12019_s10 + $0x138] sm:$0xe] }
 0x130   : > { %v9752_v2 = vcombine.low %v2556_v57, %v2560_v63  ;;  %v2564_v23 = vsel %vm12072_vm7, %v9746_v51, %v2563_v61  ;;  %v2571_v45 = vrot.slane %v12955_v39, 5  ;;  %v9749_v43 = vrot.slane %v13178_v20, 9  ;;  %v9766_v22 = vld [vmem:[%s12019_s10 + $0x140] sm:$0xe] }
 0x131   : > { %v2575_v46 = vrot.slane %v12960_v37, 5  ;;  %11152 = vmatmul.mubr.msk.bf16.gmra.mrb[4].mxu0 %vm602_vm1, %v10249_v40  ;;  %v2568_v21 = vsel %vm12072_vm7, %v9747_v8, %v2567_v54  ;;  %v2762_v39 = vsel %vm615_vm0, %v13100_v28, 0  ;;  %v9767_v52 = vrot.slane %v9759_v60, 9  ;;  %v11784_v63 = vld [vmem:[%s12019_s10 + $0xe0] ss:$8 sps:$4 sm:$0xff]  }
 0x132   : > { %10918 = vmatmul.mubr.msk.bf16.vlgmr.msra.gmra.mrb[0].mxu1 %vm602_vm1, %v9752_v2  ;;  %v2705_v44 = vrot.slane %v12987_v56, 5  ;;  %11157 = vmatprep.mubr.msk.bf16.mxu0 %vm602_vm1, %v11782_v32  ;;  %v9753_v37 = vcombine.low %v2564_v23, %v2568_v21  ;;  %v2572_v30 = vsel %vm12072_vm7, %v9748_v13, %v2571_v45  ;;  %v9768_v10 = vrot.slane %v9760_v4, 9  ;;  %v9784_v2 = vld [vmem:[%s12019_s10 + $0xb4] sm:$0x3]  ;;  %v9785_v45 = vld [vmem:[%s12019_s10 + $0xbc] sm:$0x3] }
 0x133   : > { %v2576_v6 = vsel %vm12072_vm7, %v9749_v43, %v2575_v46  ;;  %10926 = vmatpush3.bf16.msra.mxu1 %v2762_v39  ;;  %v2709_v28 = vrot.slane %v13005_v0, 5  ;;  %v9769_v7 = vrot.slane %v9761_v55, 9  ;;  %v2713_v14 = vrot.slane %v13015_v5, 5  ;;  %v9786_v39 = vld [vmem:[%s12019_s10 + $0xc4] sm:$0x3] }
 0x134   : > { %v9754_v18 = vcombine.low %v2572_v30, %v2576_v6  ;;  %v2706_v56 = vsel %vm12072_vm7, %v9767_v52, %v2705_v44  ;;  %11694 = vmatprep.subr.msk.bf16.mxu1 %vm615_vm0, %v9792_v1  ;;  %10921 = vmatprep.mubr.msk.bf16.mxu1 %vm602_vm1, %v9753_v37  ;;  %v9770_v34 = vrot.slane %v9762_v50, 9  ;;  %v2717_v3 = vrot.slane %v13032_v41, 5 }
 0x135   : > { %v13230_v32 = vsel %vm615_vm0, %v13196_v12, 0  ;;  %v2710_v57 = vsel %vm12072_vm7, %v9768_v10, %v2709_v28  ;;  %v9771_v0 = vrot.slane %v9763_v16, 9  ;;  %v2721_v51 = vrot.slane %v13063_v26, 5 }
 0x136   : > { %v9772_v60 = vrot.slane %v9764_v11, 9  ;;  %v9776_v5 = vcombine.low %v2706_v56, %v2710_v57  ;;  %v2714_v41 = vsel %vm12072_vm7, %v9769_v7, %v2713_v14  ;;  %v2718_v61 = vsel %vm12072_vm7, %v9770_v34, %v2717_v3  ;;  %v11785_v11 = vld [vmem:[%s12019_s10 + $0xf0] ss:$8 sps:$4 sm:$0xff]  }
 0x137   : > { %v2725_v8 = vrot.slane %v13071_v9, 5  ;;  %v9777_v4 = vcombine.low %v2714_v41, %v2718_v61  ;;  %v13245_v55 = vsel %vm12072_vm7, %v9771_v0, %v2721_v51  ;;  %v9773_v40 = vrot.slane %v9765_v27, 9  ;;  %v9787_v0 = vld [vmem:[%s12019_s10 + $0xcc] sm:$0x3]  ;;  %v10288_v41 = vld [vmem:[%s12019_s10 + $0xc0] sm:$0xf] }
 0x138   : > { %v2729_v26 = vrot.slane %v13079_v53, 5  ;;  %v9774_v13 = vrot.slane %v9766_v22, 9  ;;  %v2733_v50 = vrot.slane %v13086_v47, 5  ;;  %v3016_v23 = vsel %vm615_vm0, %v9792_v1, 0 }
 0x139   : > { %v2726_v54 = vsel %vm12072_vm7, %v9772_v60, %v2725_v8  ;;  %11158 = vmatmul.mubr.msk.bf16.vlgmr.msra.gmra.mrb[0].mxu0 %vm602_vm1, %v11783_v49  ;;  %v2846_v43 = vshrl.u32 %v13127_v59, 16  ;;  %v2849_v46 = vshll.u32 %v13127_v59, 16  ;;  %v2855_v16 = vshrl.u32 %v9784_v2, 16 }
 0x13a   : > { %10922 = vmatmul.mubr.msk.bf16.gmra.mrb[4].mxu1 %vm602_vm1, %v9754_v18  ;;  %v9778_v9 = vcombine.low %v13245_v55, %v2726_v54  ;;  %v13259_v53 = vsel %vm12072_vm7, %v9773_v40, %v2729_v26  ;;  %11166 = vmatpush3.bf16.msra.mxu0 %v13174_v31  ;;  %v13267_v47 = vsel %vm12072_vm7, %v9774_v13, %v2733_v50  ;;  %v2858_v1 = vshll.u32 %v9784_v2, 16  ;;  %v13290_v40 = vld [vmem:[%s12019_s10 + $0xc4] sm:$0x1]  ;;  %v10290_v26 = vld [vmem:[%s12019_s10 + $0xc8] sm:$0xf] }
 0x13b   : > { %11161 = vmatprep.mubr.msk.bf16.mxu0 %vm602_vm1, %v11784_v63  ;;  %v2864_v21 = vshrl.u32 %v13134_v25, 16  ;;  %10927 = vmatprep.mubr.msk.bf16.mxu1 %vm602_vm1, %v9776_v5  ;;  %v9779_v59 = vcombine.low %v13259_v53, %v13267_v47  ;;  %v2848_v31 = vrot.slane %v2846_v43, 5  ;;  %v2851_v52 = vrot.slane %v2849_v46, 6  ;;  %v13296_v2 = vld [vmem:[%s14489_s1 + $0x1c] sm:$0x3] }
 0x13c   : > { %11719 = vmatprep.subr.msk.bf16.mxu0 %vm615_vm0, %v13196_v12  ;;  %v2867_v44 = vshll.u32 %v13134_v25, 16  ;;  %v2857_v37 = vrot.slane %v2855_v16, 5  ;;  %v2860_v30 = vrot.slane %v2858_v1, 6  ;;  %v2873_v10 = vshrl.u32 %v9785_v45, 16  ;;  %v11786_v12 = vld [vmem:[%s12019_s10 + $0x118] ss:$8 sps:$4 sm:$0xff]  }
 0x13d   : > { %v2866_v6 = vrot.slane %v2864_v21, 5  ;;  %v2852_v49 = vor.u32 %v2851_v52, %v2848_v31  ;;  %v2876_v56 = vshll.u32 %v9785_v45, 16  ;;  %v2882_v28 = vshrl.u32 %v13140_v36, 16  ;;  %v13301_v45 = vld [vmem:[%s12019_s10 + $0xcc] sm:$0x1] }
 0x13e   : > { %v2869_v18 = vrot.slane %v2867_v44, 6  ;;  %v2861_v7 = vor.u32 %v2860_v30, %v2857_v37  ;;  %v2875_v14 = vrot.slane %v2873_v10, 5  ;;  %v2885_v34 = vshll.u32 %v13140_v36, 16  ;;  %v11788_v21 = vld [vmem:[%s12019_s10 + $0x138] ss:$8 sps:$4 sm:$0xff]  }
 0x13f   : > { %v2891_v3 = vshrl.u32 %v9786_v39, 16  ;;  %v2853_v27 = vrot.slane %v2852_v49, 4  ;;  %v2878_v57 = vrot.slane %v2876_v56, 6  ;;  %v2884_v51 = vrot.slane %v2882_v28, 5  ;;  %v10292_v44 = vld [vmem:[%s12019_s10 + $0xd0] sm:$0xf] }
 0x140   : > { %v2870_v25 = vor.u32 %v2869_v18, %v2866_v6  ;;  %v2887_v60 = vrot.slane %v2885_v34, 6  ;;  %v2894_v63 = vshll.u32 %v9786_v39, 16  ;;  %v2900_v5 = vshrl.u32 %v13145_v58, 16  ;;  %v10329_v56 = vld [vmem:[%s14489_s1 + $0x4c] sm:$0x3] }
 0x141   : > { %v2893_v22 = vrot.slane %v2891_v3, 5  ;;  %11162 = vmatmul.mubr.msk.bf16.gmra.mrb[4].mxu0 %vm602_vm1, %v11785_v11  ;;  %v2862_v36 = vsel %vm12341_vm10, %v2853_v27, %v2861_v7  ;;  %v2879_v8 = vor.u32 %v2878_v57, %v2875_v14  ;;  %v2903_v55 = vshll.u32 %v13145_v58, 16  ;;  %v11787_v58 = vld [vmem:[%s12019_s10 + $0x128] ss:$8 sps:$4 sm:$0xff]   ;;  %v13318_v34 = vld [vmem:[%s12019_s10 + $0xd4] sm:$0x1] }
 0x142   : > { %10928 = vmatmul.mubr.msk.bf16.vlgmr.msra.gmra.mrb[0].mxu1 %vm602_vm1, %v9777_v4  ;;  %v2871_v61 = vrot.slane %v2870_v25, 4  ;;  %11167 = vmatprep.mubr.msk.bf16.mxu0 %vm602_vm1, %v11786_v12  ;;  %v2888_v4 = vor.u32 %v2887_v60, %v2884_v51  ;;  %v2896_v54 = vrot.slane %v2894_v63, 6  ;;  %v2902_v13 = vrot.slane %v2900_v5, 5  ;;  %v10294_v57 = vld [vmem:[%s12019_s10 + $0xd8] sm:$0xf] }
 0x143   : > { %10931 = vmatprep.mubr.msk.bf16.mxu1 %vm602_vm1, %v9778_v9  ;;  %v2909_v50 = vshrl.u32 %v9787_v0, 16  ;;  %10936 = vmatpush3.bf16.msra.mxu1 %v3016_v23  ;;  %v2905_v46 = vrot.slane %v2903_v55, 6  ;;  %v2912_v16 = vshll.u32 %v9787_v0, 16  ;;  %v7150_v1 = vshrl.u32 %v10288_v41, 16  ;;  %v13329_v63 = vld [vmem:[%s12019_s10 + $0xdc] sm:$0x1] }
 0x144   : > { %v2880_v43 = vsel %vm12341_vm10, %v2871_v61, %v2879_v8  ;;  %v2889_v31 = vrot.slane %v2888_v4, 4  ;;  %v2897_v52 = vor.u32 %v2896_v54, %v2893_v22  ;;  %11695 = vmatprep.subr.msk.bf16.mxu1 %vm615_vm0, %v13296_v2  ;;  %v7153_v6 = vshll.u32 %v10288_v41, 16 }
 0x145   : > { %v9793_v39 = vcombine.low %v2862_v36, %v2880_v43  ;;  %v2911_v9 = vrot.slane %v2909_v50, 5  ;;  %v2906_v37 = vor.u32 %v2905_v46, %v2902_v13  ;;  %v2914_v30 = vrot.slane %v2912_v16, 6  ;;  %v9788_v13 = vld [vmem:[%s12019_s10 + $0xd4] sm:$0x3]  ;;  %v11789_v50 = vld [vmem:[%s12019_s10 + $0x148] ss:$8 sps:$4 sm:$0xff]  }
 0x146   : > { %v7152_v23 = vrot.slane %v7150_v1, 4  ;;  %v2898_v10 = vsel %vm12341_vm10, %v2889_v31, %v2897_v52  ;;  %v7159_v11 = vshll.u32 %v13290_v40, 16  ;;  %v7164_v49 = vshrl.u32 %v10290_v26, 16 }
 0x147   : > { %v7167_v18 = vshll.u32 %v10290_v26, 16  ;;  %v2907_v28 = vrot.slane %v2906_v37, 4  ;;  %v2915_v12 = vor.u32 %v2914_v30, %v2911_v9  ;;  %v7155_v7 = vrot.slane %v7153_v6, 5  ;;  %v9789_v37 = vld [vmem:[%s12019_s10 + $0xdc] sm:$0x3] }
 0x148   : > { %v7173_v14 = vshll.u32 %v13301_v45, 16  ;;  %v7161_v3 = vrot.slane %v7159_v11, 5  ;;  %v7166_v27 = vrot.slane %v7164_v49, 4  ;;  %v7178_v0 = vshrl.u32 %v10292_v44, 16 }
 0x149   : > { %v7169_v25 = vrot.slane %v7167_v18, 5  ;;  %11168 = vmatmul.mubr.msk.bf16.vlgmr.msra.gmra.mrb[0].mxu0 %vm602_vm1, %v11787_v58  ;;  %v2916_v51 = vsel %vm12341_vm10, %v2907_v28, %v2915_v12  ;;  %v7156_v60 = vor.u32 %v7155_v7, %v7152_v23  ;;  %v7181_v5 = vshll.u32 %v10292_v44, 16 }
 0x14a   : > { %10932 = vmatmul.mubr.msk.bf16.gmra.mrb[4].mxu1 %vm602_vm1, %v9779_v59  ;;  %v7175_v22 = vrot.slane %v7173_v14, 5  ;;  %11176 = vmatpush3.bf16.msra.mxu0 %v13230_v32  ;;  %v9794_v41 = vcombine.low %v2898_v10, %v2916_v51  ;;  %v7180_v61 = vrot.slane %v7178_v0, 4  ;;  %v7187_v53 = vshll.u32 %v13318_v34, 16 }
 0x14b   : > { %11171 = vmatprep.mubr.msk.bf16.mxu0 %vm602_vm1, %v11788_v21  ;;  %v7170_v36 = vor.u32 %v7169_v25, %v7166_v27  ;;  %10937 = vmatprep.mubr.msk.bf16.mxu1 %vm602_vm1, %v9793_v39  ;;  %v7157_v47 = vrot.slane %v7156_v60, 4  ;;  %v7183_v59 = vrot.slane %v7181_v5, 5  ;;  %v7192_v8 = vshrl.u32 %v10294_v57, 16 }
 0x14c   : > { %11720 = vmatprep.subr.msk.bf16.mxu0 %vm615_vm0, %v10329_v56  ;;  %v7195_v55 = vshll.u32 %v10294_v57, 16  ;;  %v7189_v4 = vrot.slane %v7187_v53, 5  ;;  %v7201_v32 = vshll.u32 %v13329_v63, 16  ;;  %v13338_v54 = vsel %vm615_vm0, %v10329_v56, 0  ;;  %v9790_v57 = vld [vmem:[%s12019_s10 + $0xe4] sm:$0x3] }
 0x14d   : > { %v7171_v26 = vrot.slane %v7170_v36, 4  ;;  %v7162_v58 = vsel %vm12053_vm6, %v7157_v47, %v7161_v3  ;;  %v7184_v43 = vor.u32 %v7183_v59, %v7180_v61  ;;  %v7194_v46 = vrot.slane %v7192_v8, 4  ;;  %v9791_v36 = vld [vmem:[%s12019_s10 + $0xec] sm:$0x3] }
 0x14e   : > { %v7197_v16 = vrot.slane %v7195_v55, 5  ;;  %v7203_v21 = vrot.slane %v7201_v32, 5  ;;  %v2918_v39 = vshrl.u32 %v13153_v33, 16  ;;  %v2921_v31 = vshll.u32 %v13153_v33, 16 }
 0x14f   : > { %v7176_v1 = vsel %vm12053_vm6, %v7171_v26, %v7175_v22  ;;  %v7185_v9 = vrot.slane %v7184_v43, 4  ;;  %v2927_v30 = vshrl.u32 %v9788_v13, 16  ;;  %v2930_v10 = vshll.u32 %v9788_v13, 16  ;;  %v10296_v26 = vld [vmem:[%s12019_s10 + $0xe0] sm:$0xf] }
 0x150   : > { %v10305_v52 = vcombine.low %v7162_v58, %v7176_v1  ;;  %v7198_v44 = vor.u32 %v7197_v16, %v7194_v46  ;;  %v2920_v23 = vrot.slane %v2918_v39, 5  ;;  %v2923_v6 = vrot.slane %v2921_v31, 6  ;;  %v13368_v58 = vld [vmem:[%s12019_s10 + $0xe4] sm:$0x1]  ;;  %v13373_v1 = vld [vmem:[%s14489_s1 + $0x4e] sm:$0x3] }
 0x151   : > { %v2936_v11 = vshrl.u32 %v13160_v62, 16  ;;  %11172 = vmatmul.mubr.msk.bf16.gmra.mrb[4].mxu0 %vm602_vm1, %v11789_v50  ;;  %v7190_v49 = vsel %vm12053_vm6, %v7185_v9, %v7189_v4  ;;  %v2929_v33 = vrot.slane %v2927_v30, 5  ;;  %v2939_v56 = vshll.u32 %v13160_v62, 16  ;;  %v13382_v9 = vld [vmem:[%s14489_s1 + $0x1e] sm:$0x3] }
 0x152   : > { %10938 = vmatmul.mubr.msk.bf16.vlgmr.msra.gmra.mrb[0].mxu1 %vm602_vm1, %v9794_v41  ;;  %v7199_v18 = vrot.slane %v7198_v44, 4  ;;  %11177 = vmatprep.mubr.msk.bf16.mxu0 %vm602_vm1, %v10305_v52  ;;  %v2924_v28 = vor.u32 %v2923_v6, %v2920_v23  ;;  %v2932_v12 = vrot.slane %v2930_v10, 6  ;;  %v2945_v14 = vshrl.u32 %v9789_v37, 16  ;;  %v10298_v52 = vld [vmem:[%s12019_s10 + $0xe8] sm:$0xf] }
 0x153   : > { %v2938_v7 = vrot.slane %v2936_v11, 5  ;;  %v2941_v27 = vrot.slane %v2939_v56, 6  ;;  %v2948_v25 = vshll.u32 %v9789_v37, 16  ;;  %v2954_v0 = vshrl.u32 %v13168_v29, 16 }
 0x154   : > { %v7204_v3 = vsel %vm12053_vm6, %v7199_v18, %v7203_v21  ;;  %v2925_v60 = vrot.slane %v2924_v28, 4  ;;  %v2933_v22 = vor.u32 %v2932_v12, %v2929_v33  ;;  %v2947_v62 = vrot.slane %v2945_v14, 5 }
 0x155   : > { %v10306_v51 = vcombine.low %v7190_v49, %v7204_v3  ;;  %v2942_v5 = vor.u32 %v2941_v27, %v2938_v7  ;;  %v2950_v41 = vrot.slane %v2948_v25, 6  ;;  %v2956_v61 = vrot.slane %v2954_v0, 5  ;;  %v13388_v49 = vld [vmem:[%s12019_s10 + $0xec] sm:$0x1]  ;;  %v13400_v27 = vld [vmem:[%s12019_s10 + $0xf4] sm:$0x1] }
 0x156   : > { %v2957_v53 = vshll.u32 %v13168_v29, 16  ;;  %v2934_v47 = vsel %vm12341_vm10, %v2925_v60, %v2933_v22  ;;  %v2963_v59 = vshrl.u32 %v9790_v57, 16  ;;  %v2966_v8 = vshll.u32 %v9790_v57, 16  ;;  %v10302_v60 = vld [vmem:[%s12019_s10 + $0xf8] sm:$0xf] }
 0x157   : > { %v2972_v55 = vshrl.u32 %v13178_v20, 16  ;;  %v2943_v4 = vrot.slane %v2942_v5, 4  ;;  %v2951_v32 = vor.u32 %v2950_v41, %v2947_v62  ;;  %v2975_v50 = vshll.u32 %v13178_v20, 16 }
 0x158   : > { %v2959_v13 = vrot.slane %v2957_v53, 6  ;;  %v2965_v43 = vrot.slane %v2963_v59, 5  ;;  %v2968_v46 = vrot.slane %v2966_v8, 6  ;;  %v2981_v29 = vshrl.u32 %v9791_v36, 16  ;;  %v13408_v59 = vld [vmem:[%s12019_s10 + $0xfc] sm:$0x1] }
 0x159   : > { %v2974_v16 = vrot.slane %v2972_v55, 5  ;;  %11178 = vmatmul.mubr.msk.bf16.vlgmr.msra.gmra.mrb[0].mxu0 %vm602_vm1, %v10306_v51  ;;  %v2952_v21 = vsel %vm12341_vm10, %v2943_v4, %v2951_v32  ;;  %v2977_v31 = vrot.slane %v2975_v50, 6  ;;  %v2984_v20 = vshll.u32 %v9791_v36, 16  ;;  %v11790_v36 = vld [vmem:[%s12019_s10 + $0x8] ss:$8 sps:$4 sm:$0xff]  }
 0x15a   : > { %v2960_v39 = vor.u32 %v2959_v13, %v2956_v61  ;;  %11186 = vmatpush3.bf16.msra.mxu0 %v13338_v54  ;;  %v9795_v44 = vcombine.low %v2934_v47, %v2952_v21  ;;  %v2969_v37 = vor.u32 %v2968_v46, %v2965_v43  ;;  %v2983_v30 = vrot.slane %v2981_v29, 5  ;;  %v10313_v55 = vld [vmem:[%s12019_s10 + $0x118] sm:$0xf]  ;;  %v13414_v29 = vld [vmem:[%s12019_s10 + $0x11c] sm:$0x1] }
 0x15b   : > { %v3135_v23 = vsel %vm615_vm0, %v13296_v2, 0  ;;  %v2978_v10 = vor.u32 %v2977_v31, %v2974_v16  ;;  %v2986_v11 = vrot.slane %v2984_v20, 6  ;;  %v7206_v18 = vshrl.u32 %v10296_v26, 16  ;;  %11721 = vmatprep.subr.msk.bf16.mxu0 %vm615_vm0, %v13373_v1  ;;  %v10300_v2 = vld [vmem:[%s12019_s10 + $0xf0] sm:$0xf] }
 0x15c   : > { %v2961_v6 = vrot.slane %v2960_v39, 4  ;;  %10946 = vmatpush3.bf16.msra.mxu1 %v3135_v23  ;;  %10941 = vmatprep.mubr.msk.bf16.mxu1 %vm602_vm1, %v9795_v44  ;;  %v7209_v54 = vshll.u32 %v10296_v26, 16  ;;  %v7215_v33 = vshll.u32 %v13368_v58, 16  ;;  %v7220_v56 = vshrl.u32 %v10298_v52, 16  ;;  %v10315_v20 = vld [vmem:[%s12019_s10 + $0x120] sm:$0xf] }
 0x15d   : > { %v7223_v28 = vshll.u32 %v10298_v52, 16  ;;  %11696 = vmatprep.subr.msk.bf16.mxu1 %vm615_vm0, %v13382_v9  ;;  %v2979_v7 = vrot.slane %v2978_v10, 4  ;;  %v2987_v14 = vor.u32 %v2986_v11, %v2983_v30  ;;  %v7208_v3 = vrot.slane %v7206_v18, 4  ;;  %v11791_v23 = vld [vmem:[%s12019_s10 + $0x18] ss:$8 sps:$4 sm:$0xff]  }
 0x15e   : > { %v2970_v12 = vsel %vm12341_vm10, %v2961_v6, %v2969_v37  ;;  %v7211_v25 = vrot.slane %v7209_v54, 5  ;;  %v7217_v57 = vrot.slane %v7215_v33, 5  ;;  %v7222_v0 = vrot.slane %v7220_v56, 4  ;;  %v13425_v6 = vld [vmem:[%s12019_s10 + $0x124] sm:$0x1] }
 0x15f   : > { %v7225_v51 = vrot.slane %v7223_v28, 5  ;;  %v2988_v22 = vsel %vm12341_vm10, %v2979_v7, %v2987_v14  ;;  %v7229_v62 = vshll.u32 %v13388_v49, 16  ;;  %v7234_v5 = vshrl.u32 %v10300_v2, 16  ;;  %v10317_v11 = vld [vmem:[%s12019_s10 + $0x128] sm:$0xf] }
 0x160   : > { %v7237_v41 = vshll.u32 %v10300_v2, 16  ;;  %v9796_v61 = vcombine.low %v2970_v12, %v2988_v22  ;;  %v7212_v53 = vor.u32 %v7211_v25, %v7208_v3  ;;  %v7243_v8 = vshll.u32 %v13400_v27, 16  ;;  %v13429_v28 = vld [vmem:[%s12019_s10 + $0x12c] sm:$0x1]  ;;  %v10319_v3 = vld [vmem:[%s12019_s10 + $0x130] sm:$0xf] }
 0x161   : > { %v7226_v47 = vor.u32 %v7225_v51, %v7222_v0  ;;  %v7231_v26 = vrot.slane %v7229_v62, 5  ;;  %v7236_v4 = vrot.slane %v7234_v5, 4  ;;  %v7248_v13 = vshrl.u32 %v10302_v60, 16 }
 0x162   : > { %v7239_v32 = vrot.slane %v7237_v41, 5  ;;  %10942 = vmatmul.mubr.msk.bf16.gmra.mrb[4].mxu1 %vm602_vm1, %v9796_v61  ;;  %v7213_v50 = vrot.slane %v7212_v53, 4  ;;  %v7245_v46 = vrot.slane %v7243_v8, 5  ;;  %v7251_v16 = vshll.u32 %v10302_v60, 16  ;;  %v11792_v60 = vld [vmem:[%s12019_s10 + $0x28] ss:$8 sps:$4 sm:$0xff]  }
 0x163   : > { %v7227_v43 = vrot.slane %v7226_v47, 4  ;;  %v7250_v39 = vrot.slane %v7248_v13, 4  ;;  %v7257_v31 = vshll.u32 %v13408_v59, 16  ;;  %10947 = vmatprep.mubr.msk.bf16.mxu1 %vm602_vm1, %v11790_v36  ;;  %v7380_v52 = vshrl.u32 %v10313_v55, 16  ;;  %v13439_v53 = vld [vmem:[%s12019_s10 + $0x134] sm:$0x1] }
 0x164   : > { %v7240_v21 = vor.u32 %v7239_v32, %v7236_v4  ;;  %v7218_v44 = vsel %vm12053_vm6, %v7213_v50, %v7217_v57  ;;  %v7253_v30 = vrot.slane %v7251_v16, 5  ;;  %v7383_v10 = vshll.u32 %v10313_v55, 16  ;;  %v10321_v16 = vld [vmem:[%s12019_s10 + $0x138] sm:$0xf] }
 0x165   : > { %v7232_v37 = vsel %vm12053_vm6, %v7227_v43, %v7231_v26  ;;  %v7259_v33 = vrot.slane %v7257_v31, 5  ;;  %v7382_v56 = vrot.slane %v7380_v52, 4  ;;  %v7389_v7 = vshll.u32 %v13414_v29, 16 }
 0x166   : > { %v10307_v18 = vcombine.low %v7218_v44, %v7232_v37  ;;  %v7241_v54 = vrot.slane %v7240_v21, 4  ;;  %v7254_v2 = vor.u32 %v7253_v30, %v7250_v39  ;;  %v7385_v12 = vrot.slane %v7383_v10, 5  ;;  %v13448_v21 = vld [vmem:[%s12019_s10 + $0x13c] sm:$0x1]  ;;  %v11793_v44 = vld [vmem:[%s12019_s10 + $0x38] ss:$8 sps:$4 sm:$0xff]  }
 0x167   : > { %v7394_v14 = vshrl.u32 %v10315_v20, 16  ;;  %v7397_v57 = vshll.u32 %v10315_v20, 16  ;;  %v7403_v0 = vshll.u32 %v13425_v6, 16  ;;  %v7408_v51 = vshrl.u32 %v10317_v11, 16  ;;  %v10323_v37 = vld [vmem:[%s12019_s10 + $0x140] sm:$0xf] }
 0x168   : > { %11181 = vmatprep.mubr.msk.bf16.mxu0 %vm602_vm1, %v10307_v18  ;;  %v7246_v25 = vsel %vm12053_vm6, %v7241_v54, %v7245_v46  ;;  %v7255_v22 = vrot.slane %v7254_v2, 4  ;;  %v7386_v62 = vor.u32 %v7385_v12, %v7382_v56  ;;  %v7391_v5 = vrot.slane %v7389_v7, 5  ;;  %v13459_v18 = vld [vmem:[%s12019_s10 + $0x144] sm:$0x1]  ;;  %v13464_v54 = vld [vmem:[%s14489_s1 + $0x20] sm:$0x3] }
 0x169   : > { %v7396_v41 = vrot.slane %v7394_v14, 4  ;;  %v7399_v36 = vrot.slane %v7397_v57, 5  ;;  %v7405_v61 = vrot.slane %v7403_v0, 5  ;;  %v7410_v47 = vrot.slane %v7408_v51, 4  ;;  %v10325_v7 = vld [vmem:[%s12019_s10 + $0x148] sm:$0xf] }
 0x16a   : > { %v7411_v8 = vshll.u32 %v10317_v11, 16  ;;  %v7260_v55 = vsel %vm12053_vm6, %v7255_v22, %v7259_v33  ;;  %10948 = vmatmul.mubr.msk.bf16.vlgmr.msra.gmra.mrb[0].mxu1 %vm602_vm1, %v11791_v23  ;;  %v7387_v26 = vrot.slane %v7386_v62, 4  ;;  %v7417_v4 = vshll.u32 %v13429_v28, 16  ;;  %v13473_v57 = vld [vmem:[%s12019_s10 + $0x14c] sm:$0x1] }
 0x16b   : > { %v7422_v32 = vshrl.u32 %v10319_v3, 16  ;;  %v10308_v13 = vcombine.low %v7246_v25, %v7260_v55  ;;  %v7400_v50 = vor.u32 %v7399_v36, %v7396_v41  ;;  %v7425_v46 = vshll.u32 %v10319_v3, 16  ;;  %10951 = vmatprep.mubr.msk.bf16.mxu1 %vm602_vm1, %v11792_v60  ;;  %v11794_v0 = vld [vmem:[%s12019_s10 + $0x60] ss:$8 sps:$4 sm:$0xff]   ;;  %v10327_v62 = vld [vmem:[%s12019_s10 + $0x150] sm:$0xf] }
 0x16c   : > { %v7413_v43 = vrot.slane %v7411_v8, 5  ;;  %v7392_v39 = vsel %vm12053_vm6, %v7387_v26, %v7391_v5  ;;  %v7419_v31 = vrot.slane %v7417_v4, 5  ;;  %v7431_v52 = vshll.u32 %v13439_v53, 16 }
 0x16d   : > { %v7424_v20 = vrot.slane %v7422_v32, 4  ;;  %11182 = vmatmul.mubr.msk.bf16.gmra.mrb[4].mxu0 %vm602_vm1, %v10308_v13  ;;  %v7401_v30 = vrot.slane %v7400_v50, 4  ;;  %v7427_v10 = vrot.slane %v7425_v46, 5  ;;  %v7676_v11 = vsel %vm615_vm0, %v13373_v1, 0  ;;  %v13488_v32 = vld [vmem:[%s12019_s10 + $0xc0] sm:$0xe] }
 0x16e   : > { %v7414_v23 = vor.u32 %v7413_v43, %v7410_v47  ;;  %v7433_v33 = vrot.slane %v7431_v52, 5  ;;  %v3254_v56 = vsel %vm615_vm0, %v13382_v9, 0  ;;  %v7436_v2 = vshrl.u32 %v10321_v16, 16  ;;  %v13482_v47 = vld [vmem:[%s12019_s10 + $0x154] sm:$0x1] }
 0x16f   : > { %v7439_v12 = vshll.u32 %v10321_v16, 16  ;;  %v7406_v14 = vsel %vm12053_vm6, %v7401_v30, %v7405_v61  ;;  %v7428_v1 = vor.u32 %v7427_v10, %v7424_v20  ;;  %10956 = vmatpush3.bf16.msra.mxu1 %v3254_v56  ;;  %v7445_v25 = vshll.u32 %v13448_v21, 16  ;;  %v13495_v16 = vld [vmem:[%s12019_s10 + $0xc8] sm:$0xe]  ;;  %v13502_v56 = vld [vmem:[%s12019_s10 + $0xd0] sm:$0xe] }
 0x170   : > { %v7415_v3 = vrot.slane %v7414_v23, 4  ;;  %v10330_v51 = vcombine.low %v7392_v39, %v7406_v14  ;;  %v7438_v60 = vrot.slane %v7436_v2, 4  ;;  %v7450_v9 = vshrl.u32 %v10323_v37, 16  ;;  %11697 = vmatprep.subr.msk.bf16.mxu1 %vm615_vm0, %v13464_v54 }
 0x171   : > { %v7441_v22 = vrot.slane %v7439_v12, 5  ;;  %v7429_v41 = vrot.slane %v7428_v1, 4  ;;  %v7447_v36 = vrot.slane %v7445_v25, 5  ;;  %v7453_v61 = vshll.u32 %v10323_v37, 16  ;;  %v10379_v37 = vld [vmem:[%s14489_s1 + $0x50] sm:$0x3] }
 0x172   : > { %v7420_v5 = vsel %vm12053_vm6, %v7415_v3, %v7419_v31  ;;  %11187 = vmatprep.mubr.msk.bf16.mxu0 %vm602_vm1, %v10330_v51  ;;  %10952 = vmatmul.mubr.msk.bf16.gmra.mrb[4].mxu1 %vm602_vm1, %v11793_v44  ;;  %v7452_v55 = vrot.slane %v7450_v9, 4  ;;  %v7459_v26 = vshll.u32 %v13459_v18, 16  ;;  %v7464_v4 = vshrl.u32 %v10325_v7, 16  ;;  %v11795_v44 = vld [vmem:[%s12019_s10 + $0x70] ss:$8 sps:$4 sm:$0xff]  }
 0x173   : > { %v7442_v8 = vor.u32 %v7441_v22, %v7438_v60  ;;  %v7434_v13 = vsel %vm12053_vm6, %v7429_v41, %v7433_v33  ;;  %v7455_v50 = vrot.slane %v7453_v61, 5  ;;  %v7467_v43 = vshll.u32 %v10325_v7, 16  ;;  %10957 = vmatprep.mubr.msk.bf16.mxu1 %vm602_vm1, %v11794_v0  ;;  %v13510_v3 = vld [vmem:[%s12019_s10 + $0xd8] sm:$0xe]  ;;  %v11796_v60 = vld [vmem:[%s12019_s10 + $0x80] ss:$8 sps:$4 sm:$0xff]  }
 0x174   : > { %v7473_v46 = vshll.u32 %v13473_v57, 16  ;;  %v10331_v39 = vcombine.low %v7420_v5, %v7434_v13  ;;  %v7461_v20 = vrot.slane %v7459_v26, 5  ;;  %v7466_v52 = vrot.slane %v7464_v4, 4  ;;  %v13518_v41 = vld [vmem:[%s12019_s10 + $0xe0] sm:$0xe] }
 0x175   : > { %v7443_v31 = vrot.slane %v7442_v8, 4  ;;  %v7456_v30 = vor.u32 %v7455_v50, %v7452_v55  ;;  %v7469_v23 = vrot.slane %v7467_v43, 5  ;;  %v7478_v33 = vshrl.u32 %v10327_v62, 16  ;;  %v13529_v55 = vld [vmem:[%s12019_s10 + $0xf0] sm:$0xe] }
 0x176   : > { %v7475_v10 = vrot.slane %v7473_v46, 5  ;;  %11188 = vmatmul.mubr.msk.bf16.vlgmr.msra.gmra.mrb[0].mxu0 %vm602_vm1, %v10331_v39  ;;  %v7481_v12 = vshll.u32 %v10327_v62, 16  ;;  %v7487_v7 = vshll.u32 %v13482_v47, 16  ;;  %v10346_v14 = vrot.slane %v13488_v32, 9  ;;  %v13536_v50 = vld [vmem:[%s12019_s10 + $0xf8] sm:$0xe] }
 0x177   : > { %v7448_v2 = vsel %vm12053_vm6, %v7443_v31, %v7447_v36  ;;  %11196 = vmatpush3.bf16.msra.mxu0 %v7676_v11  ;;  %v7457_v1 = vrot.slane %v7456_v30, 4  ;;  %v7470_v25 = vor.u32 %v7469_v23, %v7466_v52  ;;  %v7480_v0 = vrot.slane %v7478_v33, 4  ;;  %v13521_v36 = vld [vmem:[%s12019_s10 + $0xe8] sm:$0xe] }
 0x178   : > { %v7619_v51 = vrot.slane %v13290_v40, 5  ;;  %v7483_v22 = vrot.slane %v7481_v12, 5  ;;  %v7489_v9 = vrot.slane %v7487_v7, 5  ;;  %v10347_v62 = vrot.slane %v13495_v16, 9  ;;  %11722 = vmatprep.subr.msk.bf16.mxu0 %vm615_vm0, %v10379_v37  ;;  %v9835_v23 = vld [vmem:[%s12019_s10 + $0x8] sm:$0xf] }
 0x179   : > { %v7623_v5 = vrot.slane %v13301_v45, 5  ;;  %v7462_v11 = vsel %vm12053_vm6, %v7457_v1, %v7461_v20  ;;  %v7471_v61 = vrot.slane %v7470_v25, 4  ;;  %v10348_v8 = vrot.slane %v13502_v56, 9  ;;  %v13546_v20 = vld [vmem:[%s14489_s1 + $0x22] sm:$0x3] }
 0x17a   : > { %v7620_v40 = vsel %vm12072_vm7, %v10346_v14, %v7619_v51  ;;  %v10332_v26 = vcombine.low %v7448_v2, %v7462_v11  ;;  %v7484_v45 = vor.u32 %v7483_v22, %v7480_v0  ;;  %10958 = vmatmul.mubr.msk.bf16.vlgmr.msra.gmra.mrb[0].mxu1 %vm602_vm1, %v11795_v44  ;;  %v7627_v13 = vrot.slane %v13318_v34, 5  ;;  %v13568_v7 = vld [vmem:[%s12019_s10 + $0xc] sm:$0x1]  ;;  %v9837_v25 = vld [vmem:[%s12019_s10 + $0x10] sm:$0xf] }
 0x17b   : > { %v7624_v4 = vsel %vm12072_vm7, %v10347_v62, %v7623_v5  ;;  %v7476_v43 = vsel %vm12053_vm6, %v7471_v61, %v7475_v10  ;;  %v10349_v39 = vrot.slane %v13510_v3, 9  ;;  %v7631_v31 = vrot.slane %v13329_v63, 5  ;;  %10961 = vmatprep.mubr.msk.bf16.mxu1 %vm602_vm1, %v11796_v60  ;;  %v11797_v63 = vld [vmem:[%s12019_s10 + $0x90] ss:$8 sps:$4 sm:$0xff]   ;;  %v13578_v0 = vld [vmem:[%s12019_s10 + $0x14] sm:$0x1] }
 0x17c   : > { %v10355_v46 = vcombine.low %v7620_v40, %v7624_v4  ;;  %11191 = vmatprep.mubr.msk.bf16.mxu0 %vm602_vm1, %v10332_v26  ;;  %v7485_v34 = vrot.slane %v7484_v45, 4  ;;  %v13551_v52 = vsel %vm12072_vm7, %v10348_v8, %v7627_v13  ;;  %v13554_v44 = vsel %vm615_vm0, %v10379_v37, 0  ;;  %v13591_v61 = vld [vmem:[%s12019_s10 + $0x1c] sm:$0x1]  ;;  %v9841_v45 = vld [vmem:[%s12019_s10 + $0x20] sm:$0xf] }
 0x17d   : > { %v3484_v30 = vsel %vm615_vm0, %v13464_v54, 0  ;;  %v13562_v10 = vsel %vm12072_vm7, %v10349_v39, %v7631_v31  ;;  %v10350_v33 = vrot.slane %v13518_v41, 9  ;;  %v7635_v2 = vrot.slane %v13368_v58, 5 }
 0x17e   : > { %10966 = vmatpush3.bf16.msra.mxu1 %v3484_v30  ;;  %v10351_v12 = vrot.slane %v13521_v36, 9  ;;  %v7490_v37 = vsel %vm12053_vm6, %v7485_v34, %v7489_v9  ;;  %v10356_v54 = vcombine.low %v13551_v52, %v13562_v10  ;;  %v7639_v14 = vrot.slane %v13388_v49, 5  ;;  %v9839_v9 = vld [vmem:[%s12019_s10 + $0x18] sm:$0xf]  ;;  %v13610_v30 = vld [vmem:[%s12019_s10 + $0x24] sm:$0x1] }
 0x17f   : > { %v10352_v1 = vrot.slane %v13529_v55, 9  ;;  %11698 = vmatprep.subr.msk.bf16.mxu1 %vm615_vm0, %v13546_v20  ;;  %v10333_v58 = vcombine.low %v7476_v43, %v7490_v37  ;;  %v7636_v51 = vsel %vm12072_vm7, %v10350_v33, %v7635_v2  ;;  %v7643_v60 = vrot.slane %v13400_v27, 5  ;;  %v10363_v33 = vld [vmem:[%s12019_s10 + $0x118] sm:$0xe] }
 0x180   : > { %v10353_v22 = vrot.slane %v13536_v50, 9  ;;  %v7640_v49 = vsel %vm12072_vm7, %v10351_v12, %v7639_v14  ;;  %v7647_v62 = vrot.slane %v13408_v59, 5  ;;  %v3346_v5 = vshrl.u32 %v9835_v23, 16 }
 0x181   : > { %v3349_v11 = vshll.u32 %v9835_v23, 16  ;;  %11192 = vmatmul.mubr.msk.bf16.gmra.mrb[4].mxu0 %vm602_vm1, %v10333_v58  ;;  %v10357_v40 = vcombine.low %v7636_v51, %v7640_v49  ;;  %v13596_v8 = vsel %vm12072_vm7, %v10352_v1, %v7643_v60  ;;  %v3355_v27 = vshll.u32 %v13568_v7, 16  ;;  %v10364_v1 = vld [vmem:[%s12019_s10 + $0x120] sm:$0xe] }
 0x182   : > { %v3360_v26 = vshrl.u32 %v9837_v25, 16  ;;  %11197 = vmatprep.mubr.msk.bf16.mxu0 %vm602_vm1, %v10355_v46  ;;  %10962 = vmatmul.mubr.msk.bf16.gmra.mrb[4].mxu1 %vm602_vm1, %v11797_v63  ;;  %v13604_v59 = vsel %vm12072_vm7, %v10353_v22, %v7647_v62  ;;  %v3348_v4 = vrot.slane %v3346_v5, 4  ;;  %v3363_v43 = vshll.u32 %v9837_v25, 16  ;;  %v10396_v22 = vld [vmem:[%s14489_s1 + $0x52] sm:$0x3] }
 0x183   : > { %v3351_v13 = vrot.slane %v3349_v11, 5  ;;  %v10358_v39 = vcombine.low %v13596_v8, %v13604_v59  ;;  %v3357_v31 = vrot.slane %v3355_v27, 5  ;;  %v3369_v52 = vshll.u32 %v13578_v0, 16  ;;  %v10365_v11 = vld [vmem:[%s12019_s10 + $0x128] sm:$0xe] }
 0x184   : > { %v3362_v34 = vrot.slane %v3360_v26, 4  ;;  %v3365_v23 = vrot.slane %v3363_v43, 5  ;;  %v3374_v63 = vshrl.u32 %v9839_v9, 16  ;;  %v3377_v10 = vshll.u32 %v9839_v9, 16 }
 0x185   : > { %v3352_v46 = vor.u32 %v3351_v13, %v3348_v4  ;;  %v3371_v2 = vrot.slane %v3369_v52, 5  ;;  %v3383_v12 = vshll.u32 %v13591_v61, 16  ;;  %v3388_v37 = vshrl.u32 %v9841_v45, 16 }
 0x186   : > { %v3391_v14 = vshll.u32 %v9841_v45, 16  ;;  %v3366_v58 = vor.u32 %v3365_v23, %v3362_v34  ;;  %v3376_v51 = vrot.slane %v3374_v63, 4  ;;  %v3379_v60 = vrot.slane %v3377_v10, 5 }
 0x187   : > { %v3353_v25 = vrot.slane %v3352_v46, 4  ;;  %v3385_v49 = vrot.slane %v3383_v12, 5  ;;  %v3390_v62 = vrot.slane %v3388_v37, 4  ;;  %v3397_v5 = vshll.u32 %v13610_v30, 16  ;;  %v10366_v46 = vld [vmem:[%s12019_s10 + $0x130] sm:$0xe] }
 0x188   : > { %v3393_v9 = vrot.slane %v3391_v14, 5  ;;  %v3367_v26 = vrot.slane %v3366_v58, 4  ;;  %v3380_v45 = vor.u32 %v3379_v60, %v3376_v51  ;;  %v10371_v4 = vrot.slane %v10363_v33, 9  ;;  %v13641_v14 = vld [vmem:[%s12019_s10 + $0x2c] sm:$0x1] }
 0x189   : > { %v3358_v27 = vsel %vm12053_vm6, %v3353_v25, %v3357_v31  ;;  %11198 = vmatmul.mubr.msk.bf16.vlgmr.msra.gmra.mrb[0].mxu0 %vm602_vm1, %v10356_v54  ;;  %v3399_v43 = vrot.slane %v3397_v5, 5  ;;  %v7777_v34 = vrot.slane %v13414_v29, 5  ;;  %v10372_v52 = vrot.slane %v10364_v1, 9  ;;  %v9843_v54 = vld [vmem:[%s12019_s10 + $0x28] sm:$0xf] }
 0x18a   : > { %v3394_v13 = vor.u32 %v3393_v9, %v3390_v62  ;;  %11206 = vmatpush3.bf16.msra.mxu0 %v13554_v44  ;;  %11201 = vmatprep.mubr.msk.bf16.mxu0 %vm602_vm1, %v10357_v40  ;;  %v3372_v31 = vsel %vm12053_vm6, %v3367_v26, %v3371_v2  ;;  %v3381_v23 = vrot.slane %v3380_v45, 4  ;;  %v7781_v63 = vrot.slane %v13425_v6, 5  ;;  %v9845_v1 = vld [vmem:[%s12019_s10 + $0x30] sm:$0xf]  ;;  %v13655_v60 = vld [vmem:[%s12019_s10 + $0x34] sm:$0x1] }
 0x18b   : > { %v10373_v10 = vrot.slane %v10365_v11, 9  ;;  %v9852_v33 = vcombine.low %v3358_v27, %v3372_v31  ;;  %v7778_v29 = vsel %vm12072_vm7, %v10371_v4, %v7777_v34  ;;  %11723 = vmatprep.subr.msk.bf16.mxu0 %vm615_vm0, %v10396_v22  ;;  %v7785_v44 = vrot.slane %v13429_v28, 5  ;;  %v13661_v11 = vld [vmem:[%s12019_s10 + $0x3c] sm:$0x1]  ;;  %v9849_v27 = vld [vmem:[%s12019_s10 + $0x40] sm:$0xf] }
 0x18c   : > { %v3395_v12 = vrot.slane %v3394_v13, 4  ;;  %v3386_v40 = vsel %vm12053_vm6, %v3381_v23, %v3385_v49  ;;  %v7782_v2 = vsel %vm12072_vm7, %v10372_v52, %v7781_v63  ;;  %v10374_v6 = vrot.slane %v10366_v46, 9  ;;  %v13667_v13 = vld [vmem:[%s12019_s10 + $0x44] sm:$0x1] }
 0x18d   : > { %v7789_v37 = vrot.slane %v13439_v53, 5  ;;  %10967 = vmatprep.mubr.msk.bf16.mxu1 %vm602_vm1, %v9852_v33  ;;  %v10380_v28 = vcombine.low %v7778_v29, %v7782_v2  ;;  %v13649_v58 = vsel %vm12072_vm7, %v10373_v10, %v7785_v44  ;;  %v13652_v51 = vsel %vm615_vm0, %v10396_v22, 0  ;;  %v9847_v53 = vld [vmem:[%s12019_s10 + $0x38] sm:$0xf]  ;;  %v13679_v33 = vld [vmem:[%s14489_s1 + $0x24] sm:$0x3] }
 0x18e   : > { %v3400_v25 = vsel %vm12053_vm6, %v3395_v12, %v3399_v43  ;;  %v3402_v9 = vshrl.u32 %v9843_v54, 16  ;;  %v3405_v5 = vshll.u32 %v9843_v54, 16  ;;  %v3411_v45 = vshll.u32 %v13641_v14, 16  ;;  %v10367_v54 = vld [vmem:[%s12019_s10 + $0x138] sm:$0xe] }
 0x18f   : > { %v9853_v49 = vcombine.low %v3386_v40, %v3400_v25  ;;  %v7790_v62 = vsel %vm12072_vm7, %v10374_v6, %v7789_v37  ;;  %v3416_v4 = vshrl.u32 %v9845_v1, 16  ;;  %v3419_v22 = vshll.u32 %v9845_v1, 16 }
 0x190   : > { %v10381_v26 = vcombine.low %v13649_v58, %v7790_v62  ;;  %v3404_v43 = vrot.slane %v3402_v9, 4  ;;  %v3407_v34 = vrot.slane %v3405_v5, 5  ;;  %v3425_v52 = vshll.u32 %v13655_v60, 16  ;;  %v10368_v58 = vld [vmem:[%s12019_s10 + $0x140] sm:$0xe] }
 0x191   : > { %10968 = vmatmul.mubr.msk.bf16.vlgmr.msra.gmra.mrb[0].mxu1 %vm602_vm1, %v9853_v49  ;;  %v3430_v46 = vshrl.u32 %v9847_v53, 16  ;;  %11202 = vmatmul.mubr.msk.bf16.gmra.mrb[4].mxu0 %vm602_vm1, %v10358_v39  ;;  %v3413_v31 = vrot.slane %v3411_v45, 5  ;;  %v3418_v23 = vrot.slane %v3416_v4, 4  ;;  %v3421_v63 = vrot.slane %v3419_v22, 5  ;;  %v10369_v9 = vld [vmem:[%s12019_s10 + $0x148] sm:$0xe] }
 0x192   : > { %v3433_v10 = vshll.u32 %v9847_v53, 16  ;;  %11207 = vmatprep.mubr.msk.bf16.mxu0 %vm602_vm1, %v10380_v28  ;;  %v3408_v12 = vor.u32 %v3407_v34, %v3404_v43  ;;  %v3427_v29 = vrot.slane %v3425_v52, 5  ;;  %v3439_v8 = vshll.u32 %v13661_v11, 16  ;;  %v10370_v22 = vld [vmem:[%s12019_s10 + $0x150] sm:$0xe] }
 0x193   : > { %v3432_v44 = vrot.slane %v3430_v46, 4  ;;  %v3422_v59 = vor.u32 %v3421_v63, %v3418_v23  ;;  %v3444_v40 = vshrl.u32 %v9849_v27, 16  ;;  %v3447_v2 = vshll.u32 %v9849_v27, 16  ;;  %v9860_v46 = vld [vmem:[%s12019_s10 + $0x60] sm:$0xf] }
 0x194   : > { %v3435_v39 = vrot.slane %v3433_v10, 5  ;;  %v3409_v6 = vrot.slane %v3408_v12, 4  ;;  %v3441_v37 = vrot.slane %v3439_v8, 5  ;;  %v3453_v1 = vshll.u32 %v13667_v13, 16 }
 0x195   : > { %v3714_v25 = vsel %vm615_vm0, %v13546_v20, 0  ;;  %v3423_v28 = vrot.slane %v3422_v59, 4  ;;  %v3446_v49 = vrot.slane %v3444_v40, 4  ;;  %v3449_v62 = vrot.slane %v3447_v2, 5 }
 0x196   : > { %v3436_v53 = vor.u32 %v3435_v39, %v3432_v44  ;;  %10976 = vmatpush3.bf16.msra.mxu1 %v3714_v25  ;;  %v3414_v5 = vsel %vm12053_vm6, %v3409_v6, %v3413_v31  ;;  %v3455_v27 = vrot.slane %v3453_v1, 5  ;;  %v10375_v45 = vrot.slane %v10367_v54, 9  ;;  %v13706_v54 = vld [vmem:[%s14489_s1 + $0x54] sm:$0x3]  ;;  %v9864_v1 = vld [vmem:[%s12019_s10 + $0x70] sm:$0xf] }
 0x197   : > { %v7793_v4 = vrot.slane %v13448_v21, 5  ;;  %11699 = vmatprep.subr.msk.bf16.mxu1 %vm615_vm0, %v13679_v33  ;;  %v3428_v20 = vsel %vm12053_vm6, %v3423_v28, %v3427_v29  ;;  %v3450_v34 = vor.u32 %v3449_v62, %v3446_v49  ;;  %v10376_v52 = vrot.slane %v10368_v58, 9  ;;  %v13701_v21 = vld [vmem:[%s12019_s10 + $0x64] sm:$0x1]  ;;  %v9866_v49 = vld [vmem:[%s12019_s10 + $0x78] sm:$0xf] }
 0x198   : > { %v3437_v43 = vrot.slane %v3436_v53, 4  ;;  %v9854_v23 = vcombine.low %v3414_v5, %v3428_v20  ;;  %v7797_v63 = vrot.slane %v13459_v18, 5  ;;  %v10377_v10 = vrot.slane %v10369_v9, 9  ;;  %v13732_v53 = vld [vmem:[%s12019_s10 + $0x74] sm:$0x1] }
 0x199   : > { %v7794_v31 = vsel %vm12072_vm7, %v10375_v45, %v7793_v4  ;;  %11208 = vmatmul.mubr.msk.bf16.vlgmr.msra.gmra.mrb[0].mxu0 %vm602_vm1, %v10381_v26  ;;  %v3451_v29 = vrot.slane %v3450_v34, 4  ;;  %v7801_v44 = vrot.slane %v13473_v57, 5  ;;  %v10378_v8 = vrot.slane %v10370_v22, 9  ;;  %v9862_v26 = vld [vmem:[%s12019_s10 + $0x68] sm:$0xf] }
 0x19a   : > { %v3442_v12 = vsel %vm12053_vm6, %v3437_v43, %v3441_v37  ;;  %11216 = vmatpush3.bf16.msra.mxu0 %v13652_v51  ;;  %10971 = vmatprep.mubr.msk.bf16.mxu1 %vm602_vm1, %v9854_v23  ;;  %v7798_v18 = vsel %vm12072_vm7, %v10376_v52, %v7797_v63  ;;  %v7805_v59 = vrot.slane %v13482_v47, 5  ;;  %v3576_v39 = vshrl.u32 %v9860_v46, 16  ;;  %v13723_v51 = vld [vmem:[%s12019_s10 + $0x6c] sm:$0x1]  ;;  %v13739_v52 = vld [vmem:[%s12019_s10 + $0x7c] sm:$0x1] }
 0x19b   : > { %v3579_v40 = vshll.u32 %v9860_v46, 16  ;;  %v3456_v2 = vsel %vm12053_vm6, %v3451_v29, %v3455_v27  ;;  %v10382_v6 = vcombine.low %v7794_v31, %v7798_v18  ;;  %v7802_v57 = vsel %vm12072_vm7, %v10377_v10, %v7801_v44  ;;  %11724 = vmatprep.subr.msk.bf16.mxu0 %vm615_vm0, %v13706_v54  ;;  %v10388_v29 = vld [vmem:[%s12019_s10 + $0xc4] sm:$0x3] }
 0x19c   : > { %v3585_v37 = vshll.u32 %v13701_v21, 16  ;;  %v9855_v47 = vcombine.low %v3442_v12, %v3456_v2  ;;  %v7806_v25 = vsel %vm12072_vm7, %v10378_v8, %v7805_v59  ;;  %v3578_v58 = vrot.slane %v3576_v39, 4 }
 0x19d   : > { %v3581_v28 = vrot.slane %v3579_v40, 5  ;;  %11211 = vmatprep.mubr.msk.bf16.mxu0 %vm602_vm1, %v10382_v6  ;;  %v10383_v62 = vcombine.low %v7802_v57, %v7806_v25  ;;  %v3590_v5 = vshrl.u32 %v9862_v26, 16  ;;  %v3593_v27 = vshll.u32 %v9862_v26, 16 }
 0x19e   : > { %v3587_v9 = vrot.slane %v3585_v37, 5  ;;  %10972 = vmatmul.mubr.msk.bf16.gmra.mrb[4].mxu1 %vm602_vm1, %v9855_v47  ;;  %v3599_v4 = vshll.u32 %v13723_v51, 16  ;;  %v3604_v22 = vshrl.u32 %v9864_v1, 16  ;;  %v3607_v20 = vshll.u32 %v9864_v1, 16 }
 0x19f   : > { %v3582_v45 = vor.u32 %v3581_v28, %v3578_v58  ;;  %v3592_v43 = vrot.slane %v3590_v5, 4  ;;  %v3595_v34 = vrot.slane %v3593_v27, 5  ;;  %v3613_v46 = vshll.u32 %v13732_v53, 16  ;;  %v10389_v58 = vld [vmem:[%s12019_s10 + $0xcc] sm:$0x3] }
 0x1a0   : > { %v3618_v23 = vshrl.u32 %v9866_v49, 16  ;;  %v3601_v63 = vrot.slane %v3599_v4, 5  ;;  %v3606_v10 = vrot.slane %v3604_v22, 4  ;;  %v3609_v12 = vrot.slane %v3607_v20, 5 }
 0x1a1   : > { %v3583_v31 = vrot.slane %v3582_v45, 4  ;;  %11212 = vmatmul.mubr.msk.bf16.gmra.mrb[4].mxu0 %vm602_vm1, %v10383_v62  ;;  %v3596_v44 = vor.u32 %v3595_v34, %v3592_v43  ;;  %v3615_v8 = vrot.slane %v3613_v46, 5  ;;  %v3621_v59 = vshll.u32 %v9866_v49, 16 }
 0x1a2   : > { %v3620_v18 = vrot.slane %v3618_v23, 4  ;;  %v3610_v39 = vor.u32 %v3609_v12, %v3606_v10  ;;  %v3627_v40 = vshll.u32 %v13739_v52, 16  ;;  %v7918_v2 = vshrl.u32 %v13488_v32, 16  ;;  %v10390_v23 = vld [vmem:[%s12019_s10 + $0xd4] sm:$0x3] }
 0x1a3   : > { %v3588_v26 = vsel %vm12053_vm6, %v3583_v31, %v3587_v9  ;;  %v3597_v6 = vrot.slane %v3596_v44, 4  ;;  %v3623_v57 = vrot.slane %v3621_v59, 5  ;;  %v7921_v37 = vshll.u32 %v13488_v32, 16 }
 0x1a4   : > { %v7927_v1 = vshrl.u32 %v10388_v29, 16  ;;  %v3611_v47 = vrot.slane %v3610_v39, 4  ;;  %v3629_v25 = vrot.slane %v3627_v40, 5  ;;  %v7920_v28 = vrot.slane %v7918_v2, 5  ;;  %v10391_v39 = vld [vmem:[%s12019_s10 + $0xdc] sm:$0x3] }
 0x1a5   : > { %v7930_v62 = vshll.u32 %v10388_v29, 16  ;;  %v3602_v49 = vsel %vm12053_vm6, %v3597_v6, %v3601_v63  ;;  %v3624_v9 = vor.u32 %v3623_v57, %v3620_v18  ;;  %v7923_v5 = vrot.slane %v7921_v37, 6 }
 0x1a6   : > { %v7929_v27 = vrot.slane %v7927_v1, 5  ;;  %v9877_v45 = vcombine.low %v3588_v26, %v3602_v49  ;;  %v3616_v4 = vsel %vm12053_vm6, %v3611_v47, %v3615_v8  ;;  %v7936_v32 = vshrl.u32 %v13495_v16, 16 }
 0x1a7   : > { %v7932_v22 = vrot.slane %v7930_v62, 6  ;;  %v3625_v20 = vrot.slane %v3624_v9, 4  ;;  %v7924_v43 = vor.u32 %v7923_v5, %v7920_v28  ;;  %v7939_v34 = vshll.u32 %v13495_v16, 16  ;;  %v9868_v28 = vld [vmem:[%s12019_s10 + $0x80] sm:$0xf] }
 0x1a8   : > { %v7945_v46 = vshrl.u32 %v10389_v58, 16  ;;  %10977 = vmatprep.mubr.msk.bf16.mxu1 %vm602_vm1, %v9877_v45  ;;  %v7938_v63 = vrot.slane %v7936_v32, 5  ;;  %v7948_v10 = vshll.u32 %v10389_v58, 16  ;;  %v7954_v12 = vshrl.u32 %v13502_v56, 16  ;;  %v13770_v5 = vld [vmem:[%s12019_s10 + $0x84] sm:$0x1] }
 0x1a9   : > { %v7933_v31 = vor.u32 %v7932_v22, %v7929_v27  ;;  %v3630_v29 = vsel %vm12053_vm6, %v3625_v20, %v3629_v25  ;;  %v7925_v44 = vrot.slane %v7924_v43, 4  ;;  %v7941_v8 = vrot.slane %v7939_v34, 6  ;;  %v9870_v32 = vld [vmem:[%s12019_s10 + $0x88] sm:$0xf] }
 0x1aa   : > { %v7947_v18 = vrot.slane %v7945_v46, 5  ;;  %v9878_v59 = vcombine.low %v3616_v4, %v3630_v29  ;;  %v7950_v26 = vrot.slane %v7948_v10, 6  ;;  %v7956_v16 = vrot.slane %v7954_v12, 5  ;;  %v13778_v10 = vld [vmem:[%s12019_s10 + $0x8c] sm:$0x1] }
 0x1ab   : > { %v7957_v40 = vshll.u32 %v13502_v56, 16  ;;  %v7934_v2 = vsel %vm12341_vm10, %v7925_v44, %v7933_v31  ;;  %v7942_v6 = vor.u32 %v7941_v8, %v7938_v63  ;;  %v7963_v57 = vshrl.u32 %v10390_v23, 16 }
 0x1ac   : > { %v7966_v37 = vshll.u32 %v10390_v23, 16  ;;  %10978 = vmatmul.mubr.msk.bf16.vlgmr.msra.gmra.mrb[0].mxu1 %vm602_vm1, %v9878_v59  ;;  %v7951_v1 = vor.u32 %v7950_v26, %v7947_v18  ;;  %v7972_v25 = vshrl.u32 %v13510_v3, 16  ;;  %v7975_v58 = vshll.u32 %v13510_v3, 16  ;;  %v9872_v18 = vld [vmem:[%s12019_s10 + $0x90] sm:$0xf] }
 0x1ad   : > { %v7959_v47 = vrot.slane %v7957_v40, 6  ;;  %v7943_v62 = vrot.slane %v7942_v6, 4  ;;  %v7965_v49 = vrot.slane %v7963_v57, 5  ;;  %v7981_v56 = vshrl.u32 %v10391_v39, 16  ;;  %v9874_v40 = vld [vmem:[%s12019_s10 + $0x98] sm:$0xf] }
 0x1ae   : > { %v7968_v9 = vrot.slane %v7966_v37, 6  ;;  %v7974_v45 = vrot.slane %v7972_v25, 5  ;;  %v7977_v4 = vrot.slane %v7975_v58, 6  ;;  %v7984_v22 = vshll.u32 %v10391_v39, 16 }
 0x1af   : > { %v7960_v27 = vor.u32 %v7959_v47, %v7956_v16  ;;  %v7952_v20 = vsel %vm12341_vm10, %v7943_v62, %v7951_v1  ;;  %v7983_v34 = vrot.slane %v7981_v56, 5  ;;  %v8207_v3 = vsel %vm615_vm0, %v13706_v54, 0  ;;  %v13786_v16 = vld [vmem:[%s12019_s10 + $0x94] sm:$0x1]  ;;  %v13790_v1 = vld [vmem:[%s12019_s10 + $0x9c] sm:$0x1] }
 0x1b0   : > { %v7969_v43 = vor.u32 %v7968_v9, %v7965_v49  ;;  %v10397_v46 = vcombine.low %v7934_v2, %v7952_v20  ;;  %v7978_v31 = vor.u32 %v7977_v4, %v7974_v45  ;;  %v7986_v63 = vrot.slane %v7984_v22, 6  ;;  %v13800_v45 = vld [vmem:[%s14489_s1 + $0x56] sm:$0x3] }
 0x1b1   : > { %v7961_v23 = vrot.slane %v7960_v27, 4  ;;  %v3632_v12 = vshrl.u32 %v9868_v28, 16  ;;  %v3635_v29 = vshll.u32 %v9868_v28, 16  ;;  %v3641_v44 = vshll.u32 %v13770_v5, 16  ;;  %v10392_v27 = vld [vmem:[%s12019_s10 + $0xe4] sm:$0x3] }
 0x1b2   : > { %v3646_v8 = vshrl.u32 %v9870_v32, 16  ;;  %11217 = vmatprep.mubr.msk.bf16.mxu0 %vm602_vm1, %v10397_v46  ;;  %v7979_v59 = vrot.slane %v7978_v31, 4  ;;  %v7987_v26 = vor.u32 %v7986_v63, %v7983_v34  ;;  %v3649_v39 = vshll.u32 %v9870_v32, 16  ;;  %v13806_v31 = vld [vmem:[%s14489_s1 + $0x26] sm:$0x3] }
 0x1b3   : > { %v7970_v54 = vsel %vm12341_vm10, %v7961_v23, %v7969_v43  ;;  %v3634_v2 = vrot.slane %v3632_v12, 4  ;;  %v3637_v6 = vrot.slane %v3635_v29, 5  ;;  %v3643_v57 = vrot.slane %v3641_v44, 5 }
 0x1b4   : > { %v3648_v37 = vrot.slane %v3646_v8, 4  ;;  %v7988_v47 = vsel %vm12341_vm10, %v7979_v59, %v7987_v26  ;;  %v3651_v25 = vrot.slane %v3649_v39, 5  ;;  %v3655_v58 = vshll.u32 %v13778_v10, 16  ;;  %v10393_v39 = vld [vmem:[%s12019_s10 + $0xec] sm:$0x3] }
 0x1b5   : > { %v3660_v28 = vshrl.u32 %v9872_v18, 16  ;;  %v10398_v62 = vcombine.low %v7970_v54, %v7988_v47  ;;  %v3638_v49 = vor.u32 %v3637_v6, %v3634_v2  ;;  %v3663_v9 = vshll.u32 %v9872_v18, 16 }
 0x1b6   : > { %v3669_v56 = vshll.u32 %v13786_v16, 16  ;;  %v3652_v4 = vor.u32 %v3651_v25, %v3648_v37  ;;  %v3657_v22 = vrot.slane %v3655_v58, 5  ;;  %v3674_v20 = vshrl.u32 %v9874_v40, 16 }
 0x1b7   : > { %v3662_v32 = vrot.slane %v3660_v28, 4  ;;  %11218 = vmatmul.mubr.msk.bf16.vlgmr.msra.gmra.mrb[0].mxu0 %vm602_vm1, %v10398_v62  ;;  %v3639_v43 = vrot.slane %v3638_v49, 4  ;;  %v3665_v34 = vrot.slane %v3663_v9, 5  ;;  %v3677_v23 = vshll.u32 %v9874_v40, 16 }
 0x1b8   : > { %v3671_v46 = vrot.slane %v3669_v56, 5  ;;  %11226 = vmatpush3.bf16.msra.mxu0 %v8207_v3  ;;  %v3653_v63 = vrot.slane %v3652_v4, 4  ;;  %v3676_v12 = vrot.slane %v3674_v20, 4  ;;  %v3683_v29 = vshll.u32 %v13790_v1, 16  ;;  %v10394_v20 = vld [vmem:[%s12019_s10 + $0xf4] sm:$0x3] }
 0x1b9   : > { %v3872_v44 = vsel %vm615_vm0, %v13679_v33, 0  ;;  %v3644_v8 = vsel %vm12053_vm6, %v3639_v43, %v3643_v57  ;;  %v3666_v18 = vor.u32 %v3665_v34, %v3662_v32  ;;  %v3679_v54 = vrot.slane %v3677_v23, 5  ;;  %11725 = vmatprep.subr.msk.bf16.mxu0 %vm615_vm0, %v13800_v45 }
 0x1ba   : > { %10986 = vmatpush3.bf16.msra.mxu1 %v3872_v44  ;;  %v7990_v59 = vshrl.u32 %v13518_v41, 16  ;;  %v3658_v3 = vsel %vm12053_vm6, %v3653_v63, %v3657_v22  ;;  %v3685_v26 = vrot.slane %v3683_v29, 5  ;;  %v7993_v40 = vshll.u32 %v13518_v41, 16  ;;  %v10395_v44 = vld [vmem:[%s12019_s10 + $0xfc] sm:$0x3] }
 0x1bb   : > { %v7999_v2 = vshrl.u32 %v10392_v27, 16  ;;  %11700 = vmatprep.subr.msk.bf16.mxu1 %vm615_vm0, %v13806_v31  ;;  %v9879_v33 = vcombine.low %v3644_v8, %v3658_v3  ;;  %v3667_v6 = vrot.slane %v3666_v18, 4  ;;  %v3680_v57 = vor.u32 %v3679_v54, %v3676_v12 }
 0x1bc   : > { %v7992_v37 = vrot.slane %v7990_v59, 5  ;;  %v7995_v47 = vrot.slane %v7993_v40, 6  ;;  %v8002_v58 = vshll.u32 %v10392_v27, 16  ;;  %v8008_v28 = vshrl.u32 %v13521_v36, 16  ;;  %v13838_v40 = vld [vmem:[%s12019_s10 + $0x8] sm:$0xe] }
 0x1bd   : > { %v8001_v25 = vrot.slane %v7999_v2, 5  ;;  %10981 = vmatprep.mubr.msk.bf16.mxu1 %vm602_vm1, %v9879_v33  ;;  %v3672_v62 = vsel %vm12053_vm6, %v3667_v6, %v3671_v46  ;;  %v3681_v41 = vrot.slane %v3680_v57, 4  ;;  %v8011_v49 = vshll.u32 %v13521_v36, 16 }
 0x1be   : > { %v8017_v9 = vshrl.u32 %v10393_v39, 16  ;;  %v7996_v56 = vor.u32 %v7995_v47, %v7992_v37  ;;  %v8004_v4 = vrot.slane %v8002_v58, 6  ;;  %v8010_v22 = vrot.slane %v8008_v28, 5  ;;  %v13842_v58 = vld [vmem:[%s12019_s10 + $0x10] sm:$0xe] }
 0x1bf   : > { %v8020_v32 = vshll.u32 %v10393_v39, 16  ;;  %v3686_v27 = vsel %vm12053_vm6, %v3681_v41, %v3685_v26  ;;  %v8013_v43 = vrot.slane %v8011_v49, 6  ;;  %v8026_v23 = vshrl.u32 %v13529_v55, 16 }
 0x1c0   : > { %v8019_v34 = vrot.slane %v8017_v9, 5  ;;  %v9880_v63 = vcombine.low %v3672_v62, %v3686_v27  ;;  %v7997_v46 = vrot.slane %v7996_v56, 4  ;;  %v8005_v12 = vor.u32 %v8004_v4, %v8001_v25  ;;  %v13848_v9 = vld [vmem:[%s12019_s10 + $0x18] sm:$0xe]  ;;  %v13851_v56 = vld [vmem:[%s12019_s10 + $0x20] sm:$0xe] }
 0x1c1   : > { %v8022_v29 = vrot.slane %v8020_v32, 6  ;;  %v8014_v36 = vor.u32 %v8013_v43, %v8010_v22  ;;  %v8028_v8 = vrot.slane %v8026_v23, 5  ;;  %v8029_v18 = vshll.u32 %v13529_v55, 16 }
 0x1c2   : > { %v8035_v54 = vshrl.u32 %v10394_v20, 16  ;;  %10982 = vmatmul.mubr.msk.bf16.gmra.mrb[4].mxu1 %vm602_vm1, %v9880_v63  ;;  %v8006_v59 = vsel %vm12341_vm10, %v7997_v46, %v8005_v12  ;;  %v8038_v26 = vshll.u32 %v10394_v20, 16  ;;  %v8044_v39 = vshrl.u32 %v13536_v50, 16  ;;  %v13854_v20 = vld [vmem:[%s12019_s10 + $0x28] sm:$0xe] }
 0x1c3   : > { %v8023_v3 = vor.u32 %v8022_v29, %v8019_v34  ;;  %v8015_v2 = vrot.slane %v8014_v36, 4  ;;  %v8031_v33 = vrot.slane %v8029_v18, 6  ;;  %v8047_v55 = vshll.u32 %v13536_v50, 16 }
 0x1c4   : > { %v8037_v6 = vrot.slane %v8035_v54, 5  ;;  %v8040_v57 = vrot.slane %v8038_v26, 6  ;;  %v8046_v37 = vrot.slane %v8044_v39, 5  ;;  %v8053_v47 = vshrl.u32 %v10395_v44, 16 }
 0x1c5   : > { %v8056_v25 = vshll.u32 %v10395_v44, 16  ;;  %v8024_v28 = vsel %vm12341_vm10, %v8015_v2, %v8023_v3  ;;  %v8032_v62 = vor.u32 %v8031_v33, %v8028_v8  ;;  %v8049_v41 = vrot.slane %v8047_v55, 6  ;;  %v13863_v44 = vld [vmem:[%s12019_s10 + $0x30] sm:$0xe]  ;;  %v13880_v3 = vld [vmem:[%s12019_s10 + $0x38] sm:$0xe] }
 0x1c6   : > { %v9893_v49 = vrot.slane %v13838_v40, 9  ;;  %v10399_v50 = vcombine.low %v8006_v59, %v8024_v28  ;;  %v8041_v4 = vor.u32 %v8040_v57, %v8037_v6  ;;  %v8055_v22 = vrot.slane %v8053_v47, 5  ;;  %v11798_v2 = vld [vmem:[%s12019_s10 + $0x18] ss:$8 sps:$4 sm:$0xff]  }
 0x1c7   : > { %v8058_v32 = vrot.slane %v8056_v25, 6  ;;  %v8033_v27 = vrot.slane %v8032_v62, 4  ;;  %v8050_v43 = vor.u32 %v8049_v41, %v8046_v37  ;;  %v3815_v34 = vrot.slane %v13568_v7, 5  ;;  %v13888_v55 = vld [vmem:[%s12019_s10 + $0x40] sm:$0xe] }
 0x1c8   : > { %v9894_v23 = vrot.slane %v13842_v58, 9  ;;  %11221 = vmatprep.mubr.msk.bf16.mxu0 %vm602_vm1, %v10399_v50  ;;  %v3819_v46 = vrot.slane %v13578_v0, 5  ;;  %v9895_v12 = vrot.slane %v13848_v9, 9  ;;  %v3823_v29 = vrot.slane %v13591_v61, 5  ;;  %v9910_v47 = vld [vmem:[%s12019_s10 + $0x60] sm:$0xe] }
 0x1c9   : > { %v8059_v63 = vor.u32 %v8058_v32, %v8055_v22  ;;  %v8042_v36 = vsel %vm12341_vm10, %v8033_v27, %v8041_v4  ;;  %v8051_v7 = vrot.slane %v8050_v43, 4  ;;  %v3816_v8 = vsel %vm12072_vm7, %v9893_v49, %v3815_v34  ;;  %v9911_v25 = vld [vmem:[%s12019_s10 + $0x68] sm:$0xe]  ;;  %v9912_v49 = vld [vmem:[%s12019_s10 + $0x70] sm:$0xe] }
 0x1ca   : > { %v9896_v18 = vrot.slane %v13851_v56, 9  ;;  %v3820_v0 = vsel %vm12072_vm7, %v9894_v23, %v3819_v46  ;;  %v3824_v61 = vsel %vm12072_vm7, %v9895_v12, %v3823_v29  ;;  %v3827_v54 = vrot.slane %v13610_v30, 5  ;;  %v9913_v50 = vld [vmem:[%s12019_s10 + $0x78] sm:$0xe]  ;;  %v9914_v23 = vld [vmem:[%s12019_s10 + $0x80] sm:$0xe] }
 0x1cb   : > { %v13877_v59 = vsel %vm615_vm0, %v13800_v45, 0  ;;  %v8060_v26 = vsel %vm12341_vm10, %v8051_v7, %v8059_v63  ;;  %v9902_v39 = vcombine.low %v3816_v8, %v3820_v0  ;;  %v9897_v33 = vrot.slane %v13854_v20, 9  ;;  %v11799_v7 = vld [vmem:[%s12019_s10 + $0x28] ss:$8 sps:$4 sm:$0xff]  }
 0x1cc   : > { %v3831_v6 = vrot.slane %v13641_v14, 5  ;;  %v10400_v30 = vcombine.low %v8042_v36, %v8060_v26  ;;  %v3828_v45 = vsel %vm12072_vm7, %v9896_v18, %v3827_v54  ;;  %v9898_v57 = vrot.slane %v13863_v44, 9  ;;  %v9915_v36 = vld [vmem:[%s12019_s10 + $0x88] sm:$0xe] }
 0x1cd   : > { %v3835_v37 = vrot.slane %v13655_v60, 5  ;;  %10987 = vmatprep.mubr.msk.bf16.mxu1 %vm602_vm1, %v9902_v39  ;;  %v9903_v28 = vcombine.low %v3824_v61, %v3828_v45  ;;  %v9899_v14 = vrot.slane %v13880_v3, 9  ;;  %v3839_v41 = vrot.slane %v13661_v11, 5  ;;  %v9943_v11 = vld [vmem:[%s14489_s1 + $0x28] sm:$0x3] }
 0x1ce   : > { %v3832_v62 = vsel %vm12072_vm7, %v9897_v33, %v3831_v6  ;;  %11222 = vmatmul.mubr.msk.bf16.gmra.mrb[4].mxu0 %vm602_vm1, %v10400_v30  ;;  %v9900_v4 = vrot.slane %v13888_v55, 9  ;;  %v3843_v22 = vrot.slane %v13667_v13, 5  ;;  %v4030_v32 = vsel %vm615_vm0, %v13806_v31, 0  ;;  %v10455_v31 = vld [vmem:[%s14489_s1 + $0x58] sm:$0x3] }
 0x1cf   : > { %v3836_v60 = vsel %vm12072_vm7, %v9898_v57, %v3835_v37  ;;  %10988 = vmatmul.mubr.msk.bf16.vlgmr.msra.gmra.mrb[0].mxu1 %vm602_vm1, %v9903_v28  ;;  %11227 = vmatprep.mubr.msk.bf16.mxu0 %vm602_vm1, %v11798_v2  ;;  %v3840_v43 = vsel %vm12072_vm7, %v9899_v14, %v3839_v41  ;;  %v9918_v34 = vrot.slane %v9910_v47, 9  ;;  %v3973_v13 = vrot.slane %v13701_v21, 5  ;;  %v9916_v61 = vld [vmem:[%s12019_s10 + $0x90] sm:$0xe]  ;;  %v9917_v2 = vld [vmem:[%s12019_s10 + $0x98] sm:$0xe] }
 0x1d0   : > { %v9904_v27 = vcombine.low %v3832_v62, %v3836_v60  ;;  %v3844_v63 = vsel %vm12072_vm7, %v9900_v4, %v3843_v22  ;;  %10996 = vmatpush3.bf16.msra.mxu1 %v4030_v32  ;;  %v9919_v46 = vrot.slane %v9911_v25, 9  ;;  %v3977_v12 = vrot.slane %v13723_v51, 5  ;;  %v11800_v33 = vld [vmem:[%s12019_s10 + $0x38] ss:$8 sps:$4 sm:$0xff]   ;;  %v9935_v25 = vld [vmem:[%s12019_s10 + $0xc] sm:$0x3] }
 0x1d1   : > { %v9920_v29 = vrot.slane %v9912_v49, 9  ;;  %v9905_v21 = vcombine.low %v3840_v43, %v3844_v63  ;;  %v3974_v8 = vsel %vm12072_vm7, %v9918_v34, %v3973_v13  ;;  %v3981_v18 = vrot.slane %v13732_v53, 5  ;;  %11701 = vmatprep.subr.msk.bf16.mxu1 %vm615_vm0, %v9943_v11  ;;  %v9936_v49 = vld [vmem:[%s12019_s10 + $0x14] sm:$0x3]  ;;  %v11801_v63 = vld [vmem:[%s12019_s10 + $0x48] ss:$8 sps:$4 sm:$0xff]  }
 0x1d2   : > { %10991 = vmatprep.mubr.msk.bf16.mxu1 %vm602_vm1, %v9904_v27  ;;  %v9921_v0 = vrot.slane %v9913_v50, 9  ;;  %v3978_v51 = vsel %vm12072_vm7, %v9919_v46, %v3977_v12  ;;  %v3985_v54 = vrot.slane %v13739_v52, 5  ;;  %v13937_v26 = vsel %vm615_vm0, %v10455_v31, 0 }
 0x1d3   : > { %v9922_v39 = vrot.slane %v9914_v23, 9  ;;  %v9927_v6 = vcombine.low %v3974_v8, %v3978_v51  ;;  %v13943_v53 = vsel %vm12072_vm7, %v9920_v29, %v3981_v18  ;;  %v3989_v30 = vrot.slane %v13770_v5, 5  ;;  %v9937_v23 = vld [vmem:[%s12019_s10 + $0x1c] sm:$0x3]  ;;  %v9938_v51 = vld [vmem:[%s12019_s10 + $0x24] sm:$0x3] }
 0x1d4   : > { %v9923_v45 = vrot.slane %v9915_v36, 9  ;;  %v3986_v57 = vsel %vm12072_vm7, %v9921_v0, %v3985_v54  ;;  %v3993_v52 = vrot.slane %v13778_v10, 5  ;;  %v9924_v37 = vrot.slane %v9916_v61, 9 }
 0x1d5   : > { %v3997_v47 = vrot.slane %v13786_v16, 5  ;;  %v9928_v28 = vcombine.low %v13943_v53, %v3986_v57  ;;  %v3990_v62 = vsel %vm12072_vm7, %v9922_v39, %v3989_v30  ;;  %v9925_v14 = vrot.slane %v9917_v2, 9  ;;  %v10439_v53 = vld [vmem:[%s12019_s10 + $0x18] sm:$0xf] }
 0x1d6   : > { %v4001_v41 = vrot.slane %v13790_v1, 5  ;;  %11228 = vmatmul.mubr.msk.bf16.vlgmr.msra.gmra.mrb[0].mxu0 %vm602_vm1, %v11799_v7  ;;  %v3994_v5 = vsel %vm12072_vm7, %v9923_v45, %v3993_v52  ;;  %v4284_v16 = vsel %vm615_vm0, %v9943_v11, 0  ;;  %v4114_v50 = vshrl.u32 %v13838_v40, 16  ;;  %v11802_v7 = vld [vmem:[%s12019_s10 + $0x70] ss:$8 sps:$4 sm:$0xff]  }
 0x1d7   : > { %v13960_v10 = vsel %vm12072_vm7, %v9924_v37, %v3997_v47  ;;  %11236 = vmatpush3.bf16.msra.mxu0 %v13877_v59  ;;  %10992 = vmatmul.mubr.msk.bf16.gmra.mrb[4].mxu1 %vm602_vm1, %v9905_v21  ;;  %v9929_v1 = vcombine.low %v3990_v62, %v3994_v5  ;;  %v4117_v4 = vshll.u32 %v13838_v40, 16  ;;  %v4123_v22 = vshrl.u32 %v9935_v25, 16  ;;  %v13992_v52 = vld [vmem:[%s14489_s1 + $0x2a] sm:$0x3] }
 0x1d8   : > { %v13969_v60 = vsel %vm12072_vm7, %v9925_v14, %v4001_v41  ;;  %11231 = vmatprep.mubr.msk.bf16.mxu0 %vm602_vm1, %v11800_v33  ;;  %10997 = vmatprep.mubr.msk.bf16.mxu1 %vm602_vm1, %v9927_v6  ;;  %v4116_v32 = vrot.slane %v4114_v50, 5  ;;  %v4126_v11 = vshll.u32 %v9935_v25, 16  ;;  %v4132_v27 = vshrl.u32 %v13842_v58, 16 }
 0x1d9   : > { %v9930_v59 = vcombine.low %v13960_v10, %v13969_v60  ;;  %11726 = vmatprep.subr.msk.bf16.mxu0 %vm615_vm0, %v10455_v31  ;;  %v4119_v43 = vrot.slane %v4117_v4, 6  ;;  %v4125_v34 = vrot.slane %v4123_v22, 5  ;;  %v4135_v40 = vshll.u32 %v13842_v58, 16 }
 0x1da   : > { %v4141_v13 = vshrl.u32 %v9936_v49, 16  ;;  %v4128_v46 = vrot.slane %v4126_v11, 6  ;;  %v4134_v12 = vrot.slane %v4132_v27, 5  ;;  %v4144_v29 = vshll.u32 %v9936_v49, 16  ;;  %v11803_v49 = vld [vmem:[%s12019_s10 + $0x80] ss:$8 sps:$4 sm:$0xff]  }
 0x1db   : > { %v4150_v36 = vshrl.u32 %v13848_v9, 16  ;;  %v4120_v21 = vor.u32 %v4119_v43, %v4116_v32  ;;  %v4137_v8 = vrot.slane %v4135_v40, 6  ;;  %v4153_v31 = vshll.u32 %v13848_v9, 16  ;;  %v10441_v32 = vld [vmem:[%s12019_s10 + $0x20] sm:$0xf] }
 0x1dc   : > { %v4143_v18 = vrot.slane %v4141_v13, 5  ;;  %v4129_v0 = vor.u32 %v4128_v46, %v4125_v34  ;;  %v4146_v61 = vrot.slane %v4144_v29, 6  ;;  %v4159_v58 = vshrl.u32 %v9937_v23, 16  ;;  %v14009_v34 = vld [vmem:[%s12019_s10 + $0x24] sm:$0x1] }
 0x1dd   : > { %v4152_v54 = vrot.slane %v4150_v36, 5  ;;  %v4121_v39 = vrot.slane %v4120_v21, 4  ;;  %v4138_v2 = vor.u32 %v4137_v8, %v4134_v12  ;;  %v4155_v33 = vrot.slane %v4153_v31, 6  ;;  %v10443_v40 = vld [vmem:[%s12019_s10 + $0x28] sm:$0xf] }
 0x1de   : > { %v4162_v6 = vshll.u32 %v9937_v23, 16  ;;  %11232 = vmatmul.mubr.msk.bf16.gmra.mrb[4].mxu0 %vm602_vm1, %v11801_v63  ;;  %v4147_v30 = vor.u32 %v4146_v61, %v4143_v18  ;;  %v4161_v45 = vrot.slane %v4159_v58, 5  ;;  %v4168_v57 = vshrl.u32 %v13851_v56, 16  ;;  %v11804_v13 = vld [vmem:[%s12019_s10 + $0x90] ss:$8 sps:$4 sm:$0xff]  }
 0x1df   : > { %v4171_v9 = vshll.u32 %v13851_v56, 16  ;;  %10998 = vmatmul.mubr.msk.bf16.vlgmr.msra.gmra.mrb[0].mxu1 %vm602_vm1, %v9928_v28  ;;  %11237 = vmatprep.mubr.msk.bf16.mxu0 %vm602_vm1, %v11802_v7  ;;  %v4130_v37 = vsel %vm12341_vm10, %v4121_v39, %v4129_v0  ;;  %v4139_v47 = vrot.slane %v4138_v2, 4  ;;  %v4156_v25 = vor.u32 %v4155_v33, %v4152_v54  ;;  %v14000_v28 = vld [vmem:[%s12019_s10 + $0x1c] sm:$0x1]  ;;  %v10480_v8 = vld [vmem:[%s14489_s1 + $0x5a] sm:$0x3] }
 0x1e0   : > { %v4164_v62 = vrot.slane %v4162_v6, 6  ;;  %11001 = vmatprep.mubr.msk.bf16.mxu1 %vm602_vm1, %v9929_v1  ;;  %11006 = vmatpush3.bf16.msra.mxu1 %v4284_v16  ;;  %v4170_v56 = vrot.slane %v4168_v57, 5  ;;  %v4177_v41 = vshrl.u32 %v9938_v51, 16  ;;  %v4180_v5 = vshll.u32 %v9938_v51, 16  ;;  %v14022_v18 = vld [vmem:[%s12019_s10 + $0x2c] sm:$0x1] }
 0x1e1   : > { %v4173_v14 = vrot.slane %v4171_v9, 6  ;;  %v4148_v50 = vsel %vm12341_vm10, %v4139_v47, %v4147_v30  ;;  %v4157_v4 = vrot.slane %v4156_v25, 4  ;;  %v8418_v11 = vshrl.u32 %v10439_v53, 16  ;;  %11702 = vmatprep.subr.msk.bf16.mxu1 %vm615_vm0, %v13992_v52  ;;  %v10445_v51 = vld [vmem:[%s12019_s10 + $0x30] sm:$0xf] }
 0x1e2   : > { %v4165_v22 = vor.u32 %v4164_v62, %v4161_v45  ;;  %v9944_v16 = vcombine.low %v4130_v37, %v4148_v50  ;;  %v4179_v27 = vrot.slane %v4177_v41, 5  ;;  %v4182_v43 = vrot.slane %v4180_v5, 6  ;;  %v14030_v33 = vld [vmem:[%s12019_s10 + $0x34] sm:$0x1]  ;;  %v9939_v62 = vld [vmem:[%s12019_s10 + $0x2c] sm:$0x3] }
 0x1e3   : > { %v4174_v1 = vor.u32 %v4173_v14, %v4170_v56  ;;  %v8420_v63 = vrot.slane %v8418_v11, 4  ;;  %v8421_v46 = vshll.u32 %v10439_v53, 16  ;;  %v8427_v12 = vshll.u32 %v14000_v28, 16  ;;  %v11805_v56 = vld [vmem:[%s12019_s10 + $0xa0] ss:$8 sps:$4 sm:$0xff]  }
 0x1e4   : > { %v14015_v23 = vsel %vm12341_vm10, %v4157_v4, %v4165_v22  ;;  %v4183_v36 = vor.u32 %v4182_v43, %v4179_v27  ;;  %v8432_v7 = vshrl.u32 %v10441_v32, 16  ;;  %v8435_v21 = vshll.u32 %v10441_v32, 16 }
 0x1e5   : > { %v4175_v29 = vrot.slane %v4174_v1, 4  ;;  %v8423_v31 = vrot.slane %v8421_v46, 5  ;;  %v8429_v0 = vrot.slane %v8427_v12, 5  ;;  %v8441_v61 = vshll.u32 %v14009_v34, 16  ;;  %v9940_v1 = vld [vmem:[%s12019_s10 + $0x34] sm:$0x3] }
 0x1e6   : > { %v8446_v54 = vshrl.u32 %v10443_v40, 16  ;;  %11238 = vmatmul.mubr.msk.bf16.vlgmr.msra.gmra.mrb[0].mxu0 %vm602_vm1, %v11803_v49  ;;  %v8434_v39 = vrot.slane %v8432_v7, 4  ;;  %v8437_v2 = vrot.slane %v8435_v21, 5  ;;  %v8449_v6 = vshll.u32 %v10443_v40, 16 }
 0x1e7   : > { %v4184_v58 = vsel %vm12341_vm10, %v4175_v29, %v4183_v36  ;;  %11246 = vmatpush3.bf16.msra.mxu0 %v13937_v26  ;;  %11002 = vmatmul.mubr.msk.bf16.gmra.mrb[4].mxu1 %vm602_vm1, %v9930_v59  ;;  %v8424_v30 = vor.u32 %v8423_v31, %v8420_v63  ;;  %v8443_v45 = vrot.slane %v8441_v61, 5  ;;  %v8455_v26 = vshll.u32 %v14022_v18, 16 }
 0x1e8   : > { %v9945_v53 = vcombine.low %v14015_v23, %v4184_v58  ;;  %v8448_v57 = vrot.slane %v8446_v54, 4  ;;  %11241 = vmatprep.mubr.msk.bf16.mxu0 %vm602_vm1, %v11804_v13  ;;  %11007 = vmatprep.mubr.msk.bf16.mxu1 %vm602_vm1, %v9944_v16  ;;  %v8438_v9 = vor.u32 %v8437_v2, %v8434_v39  ;;  %v8451_v37 = vrot.slane %v8449_v6, 5 }
 0x1e9   : > { %v8460_v47 = vshrl.u32 %v10445_v51, 16  ;;  %v8425_v25 = vrot.slane %v8424_v30, 4  ;;  %11727 = vmatprep.subr.msk.bf16.mxu0 %vm615_vm0, %v10480_v8  ;;  %v8463_v10 = vshll.u32 %v10445_v51, 16  ;;  %v8469_v60 = vshll.u32 %v14030_v33, 16  ;;  %v9941_v51 = vld [vmem:[%s12019_s10 + $0x3c] sm:$0x3] }
 0x1ea   : > { %v14044_v59 = vsel %vm615_vm0, %v10480_v8, 0  ;;  %v8439_v14 = vrot.slane %v8438_v9, 4  ;;  %v8452_v41 = vor.u32 %v8451_v37, %v8448_v57  ;;  %v8457_v5 = vrot.slane %v8455_v26, 5  ;;  %v9942_v9 = vld [vmem:[%s12019_s10 + $0x44] sm:$0x3] }
 0x1eb   : > { %v8462_v49 = vrot.slane %v8460_v47, 4  ;;  %v8430_v50 = vsel %vm12053_vm6, %v8425_v25, %v8429_v0  ;;  %v8465_v4 = vrot.slane %v8463_v10, 5  ;;  %v8471_v22 = vrot.slane %v8469_v60, 5 }
 0x1ec   : > { %v4186_v32 = vshrl.u32 %v13854_v20, 16  ;;  %v8444_v11 = vsel %vm12053_vm6, %v8439_v14, %v8443_v45  ;;  %v8453_v16 = vrot.slane %v8452_v41, 4  ;;  %v4189_v27 = vshll.u32 %v13854_v20, 16  ;;  %v14074_v14 = vld [vmem:[%s12019_s10 + $0x3c] sm:$0x1] }
 0x1ed   : > { %v4195_v43 = vshrl.u32 %v9939_v62, 16  ;;  %v10456_v40 = vcombine.low %v8430_v50, %v8444_v11  ;;  %v8466_v13 = vor.u32 %v8465_v4, %v8462_v49  ;;  %v4198_v63 = vshll.u32 %v9939_v62, 16  ;;  %v14085_v11 = vld [vmem:[%s14489_s1 + $0x2c] sm:$0x3] }
 0x1ee   : > { %v4188_v23 = vrot.slane %v4186_v32, 5  ;;  %11242 = vmatmul.mubr.msk.bf16.gmra.mrb[4].mxu0 %vm602_vm1, %v11805_v56  ;;  %v8458_v46 = vsel %vm12053_vm6, %v8453_v16, %v8457_v5  ;;  %v4191_v12 = vrot.slane %v4189_v27, 6  ;;  %v4204_v36 = vshrl.u32 %v13863_v44, 16  ;;  %v10447_v56 = vld [vmem:[%s12019_s10 + $0x38] sm:$0xf] }
 0x1ef   : > { %v4197_v29 = vrot.slane %v4195_v43, 5  ;;  %11008 = vmatmul.mubr.msk.bf16.vlgmr.msra.gmra.mrb[0].mxu1 %vm602_vm1, %v9945_v53  ;;  %11247 = vmatprep.mubr.msk.bf16.mxu0 %vm602_vm1, %v10456_v40  ;;  %v8467_v20 = vrot.slane %v8466_v13, 4  ;;  %v4200_v7 = vrot.slane %v4198_v63, 6  ;;  %v4207_v21 = vshll.u32 %v13863_v44, 16  ;;  %v10449_v40 = vld [vmem:[%s12019_s10 + $0x40] sm:$0xf] }
 0x1f0   : > { %v4213_v8 = vshrl.u32 %v9940_v1, 16  ;;  %v4192_v31 = vor.u32 %v4191_v12, %v4188_v23  ;;  %v4206_v0 = vrot.slane %v4204_v36, 5  ;;  %v4216_v61 = vshll.u32 %v9940_v1, 16  ;;  %v14094_v12 = vld [vmem:[%s12019_s10 + $0x44] sm:$0x1] }
 0x1f1   : > { %v4222_v54 = vshrl.u32 %v13880_v3, 16  ;;  %v8472_v58 = vsel %vm12053_vm6, %v8467_v20, %v8471_v22  ;;  %v4201_v39 = vor.u32 %v4200_v7, %v4197_v29  ;;  %v4209_v2 = vrot.slane %v4207_v21, 6  ;;  %v10451_v7 = vld [vmem:[%s12019_s10 + $0x48] sm:$0xf] }
 0x1f2   : > { %v4215_v6 = vrot.slane %v4213_v8, 5  ;;  %v10457_v53 = vcombine.low %v8458_v46, %v8472_v58  ;;  %v4193_v30 = vrot.slane %v4192_v31, 4  ;;  %v4218_v45 = vrot.slane %v4216_v61, 6 }
 0x1f3   : > { %v4224_v44 = vrot.slane %v4222_v54, 5  ;;  %v4210_v57 = vor.u32 %v4209_v2, %v4206_v0  ;;  %v4225_v37 = vshll.u32 %v13880_v3, 16  ;;  %v4231_v26 = vshrl.u32 %v9941_v51, 16  ;;  %v14079_v3 = vld [vmem:[%s14489_s1 + $0x5c] sm:$0x3] }
 0x1f4   : > { %v4234_v47 = vshll.u32 %v9941_v51, 16  ;;  %v4202_v25 = vsel %vm12341_vm10, %v4193_v30, %v4201_v39  ;;  %v4219_v10 = vor.u32 %v4218_v45, %v4215_v6  ;;  %v4240_v60 = vshrl.u32 %v13888_v55, 16  ;;  %v14104_v0 = vld [vmem:[%s12019_s10 + $0x4c] sm:$0x1]  ;;  %v10453_v39 = vld [vmem:[%s12019_s10 + $0x50] sm:$0xf] }
 0x1f5   : > { %v4243_v62 = vshll.u32 %v13888_v55, 16  ;;  %v4211_v41 = vrot.slane %v4210_v57, 4  ;;  %v4227_v5 = vrot.slane %v4225_v37, 6  ;;  %v4233_v49 = vrot.slane %v4231_v26, 5  ;;  %v11806_v45 = vld [vmem:[%s12019_s10 + $0xb8] ss:$8 sps:$4 sm:$0xff]  }
 0x1f6   : > { %v4236_v50 = vrot.slane %v4234_v47, 6  ;;  %11248 = vmatmul.mubr.msk.bf16.vlgmr.msra.gmra.mrb[0].mxu0 %vm602_vm1, %v10457_v53  ;;  %v4242_v4 = vrot.slane %v4240_v60, 5  ;;  %v4249_v32 = vshrl.u32 %v9942_v9, 16  ;;  %v4252_v55 = vshll.u32 %v9942_v9, 16  ;;  %v14114_v9 = vld [vmem:[%s12019_s10 + $0x54] sm:$0x1] }
 0x1f7   : > { %v4245_v22 = vrot.slane %v4243_v62, 6  ;;  %11256 = vmatpush3.bf16.msra.mxu0 %v14044_v59  ;;  %v4220_v16 = vsel %vm12341_vm10, %v4211_v41, %v4219_v10  ;;  %v4228_v1 = vor.u32 %v4227_v5, %v4224_v44  ;;  %v4403_v43 = vsel %vm615_vm0, %v13992_v52, 0  ;;  %v10464_v62 = vld [vmem:[%s12019_s10 + $0x70] sm:$0xf] }
 0x1f8   : > { %v4237_v27 = vor.u32 %v4236_v50, %v4233_v49  ;;  %v9946_v13 = vcombine.low %v4202_v25, %v4220_v16  ;;  %v4251_v63 = vrot.slane %v4249_v32, 5  ;;  %v4254_v46 = vrot.slane %v4252_v55, 6  ;;  %11016 = vmatpush3.bf16.msra.mxu1 %v4403_v43  ;;  %11728 = vmatprep.subr.msk.bf16.mxu0 %vm615_vm0, %v14079_v3  ;;  %v14120_v50 = vld [vmem:[%s12019_s10 + $0x74] sm:$0x1]  ;;  %v10466_v43 = vld [vmem:[%s12019_s10 + $0x78] sm:$0xf] }
 0x1f9   : > { %v4246_v23 = vor.u32 %v4245_v22, %v4242_v4  ;;  %v4229_v59 = vrot.slane %v4228_v1, 4  ;;  %v8474_v29 = vshrl.u32 %v10447_v56, 16  ;;  %v8477_v36 = vshll.u32 %v10447_v56, 16  ;;  %11703 = vmatprep.subr.msk.bf16.mxu1 %vm615_vm0, %v14085_v11 }
 0x1fa   : > { %v8483_v20 = vshll.u32 %v14074_v14, 16  ;;  %11011 = vmatprep.mubr.msk.bf16.mxu1 %vm602_vm1, %v9946_v13  ;;  %v4255_v21 = vor.u32 %v4254_v46, %v4251_v63  ;;  %v8488_v8 = vshrl.u32 %v10449_v40, 16  ;;  %v8491_v31 = vshll.u32 %v10449_v40, 16  ;;  %v14128_v40 = vld [vmem:[%s12019_s10 + $0x7c] sm:$0x1] }
 0x1fb   : > { %v4247_v52 = vrot.slane %v4246_v23, 4  ;;  %v4238_v61 = vsel %vm12341_vm10, %v4229_v59, %v4237_v27  ;;  %v8476_v51 = vrot.slane %v8474_v29, 4  ;;  %v8479_v54 = vrot.slane %v8477_v36, 5  ;;  %v10468_v29 = vld [vmem:[%s12019_s10 + $0x80] sm:$0xf] }
 0x1fc   : > { %v8485_v58 = vrot.slane %v8483_v20, 5  ;;  %v8490_v6 = vrot.slane %v8488_v8, 4  ;;  %v8493_v53 = vrot.slane %v8491_v31, 5  ;;  %v8497_v30 = vshll.u32 %v14094_v12, 16  ;;  %v14136_v8 = vld [vmem:[%s12019_s10 + $0x84] sm:$0x1] }
 0x1fd   : > { %v4256_v2 = vsel %vm12341_vm10, %v4247_v52, %v4255_v21  ;;  %v8480_v57 = vor.u32 %v8479_v54, %v8476_v51  ;;  %v8502_v37 = vshrl.u32 %v10451_v7, 16  ;;  %v8505_v26 = vshll.u32 %v10451_v7, 16  ;;  %v11807_v52 = vld [vmem:[%s12019_s10 + $0xc8] ss:$8 sps:$4 sm:$0xff]  }
 0x1fe   : > { %v9947_v44 = vcombine.low %v4238_v61, %v4256_v2  ;;  %v8494_v47 = vor.u32 %v8493_v53, %v8490_v6  ;;  %v8499_v25 = vrot.slane %v8497_v30, 5  ;;  %v8511_v10 = vshll.u32 %v14104_v0, 16  ;;  %v10470_v53 = vld [vmem:[%s12019_s10 + $0x88] sm:$0xf] }
 0x1ff   : > { %v8516_v60 = vshrl.u32 %v10453_v39, 16  ;;  %v8481_v56 = vrot.slane %v8480_v57, 4  ;;  %v8504_v41 = vrot.slane %v8502_v37, 4  ;;  %v8507_v5 = vrot.slane %v8505_v26, 5  ;;  %v14145_v37 = vld [vmem:[%s12019_s10 + $0x8c] sm:$0x1] }
 0x200   : > { %11012 = vmatmul.mubr.msk.bf16.gmra.mrb[4].mxu1 %vm602_vm1, %v9947_v44  ;;  %v8519_v49 = vshll.u32 %v10453_v39, 16  ;;  %v8495_v4 = vrot.slane %v8494_v47, 4  ;;  %v8513_v22 = vrot.slane %v8511_v10, 5  ;;  %v8525_v55 = vshll.u32 %v14114_v9, 16 }
 0x201   : > { %v8518_v32 = vrot.slane %v8516_v60, 4  ;;  %11017 = vmatprep.mubr.msk.bf16.mxu1 %vm602_vm1, %v11806_v45  ;;  %v8486_v16 = vsel %vm12053_vm6, %v8481_v56, %v8485_v58  ;;  %v8508_v1 = vor.u32 %v8507_v5, %v8504_v41  ;;  %v8648_v13 = vshrl.u32 %v10464_v62, 16  ;;  %v11808_v58 = vld [vmem:[%s12019_s10 + $0xd8] ss:$8 sps:$4 sm:$0xff]  }
 0x202   : > { %v8521_v27 = vrot.slane %v8519_v49, 5  ;;  %v8500_v23 = vsel %vm12053_vm6, %v8495_v4, %v8499_v25  ;;  %v8527_v63 = vrot.slane %v8525_v55, 5  ;;  %v8651_v46 = vshll.u32 %v10464_v62, 16  ;;  %v10472_v49 = vld [vmem:[%s12019_s10 + $0x90] sm:$0xf] }
 0x203   : > { %v8657_v59 = vshll.u32 %v14120_v50, 16  ;;  %v10458_v36 = vcombine.low %v8486_v16, %v8500_v23  ;;  %v8509_v20 = vrot.slane %v8508_v1, 4  ;;  %v8650_v21 = vrot.slane %v8648_v13, 4  ;;  %v11809_v16 = vld [vmem:[%s12019_s10 + $0xe8] ss:$8 sps:$4 sm:$0xff]  }
 0x204   : > { %v8522_v7 = vor.u32 %v8521_v27, %v8518_v32  ;;  %v8653_v31 = vrot.slane %v8651_v46, 5  ;;  %v8662_v51 = vshrl.u32 %v10466_v43, 16  ;;  %v8665_v54 = vshll.u32 %v10466_v43, 16  ;;  %v14156_v1 = vld [vmem:[%s12019_s10 + $0x94] sm:$0x1] }
 0x205   : > { %v8659_v61 = vrot.slane %v8657_v59, 5  ;;  %11251 = vmatprep.mubr.msk.bf16.mxu0 %vm602_vm1, %v10458_v36  ;;  %v8514_v39 = vsel %vm12053_vm6, %v8509_v20, %v8513_v22  ;;  %v8671_v6 = vshll.u32 %v14128_v40, 16  ;;  %v8676_v30 = vshrl.u32 %v10468_v29, 16  ;;  %v14167_v46 = vld [vmem:[%s14489_s1 + $0x2e] sm:$0x3] }
 0x206   : > { %v8523_v2 = vrot.slane %v8522_v7, 4  ;;  %v8654_v45 = vor.u32 %v8653_v31, %v8650_v21  ;;  %v8664_v44 = vrot.slane %v8662_v51, 4  ;;  %v8667_v57 = vrot.slane %v8665_v54, 5  ;;  %v14172_v7 = vld [vmem:[%s12019_s10 + $0x9c] sm:$0x1] }
 0x207   : > { %v8679_v26 = vshll.u32 %v10468_v29, 16  ;;  %v8673_v25 = vrot.slane %v8671_v6, 5  ;;  %v8678_v10 = vrot.slane %v8676_v30, 4  ;;  %v8685_v60 = vshll.u32 %v14136_v8, 16  ;;  %v14180_v6 = vld [vmem:[%s12019_s10 + $0xa4] sm:$0x1] }
 0x208   : > { %v8528_v47 = vsel %vm12053_vm6, %v8523_v2, %v8527_v63  ;;  %11018 = vmatmul.mubr.msk.bf16.vlgmr.msra.gmra.mrb[0].mxu1 %vm602_vm1, %v11807_v52  ;;  %v8655_v56 = vrot.slane %v8654_v45, 4  ;;  %v8668_v41 = vor.u32 %v8667_v57, %v8664_v44  ;;  %v8690_v22 = vshrl.u32 %v10470_v53, 16  ;;  %v10474_v63 = vld [vmem:[%s12019_s10 + $0x98] sm:$0xf]  ;;  %v10476_v2 = vld [vmem:[%s12019_s10 + $0xa0] sm:$0xf] }
 0x209   : > { %v10459_v62 = vcombine.low %v8514_v39, %v8528_v47  ;;  %v8681_v5 = vrot.slane %v8679_v26, 5  ;;  %11021 = vmatprep.mubr.msk.bf16.mxu1 %vm602_vm1, %v11808_v58  ;;  %v8687_v4 = vrot.slane %v8685_v60, 5  ;;  %v8693_v32 = vshll.u32 %v10470_v53, 16  ;;  %v10478_v44 = vld [vmem:[%s12019_s10 + $0xa8] sm:$0xf] }
 0x20a   : > { %v8699_v55 = vshll.u32 %v14145_v37, 16  ;;  %v8660_v27 = vsel %vm12053_vm6, %v8655_v56, %v8659_v61  ;;  %v8669_v43 = vrot.slane %v8668_v41, 4  ;;  %v8944_v23 = vsel %vm615_vm0, %v14079_v3, 0  ;;  %v11810_v61 = vld [vmem:[%s12019_s10 + $0x110] ss:$8 sps:$4 sm:$0xff]  }
 0x20b   : > { %11252 = vmatmul.mubr.msk.bf16.gmra.mrb[4].mxu0 %vm602_vm1, %v10459_v62  ;;  %v8682_v13 = vor.u32 %v8681_v5, %v8678_v10  ;;  %v8692_v59 = vrot.slane %v8690_v22, 4  ;;  %v8695_v29 = vrot.slane %v8693_v32, 5  ;;  %v4522_v20 = vsel %vm615_vm0, %v14085_v11, 0  ;;  %v14191_v62 = vld [vmem:[%s12019_s10 + $0xac] sm:$0x1] }
 0x20c   : > { %v8701_v36 = vrot.slane %v8699_v55, 5  ;;  %v8674_v52 = vsel %vm12053_vm6, %v8669_v43, %v8673_v25  ;;  %11026 = vmatpush3.bf16.msra.mxu1 %v4522_v20  ;;  %v8704_v21 = vshrl.u32 %v10472_v49, 16  ;;  %v8707_v31 = vshll.u32 %v10472_v49, 16  ;;  %v11811_v32 = vld [vmem:[%s12019_s10 + $0x120] ss:$8 sps:$4 sm:$0xff]  }
 0x20d   : > { %v8683_v3 = vrot.slane %v8682_v13, 4  ;;  %v10481_v51 = vcombine.low %v8660_v27, %v8674_v52  ;;  %v8696_v54 = vor.u32 %v8695_v29, %v8692_v59  ;;  %v8713_v58 = vshll.u32 %v14156_v1, 16  ;;  %11704 = vmatprep.subr.msk.bf16.mxu1 %vm615_vm0, %v14167_v46  ;;  %v14199_v55 = vld [vmem:[%s12019_s10 + $0x18] sm:$0xe]  ;;  %v10530_v59 = vld [vmem:[%s14489_s1 + $0x5e] sm:$0x3] }
 0x20e   : > { %v8718_v39 = vshrl.u32 %v10474_v63, 16  ;;  %v8706_v53 = vrot.slane %v8704_v21, 4  ;;  %v8709_v30 = vrot.slane %v8707_v31, 5  ;;  %v8721_v45 = vshll.u32 %v10474_v63, 16  ;;  %v14202_v63 = vld [vmem:[%s12019_s10 + $0x20] sm:$0xe] }
 0x20f   : > { %v8688_v11 = vsel %vm12053_vm6, %v8683_v3, %v8687_v4  ;;  %11257 = vmatprep.mubr.msk.bf16.mxu0 %vm602_vm1, %v10481_v51  ;;  %v8697_v57 = vrot.slane %v8696_v54, 4  ;;  %v8715_v26 = vrot.slane %v8713_v58, 5  ;;  %v8727_v25 = vshll.u32 %v14172_v7, 16  ;;  %v14208_v3 = vld [vmem:[%s12019_s10 + $0x28] sm:$0xe] }
 0x210   : > { %11022 = vmatmul.mubr.msk.bf16.gmra.mrb[4].mxu1 %vm602_vm1, %v11809_v16  ;;  %v8720_v47 = vrot.slane %v8718_v39, 4  ;;  %v8710_v10 = vor.u32 %v8709_v30, %v8706_v53  ;;  %v8723_v60 = vrot.slane %v8721_v45, 5  ;;  %v8732_v56 = vshrl.u32 %v10476_v2, 16  ;;  %v11812_v54 = vld [vmem:[%s12019_s10 + $0x130] ss:$8 sps:$4 sm:$0xff]  }
 0x211   : > { %v8735_v41 = vshll.u32 %v10476_v2, 16  ;;  %11027 = vmatprep.mubr.msk.bf16.mxu1 %vm602_vm1, %v11810_v61  ;;  %v8702_v5 = vsel %vm12053_vm6, %v8697_v57, %v8701_v36  ;;  %v8729_v49 = vrot.slane %v8727_v25, 5  ;;  %v8741_v4 = vshll.u32 %v14180_v6, 16  ;;  %v14219_v53 = vld [vmem:[%s12019_s10 + $0x30] sm:$0xe] }
 0x212   : > { %v8746_v22 = vshrl.u32 %v10478_v44, 16  ;;  %v10482_v16 = vcombine.low %v8688_v11, %v8702_v5  ;;  %v8711_v27 = vrot.slane %v8710_v10, 4  ;;  %v8724_v43 = vor.u32 %v8723_v60, %v8720_v47  ;;  %v14230_v25 = vld [vmem:[%s12019_s10 + $0x38] sm:$0xe] }
 0x213   : > { %v8734_v13 = vrot.slane %v8732_v56, 4  ;;  %v8737_v29 = vrot.slane %v8735_v41, 5  ;;  %v8743_v36 = vrot.slane %v8741_v4, 5  ;;  %v8749_v52 = vshll.u32 %v10478_v44, 16  ;;  %v14239_v41 = vld [vmem:[%s12019_s10 + $0x40] sm:$0xe] }
 0x214   : > { %v8748_v20 = vrot.slane %v8746_v22, 4  ;;  %11258 = vmatmul.mubr.msk.bf16.vlgmr.msra.gmra.mrb[0].mxu0 %vm602_vm1, %v10482_v16  ;;  %v8716_v21 = vsel %vm12053_vm6, %v8711_v27, %v8715_v26  ;;  %v8725_v31 = vrot.slane %v8724_v43, 4  ;;  %v8755_v61 = vshll.u32 %v14191_v62, 16  ;;  %v14262_v43 = vld [vmem:[%s12019_s10 + $0x50] sm:$0xe] }
 0x215   : > { %v10497_v51 = vrot.slane %v14199_v55, 9  ;;  %11266 = vmatpush3.bf16.msra.mxu0 %v8944_v23  ;;  %v8738_v58 = vor.u32 %v8737_v29, %v8734_v13  ;;  %v8751_v39 = vrot.slane %v8749_v52, 5  ;;  %v8887_v2 = vrot.slane %v14000_v28, 5  ;;  %v9986_v13 = vld [vmem:[%s12019_s10 + $0xb8] sm:$0xf] }
 0x216   : > { %v10498_v11 = vrot.slane %v14202_v63, 9  ;;  %v8730_v30 = vsel %vm12053_vm6, %v8725_v31, %v8729_v49  ;;  %v8757_v45 = vrot.slane %v8755_v61, 5  ;;  %v8891_v44 = vrot.slane %v14009_v34, 5  ;;  %11729 = vmatprep.subr.msk.bf16.mxu0 %vm615_vm0, %v10530_v59 }
 0x217   : > { %v10499_v23 = vrot.slane %v14208_v3, 9  ;;  %v10483_v57 = vcombine.low %v8716_v21, %v8730_v30  ;;  %v8739_v26 = vrot.slane %v8738_v58, 4  ;;  %v8752_v47 = vor.u32 %v8751_v39, %v8748_v20  ;;  %v11815_v30 = vld [vmem:[%s12019_s10 + $0xbc] sm:$0x1] }
 0x218   : > { %11028 = vmatmul.mubr.msk.bf16.vlgmr.msra.gmra.mrb[0].mxu1 %vm602_vm1, %v11811_v32  ;;  %v8888_v28 = vsel %vm12072_vm7, %v10497_v51, %v8887_v2  ;;  %v8892_v10 = vsel %vm12072_vm7, %v10498_v11, %v8891_v44  ;;  %v8895_v34 = vrot.slane %v14022_v18, 5  ;;  %v10500_v60 = vrot.slane %v14219_v53, 9  ;;  %v14248_v18 = vld [vmem:[%s12019_s10 + $0x48] sm:$0xe]  ;;  %v9988_v51 = vld [vmem:[%s12019_s10 + $0xc0] sm:$0xf] }
 0x219   : > { %v8899_v56 = vrot.slane %v14030_v33, 5  ;;  %11031 = vmatprep.mubr.msk.bf16.mxu1 %vm602_vm1, %v11812_v54  ;;  %11261 = vmatprep.mubr.msk.bf16.mxu0 %vm602_vm1, %v10483_v57  ;;  %v8744_v5 = vsel %vm12053_vm6, %v8739_v26, %v8743_v36  ;;  %v8753_v49 = vrot.slane %v8752_v47, 4  ;;  %v10506_v4 = vcombine.low %v8888_v28, %v8892_v10  ;;  %v11813_v36 = vld [vmem:[%s12019_s10 + $0x140] ss:$8 sps:$4 sm:$0xff]   ;;  %v11814_v54 = vld [vmem:[%s14489_s1 + $0x30] sm:$0x3] }
 0x21a   : > { %v14245_v22 = vsel %vm615_vm0, %v10530_v59, 0  ;;  %v14252_v33 = vsel %vm12072_vm7, %v10499_v23, %v8895_v34  ;;  %v4752_v16 = vsel %vm615_vm0, %v14167_v46, 0  ;;  %v10501_v27 = vrot.slane %v14230_v25, 9  ;;  %v9990_v44 = vld [vmem:[%s12019_s10 + $0xc8] sm:$0xf] }
 0x21b   : > { %v14256_v32 = vsel %vm12072_vm7, %v10500_v60, %v8899_v56  ;;  %v8758_v59 = vsel %vm12053_vm6, %v8753_v49, %v8757_v45  ;;  %11036 = vmatpush3.bf16.msra.mxu1 %v4752_v16  ;;  %v8903_v20 = vrot.slane %v14074_v14, 5  ;;  %v10502_v52 = vrot.slane %v14239_v41, 9  ;;  %v9992_v47 = vld [vmem:[%s12019_s10 + $0xd0] sm:$0xf]  ;;  %v11816_v49 = vld [vmem:[%s12019_s10 + $0xc4] sm:$0x1] }
 0x21c   : > { %v10507_v29 = vcombine.low %v14252_v33, %v14256_v32  ;;  %v10484_v21 = vcombine.low %v8744_v5, %v8758_v59  ;;  %v8907_v46 = vrot.slane %v14094_v12, 5  ;;  %v10503_v31 = vrot.slane %v14248_v18, 9  ;;  %11706 = vmatprep.subr.msk.bf16.mxu1 %vm615_vm0, %v11814_v54  ;;  %v10514_v56 = vld [vmem:[%s12019_s10 + $0x70] sm:$0xe] }
 0x21d   : > { %v8911_v61 = vrot.slane %v14104_v0, 5  ;;  %v8904_v14 = vsel %vm12072_vm7, %v10501_v27, %v8903_v20  ;;  %v10504_v58 = vrot.slane %v14262_v43, 9  ;;  %v8915_v12 = vrot.slane %v14114_v9, 5 }
 0x21e   : > { %v4614_v39 = vshrl.u32 %v9986_v13, 16  ;;  %11262 = vmatmul.mubr.msk.bf16.gmra.mrb[4].mxu0 %vm602_vm1, %v10484_v21  ;;  %v8908_v0 = vsel %vm12072_vm7, %v10502_v52, %v8907_v46  ;;  %v4617_v11 = vshll.u32 %v9986_v13, 16  ;;  %v4623_v45 = vshll.u32 %v11815_v30, 16  ;;  %v10517_v30 = vld [vmem:[%s12019_s10 + $0x88] sm:$0xe] }
 0x21f   : > { %v14289_v2 = vsel %vm12072_vm7, %v10503_v31, %v8911_v61  ;;  %11267 = vmatprep.mubr.msk.bf16.mxu0 %vm602_vm1, %v10506_v4  ;;  %v10508_v9 = vcombine.low %v8904_v14, %v8908_v0  ;;  %v14297_v23 = vsel %vm12072_vm7, %v10504_v58, %v8915_v12  ;;  %v4628_v26 = vshrl.u32 %v9988_v51, 16  ;;  %v10516_v31 = vld [vmem:[%s12019_s10 + $0x80] sm:$0xe] }
 0x220   : > { %11032 = vmatmul.mubr.msk.bf16.gmra.mrb[4].mxu1 %vm602_vm1, %v11813_v36  ;;  %v4616_v57 = vrot.slane %v4614_v39, 4  ;;  %v10509_v28 = vcombine.low %v14289_v2, %v14297_v23  ;;  %v4619_v10 = vrot.slane %v4617_v11, 5  ;;  %v4625_v34 = vrot.slane %v4623_v45, 5  ;;  %v10515_v36 = vld [vmem:[%s12019_s10 + $0x78] sm:$0xe] }
 0x221   : > { %v4631_v60 = vshll.u32 %v9988_v51, 16  ;;  %v4630_v5 = vrot.slane %v4628_v26, 4  ;;  %v4637_v4 = vshll.u32 %v11816_v49, 16  ;;  %v4642_v33 = vshrl.u32 %v9990_v44, 16  ;;  %v10547_v58 = vld [vmem:[%s14489_s1 + $0x60] sm:$0x3] }
 0x222   : > { %v4645_v32 = vshll.u32 %v9990_v44, 16  ;;  %v4620_v16 = vor.u32 %v4619_v10, %v4616_v57  ;;  %v4656_v13 = vshrl.u32 %v9992_v47, 16  ;;  %v4659_v59 = vshll.u32 %v9992_v47, 16  ;;  %v9994_v10 = vld [vmem:[%s12019_s10 + $0xd8] sm:$0xf] }
 0x223   : > { %v4633_v27 = vrot.slane %v4631_v60, 5  ;;  %v4639_v20 = vrot.slane %v4637_v4, 5  ;;  %v4644_v52 = vrot.slane %v4642_v33, 4  ;;  %v10522_v46 = vrot.slane %v10514_v56, 9 }
 0x224   : > { %v4647_v21 = vrot.slane %v4645_v32, 5  ;;  %v4621_v61 = vrot.slane %v4620_v16, 4  ;;  %v4658_v54 = vrot.slane %v4656_v13, 4  ;;  %v4661_v14 = vrot.slane %v4659_v59, 5  ;;  %v9998_v13 = vld [vmem:[%s12019_s10 + $0xe8] sm:$0xf] }
 0x225   : > { %v4634_v51 = vor.u32 %v4633_v27, %v4630_v5  ;;  %v9045_v39 = vrot.slane %v14120_v50, 5  ;;  %v10523_v0 = vrot.slane %v10515_v36, 9  ;;  %v9049_v11 = vrot.slane %v14128_v40, 5  ;;  %v11817_v36 = vld [vmem:[%s12019_s10 + $0xdc] sm:$0x1] }
 0x226   : > { %v4648_v12 = vor.u32 %v4647_v21, %v4644_v52  ;;  %11268 = vmatmul.mubr.msk.bf16.vlgmr.msra.gmra.mrb[0].mxu0 %vm602_vm1, %v10507_v29  ;;  %v4626_v45 = vsel %vm12053_vm6, %v4621_v61, %v4625_v34  ;;  %v4662_v57 = vor.u32 %v4661_v14, %v4658_v54  ;;  %v10524_v26 = vrot.slane %v10516_v31, 9  ;;  %v10000_v31 = vld [vmem:[%s12019_s10 + $0xf0] sm:$0xf]  ;;  %v11818_v54 = vld [vmem:[%s12019_s10 + $0xe4] sm:$0x1] }
 0x227   : > { %v4635_v44 = vrot.slane %v4634_v51, 4  ;;  %11276 = vmatpush3.bf16.msra.mxu0 %v14245_v22  ;;  %11271 = vmatprep.mubr.msk.bf16.mxu0 %vm602_vm1, %v10508_v9  ;;  %v9046_v50 = vsel %vm12072_vm7, %v10522_v46, %v9045_v39  ;;  %v9050_v40 = vsel %vm12072_vm7, %v10523_v0, %v9049_v11  ;;  %v9053_v29 = vrot.slane %v14136_v8, 5  ;;  %v9996_v9 = vld [vmem:[%s12019_s10 + $0xe0] sm:$0xf]  ;;  %v11819_v11 = vld [vmem:[%s12019_s10 + $0xec] sm:$0x1] }
 0x228   : > { %v4649_v47 = vrot.slane %v4648_v12, 4  ;;  %v4663_v60 = vrot.slane %v4662_v57, 4  ;;  %v10531_v56 = vcombine.low %v9046_v50, %v9050_v40  ;;  %11730 = vmatprep.subr.msk.bf16.mxu0 %vm615_vm0, %v10547_v58  ;;  %v10525_v22 = vrot.slane %v10517_v30, 9  ;;  %v10519_v40 = vld [vmem:[%s12019_s10 + $0x98] sm:$0xe] }
 0x229   : > { %v4640_v34 = vsel %vm12053_vm6, %v4635_v44, %v4639_v20  ;;  %v14332_v8 = vsel %vm12072_vm7, %v10524_v26, %v9053_v29  ;;  %v9057_v4 = vrot.slane %v14145_v37, 5  ;;  %v14339_v32 = vsel %vm615_vm0, %v10547_v58, 0 }
 0x22a   : > { %v10003_v5 = vcombine.low %v4626_v45, %v4640_v34  ;;  %v4654_v49 = vsel %vm12053_vm6, %v4649_v47, %v12108_v15  ;;  %v4668_v33 = vsel %vm12053_vm6, %v4663_v60, %v12112_v19  ;;  %v4670_v16 = vshrl.u32 %v9994_v10, 16  ;;  %v10518_v45 = vld [vmem:[%s12019_s10 + $0x90] sm:$0xe]  ;;  %v11820_v34 = vld [vmem:[%s12019_s10 + $0xf4] sm:$0x1] }
 0x22b   : > { %v4673_v27 = vshll.u32 %v9994_v10, 16  ;;  %v10004_v15 = vcombine.low %v4654_v49, %v4668_v33  ;;  %v9058_v59 = vsel %vm12072_vm7, %v10525_v22, %v9057_v4  ;;  %v4679_v37 = vshll.u32 %v11817_v36, 16  ;;  %v10520_v22 = vld [vmem:[%s12019_s10 + $0xa0] sm:$0xe] }
 0x22c   : > { %11037 = vmatprep.mubr.msk.bf16.mxu1 %vm602_vm1, %v10003_v5  ;;  %v4684_v20 = vshrl.u32 %v9996_v9, 16  ;;  %v10532_v52 = vcombine.low %v14332_v8, %v9058_v59  ;;  %v4672_v19 = vrot.slane %v4670_v16, 4  ;;  %v4687_v46 = vshll.u32 %v9996_v9, 16 }
 0x22d   : > { %v4675_v21 = vrot.slane %v4673_v27, 5  ;;  %11038 = vmatmul.mubr.msk.bf16.vlgmr.msra.gmra.mrb[0].mxu1 %vm602_vm1, %v10004_v15  ;;  %v4681_v61 = vrot.slane %v4679_v37, 5  ;;  %v4693_v14 = vshll.u32 %v11818_v54, 16  ;;  %v4698_v58 = vshrl.u32 %v9998_v13, 16  ;;  %v10521_v27 = vld [vmem:[%s12019_s10 + $0xa8] sm:$0xe] }
 0x22e   : > { %v4686_v51 = vrot.slane %v4684_v20, 4  ;;  %11272 = vmatmul.mubr.msk.bf16.gmra.mrb[4].mxu0 %vm602_vm1, %v10509_v28  ;;  %v4689_v39 = vrot.slane %v4687_v46, 5  ;;  %v4701_v0 = vshll.u32 %v9998_v13, 16  ;;  %v4707_v30 = vshll.u32 %v11819_v11, 16  ;;  %11296 = vmatpush3.bf16.msra.mxu1 %v12009_v48  ;;  %v10019_v37 = vld [vmem:[%s12019_s10 + $0x130] sm:$0xf] }
 0x22f   : > { %v4676_v12 = vor.u32 %v4675_v21, %v4672_v19  ;;  %11277 = vmatprep.mubr.msk.bf16.mxu0 %vm602_vm1, %v10531_v56  ;;  %v4695_v44 = vrot.slane %v4693_v14, 5  ;;  %v4700_v57 = vrot.slane %v4698_v58, 4  ;;  %v4712_v26 = vshrl.u32 %v10000_v31, 16  ;;  %v10021_v46 = vld [vmem:[%s12019_s10 + $0x138] sm:$0xf] }
 0x230   : > { %v4715_v47 = vshll.u32 %v10000_v31, 16  ;;  %v4690_v23 = vor.u32 %v4689_v39, %v4686_v51  ;;  %v4703_v28 = vrot.slane %v4701_v0, 5  ;;  %v4709_v50 = vrot.slane %v4707_v30, 5  ;;  %v10023_v58 = vld [vmem:[%s12019_s10 + $0x140] sm:$0xf] }
 0x231   : > { %v4677_v2 = vrot.slane %v4676_v12, 4  ;;  %v4714_v29 = vrot.slane %v4712_v26, 4  ;;  %v4721_v60 = vshll.u32 %v11820_v34, 16  ;;  %v10526_v48 = vrot.slane %v10518_v45, 9  ;;  %v11821_v39 = vld [vmem:[%s12019_s10 + $0x134] sm:$0x1] }
 0x232   : > { %v4717_v10 = vrot.slane %v4715_v47, 5  ;;  %v4691_v9 = vrot.slane %v4690_v23, 4  ;;  %v4704_v5 = vor.u32 %v4703_v28, %v4700_v57  ;;  %v9061_v49 = vrot.slane %v14156_v1, 5  ;;  %v10025_v11 = vld [vmem:[%s12019_s10 + $0x148] sm:$0xf] }
 0x233   : > { %v4682_v56 = vsel %vm12053_vm6, %v4677_v2, %v4681_v61  ;;  %v4723_v4 = vrot.slane %v4721_v60, 5  ;;  %v10527_v33 = vrot.slane %v10519_v40, 9  ;;  %v9065_v16 = vrot.slane %v14172_v7, 5  ;;  %v11822_v2 = vld [vmem:[%s12019_s10 + $0x13c] sm:$0x1] }
 0x234   : > { %v4718_v8 = vor.u32 %v4717_v10, %v4714_v29  ;;  %v4696_v13 = vsel %vm12053_vm6, %v4691_v9, %v4695_v44  ;;  %v4705_v15 = vrot.slane %v4704_v5, 4  ;;  %v9062_v59 = vsel %vm12072_vm7, %v10526_v48, %v9061_v49  ;;  %v10539_v10 = vld [vmem:[%s12019_s10 + $0x1c] sm:$0x3] }
 0x235   : > { %v10528_v36 = vrot.slane %v10520_v22, 9  ;;  %v10005_v20 = vcombine.low %v4682_v56, %v4696_v13  ;;  %v9066_v1 = vsel %vm12072_vm7, %v10527_v33, %v9065_v16  ;;  %v9069_v21 = vrot.slane %v14180_v6, 5 }
 0x236   : > { %v4719_v19 = vrot.slane %v4718_v8, 4  ;;  %11278 = vmatmul.mubr.msk.bf16.vlgmr.msra.gmra.mrb[0].mxu0 %vm602_vm1, %v10532_v52  ;;  %v4710_v7 = vsel %vm12053_vm6, %v4705_v15, %v4709_v50  ;;  %v10533_v31 = vcombine.low %v9062_v59, %v9066_v1  ;;  %v10529_v61 = vrot.slane %v10521_v27, 9 }
 0x237   : > { %v9073_v51 = vrot.slane %v14191_v62, 5  ;;  %11286 = vmatpush3.bf16.msra.mxu0 %v14339_v32  ;;  %11041 = vmatprep.mubr.msk.bf16.mxu1 %vm602_vm1, %v10005_v20  ;;  %v9070_v6 = vsel %vm12072_vm7, %v10528_v36, %v9069_v21  ;;  %v4900_v14 = vshrl.u32 %v10019_v37, 16  ;;  %v4903_v52 = vshll.u32 %v10019_v37, 16  ;;  %v10540_v37 = vld [vmem:[%s12019_s10 + $0x24] sm:$0x3] }
 0x238   : > { %v4724_v54 = vsel %vm12053_vm6, %v4719_v19, %v4723_v4  ;;  %11281 = vmatprep.mubr.msk.bf16.mxu0 %vm602_vm1, %v10533_v31  ;;  %v4909_v32 = vshll.u32 %v11821_v39, 16  ;;  %v4914_v0 = vshrl.u32 %v10021_v46, 16  ;;  %v4917_v57 = vshll.u32 %v10021_v46, 16 }
 0x239   : > { %v10006_v12 = vcombine.low %v4710_v7, %v4724_v54  ;;  %v9074_v62 = vsel %vm12072_vm7, %v10529_v61, %v9073_v51  ;;  %v4902_v45 = vrot.slane %v4900_v14, 4  ;;  %v4905_v44 = vrot.slane %v4903_v52, 5 }
 0x23a   : > { %v10534_v30 = vcombine.low %v9070_v6, %v9074_v62  ;;  %v4911_v26 = vrot.slane %v4909_v32, 5  ;;  %v4916_v47 = vrot.slane %v4914_v0, 4  ;;  %v4923_v23 = vshll.u32 %v11822_v2, 16 }
 0x23b   : > { %11042 = vmatmul.mubr.msk.bf16.gmra.mrb[4].mxu1 %vm602_vm1, %v10006_v12  ;;  %v4928_v28 = vshrl.u32 %v10023_v58, 16  ;;  %v4906_v50 = vor.u32 %v4905_v44, %v4902_v45  ;;  %v4919_v40 = vrot.slane %v4917_v57, 5  ;;  %v4931_v42 = vshll.u32 %v10023_v58, 16  ;;  %v10541_v12 = vld [vmem:[%s12019_s10 + $0x2c] sm:$0x3] }
 0x23c   : > { %v4942_v29 = vshrl.u32 %v10025_v11, 16  ;;  %v4925_v34 = vrot.slane %v4923_v23, 5  ;;  %v4945_v48 = vshll.u32 %v10025_v11, 16  ;;  %v9186_v22 = vshrl.u32 %v14199_v55, 16  ;;  %v10542_v45 = vld [vmem:[%s12019_s10 + $0x34] sm:$0x3] }
 0x23d   : > { %v4930_v60 = vrot.slane %v4928_v28, 4  ;;  %v4907_v56 = vrot.slane %v4906_v50, 4  ;;  %v4920_v9 = vor.u32 %v4919_v40, %v4916_v47  ;;  %v4933_v5 = vrot.slane %v4931_v42, 5 }
 0x23e   : > { %v4944_v49 = vrot.slane %v4942_v29, 4  ;;  %11282 = vmatmul.mubr.msk.bf16.gmra.mrb[4].mxu0 %vm602_vm1, %v10534_v30  ;;  %v4947_v8 = vrot.slane %v4945_v48, 5  ;;  %v9188_v4 = vrot.slane %v9186_v22, 5  ;;  %v9189_v33 = vshll.u32 %v14199_v55, 16 }
 0x23f   : > { %v9195_v16 = vshrl.u32 %v10539_v10, 16  ;;  %v4912_v27 = vsel %vm12053_vm6, %v4907_v56, %v4911_v26  ;;  %v4921_v13 = vrot.slane %v4920_v9, 4  ;;  %v4934_v15 = vor.u32 %v4933_v5, %v4930_v60  ;;  %v10543_v60 = vld [vmem:[%s12019_s10 + $0x3c] sm:$0x3] }
 0x240   : > { %v9198_v59 = vshll.u32 %v10539_v10, 16  ;;  %v4948_v36 = vor.u32 %v4947_v8, %v4944_v49  ;;  %v9191_v20 = vrot.slane %v9189_v33, 6  ;;  %v9204_v1 = vshrl.u32 %v14202_v63, 16 }
 0x241   : > { %v9197_v19 = vrot.slane %v9195_v16, 5  ;;  %v4926_v21 = vsel %vm12053_vm6, %v4921_v13, %v4925_v34  ;;  %v4935_v46 = vrot.slane %v4934_v15, 4  ;;  %v9207_v55 = vshll.u32 %v14202_v63, 16 }
 0x242   : > { %v9200_v7 = vrot.slane %v9198_v59, 6  ;;  %v10030_v31 = vcombine.low %v4912_v27, %v4926_v21  ;;  %v4949_v61 = vrot.slane %v4948_v36, 4  ;;  %v9192_v51 = vor.u32 %v9191_v20, %v9188_v4 }
 0x243   : > { %v9206_v54 = vrot.slane %v9204_v1, 5  ;;  %v4940_v6 = vsel %vm12053_vm6, %v4935_v46, %v12282_v35  ;;  %v9209_v52 = vrot.slane %v9207_v55, 6  ;;  %v9213_v58 = vshrl.u32 %v10540_v37, 16 }
 0x244   : > { %v9201_v14 = vor.u32 %v9200_v7, %v9197_v19  ;;  %11051 = vmatprep.mubr.msk.bf16.mxu1 %vm602_vm1, %v10030_v31  ;;  %v4954_v62 = vsel %vm12053_vm6, %v4949_v61, %v12284_v38  ;;  %v9193_v63 = vrot.slane %v9192_v51, 4  ;;  %v9216_v39 = vshll.u32 %v10540_v37, 16 }
 0x245   : > { %v9222_v32 = vshrl.u32 %v14208_v3, 16  ;;  %v10031_v0 = vcombine.low %v4940_v6, %v4954_v62  ;;  %v9210_v11 = vor.u32 %v9209_v52, %v9206_v54  ;;  %v9215_v30 = vrot.slane %v9213_v58, 5  ;;  %v10545_v54 = vld [vmem:[%s12019_s10 + $0x4c] sm:$0x3] }
 0x246   : > { %v9225_v35 = vshll.u32 %v14208_v3, 16  ;;  %v9202_v44 = vsel %vm12341_vm10, %v9193_v63, %v9201_v14  ;;  %v9218_v57 = vrot.slane %v9216_v39, 6  ;;  %v9231_v47 = vshrl.u32 %v10541_v12, 16 }
 0x247   : > { %v9224_v26 = vrot.slane %v9222_v32, 5  ;;  %11052 = vmatmul.mubr.msk.bf16.vlgmr.msra.gmra.mrb[4].mxu1 %vm602_vm1, %v10031_v0  ;;  %v9211_v17 = vrot.slane %v9210_v11, 4  ;;  %v9234_v2 = vshll.u32 %v10541_v12, 16  ;;  %v9240_v23 = vshrl.u32 %v14219_v53, 16 }
 0x248   : > { %v9227_v38 = vrot.slane %v9225_v35, 6  ;;  %v9219_v28 = vor.u32 %v9218_v57, %v9215_v30  ;;  %v9233_v50 = vrot.slane %v9231_v47, 5  ;;  %v9243_v40 = vshll.u32 %v14219_v53, 16  ;;  %v10544_v53 = vld [vmem:[%s12019_s10 + $0x44] sm:$0x3] }
 0x249   : > { %v9249_v3 = vshrl.u32 %v10542_v45, 16  ;;  %v9236_v29 = vrot.slane %v9234_v2, 6  ;;  %v9242_v10 = vrot.slane %v9240_v23, 5  ;;  %v9252_v34 = vshll.u32 %v10542_v45, 16 }
 0x24a   : > { %v9228_v42 = vor.u32 %v9227_v38, %v9224_v26  ;;  %v9220_v48 = vsel %vm12341_vm10, %v9211_v17, %v9219_v28  ;;  %v9245_v22 = vrot.slane %v9243_v40, 6  ;;  %v9258_v9 = vshrl.u32 %v14230_v25, 16 }
 0x24b   : > { %v9251_v56 = vrot.slane %v9249_v3, 5  ;;  %v10548_v5 = vcombine.low %v9202_v44, %v9220_v48  ;;  %v9237_v8 = vor.u32 %v9236_v29, %v9233_v50  ;;  %v9254_v4 = vrot.slane %v9252_v34, 6 }
 0x24c   : > { %v9229_v49 = vrot.slane %v9228_v42, 4  ;;  %v9246_v33 = vor.u32 %v9245_v22, %v9242_v10  ;;  %v9260_v16 = vrot.slane %v9258_v9, 5  ;;  %v9261_v27 = vshll.u32 %v14230_v25, 16 }
 0x24d   : > { %v9267_v13 = vshrl.u32 %v10543_v60, 16  ;;  %11287 = vmatprep.mubr.msk.bf16.mxu0 %vm602_vm1, %v10548_v5  ;;  %v9255_v59 = vor.u32 %v9254_v4, %v9251_v56  ;;  %v9270_v36 = vshll.u32 %v10543_v60, 16  ;;  %v9276_v37 = vshrl.u32 %v14239_v41, 16 }
 0x24e   : > { %v9238_v15 = vsel %vm12341_vm10, %v9229_v49, %v9237_v8  ;;  %v9247_v20 = vrot.slane %v9246_v33, 4  ;;  %v9263_v19 = vrot.slane %v9261_v27, 6  ;;  %v9279_v21 = vshll.u32 %v14239_v41, 16  ;;  %v10546_v41 = vld [vmem:[%s12019_s10 + $0x54] sm:$0x3] }
 0x24f   : > { %v9269_v1 = vrot.slane %v9267_v13, 5  ;;  %v9272_v46 = vrot.slane %v9270_v36, 6  ;;  %v9278_v7 = vrot.slane %v9276_v37, 5  ;;  %v9285_v25 = vshrl.u32 %v10544_v53, 16 }
 0x250   : > { %v9288_v55 = vshll.u32 %v10544_v53, 16  ;;  %v9256_v31 = vsel %vm12341_vm10, %v9247_v20, %v9255_v59  ;;  %v9264_v61 = vor.u32 %v9263_v19, %v9260_v16  ;;  %v9281_v51 = vrot.slane %v9279_v21, 6 }
 0x251   : > { %v9294_v6 = vshrl.u32 %v14248_v18, 16  ;;  %v10549_v14 = vcombine.low %v9238_v15, %v9256_v31  ;;  %v9273_v52 = vor.u32 %v9272_v46, %v9269_v1  ;;  %v9287_v58 = vrot.slane %v9285_v25, 5 }
 0x252   : > { %v9290_v12 = vrot.slane %v9288_v55, 6  ;;  %v9265_v62 = vrot.slane %v9264_v61, 4  ;;  %v9282_v63 = vor.u32 %v9281_v51, %v9278_v7  ;;  %v9297_v32 = vshll.u32 %v14248_v18, 16 }
 0x253   : > { %v9296_v39 = vrot.slane %v9294_v6, 5  ;;  %11288 = vmatmul.mubr.msk.bf16.vlgmr.msra.gmra.mrb[0].mxu0 %vm602_vm1, %v10549_v14  ;;  %v9303_v11 = vshrl.u32 %v10545_v54, 16  ;;  %v9306_v30 = vshll.u32 %v10545_v54, 16  ;;  %v9312_v45 = vshrl.u32 %v14262_v43, 16 }
 0x254   : > { %v9291_v0 = vor.u32 %v9290_v12, %v9287_v58  ;;  %v9274_v35 = vsel %vm12341_vm10, %v9265_v62, %v9273_v52  ;;  %v9283_v44 = vrot.slane %v9282_v63, 4  ;;  %v9299_v57 = vrot.slane %v9297_v32, 6 }
 0x255   : > { %v9315_v26 = vshll.u32 %v14262_v43, 16  ;;  %v9305_v47 = vrot.slane %v9303_v11, 5  ;;  %v9308_v17 = vrot.slane %v9306_v30, 6  ;;  %v9314_v38 = vrot.slane %v9312_v45, 5 }
 0x256   : > { %v9321_v2 = vshrl.u32 %v10546_v41, 16  ;;  %v9292_v18 = vsel %vm12341_vm10, %v9283_v44, %v9291_v0  ;;  %v9300_v23 = vor.u32 %v9299_v57, %v9296_v39  ;;  %v9324_v50 = vshll.u32 %v10546_v41, 16 }
 0x257   : > { %v9317_v28 = vrot.slane %v9315_v26, 6  ;;  %v10550_v40 = vcombine.low %v9274_v35, %v9292_v18  ;;  %v9309_v3 = vor.u32 %v9308_v17, %v9305_v47  ;;  %vm9462_vm11 = vcmask 519168  }
 0x258   : > { %v9323_v42 = vrot.slane %v9321_v2, 5  ;;  %v9301_v29 = vrot.slane %v9300_v23, 4  ;;  %v9326_v34 = vrot.slane %v9324_v50, 6 }
 0x259   : > { %v9318_v10 = vor.u32 %v9317_v28, %v9314_v38  ;;  %11291 = vmatprep.mubr.msk.bf16.mxu0 %vm602_vm1, %v10550_v40 }
 0x25a   : > { %v9310_v43 = vsel %vm12341_vm10, %v9301_v29, %v9309_v3  ;;  %v9327_v48 = vor.u32 %v9326_v34, %v9323_v42 }
 0x25b   : > { %v9319_v60 = vrot.slane %v9318_v10, 4 }
 0x25d   : > { %v9328_v22 = vsel %vm12341_vm10, %v9319_v60, %v9327_v48 }
 0x25e   : > { %v10551_v56 = vcombine.low %v9310_v43, %v9328_v22 }
 0x260   : > { %11292 = vmatmul.mubr.msk.bf16.gmra.mrb[4].mxu0 %vm602_vm1, %v10551_v56 }
 0x300   : > { %v11039_v9 = vpop.f32.mrb[0].mxu1 }
 0x301   : > { %v4788_v5 = vpop.f32.mrb[1].mxu1 }
 0x302   : > { %v11040_v49 = vpop.f32.mrb[2].mxu1 }
 0x303   : > { %v4791_v8 = vpop.f32.mrb[3].mxu1 }
 0x31a   : > { %v11053_v4 = vpop.f32.mrb[4].mxu1 }
 0x31b   : > { %v5034_v33 = vpop.f32.mrb[5].mxu1 }
 0x31c   : > { %v11054_v53 = vpop.f32.mrb[6].mxu1 }
 0x31d   : > { %v5037_v16 = vpop.f32.mrb[7].mxu1 }
 0x326   : > { %v11289_v27 = vpop.f32.mrb[0].mxu0 }
 0x327   : > { %v11297_v13 = vadd.f32 %v11289_v27, %v11039_v9  ;;  %v9392_v15 = vpop.f32.mrb[1].mxu0 }
 0x328   : > { %v11298_v59 = vadd.f32 %v9392_v15, %v4788_v5  ;;  %v11290_v36 = vpop.f32.mrb[2].mxu0 }
 0x329   : > { %v9440_v37 = vadd.f32 %v11297_v13, %v10556_v24  ;;  %v11299_v20 = vadd.f32 %v11290_v36, %v11040_v49  ;;  %v9395_v19 = vpop.f32.mrb[3].mxu0 }
 0x32a   : > { %v9438_v1 = vadd.f32 %v11298_v59, %v10556_v24  ;;  %v11300_v21 = vadd.f32 %v9395_v19, %v4791_v8 }
 0x32b   : > { %v9448_v46 = vmax.f32 %v9440_v37, 0.0  ;;  %v9441_v7 = vadd.f32 %v11299_v20, %v10556_v24 }
 0x32c   : > { %v9446_v25 = vmax.f32 %v9438_v1, 0.0  ;;  %v9439_v55 = vadd.f32 %v11300_v21, %v10556_v24 }
 0x32d   : > { %v9456_v31 = vpack.c.bf16 %v9448_v46, %v9448_v46  ;;  %v9449_v61 = vmax.f32 %v9441_v7, 0.0 }
 0x32e   : > { %v9454_v51 = vpack.c.bf16 %v9446_v25, %v9446_v25  ;;  %v9447_v54 = vmax.f32 %v9439_v55, 0.0 }
 0x32f   : > { %9465 = vst.msk [vmem:[%s14460_s27 + $0x8] sm:$0xf] %vm9462_vm11, %v9456_v31  ;;  %v9457_v6 = vpack.c.bf16 %v9449_v61, %v9449_v61 }
 0x330   : > { %9463 = vst.msk [vmem:[%s14460_s27] sm:$0xf] %vm9462_vm11, %v9454_v51  ;;  %v9455_v14 = vpack.c.bf16 %v9447_v54, %v9447_v54 }
 0x331   : > { %9466 = vst.msk [vmem:[%s14460_s27 + $0xc] sm:$0xf] %vm9462_vm11, %v9457_v6 }
 0x332   : > { %9464 = vst.msk [vmem:[%s14460_s27 + $0x4] sm:$0xf] %vm9462_vm11, %v9455_v14 }
 0x333   : > { %v11293_v52 = vpop.f32.mrb[4].mxu0 }
 0x334   : > { %v11301_v58 = vadd.f32 %v11293_v52, %v11053_v4  ;;  %v9408_v12 = vpop.f32.mrb[5].mxu0 }
 0x335   : > { %v11302_v62 = vadd.f32 %v9408_v12, %v5034_v33  ;;  %v11294_v63 = vpop.f32.mrb[6].mxu0 }
 0x336   : > { %v9444_v41 = vadd.f32 %v11301_v58, %v10556_v24  ;;  %v11303_v39 = vadd.f32 %v11294_v63, %v11054_v53  ;;  %v9411_v32 = vpop.f32.mrb[7].mxu0 }
 0x337   : > { %v9442_v0 = vadd.f32 %v11302_v62, %v10556_v24  ;;  %v11304_v11 = vadd.f32 %v9411_v32, %v5037_v16 }
 0x338   : > { %v9452_v30 = vmax.f32 %v9444_v41, 0.0  ;;  %v9445_v45 = vadd.f32 %v11303_v39, %v10556_v24 }
 0x339   : > { %v9450_v35 = vmax.f32 %v9442_v0, 0.0  ;;  %v9443_v44 = vadd.f32 %v11304_v11, %v10556_v24 }
 0x33a   : > { %v9460_v57 = vpack.c.bf16 %v9452_v30, %v9452_v30  ;;  %v9453_v26 = vmax.f32 %v9445_v45, 0.0 }
 0x33b   : > { %v9458_v47 = vpack.c.bf16 %v9450_v35, %v9450_v35  ;;  %v9451_v17 = vmax.f32 %v9443_v44, 0.0 }
 0x33c   : > { %9469 = vst.msk [vmem:[%s14460_s27 + $0x18] sm:$0xf] %vm9462_vm11, %v9460_v57  ;;  %v9461_v38 = vpack.c.bf16 %v9453_v26, %v9453_v26 }
 0x33d   : > { %9467 = vst.msk [vmem:[%s14460_s27 + $0x10] sm:$0xf] %vm9462_vm11, %v9458_v47  ;;  %v9459_v2 = vpack.c.bf16 %v9451_v17, %v9451_v17 }
 0x33e   : > { %9470 = vst.msk [vmem:[%s14460_s27 + $0x1c] sm:$0xf] %vm9462_vm11, %v9461_v38 }
 0x33f   : > { %9468 = vst.msk [vmem:[%s14460_s27 + $0x14] sm:$0xf] %vm9462_vm11, %v9459_v2 }
 0x340 PF: > { %p10_p9 = scmp.ge.s32.totalorder %s11884_s16, 4   ;;  %s14498_s12 = smov %s11841_s13 }
 0x341   : > { %s14499_s13 = smov %s11893_s19  ;;  %s14500_s14 = smov %s11884_s16 }
 0x342   :  { %12 = sbr.rel (!%p10_p9) target bundleno = 2 (0x2), region = 169 }

</bundles_post_ra>
